<compile_context>
chip_gen: v5e
topology: v5e:2x2
jax: 0.10.0
libtpu: 0.0.40
codegen_flags: <defaults>
</compile_context>

<pallas_src>
import jax
import jax.numpy as jnp
from jax import lax
from jax.experimental import pallas as pl
from jax.experimental.pallas import tpu as pltpu


# ----------------------------- fused Pallas kernel -----------------------------

def _net_kernel(x_ref, w1_ref, b1_ref, w2_ref, b2_ref,
                fc1w_ref, fc1b_ref, fc2w_ref, fc2b_ref,
                o_ref, y1_scr):
    """Forward pass for TB images.  Activation layout: (H, W, batch, channel)."""
    cdt = w2_ref.dtype                # MXU operand dtype (bf16 default, f32 optional)
    TB = x_ref.shape[2]

    # ---- conv1 (1->32, 3x3, VALID) + ReLU : VPU taps, one output row at a time ----
    # Registers stay bounded (row-sized values); one store per row into VMEM scratch.
    def conv1_row(r, carry):
        acc = jnp.zeros((26, TB, 32), jnp.float32)
        for dy in range(3):
            xrow = x_ref[r + dy]                                    # (28, TB, 1)
            for dx in range(3):
                acc = acc + xrow[dx:dx + 26] * w1_ref[3 * dy + dx]  # -> (26, TB, 32)
        y1_scr[r] = jnp.maximum(acc + b1_ref[...], 0.0)
        return carry

    lax.fori_loop(0, 26, conv1_row, 0)

    # ---- conv2 (32->64) + ReLU + 2x2 maxpool + fc1 partial, fused per pooled row ----
    def pooled_row(h, h1_acc):
        rows = []
        for r_off in range(2):                       # the two conv2 rows of pooled row h
            acc = jnp.zeros((24 * TB, 64), jnp.float32)
            for t in range(9):                       # 9 taps, MXU matmuls (f32 accumulation)
                dy, dx = divmod(t, 3)
                win = y1_scr[2 * h + r_off + dy]     # (26, TB, 32)
                lhs = win[dx:dx + 24].reshape(24 * TB, 32).astype(cdt)
                acc = acc + jnp.dot(lhs, w2_ref[t],
                                    preferred_element_type=jnp.float32)
            rows.append(jnp.maximum(acc + b2_ref[...], 0.0))        # (24*TB, 64)

        hp = jnp.maximum(rows[0], rows[1])           # H-pair max              (24*TB, 64)
        hp = hp.reshape(12, 2, TB, 64)               # split W pairs (layout-preserving)
        pooled = jnp.maximum(hp[:, 0], hp[:, 1])     # W-pair max              (12, TB, 64)

        # fc1 partial: batched over the 12 pooled columns, contracting the 64 channels.
        part = jnp.einsum('wtc,wcn->wtn', pooled.astype(cdt), fc1w_ref[h],
                          preferred_element_type=jnp.float32)       # (12, TB, 128)
        return h1_acc + jnp.sum(part, axis=0)                        # (TB, 128)

    h1 = lax.fori_loop(0, 12, pooled_row, jnp.zeros((TB, 128), jnp.float32))

    # ---- fc1 bias + ReLU, fc2, log_softmax ----
    h1 = jnp.maximum(h1 + fc1b_ref[...], 0.0)                        # (TB, 128)
    logits = jnp.dot(h1.astype(cdt), fc2w_ref[...],
                     preferred_element_type=jnp.float32) + fc2b_ref[...]   # (TB, 10)
    m = jnp.max(logits, axis=-1, keepdims=True)
    s = logits - m
    lse = jnp.log(jnp.sum(jnp.exp(s), axis=-1, keepdims=True))
    o_ref[...] = s - lse


# ------------------------------- wrappers (JAX) --------------------------------

def prepare_params(params, compute_dtype=jnp.bfloat16):
    """One-time (outside jit) re-layout of PyTorch-shaped params into kernel layout.

    - conv weights -> (tap, cin, cout), tap-major.
    - fc1 weights  -> (12, 12, 64, 128): rows permuted from NCHW-flatten (c,h,w) order
      to (h, w, c) so the kernel's pooled activations contract without transposes.
    - fc2 weights  -> (128, 10).
    - MXU operand weights in compute_dtype (bf16 default); VPU/bias math stays f32.
    """
    f32 = jnp.float32
    w1 = jnp.transpose(params["conv1_w"], (2, 3, 1, 0)).reshape(9, 1, 32)
    w2 = jnp.transpose(params["conv2_w"], (2, 3, 1, 0)).reshape(9, 32, 64)
    fc1w = jnp.transpose(params["fc1_w"].reshape(128, 64, 12, 12), (2, 3, 1, 0))
    fc2w = jnp.transpose(params["fc2_w"], (1, 0))
    return {
        "w1": w1.astype(f32),
        "b1": params["conv1_b"].reshape(1, 32).astype(f32),
        "w2": w2.astype(compute_dtype),
        "b2": params["conv2_b"].reshape(1, 64).astype(f32),
        "fc1_w": fc1w.astype(compute_dtype),
        "fc1_b": params["fc1_b"].reshape(1, 128).astype(f32),
        "fc2_w": fc2w.astype(compute_dtype),
        "fc2_b": params["fc2_b"].reshape(1, 10).astype(f32),
    }


def net_forward(x_nchw, kp, *, tb=8):
    """Fused forward pass. x_nchw: (B, 1, 28, 28) f32. Returns (B, 10) log-probs."""
    B = x_nchw.shape[0]
    assert x_nchw.shape[1:] == (1, 28, 28)
    assert tb % 8 == 0, "batch tile must be a multiple of the sublane width (8)"
    b_pad = ((B + tb - 1) // tb) * tb

    # (H, W, batch, channel) layout; tiny XLA transpose outside the kernel.
    x = jnp.transpose(x_nchw, (2, 3, 0, 1))                   # (28, 28, B, 1)
    if b_pad != B:
        x = jnp.pad(x, ((0, 0), (0, 0), (0, b_pad - B), (0, 0)))

    out = pl.pallas_call(
        _net_kernel,
        out_shape=jax.ShapeDtypeStruct((b_pad, 10), jnp.float32),
        grid_spec=pltpu.PrefetchScalarGridSpec(
            num_scalar_prefetch=0,
            grid=(b_pad // tb,),
            in_specs=[
                pl.BlockSpec((28, 28, tb, 1), lambda b: (0, 0, b, 0)),     # images (TB per step)
                pl.BlockSpec((9, 1, 32), lambda b: (0, 0, 0)),             # conv1 w (resident)
                pl.BlockSpec((1, 32), lambda b: (0, 0)),                   # conv1 b
                pl.BlockSpec((9, 32, 64), lambda b: (0, 0, 0)),            # conv2 w (resident)
                pl.BlockSpec((1, 64), lambda b: (0, 0)),                   # conv2 b
                pl.BlockSpec((12, 12, 64, 128), lambda b: (0, 0, 0, 0)),   # fc1 w (resident)
                pl.BlockSpec((1, 128), lambda b: (0, 0)),                  # fc1 b
                pl.BlockSpec((128, 10), lambda b: (0, 0)),                 # fc2 w
                pl.BlockSpec((1, 10), lambda b: (0, 0)),                   # fc2 b
            ],
            out_specs=pl.BlockSpec((tb, 10), lambda b: (b, 0)),
            scratch_shapes=[
                pltpu.VMEM((26, 26, tb, 32), jnp.float32),                 # conv1 activations
            ],
        ),
        # Batch blocks are independent -> v7x megacore splits them across TensorCores.
        compiler_params=pltpu.CompilerParams(
            dimension_semantics=("parallel",),
            vmem_limit_bytes=40 * 1024 * 1024,
        ),
    )(x, kp["w1"], kp["b1"], kp["w2"], kp["b2"],
      kp["fc1_w"], kp["fc1_b"], kp["fc2_w"], kp["fc2_b"])
    return out[:B]


def net_forward_ref(x_nchw, params):
    """Pure-JAX reference (no Pallas) for the correctness check."""
    x = jnp.transpose(x_nchw, (0, 2, 3, 1))

    def conv(x, w, b):
        w_hwio = jnp.transpose(w, (2, 3, 1, 0))
        y = lax.conv_general_dilated(x, w_hwio, (1, 1), "VALID",
                                     dimension_numbers=("NHWC", "HWIO", "NHWC"))
        return jnp.maximum(y + b, 0.0)

    x = conv(x, params["conv1_w"], params["conv1_b"])
    x = conv(x, params["conv2_w"], params["conv2_b"])
    x = lax.reduce_window(x, -jnp.inf, lax.max, (1, 2, 2, 1), (1, 2, 2, 1), "VALID")
    x = jnp.transpose(x, (0, 3, 1, 2)).reshape(x.shape[0], -1)
    h = jnp.maximum(x @ params["fc1_w"].T + params["fc1_b"], 0.0)
    logits = h @ params["fc2_w"].T + params["fc2_b"]
    return jax.nn.log_softmax(logits, axis=1)


def init_params(key):
    """Deterministic synthetic params, PyTorch parameter shapes."""
    ks = jax.random.split(key, 8)
    f32 = jnp.float32
    return {
        "conv1_w": 0.1 * jax.random.normal(ks[0], (32, 1, 3, 3), f32),
        "conv1_b": 0.1 * jax.random.normal(ks[1], (32,), f32),
        "conv2_w": 0.05 * jax.random.normal(ks[2], (64, 32, 3, 3), f32),
        "conv2_b": 0.05 * jax.random.normal(ks[3], (64,), f32),
        "fc1_w": 0.02 * jax.random.normal(ks[4], (128, 9216), f32),
        "fc1_b": 0.02 * jax.random.normal(ks[5], (128,), f32),
        "fc2_w": 0.05 * jax.random.normal(ks[6], (10, 128), f32),
        "fc2_b": 0.05 * jax.random.normal(ks[7], (10,), f32),
    }


if __name__ == "__main__":
    key = jax.random.PRNGKey(0)
    k_x, k_p = jax.random.split(key)
    # 28x28 input is forced by fc1 (9216 = 64*12*12); B=16 -> two grid steps of TB=8.
    x = jax.random.normal(k_x, (16, 1, 28, 28), jnp.float32)
    params = init_params(k_p)

    ref = jax.block_until_ready(net_forward_ref(x, params))
    fwd = jax.jit(net_forward)

    # f32 MXU operands: tight check against the pure-JAX reference.
    out32 = jax.block_until_ready(fwd(x, prepare_params(params, jnp.float32)))
    assert out32.shape == (16, 10)
    assert jnp.allclose(out32, ref, rtol=1e-3, atol=1e-3), (out32, ref)
    assert jnp.allclose(jnp.sum(jnp.exp(out32), axis=1), 1.0, atol=1e-3)

    # bf16 MXU operands (default mode, f32 accumulation): looser tolerance.
    out16 = jax.block_until_ready(fwd(x, prepare_params(params)))
    assert out16.shape == (16, 10)
    assert float(jnp.max(jnp.abs(out16 - ref))) < 1e-1

    print("KERNEL_OK")
</pallas_src>

<mosaic_0001>
module attributes {stable_mosaic.version = 11 : i64} {
  func.func @_net_kernel(%arg0: i32, %arg1: memref<28x28x8x1xf32, #tpu.memory_space<vmem>>, %arg2: memref<9x1x32xf32, #tpu.memory_space<vmem>>, %arg3: memref<1x32xf32, #tpu.memory_space<vmem>>, %arg4: memref<9x32x64xf32, #tpu.memory_space<vmem>>, %arg5: memref<1x64xf32, #tpu.memory_space<vmem>>, %arg6: memref<12x12x64x128xf32, #tpu.memory_space<vmem>>, %arg7: memref<1x128xf32, #tpu.memory_space<vmem>>, %arg8: memref<128x10xf32, #tpu.memory_space<vmem>>, %arg9: memref<1x10xf32, #tpu.memory_space<vmem>>, %arg10: memref<8x10xf32, #tpu.memory_space<vmem>>, %arg11: memref<26x26x8x32xf32, #tpu.memory_space<vmem>>) attributes {dimension_semantics = [#tpu.dimension_semantics<parallel>], iteration_bounds = array<i64: 2>, scalar_prefetch = 0 : i64, scratch_operands = 1 : i64, tpu.core_type = #tpu.core_type<tc>, window_params = [{transform_indices = @transform_0, window_bounds = array<i64: 28, 28, 8, 1>}, {pipeline_mode = #tpu.pipeline_mode<synchronous>, transform_indices = @transform_1, window_bounds = array<i64: 9, 1, 32>}, {pipeline_mode = #tpu.pipeline_mode<synchronous>, transform_indices = @transform_2, window_bounds = array<i64: 1, 32>}, {pipeline_mode = #tpu.pipeline_mode<synchronous>, transform_indices = @transform_3, window_bounds = array<i64: 9, 32, 64>}, {pipeline_mode = #tpu.pipeline_mode<synchronous>, transform_indices = @transform_4, window_bounds = array<i64: 1, 64>}, {pipeline_mode = #tpu.pipeline_mode<synchronous>, transform_indices = @transform_5, window_bounds = array<i64: 12, 12, 64, 128>}, {pipeline_mode = #tpu.pipeline_mode<synchronous>, transform_indices = @transform_6, window_bounds = array<i64: 1, 128>}, {pipeline_mode = #tpu.pipeline_mode<synchronous>, transform_indices = @transform_7, window_bounds = array<i64: 128, 10>}, {pipeline_mode = #tpu.pipeline_mode<synchronous>, transform_indices = @transform_8, window_bounds = array<i64: 1, 10>}, {transform_indices = @transform_9, window_bounds = array<i64: 8, 10>}]} {
    %c0_i32 = arith.constant 0 : i32
    %c26_i32 = arith.constant 26 : i32
    %0 = arith.addi %c0_i32, %c26_i32 : i32
    %c1_i32 = arith.constant 1 : i32
    scf.for %arg12 = %c0_i32 to %0 step %c1_i32  : i32 {
      %cst_15 = arith.constant 0.000000e+00 : f32
      %25 = vector.broadcast %cst_15 : f32 to vector<26x8x32xf32>
      %c0_i32_16 = arith.constant 0 : i32
      %26 = arith.addi %arg12, %c0_i32_16 : i32
      %27 = arith.index_cast %26 : i32 to index
      %c0_17 = arith.constant 0 : index
      %c0_18 = arith.constant 0 : index
      %c0_19 = arith.constant 0 : index
      %28 = vector.load %arg1[%27, %c0_17, %c0_18, %c0_19] : memref<28x28x8x1xf32, #tpu.memory_space<vmem>>, vector<1x28x8x1xf32>
      %29 = vector.shape_cast %28 : vector<1x28x8x1xf32> to vector<28x8x1xf32>
      %30 = vector.extract_strided_slice %29 {offsets = [0, 0, 0], sizes = [26, 8, 1], strides = [1, 1, 1]} : vector<28x8x1xf32> to vector<26x8x1xf32>
      %c0_20 = arith.constant 0 : index
      %c0_21 = arith.constant 0 : index
      %c0_22 = arith.constant 0 : index
      %31 = vector.load %arg2[%c0_20, %c0_21, %c0_22] : memref<9x1x32xf32, #tpu.memory_space<vmem>>, vector<1x1x32xf32>
      %32 = vector.shape_cast %31 : vector<1x1x32xf32> to vector<1x32xf32>
      %33 = vector.shape_cast %32 : vector<1x32xf32> to vector<1x1x32xf32>
      %34 = vector.broadcast %30 : vector<26x8x1xf32> to vector<26x8x32xf32>
      %35 = vector.broadcast %33 : vector<1x1x32xf32> to vector<26x8x32xf32>
      %36 = arith.mulf %34, %35 : vector<26x8x32xf32>
      %37 = arith.addf %25, %36 : vector<26x8x32xf32>
      %38 = vector.extract_strided_slice %29 {offsets = [1, 0, 0], sizes = [26, 8, 1], strides = [1, 1, 1]} : vector<28x8x1xf32> to vector<26x8x1xf32>
      %c1 = arith.constant 1 : index
      %c0_23 = arith.constant 0 : index
      %c0_24 = arith.constant 0 : index
      %39 = vector.load %arg2[%c1, %c0_23, %c0_24] : memref<9x1x32xf32, #tpu.memory_space<vmem>>, vector<1x1x32xf32>
      %40 = vector.shape_cast %39 : vector<1x1x32xf32> to vector<1x32xf32>
      %41 = vector.shape_cast %40 : vector<1x32xf32> to vector<1x1x32xf32>
      %42 = vector.broadcast %38 : vector<26x8x1xf32> to vector<26x8x32xf32>
      %43 = vector.broadcast %41 : vector<1x1x32xf32> to vector<26x8x32xf32>
      %44 = arith.mulf %42, %43 : vector<26x8x32xf32>
      %45 = arith.addf %37, %44 : vector<26x8x32xf32>
      %46 = vector.extract_strided_slice %29 {offsets = [2, 0, 0], sizes = [26, 8, 1], strides = [1, 1, 1]} : vector<28x8x1xf32> to vector<26x8x1xf32>
      %c2 = arith.constant 2 : index
      %c0_25 = arith.constant 0 : index
      %c0_26 = arith.constant 0 : index
      %47 = vector.load %arg2[%c2, %c0_25, %c0_26] : memref<9x1x32xf32, #tpu.memory_space<vmem>>, vector<1x1x32xf32>
      %48 = vector.shape_cast %47 : vector<1x1x32xf32> to vector<1x32xf32>
      %49 = vector.shape_cast %48 : vector<1x32xf32> to vector<1x1x32xf32>
      %50 = vector.broadcast %46 : vector<26x8x1xf32> to vector<26x8x32xf32>
      %51 = vector.broadcast %49 : vector<1x1x32xf32> to vector<26x8x32xf32>
      %52 = arith.mulf %50, %51 : vector<26x8x32xf32>
      %53 = arith.addf %45, %52 : vector<26x8x32xf32>
      %c1_i32_27 = arith.constant 1 : i32
      %54 = arith.addi %arg12, %c1_i32_27 : i32
      %55 = arith.index_cast %54 : i32 to index
      %c0_28 = arith.constant 0 : index
      %c0_29 = arith.constant 0 : index
      %c0_30 = arith.constant 0 : index
      %56 = vector.load %arg1[%55, %c0_28, %c0_29, %c0_30] : memref<28x28x8x1xf32, #tpu.memory_space<vmem>>, vector<1x28x8x1xf32>
      %57 = vector.shape_cast %56 : vector<1x28x8x1xf32> to vector<28x8x1xf32>
      %58 = vector.extract_strided_slice %57 {offsets = [0, 0, 0], sizes = [26, 8, 1], strides = [1, 1, 1]} : vector<28x8x1xf32> to vector<26x8x1xf32>
      %c3 = arith.constant 3 : index
      %c0_31 = arith.constant 0 : index
      %c0_32 = arith.constant 0 : index
      %59 = vector.load %arg2[%c3, %c0_31, %c0_32] : memref<9x1x32xf32, #tpu.memory_space<vmem>>, vector<1x1x32xf32>
      %60 = vector.shape_cast %59 : vector<1x1x32xf32> to vector<1x32xf32>
      %61 = vector.shape_cast %60 : vector<1x32xf32> to vector<1x1x32xf32>
      %62 = vector.broadcast %58 : vector<26x8x1xf32> to vector<26x8x32xf32>
      %63 = vector.broadcast %61 : vector<1x1x32xf32> to vector<26x8x32xf32>
      %64 = arith.mulf %62, %63 : vector<26x8x32xf32>
      %65 = arith.addf %53, %64 : vector<26x8x32xf32>
      %66 = vector.extract_strided_slice %57 {offsets = [1, 0, 0], sizes = [26, 8, 1], strides = [1, 1, 1]} : vector<28x8x1xf32> to vector<26x8x1xf32>
      %c4 = arith.constant 4 : index
      %c0_33 = arith.constant 0 : index
      %c0_34 = arith.constant 0 : index
      %67 = vector.load %arg2[%c4, %c0_33, %c0_34] : memref<9x1x32xf32, #tpu.memory_space<vmem>>, vector<1x1x32xf32>
      %68 = vector.shape_cast %67 : vector<1x1x32xf32> to vector<1x32xf32>
      %69 = vector.shape_cast %68 : vector<1x32xf32> to vector<1x1x32xf32>
      %70 = vector.broadcast %66 : vector<26x8x1xf32> to vector<26x8x32xf32>
      %71 = vector.broadcast %69 : vector<1x1x32xf32> to vector<26x8x32xf32>
      %72 = arith.mulf %70, %71 : vector<26x8x32xf32>
      %73 = arith.addf %65, %72 : vector<26x8x32xf32>
      %74 = vector.extract_strided_slice %57 {offsets = [2, 0, 0], sizes = [26, 8, 1], strides = [1, 1, 1]} : vector<28x8x1xf32> to vector<26x8x1xf32>
      %c5 = arith.constant 5 : index
      %c0_35 = arith.constant 0 : index
      %c0_36 = arith.constant 0 : index
      %75 = vector.load %arg2[%c5, %c0_35, %c0_36] : memref<9x1x32xf32, #tpu.memory_space<vmem>>, vector<1x1x32xf32>
      %76 = vector.shape_cast %75 : vector<1x1x32xf32> to vector<1x32xf32>
      %77 = vector.shape_cast %76 : vector<1x32xf32> to vector<1x1x32xf32>
      %78 = vector.broadcast %74 : vector<26x8x1xf32> to vector<26x8x32xf32>
      %79 = vector.broadcast %77 : vector<1x1x32xf32> to vector<26x8x32xf32>
      %80 = arith.mulf %78, %79 : vector<26x8x32xf32>
      %81 = arith.addf %73, %80 : vector<26x8x32xf32>
      %c2_i32 = arith.constant 2 : i32
      %82 = arith.addi %arg12, %c2_i32 : i32
      %83 = arith.index_cast %82 : i32 to index
      %c0_37 = arith.constant 0 : index
      %c0_38 = arith.constant 0 : index
      %c0_39 = arith.constant 0 : index
      %84 = vector.load %arg1[%83, %c0_37, %c0_38, %c0_39] : memref<28x28x8x1xf32, #tpu.memory_space<vmem>>, vector<1x28x8x1xf32>
      %85 = vector.shape_cast %84 : vector<1x28x8x1xf32> to vector<28x8x1xf32>
      %86 = vector.extract_strided_slice %85 {offsets = [0, 0, 0], sizes = [26, 8, 1], strides = [1, 1, 1]} : vector<28x8x1xf32> to vector<26x8x1xf32>
      %c6 = arith.constant 6 : index
      %c0_40 = arith.constant 0 : index
      %c0_41 = arith.constant 0 : index
      %87 = vector.load %arg2[%c6, %c0_40, %c0_41] : memref<9x1x32xf32, #tpu.memory_space<vmem>>, vector<1x1x32xf32>
      %88 = vector.shape_cast %87 : vector<1x1x32xf32> to vector<1x32xf32>
      %89 = vector.shape_cast %88 : vector<1x32xf32> to vector<1x1x32xf32>
      %90 = vector.broadcast %86 : vector<26x8x1xf32> to vector<26x8x32xf32>
      %91 = vector.broadcast %89 : vector<1x1x32xf32> to vector<26x8x32xf32>
      %92 = arith.mulf %90, %91 : vector<26x8x32xf32>
      %93 = arith.addf %81, %92 : vector<26x8x32xf32>
      %94 = vector.extract_strided_slice %85 {offsets = [1, 0, 0], sizes = [26, 8, 1], strides = [1, 1, 1]} : vector<28x8x1xf32> to vector<26x8x1xf32>
      %c7 = arith.constant 7 : index
      %c0_42 = arith.constant 0 : index
      %c0_43 = arith.constant 0 : index
      %95 = vector.load %arg2[%c7, %c0_42, %c0_43] : memref<9x1x32xf32, #tpu.memory_space<vmem>>, vector<1x1x32xf32>
      %96 = vector.shape_cast %95 : vector<1x1x32xf32> to vector<1x32xf32>
      %97 = vector.shape_cast %96 : vector<1x32xf32> to vector<1x1x32xf32>
      %98 = vector.broadcast %94 : vector<26x8x1xf32> to vector<26x8x32xf32>
      %99 = vector.broadcast %97 : vector<1x1x32xf32> to vector<26x8x32xf32>
      %100 = arith.mulf %98, %99 : vector<26x8x32xf32>
      %101 = arith.addf %93, %100 : vector<26x8x32xf32>
      %102 = vector.extract_strided_slice %85 {offsets = [2, 0, 0], sizes = [26, 8, 1], strides = [1, 1, 1]} : vector<28x8x1xf32> to vector<26x8x1xf32>
      %c8 = arith.constant 8 : index
      %c0_44 = arith.constant 0 : index
      %c0_45 = arith.constant 0 : index
      %103 = vector.load %arg2[%c8, %c0_44, %c0_45] : memref<9x1x32xf32, #tpu.memory_space<vmem>>, vector<1x1x32xf32>
      %104 = vector.shape_cast %103 : vector<1x1x32xf32> to vector<1x32xf32>
      %105 = vector.shape_cast %104 : vector<1x32xf32> to vector<1x1x32xf32>
      %106 = vector.broadcast %102 : vector<26x8x1xf32> to vector<26x8x32xf32>
      %107 = vector.broadcast %105 : vector<1x1x32xf32> to vector<26x8x32xf32>
      %108 = arith.mulf %106, %107 : vector<26x8x32xf32>
      %109 = arith.addf %101, %108 : vector<26x8x32xf32>
      %c0_46 = arith.constant 0 : index
      %c0_47 = arith.constant 0 : index
      %110 = vector.load %arg3[%c0_46, %c0_47] : memref<1x32xf32, #tpu.memory_space<vmem>>, vector<1x32xf32>
      %111 = vector.shape_cast %110 : vector<1x32xf32> to vector<1x1x32xf32>
      %112 = vector.broadcast %111 : vector<1x1x32xf32> to vector<26x8x32xf32>
      %113 = arith.addf %109, %112 : vector<26x8x32xf32>
      %cst_48 = arith.constant 0.000000e+00 : f32
      %114 = vector.broadcast %cst_48 : f32 to vector<26x8x32xf32>
      %115 = arith.maximumf %113, %114 : vector<26x8x32xf32>
      %116 = arith.index_cast %arg12 : i32 to index
      %c0_49 = arith.constant 0 : index
      %c0_50 = arith.constant 0 : index
      %c0_51 = arith.constant 0 : index
      %117 = vector.load %arg11[%116, %c0_49, %c0_50, %c0_51] : memref<26x26x8x32xf32, #tpu.memory_space<vmem>>, vector<1x26x8x32xf32>
      %118 = vector.shape_cast %117 : vector<1x26x8x32xf32> to vector<26x8x32xf32>
      %119 = vector.shape_cast %115 : vector<26x8x32xf32> to vector<1x26x8x32xf32>
      tpu.vector_store %arg11[%116, %c0_49, %c0_50, %c0_51], %119 {strides = array<i32>} : memref<26x26x8x32xf32, #tpu.memory_space<vmem>>, vector<1x26x8x32xf32>,
    }
    %c26_i32_0 = arith.constant 26 : i32
    %cst = arith.constant 0.000000e+00 : f32
    %1 = vector.broadcast %cst : f32 to vector<8x128xf32>
    %c0_i32_1 = arith.constant 0 : i32
    %c12_i32 = arith.constant 12 : i32
    %2 = arith.addi %c0_i32_1, %c12_i32 : i32
    %c1_i32_2 = arith.constant 1 : i32
    %3 = scf.for %arg12 = %c0_i32_1 to %2 step %c1_i32_2 iter_args(%arg13 = %1) -> (vector<8x128xf32>)  : i32 {
      %cst_15 = arith.constant 0.000000e+00 : f32
      %25 = vector.broadcast %cst_15 : f32 to vector<192x64xf32>
      %c2_i32 = arith.constant 2 : i32
      %26 = arith.muli %c2_i32, %arg12 : i32
      %c0_i32_16 = arith.constant 0 : i32
      %27 = arith.addi %26, %c0_i32_16 : i32
      %c0_i32_17 = arith.constant 0 : i32
      %28 = arith.addi %27, %c0_i32_17 : i32
      %29 = arith.index_cast %28 : i32 to index
      %c0_18 = arith.constant 0 : index
      %c0_19 = arith.constant 0 : index
      %c0_20 = arith.constant 0 : index
      %30 = vector.load %arg11[%29, %c0_18, %c0_19, %c0_20] : memref<26x26x8x32xf32, #tpu.memory_space<vmem>>, vector<1x26x8x32xf32>
      %31 = vector.shape_cast %30 : vector<1x26x8x32xf32> to vector<26x8x32xf32>
      %32 = vector.extract_strided_slice %31 {offsets = [0, 0, 0], sizes = [24, 8, 32], strides = [1, 1, 1]} : vector<26x8x32xf32> to vector<24x8x32xf32>
      %33 = vector.shape_cast %32 : vector<24x8x32xf32> to vector<192x32xf32>
      %c0_21 = arith.constant 0 : index
      %c0_22 = arith.constant 0 : index
      %c0_23 = arith.constant 0 : index
      %34 = vector.load %arg4[%c0_21, %c0_22, %c0_23] : memref<9x32x64xf32, #tpu.memory_space<vmem>>, vector<1x32x64xf32>
      %35 = vector.shape_cast %34 : vector<1x32x64xf32> to vector<32x64xf32>
      %cst_24 = arith.constant dense<0.000000e+00> : vector<192x64xf32>
      %36 = tpu.matmul %33, %35, %cst_24 {dimension_numbers = #tpu.dot_dimension_numbers<[1], [0], [0], [1], [0, 0, 1, 1], [], []>} : vector<192x32xf32>, vector<32x64xf32>, vector<192x64xf32> -> vector<192x64xf32>
      %37 = arith.addf %25, %36 : vector<192x64xf32>
      %c2_i32_25 = arith.constant 2 : i32
      %38 = arith.muli %c2_i32_25, %arg12 : i32
      %c0_i32_26 = arith.constant 0 : i32
      %39 = arith.addi %38, %c0_i32_26 : i32
      %c0_i32_27 = arith.constant 0 : i32
      %40 = arith.addi %39, %c0_i32_27 : i32
      %41 = arith.index_cast %40 : i32 to index
      %c0_28 = arith.constant 0 : index
      %c0_29 = arith.constant 0 : index
      %c0_30 = arith.constant 0 : index
      %42 = vector.load %arg11[%41, %c0_28, %c0_29, %c0_30] : memref<26x26x8x32xf32, #tpu.memory_space<vmem>>, vector<1x26x8x32xf32>
      %43 = vector.shape_cast %42 : vector<1x26x8x32xf32> to vector<26x8x32xf32>
      %44 = vector.extract_strided_slice %43 {offsets = [1, 0, 0], sizes = [24, 8, 32], strides = [1, 1, 1]} : vector<26x8x32xf32> to vector<24x8x32xf32>
      %45 = vector.shape_cast %44 : vector<24x8x32xf32> to vector<192x32xf32>
      %c1 = arith.constant 1 : index
      %c0_31 = arith.constant 0 : index
      %c0_32 = arith.constant 0 : index
      %46 = vector.load %arg4[%c1, %c0_31, %c0_32] : memref<9x32x64xf32, #tpu.memory_space<vmem>>, vector<1x32x64xf32>
      %47 = vector.shape_cast %46 : vector<1x32x64xf32> to vector<32x64xf32>
      %cst_33 = arith.constant dense<0.000000e+00> : vector<192x64xf32>
      %48 = tpu.matmul %45, %47, %cst_33 {dimension_numbers = #tpu.dot_dimension_numbers<[1], [0], [0], [1], [0, 0, 1, 1], [], []>} : vector<192x32xf32>, vector<32x64xf32>, vector<192x64xf32> -> vector<192x64xf32>
      %49 = arith.addf %37, %48 : vector<192x64xf32>
      %c2_i32_34 = arith.constant 2 : i32
      %50 = arith.muli %c2_i32_34, %arg12 : i32
      %c0_i32_35 = arith.constant 0 : i32
      %51 = arith.addi %50, %c0_i32_35 : i32
      %c0_i32_36 = arith.constant 0 : i32
      %52 = arith.addi %51, %c0_i32_36 : i32
      %53 = arith.index_cast %52 : i32 to index
      %c0_37 = arith.constant 0 : index
      %c0_38 = arith.constant 0 : index
      %c0_39 = arith.constant 0 : index
      %54 = vector.load %arg11[%53, %c0_37, %c0_38, %c0_39] : memref<26x26x8x32xf32, #tpu.memory_space<vmem>>, vector<1x26x8x32xf32>
      %55 = vector.shape_cast %54 : vector<1x26x8x32xf32> to vector<26x8x32xf32>
      %56 = vector.extract_strided_slice %55 {offsets = [2, 0, 0], sizes = [24, 8, 32], strides = [1, 1, 1]} : vector<26x8x32xf32> to vector<24x8x32xf32>
      %57 = vector.shape_cast %56 : vector<24x8x32xf32> to vector<192x32xf32>
      %c2 = arith.constant 2 : index
      %c0_40 = arith.constant 0 : index
      %c0_41 = arith.constant 0 : index
      %58 = vector.load %arg4[%c2, %c0_40, %c0_41] : memref<9x32x64xf32, #tpu.memory_space<vmem>>, vector<1x32x64xf32>
      %59 = vector.shape_cast %58 : vector<1x32x64xf32> to vector<32x64xf32>
      %cst_42 = arith.constant dense<0.000000e+00> : vector<192x64xf32>
      %60 = tpu.matmul %57, %59, %cst_42 {dimension_numbers = #tpu.dot_dimension_numbers<[1], [0], [0], [1], [0, 0, 1, 1], [], []>} : vector<192x32xf32>, vector<32x64xf32>, vector<192x64xf32> -> vector<192x64xf32>
      %61 = arith.addf %49, %60 : vector<192x64xf32>
      %c2_i32_43 = arith.constant 2 : i32
      %62 = arith.muli %c2_i32_43, %arg12 : i32
      %c0_i32_44 = arith.constant 0 : i32
      %63 = arith.addi %62, %c0_i32_44 : i32
      %c1_i32_45 = arith.constant 1 : i32
      %64 = arith.addi %63, %c1_i32_45 : i32
      %65 = arith.index_cast %64 : i32 to index
      %c0_46 = arith.constant 0 : index
      %c0_47 = arith.constant 0 : index
      %c0_48 = arith.constant 0 : index
      %66 = vector.load %arg11[%65, %c0_46, %c0_47, %c0_48] : memref<26x26x8x32xf32, #tpu.memory_space<vmem>>, vector<1x26x8x32xf32>
      %67 = vector.shape_cast %66 : vector<1x26x8x32xf32> to vector<26x8x32xf32>
      %68 = vector.extract_strided_slice %67 {offsets = [0, 0, 0], sizes = [24, 8, 32], strides = [1, 1, 1]} : vector<26x8x32xf32> to vector<24x8x32xf32>
      %69 = vector.shape_cast %68 : vector<24x8x32xf32> to vector<192x32xf32>
      %c3 = arith.constant 3 : index
      %c0_49 = arith.constant 0 : index
      %c0_50 = arith.constant 0 : index
      %70 = vector.load %arg4[%c3, %c0_49, %c0_50] : memref<9x32x64xf32, #tpu.memory_space<vmem>>, vector<1x32x64xf32>
      %71 = vector.shape_cast %70 : vector<1x32x64xf32> to vector<32x64xf32>
      %cst_51 = arith.constant dense<0.000000e+00> : vector<192x64xf32>
      %72 = tpu.matmul %69, %71, %cst_51 {dimension_numbers = #tpu.dot_dimension_numbers<[1], [0], [0], [1], [0, 0, 1, 1], [], []>} : vector<192x32xf32>, vector<32x64xf32>, vector<192x64xf32> -> vector<192x64xf32>
      %73 = arith.addf %61, %72 : vector<192x64xf32>
      %c2_i32_52 = arith.constant 2 : i32
      %74 = arith.muli %c2_i32_52, %arg12 : i32
      %c0_i32_53 = arith.constant 0 : i32
      %75 = arith.addi %74, %c0_i32_53 : i32
      %c1_i32_54 = arith.constant 1 : i32
      %76 = arith.addi %75, %c1_i32_54 : i32
      %77 = arith.index_cast %76 : i32 to index
      %c0_55 = arith.constant 0 : index
      %c0_56 = arith.constant 0 : index
      %c0_57 = arith.constant 0 : index
      %78 = vector.load %arg11[%77, %c0_55, %c0_56, %c0_57] : memref<26x26x8x32xf32, #tpu.memory_space<vmem>>, vector<1x26x8x32xf32>
      %79 = vector.shape_cast %78 : vector<1x26x8x32xf32> to vector<26x8x32xf32>
      %80 = vector.extract_strided_slice %79 {offsets = [1, 0, 0], sizes = [24, 8, 32], strides = [1, 1, 1]} : vector<26x8x32xf32> to vector<24x8x32xf32>
      %81 = vector.shape_cast %80 : vector<24x8x32xf32> to vector<192x32xf32>
      %c4 = arith.constant 4 : index
      %c0_58 = arith.constant 0 : index
      %c0_59 = arith.constant 0 : index
      %82 = vector.load %arg4[%c4, %c0_58, %c0_59] : memref<9x32x64xf32, #tpu.memory_space<vmem>>, vector<1x32x64xf32>
      %83 = vector.shape_cast %82 : vector<1x32x64xf32> to vector<32x64xf32>
      %cst_60 = arith.constant dense<0.000000e+00> : vector<192x64xf32>
      %84 = tpu.matmul %81, %83, %cst_60 {dimension_numbers = #tpu.dot_dimension_numbers<[1], [0], [0], [1], [0, 0, 1, 1], [], []>} : vector<192x32xf32>, vector<32x64xf32>, vector<192x64xf32> -> vector<192x64xf32>
      %85 = arith.addf %73, %84 : vector<192x64xf32>
      %c2_i32_61 = arith.constant 2 : i32
      %86 = arith.muli %c2_i32_61, %arg12 : i32
      %c0_i32_62 = arith.constant 0 : i32
      %87 = arith.addi %86, %c0_i32_62 : i32
      %c1_i32_63 = arith.constant 1 : i32
      %88 = arith.addi %87, %c1_i32_63 : i32
      %89 = arith.index_cast %88 : i32 to index
      %c0_64 = arith.constant 0 : index
      %c0_65 = arith.constant 0 : index
      %c0_66 = arith.constant 0 : index
      %90 = vector.load %arg11[%89, %c0_64, %c0_65, %c0_66] : memref<26x26x8x32xf32, #tpu.memory_space<vmem>>, vector<1x26x8x32xf32>
      %91 = vector.shape_cast %90 : vector<1x26x8x32xf32> to vector<26x8x32xf32>
      %92 = vector.extract_strided_slice %91 {offsets = [2, 0, 0], sizes = [24, 8, 32], strides = [1, 1, 1]} : vector<26x8x32xf32> to vector<24x8x32xf32>
      %93 = vector.shape_cast %92 : vector<24x8x32xf32> to vector<192x32xf32>
      %c5 = arith.constant 5 : index
      %c0_67 = arith.constant 0 : index
      %c0_68 = arith.constant 0 : index
      %94 = vector.load %arg4[%c5, %c0_67, %c0_68] : memref<9x32x64xf32, #tpu.memory_space<vmem>>, vector<1x32x64xf32>
      %95 = vector.shape_cast %94 : vector<1x32x64xf32> to vector<32x64xf32>
      %cst_69 = arith.constant dense<0.000000e+00> : vector<192x64xf32>
      %96 = tpu.matmul %93, %95, %cst_69 {dimension_numbers = #tpu.dot_dimension_numbers<[1], [0], [0], [1], [0, 0, 1, 1], [], []>} : vector<192x32xf32>, vector<32x64xf32>, vector<192x64xf32> -> vector<192x64xf32>
      %97 = arith.addf %85, %96 : vector<192x64xf32>
      %c2_i32_70 = arith.constant 2 : i32
      %98 = arith.muli %c2_i32_70, %arg12 : i32
      %c0_i32_71 = arith.constant 0 : i32
      %99 = arith.addi %98, %c0_i32_71 : i32
      %c2_i32_72 = arith.constant 2 : i32
      %100 = arith.addi %99, %c2_i32_72 : i32
      %101 = arith.index_cast %100 : i32 to index
      %c0_73 = arith.constant 0 : index
      %c0_74 = arith.constant 0 : index
      %c0_75 = arith.constant 0 : index
      %102 = vector.load %arg11[%101, %c0_73, %c0_74, %c0_75] : memref<26x26x8x32xf32, #tpu.memory_space<vmem>>, vector<1x26x8x32xf32>
      %103 = vector.shape_cast %102 : vector<1x26x8x32xf32> to vector<26x8x32xf32>
      %104 = vector.extract_strided_slice %103 {offsets = [0, 0, 0], sizes = [24, 8, 32], strides = [1, 1, 1]} : vector<26x8x32xf32> to vector<24x8x32xf32>
      %105 = vector.shape_cast %104 : vector<24x8x32xf32> to vector<192x32xf32>
      %c6 = arith.constant 6 : index
      %c0_76 = arith.constant 0 : index
      %c0_77 = arith.constant 0 : index
      %106 = vector.load %arg4[%c6, %c0_76, %c0_77] : memref<9x32x64xf32, #tpu.memory_space<vmem>>, vector<1x32x64xf32>
      %107 = vector.shape_cast %106 : vector<1x32x64xf32> to vector<32x64xf32>
      %cst_78 = arith.constant dense<0.000000e+00> : vector<192x64xf32>
      %108 = tpu.matmul %105, %107, %cst_78 {dimension_numbers = #tpu.dot_dimension_numbers<[1], [0], [0], [1], [0, 0, 1, 1], [], []>} : vector<192x32xf32>, vector<32x64xf32>, vector<192x64xf32> -> vector<192x64xf32>
      %109 = arith.addf %97, %108 : vector<192x64xf32>
      %c2_i32_79 = arith.constant 2 : i32
      %110 = arith.muli %c2_i32_79, %arg12 : i32
      %c0_i32_80 = arith.constant 0 : i32
      %111 = arith.addi %110, %c0_i32_80 : i32
      %c2_i32_81 = arith.constant 2 : i32
      %112 = arith.addi %111, %c2_i32_81 : i32
      %113 = arith.index_cast %112 : i32 to index
      %c0_82 = arith.constant 0 : index
      %c0_83 = arith.constant 0 : index
      %c0_84 = arith.constant 0 : index
      %114 = vector.load %arg11[%113, %c0_82, %c0_83, %c0_84] : memref<26x26x8x32xf32, #tpu.memory_space<vmem>>, vector<1x26x8x32xf32>
      %115 = vector.shape_cast %114 : vector<1x26x8x32xf32> to vector<26x8x32xf32>
      %116 = vector.extract_strided_slice %115 {offsets = [1, 0, 0], sizes = [24, 8, 32], strides = [1, 1, 1]} : vector<26x8x32xf32> to vector<24x8x32xf32>
      %117 = vector.shape_cast %116 : vector<24x8x32xf32> to vector<192x32xf32>
      %c7 = arith.constant 7 : index
      %c0_85 = arith.constant 0 : index
      %c0_86 = arith.constant 0 : index
      %118 = vector.load %arg4[%c7, %c0_85, %c0_86] : memref<9x32x64xf32, #tpu.memory_space<vmem>>, vector<1x32x64xf32>
      %119 = vector.shape_cast %118 : vector<1x32x64xf32> to vector<32x64xf32>
      %cst_87 = arith.constant dense<0.000000e+00> : vector<192x64xf32>
      %120 = tpu.matmul %117, %119, %cst_87 {dimension_numbers = #tpu.dot_dimension_numbers<[1], [0], [0], [1], [0, 0, 1, 1], [], []>} : vector<192x32xf32>, vector<32x64xf32>, vector<192x64xf32> -> vector<192x64xf32>
      %121 = arith.addf %109, %120 : vector<192x64xf32>
      %c2_i32_88 = arith.constant 2 : i32
      %122 = arith.muli %c2_i32_88, %arg12 : i32
      %c0_i32_89 = arith.constant 0 : i32
      %123 = arith.addi %122, %c0_i32_89 : i32
      %c2_i32_90 = arith.constant 2 : i32
      %124 = arith.addi %123, %c2_i32_90 : i32
      %125 = arith.index_cast %124 : i32 to index
      %c0_91 = arith.constant 0 : index
      %c0_92 = arith.constant 0 : index
      %c0_93 = arith.constant 0 : index
      %126 = vector.load %arg11[%125, %c0_91, %c0_92, %c0_93] : memref<26x26x8x32xf32, #tpu.memory_space<vmem>>, vector<1x26x8x32xf32>
      %127 = vector.shape_cast %126 : vector<1x26x8x32xf32> to vector<26x8x32xf32>
      %128 = vector.extract_strided_slice %127 {offsets = [2, 0, 0], sizes = [24, 8, 32], strides = [1, 1, 1]} : vector<26x8x32xf32> to vector<24x8x32xf32>
      %129 = vector.shape_cast %128 : vector<24x8x32xf32> to vector<192x32xf32>
      %c8 = arith.constant 8 : index
      %c0_94 = arith.constant 0 : index
      %c0_95 = arith.constant 0 : index
      %130 = vector.load %arg4[%c8, %c0_94, %c0_95] : memref<9x32x64xf32, #tpu.memory_space<vmem>>, vector<1x32x64xf32>
      %131 = vector.shape_cast %130 : vector<1x32x64xf32> to vector<32x64xf32>
      %cst_96 = arith.constant dense<0.000000e+00> : vector<192x64xf32>
      %132 = tpu.matmul %129, %131, %cst_96 {dimension_numbers = #tpu.dot_dimension_numbers<[1], [0], [0], [1], [0, 0, 1, 1], [], []>} : vector<192x32xf32>, vector<32x64xf32>, vector<192x64xf32> -> vector<192x64xf32>
      %133 = arith.addf %121, %132 : vector<192x64xf32>
      %c0_97 = arith.constant 0 : index
      %c0_98 = arith.constant 0 : index
      %134 = vector.load %arg5[%c0_97, %c0_98] : memref<1x64xf32, #tpu.memory_space<vmem>>, vector<1x64xf32>
      %135 = vector.broadcast %134 : vector<1x64xf32> to vector<192x64xf32>
      %136 = arith.addf %133, %135 : vector<192x64xf32>
      %cst_99 = arith.constant 0.000000e+00 : f32
      %137 = vector.broadcast %cst_99 : f32 to vector<192x64xf32>
      %138 = arith.maximumf %136, %137 : vector<192x64xf32>
      %cst_100 = arith.constant 0.000000e+00 : f32
      %139 = vector.broadcast %cst_100 : f32 to vector<192x64xf32>
      %c2_i32_101 = arith.constant 2 : i32
      %140 = arith.muli %c2_i32_101, %arg12 : i32
      %c1_i32_102 = arith.constant 1 : i32
      %141 = arith.addi %140, %c1_i32_102 : i32
      %c0_i32_103 = arith.constant 0 : i32
      %142 = arith.addi %141, %c0_i32_103 : i32
      %143 = arith.index_cast %142 : i32 to index
      %c0_104 = arith.constant 0 : index
      %c0_105 = arith.constant 0 : index
      %c0_106 = arith.constant 0 : index
      %144 = vector.load %arg11[%143, %c0_104, %c0_105, %c0_106] : memref<26x26x8x32xf32, #tpu.memory_space<vmem>>, vector<1x26x8x32xf32>
      %145 = vector.shape_cast %144 : vector<1x26x8x32xf32> to vector<26x8x32xf32>
      %146 = vector.extract_strided_slice %145 {offsets = [0, 0, 0], sizes = [24, 8, 32], strides = [1, 1, 1]} : vector<26x8x32xf32> to vector<24x8x32xf32>
      %147 = vector.shape_cast %146 : vector<24x8x32xf32> to vector<192x32xf32>
      %c0_107 = arith.constant 0 : index
      %c0_108 = arith.constant 0 : index
      %c0_109 = arith.constant 0 : index
      %148 = vector.load %arg4[%c0_107, %c0_108, %c0_109] : memref<9x32x64xf32, #tpu.memory_space<vmem>>, vector<1x32x64xf32>
      %149 = vector.shape_cast %148 : vector<1x32x64xf32> to vector<32x64xf32>
      %cst_110 = arith.constant dense<0.000000e+00> : vector<192x64xf32>
      %150 = tpu.matmul %147, %149, %cst_110 {dimension_numbers = #tpu.dot_dimension_numbers<[1], [0], [0], [1], [0, 0, 1, 1], [], []>} : vector<192x32xf32>, vector<32x64xf32>, vector<192x64xf32> -> vector<192x64xf32>
      %151 = arith.addf %139, %150 : vector<192x64xf32>
      %c2_i32_111 = arith.constant 2 : i32
      %152 = arith.muli %c2_i32_111, %arg12 : i32
      %c1_i32_112 = arith.constant 1 : i32
      %153 = arith.addi %152, %c1_i32_112 : i32
      %c0_i32_113 = arith.constant 0 : i32
      %154 = arith.addi %153, %c0_i32_113 : i32
      %155 = arith.index_cast %154 : i32 to index
      %c0_114 = arith.constant 0 : index
      %c0_115 = arith.constant 0 : index
      %c0_116 = arith.constant 0 : index
      %156 = vector.load %arg11[%155, %c0_114, %c0_115, %c0_116] : memref<26x26x8x32xf32, #tpu.memory_space<vmem>>, vector<1x26x8x32xf32>
      %157 = vector.shape_cast %156 : vector<1x26x8x32xf32> to vector<26x8x32xf32>
      %158 = vector.extract_strided_slice %157 {offsets = [1, 0, 0], sizes = [24, 8, 32], strides = [1, 1, 1]} : vector<26x8x32xf32> to vector<24x8x32xf32>
      %159 = vector.shape_cast %158 : vector<24x8x32xf32> to vector<192x32xf32>
      %c1_117 = arith.constant 1 : index
      %c0_118 = arith.constant 0 : index
      %c0_119 = arith.constant 0 : index
      %160 = vector.load %arg4[%c1_117, %c0_118, %c0_119] : memref<9x32x64xf32, #tpu.memory_space<vmem>>, vector<1x32x64xf32>
      %161 = vector.shape_cast %160 : vector<1x32x64xf32> to vector<32x64xf32>
      %cst_120 = arith.constant dense<0.000000e+00> : vector<192x64xf32>
      %162 = tpu.matmul %159, %161, %cst_120 {dimension_numbers = #tpu.dot_dimension_numbers<[1], [0], [0], [1], [0, 0, 1, 1], [], []>} : vector<192x32xf32>, vector<32x64xf32>, vector<192x64xf32> -> vector<192x64xf32>
      %163 = arith.addf %151, %162 : vector<192x64xf32>
      %c2_i32_121 = arith.constant 2 : i32
      %164 = arith.muli %c2_i32_121, %arg12 : i32
      %c1_i32_122 = arith.constant 1 : i32
      %165 = arith.addi %164, %c1_i32_122 : i32
      %c0_i32_123 = arith.constant 0 : i32
      %166 = arith.addi %165, %c0_i32_123 : i32
      %167 = arith.index_cast %166 : i32 to index
      %c0_124 = arith.constant 0 : index
      %c0_125 = arith.constant 0 : index
      %c0_126 = arith.constant 0 : index
      %168 = vector.load %arg11[%167, %c0_124, %c0_125, %c0_126] : memref<26x26x8x32xf32, #tpu.memory_space<vmem>>, vector<1x26x8x32xf32>
      %169 = vector.shape_cast %168 : vector<1x26x8x32xf32> to vector<26x8x32xf32>
      %170 = vector.extract_strided_slice %169 {offsets = [2, 0, 0], sizes = [24, 8, 32], strides = [1, 1, 1]} : vector<26x8x32xf32> to vector<24x8x32xf32>
      %171 = vector.shape_cast %170 : vector<24x8x32xf32> to vector<192x32xf32>
      %c2_127 = arith.constant 2 : index
      %c0_128 = arith.constant 0 : index
      %c0_129 = arith.constant 0 : index
      %172 = vector.load %arg4[%c2_127, %c0_128, %c0_129] : memref<9x32x64xf32, #tpu.memory_space<vmem>>, vector<1x32x64xf32>
      %173 = vector.shape_cast %172 : vector<1x32x64xf32> to vector<32x64xf32>
      %cst_130 = arith.constant dense<0.000000e+00> : vector<192x64xf32>
      %174 = tpu.matmul %171, %173, %cst_130 {dimension_numbers = #tpu.dot_dimension_numbers<[1], [0], [0], [1], [0, 0, 1, 1], [], []>} : vector<192x32xf32>, vector<32x64xf32>, vector<192x64xf32> -> vector<192x64xf32>
      %175 = arith.addf %163, %174 : vector<192x64xf32>
      %c2_i32_131 = arith.constant 2 : i32
      %176 = arith.muli %c2_i32_131, %arg12 : i32
      %c1_i32_132 = arith.constant 1 : i32
      %177 = arith.addi %176, %c1_i32_132 : i32
      %c1_i32_133 = arith.constant 1 : i32
      %178 = arith.addi %177, %c1_i32_133 : i32
      %179 = arith.index_cast %178 : i32 to index
      %c0_134 = arith.constant 0 : index
      %c0_135 = arith.constant 0 : index
      %c0_136 = arith.constant 0 : index
      %180 = vector.load %arg11[%179, %c0_134, %c0_135, %c0_136] : memref<26x26x8x32xf32, #tpu.memory_space<vmem>>, vector<1x26x8x32xf32>
      %181 = vector.shape_cast %180 : vector<1x26x8x32xf32> to vector<26x8x32xf32>
      %182 = vector.extract_strided_slice %181 {offsets = [0, 0, 0], sizes = [24, 8, 32], strides = [1, 1, 1]} : vector<26x8x32xf32> to vector<24x8x32xf32>
      %183 = vector.shape_cast %182 : vector<24x8x32xf32> to vector<192x32xf32>
      %c3_137 = arith.constant 3 : index
      %c0_138 = arith.constant 0 : index
      %c0_139 = arith.constant 0 : index
      %184 = vector.load %arg4[%c3_137, %c0_138, %c0_139] : memref<9x32x64xf32, #tpu.memory_space<vmem>>, vector<1x32x64xf32>
      %185 = vector.shape_cast %184 : vector<1x32x64xf32> to vector<32x64xf32>
      %cst_140 = arith.constant dense<0.000000e+00> : vector<192x64xf32>
      %186 = tpu.matmul %183, %185, %cst_140 {dimension_numbers = #tpu.dot_dimension_numbers<[1], [0], [0], [1], [0, 0, 1, 1], [], []>} : vector<192x32xf32>, vector<32x64xf32>, vector<192x64xf32> -> vector<192x64xf32>
      %187 = arith.addf %175, %186 : vector<192x64xf32>
      %c2_i32_141 = arith.constant 2 : i32
      %188 = arith.muli %c2_i32_141, %arg12 : i32
      %c1_i32_142 = arith.constant 1 : i32
      %189 = arith.addi %188, %c1_i32_142 : i32
      %c1_i32_143 = arith.constant 1 : i32
      %190 = arith.addi %189, %c1_i32_143 : i32
      %191 = arith.index_cast %190 : i32 to index
      %c0_144 = arith.constant 0 : index
      %c0_145 = arith.constant 0 : index
      %c0_146 = arith.constant 0 : index
      %192 = vector.load %arg11[%191, %c0_144, %c0_145, %c0_146] : memref<26x26x8x32xf32, #tpu.memory_space<vmem>>, vector<1x26x8x32xf32>
      %193 = vector.shape_cast %192 : vector<1x26x8x32xf32> to vector<26x8x32xf32>
      %194 = vector.extract_strided_slice %193 {offsets = [1, 0, 0], sizes = [24, 8, 32], strides = [1, 1, 1]} : vector<26x8x32xf32> to vector<24x8x32xf32>
      %195 = vector.shape_cast %194 : vector<24x8x32xf32> to vector<192x32xf32>
      %c4_147 = arith.constant 4 : index
      %c0_148 = arith.constant 0 : index
      %c0_149 = arith.constant 0 : index
      %196 = vector.load %arg4[%c4_147, %c0_148, %c0_149] : memref<9x32x64xf32, #tpu.memory_space<vmem>>, vector<1x32x64xf32>
      %197 = vector.shape_cast %196 : vector<1x32x64xf32> to vector<32x64xf32>
      %cst_150 = arith.constant dense<0.000000e+00> : vector<192x64xf32>
      %198 = tpu.matmul %195, %197, %cst_150 {dimension_numbers = #tpu.dot_dimension_numbers<[1], [0], [0], [1], [0, 0, 1, 1], [], []>} : vector<192x32xf32>, vector<32x64xf32>, vector<192x64xf32> -> vector<192x64xf32>
      %199 = arith.addf %187, %198 : vector<192x64xf32>
      %c2_i32_151 = arith.constant 2 : i32
      %200 = arith.muli %c2_i32_151, %arg12 : i32
      %c1_i32_152 = arith.constant 1 : i32
      %201 = arith.addi %200, %c1_i32_152 : i32
      %c1_i32_153 = arith.constant 1 : i32
      %202 = arith.addi %201, %c1_i32_153 : i32
      %203 = arith.index_cast %202 : i32 to index
      %c0_154 = arith.constant 0 : index
      %c0_155 = arith.constant 0 : index
      %c0_156 = arith.constant 0 : index
      %204 = vector.load %arg11[%203, %c0_154, %c0_155, %c0_156] : memref<26x26x8x32xf32, #tpu.memory_space<vmem>>, vector<1x26x8x32xf32>
      %205 = vector.shape_cast %204 : vector<1x26x8x32xf32> to vector<26x8x32xf32>
      %206 = vector.extract_strided_slice %205 {offsets = [2, 0, 0], sizes = [24, 8, 32], strides = [1, 1, 1]} : vector<26x8x32xf32> to vector<24x8x32xf32>
      %207 = vector.shape_cast %206 : vector<24x8x32xf32> to vector<192x32xf32>
      %c5_157 = arith.constant 5 : index
      %c0_158 = arith.constant 0 : index
      %c0_159 = arith.constant 0 : index
      %208 = vector.load %arg4[%c5_157, %c0_158, %c0_159] : memref<9x32x64xf32, #tpu.memory_space<vmem>>, vector<1x32x64xf32>
      %209 = vector.shape_cast %208 : vector<1x32x64xf32> to vector<32x64xf32>
      %cst_160 = arith.constant dense<0.000000e+00> : vector<192x64xf32>
      %210 = tpu.matmul %207, %209, %cst_160 {dimension_numbers = #tpu.dot_dimension_numbers<[1], [0], [0], [1], [0, 0, 1, 1], [], []>} : vector<192x32xf32>, vector<32x64xf32>, vector<192x64xf32> -> vector<192x64xf32>
      %211 = arith.addf %199, %210 : vector<192x64xf32>
      %c2_i32_161 = arith.constant 2 : i32
      %212 = arith.muli %c2_i32_161, %arg12 : i32
      %c1_i32_162 = arith.constant 1 : i32
      %213 = arith.addi %212, %c1_i32_162 : i32
      %c2_i32_163 = arith.constant 2 : i32
      %214 = arith.addi %213, %c2_i32_163 : i32
      %215 = arith.index_cast %214 : i32 to index
      %c0_164 = arith.constant 0 : index
      %c0_165 = arith.constant 0 : index
      %c0_166 = arith.constant 0 : index
      %216 = vector.load %arg11[%215, %c0_164, %c0_165, %c0_166] : memref<26x26x8x32xf32, #tpu.memory_space<vmem>>, vector<1x26x8x32xf32>
      %217 = vector.shape_cast %216 : vector<1x26x8x32xf32> to vector<26x8x32xf32>
      %218 = vector.extract_strided_slice %217 {offsets = [0, 0, 0], sizes = [24, 8, 32], strides = [1, 1, 1]} : vector<26x8x32xf32> to vector<24x8x32xf32>
      %219 = vector.shape_cast %218 : vector<24x8x32xf32> to vector<192x32xf32>
      %c6_167 = arith.constant 6 : index
      %c0_168 = arith.constant 0 : index
      %c0_169 = arith.constant 0 : index
      %220 = vector.load %arg4[%c6_167, %c0_168, %c0_169] : memref<9x32x64xf32, #tpu.memory_space<vmem>>, vector<1x32x64xf32>
      %221 = vector.shape_cast %220 : vector<1x32x64xf32> to vector<32x64xf32>
      %cst_170 = arith.constant dense<0.000000e+00> : vector<192x64xf32>
      %222 = tpu.matmul %219, %221, %cst_170 {dimension_numbers = #tpu.dot_dimension_numbers<[1], [0], [0], [1], [0, 0, 1, 1], [], []>} : vector<192x32xf32>, vector<32x64xf32>, vector<192x64xf32> -> vector<192x64xf32>
      %223 = arith.addf %211, %222 : vector<192x64xf32>
      %c2_i32_171 = arith.constant 2 : i32
      %224 = arith.muli %c2_i32_171, %arg12 : i32
      %c1_i32_172 = arith.constant 1 : i32
      %225 = arith.addi %224, %c1_i32_172 : i32
      %c2_i32_173 = arith.constant 2 : i32
      %226 = arith.addi %225, %c2_i32_173 : i32
      %227 = arith.index_cast %226 : i32 to index
      %c0_174 = arith.constant 0 : index
      %c0_175 = arith.constant 0 : index
      %c0_176 = arith.constant 0 : index
      %228 = vector.load %arg11[%227, %c0_174, %c0_175, %c0_176] : memref<26x26x8x32xf32, #tpu.memory_space<vmem>>, vector<1x26x8x32xf32>
      %229 = vector.shape_cast %228 : vector<1x26x8x32xf32> to vector<26x8x32xf32>
      %230 = vector.extract_strided_slice %229 {offsets = [1, 0, 0], sizes = [24, 8, 32], strides = [1, 1, 1]} : vector<26x8x32xf32> to vector<24x8x32xf32>
      %231 = vector.shape_cast %230 : vector<24x8x32xf32> to vector<192x32xf32>
      %c7_177 = arith.constant 7 : index
      %c0_178 = arith.constant 0 : index
      %c0_179 = arith.constant 0 : index
      %232 = vector.load %arg4[%c7_177, %c0_178, %c0_179] : memref<9x32x64xf32, #tpu.memory_space<vmem>>, vector<1x32x64xf32>
      %233 = vector.shape_cast %232 : vector<1x32x64xf32> to vector<32x64xf32>
      %cst_180 = arith.constant dense<0.000000e+00> : vector<192x64xf32>
      %234 = tpu.matmul %231, %233, %cst_180 {dimension_numbers = #tpu.dot_dimension_numbers<[1], [0], [0], [1], [0, 0, 1, 1], [], []>} : vector<192x32xf32>, vector<32x64xf32>, vector<192x64xf32> -> vector<192x64xf32>
      %235 = arith.addf %223, %234 : vector<192x64xf32>
      %c2_i32_181 = arith.constant 2 : i32
      %236 = arith.muli %c2_i32_181, %arg12 : i32
      %c1_i32_182 = arith.constant 1 : i32
      %237 = arith.addi %236, %c1_i32_182 : i32
      %c2_i32_183 = arith.constant 2 : i32
      %238 = arith.addi %237, %c2_i32_183 : i32
      %239 = arith.index_cast %238 : i32 to index
      %c0_184 = arith.constant 0 : index
      %c0_185 = arith.constant 0 : index
      %c0_186 = arith.constant 0 : index
      %240 = vector.load %arg11[%239, %c0_184, %c0_185, %c0_186] : memref<26x26x8x32xf32, #tpu.memory_space<vmem>>, vector<1x26x8x32xf32>
      %241 = vector.shape_cast %240 : vector<1x26x8x32xf32> to vector<26x8x32xf32>
      %242 = vector.extract_strided_slice %241 {offsets = [2, 0, 0], sizes = [24, 8, 32], strides = [1, 1, 1]} : vector<26x8x32xf32> to vector<24x8x32xf32>
      %243 = vector.shape_cast %242 : vector<24x8x32xf32> to vector<192x32xf32>
      %c8_187 = arith.constant 8 : index
      %c0_188 = arith.constant 0 : index
      %c0_189 = arith.constant 0 : index
      %244 = vector.load %arg4[%c8_187, %c0_188, %c0_189] : memref<9x32x64xf32, #tpu.memory_space<vmem>>, vector<1x32x64xf32>
      %245 = vector.shape_cast %244 : vector<1x32x64xf32> to vector<32x64xf32>
      %cst_190 = arith.constant dense<0.000000e+00> : vector<192x64xf32>
      %246 = tpu.matmul %243, %245, %cst_190 {dimension_numbers = #tpu.dot_dimension_numbers<[1], [0], [0], [1], [0, 0, 1, 1], [], []>} : vector<192x32xf32>, vector<32x64xf32>, vector<192x64xf32> -> vector<192x64xf32>
      %247 = arith.addf %235, %246 : vector<192x64xf32>
      %c0_191 = arith.constant 0 : index
      %c0_192 = arith.constant 0 : index
      %248 = vector.load %arg5[%c0_191, %c0_192] : memref<1x64xf32, #tpu.memory_space<vmem>>, vector<1x64xf32>
      %249 = vector.broadcast %248 : vector<1x64xf32> to vector<192x64xf32>
      %250 = arith.addf %247, %249 : vector<192x64xf32>
      %cst_193 = arith.constant 0.000000e+00 : f32
      %251 = vector.broadcast %cst_193 : f32 to vector<192x64xf32>
      %252 = arith.maximumf %250, %251 : vector<192x64xf32>
      %253 = arith.maximumf %138, %252 : vector<192x64xf32>
      %254 = vector.shape_cast %253 : vector<192x64xf32> to vector<12x2x8x64xf32>
      %255 = vector.extract_strided_slice %254 {offsets = [0, 0, 0, 0], sizes = [12, 1, 8, 64], strides = [1, 1, 1, 1]} : vector<12x2x8x64xf32> to vector<12x1x8x64xf32>
      %256 = vector.shape_cast %255 : vector<12x1x8x64xf32> to vector<12x8x64xf32>
      %257 = vector.extract_strided_slice %254 {offsets = [0, 1, 0, 0], sizes = [12, 1, 8, 64], strides = [1, 1, 1, 1]} : vector<12x2x8x64xf32> to vector<12x1x8x64xf32>
      %258 = vector.shape_cast %257 : vector<12x1x8x64xf32> to vector<12x8x64xf32>
      %259 = arith.maximumf %256, %258 : vector<12x8x64xf32>
      %260 = arith.index_cast %arg12 : i32 to index
      %c0_194 = arith.constant 0 : index
      %c0_195 = arith.constant 0 : index
      %c0_196 = arith.constant 0 : index
      %261 = vector.load %arg6[%260, %c0_194, %c0_195, %c0_196] : memref<12x12x64x128xf32, #tpu.memory_space<vmem>>, vector<1x12x64x128xf32>
      %262 = vector.shape_cast %261 : vector<1x12x64x128xf32> to vector<12x64x128xf32>
      "tpu.trace_start"() <{level = 10 : i32, message = "wtc,wcn->wtn"}> : () -> ()
      %cst_197 = arith.constant dense<0.000000e+00> : vector<12x8x128xf32>
      %263 = tpu.matmul %259, %262, %cst_197 {dimension_numbers = #tpu.dot_dimension_numbers<[2], [1], [1], [2], [0, 0, 0, 1, 1, 2], [0], [0]>} : vector<12x8x64xf32>, vector<12x64x128xf32>, vector<12x8x128xf32> -> vector<12x8x128xf32>
      "tpu.trace_stop"() : () -> ()
      %cst_198 = arith.constant dense<0.000000e+00> : vector<8x128xf32>
      %264 = vector.multi_reduction <add>, %263, %cst_198 [0] : vector<12x8x128xf32> to vector<8x128xf32>
      %265 = arith.addf %arg13, %264 : vector<8x128xf32>
      scf.yield %265 : vector<8x128xf32>
    }
    %c12_i32_3 = arith.constant 12 : i32
    %c0 = arith.constant 0 : index
    %c0_4 = arith.constant 0 : index
    %4 = vector.load %arg7[%c0, %c0_4] : memref<1x128xf32, #tpu.memory_space<vmem>>, vector<1x128xf32>
    %5 = vector.broadcast %4 : vector<1x128xf32> to vector<8x128xf32>
    %6 = arith.addf %3, %5 : vector<8x128xf32>
    %cst_5 = arith.constant 0.000000e+00 : f32
    %7 = vector.broadcast %cst_5 : f32 to vector<8x128xf32>
    %8 = arith.maximumf %6, %7 : vector<8x128xf32>
    %c0_6 = arith.constant 0 : index
    %c0_7 = arith.constant 0 : index
    %9 = vector.load %arg8[%c0_6, %c0_7] : memref<128x10xf32, #tpu.memory_space<vmem>>, vector<128x10xf32>
    %cst_8 = arith.constant dense<0.000000e+00> : vector<8x10xf32>
    %10 = tpu.matmul %8, %9, %cst_8 {dimension_numbers = #tpu.dot_dimension_numbers<[1], [0], [0], [1], [0, 0, 1, 1], [], []>} : vector<8x128xf32>, vector<128x10xf32>, vector<8x10xf32> -> vector<8x10xf32>
    %c0_9 = arith.constant 0 : index
    %c0_10 = arith.constant 0 : index
    %11 = vector.load %arg9[%c0_9, %c0_10] : memref<1x10xf32, #tpu.memory_space<vmem>>, vector<1x10xf32>
    %12 = vector.broadcast %11 : vector<1x10xf32> to vector<8x10xf32>
    %13 = arith.addf %10, %12 : vector<8x10xf32>
    %cst_11 = arith.constant dense<0xFF800000> : vector<8xf32>
    %14 = vector.multi_reduction <maximumf>, %13, %cst_11 [1] : vector<8x10xf32> to vector<8xf32>
    %15 = vector.shape_cast %14 : vector<8xf32> to vector<8x1xf32>
    %16 = vector.broadcast %15 : vector<8x1xf32> to vector<8x10xf32>
    %17 = arith.subf %13, %16 : vector<8x10xf32>
    %18 = math.exp %17 : vector<8x10xf32>
    %cst_12 = arith.constant dense<0.000000e+00> : vector<8xf32>
    %19 = vector.multi_reduction <add>, %18, %cst_12 [1] : vector<8x10xf32> to vector<8xf32>
    %20 = vector.shape_cast %19 : vector<8xf32> to vector<8x1xf32>
    %21 = math.log %20 : vector<8x1xf32>
    %22 = vector.broadcast %21 : vector<8x1xf32> to vector<8x10xf32>
    %23 = arith.subf %17, %22 : vector<8x10xf32>
    %c0_13 = arith.constant 0 : index
    %c0_14 = arith.constant 0 : index
    %24 = vector.load %arg10[%c0_13, %c0_14] : memref<8x10xf32, #tpu.memory_space<vmem>>, vector<8x10xf32>
    tpu.vector_store %arg10[%c0_13, %c0_14], %23 {strides = array<i32>} : memref<8x10xf32, #tpu.memory_space<vmem>>, vector<8x10xf32>,
    return
  }
  func.func @transform_0(%arg0: i32) -> (i32, i32, i32, i32) {
    %c0_i32 = arith.constant 0 : i32
    %c0_i32_0 = arith.constant 0 : i32
    %c0_i32_1 = arith.constant 0 : i32
    %c0_i32_2 = arith.constant 0 : i32
    return %c0_i32, %c0_i32_0, %arg0, %c0_i32_1 : i32, i32, i32, i32
  }
  func.func @transform_1(%arg0: i32) -> (i32, i32, i32) {
    %c0_i32 = arith.constant 0 : i32
    %c0_i32_0 = arith.constant 0 : i32
    %c0_i32_1 = arith.constant 0 : i32
    %c0_i32_2 = arith.constant 0 : i32
    return %c0_i32, %c0_i32_0, %c0_i32_1 : i32, i32, i32
  }
  func.func @transform_2(%arg0: i32) -> (i32, i32) {
    %c0_i32 = arith.constant 0 : i32
    %c0_i32_0 = arith.constant 0 : i32
    %c0_i32_1 = arith.constant 0 : i32
    return %c0_i32, %c0_i32_0 : i32, i32
  }
  func.func @transform_3(%arg0: i32) -> (i32, i32, i32) {
    %c0_i32 = arith.constant 0 : i32
    %c0_i32_0 = arith.constant 0 : i32
    %c0_i32_1 = arith.constant 0 : i32
    %c0_i32_2 = arith.constant 0 : i32
    return %c0_i32, %c0_i32_0, %c0_i32_1 : i32, i32, i32
  }
  func.func @transform_4(%arg0: i32) -> (i32, i32) {
    %c0_i32 = arith.constant 0 : i32
    %c0_i32_0 = arith.constant 0 : i32
    %c0_i32_1 = arith.constant 0 : i32
    return %c0_i32, %c0_i32_0 : i32, i32
  }
  func.func @transform_5(%arg0: i32) -> (i32, i32, i32, i32) {
    %c0_i32 = arith.constant 0 : i32
    %c0_i32_0 = arith.constant 0 : i32
    %c0_i32_1 = arith.constant 0 : i32
    %c0_i32_2 = arith.constant 0 : i32
    %c0_i32_3 = arith.constant 0 : i32
    return %c0_i32, %c0_i32_0, %c0_i32_1, %c0_i32_2 : i32, i32, i32, i32
  }
  func.func @transform_6(%arg0: i32) -> (i32, i32) {
    %c0_i32 = arith.constant 0 : i32
    %c0_i32_0 = arith.constant 0 : i32
    %c0_i32_1 = arith.constant 0 : i32
    return %c0_i32, %c0_i32_0 : i32, i32
  }
  func.func @transform_7(%arg0: i32) -> (i32, i32) {
    %c0_i32 = arith.constant 0 : i32
    %c0_i32_0 = arith.constant 0 : i32
    %c0_i32_1 = arith.constant 0 : i32
    return %c0_i32, %c0_i32_0 : i32, i32
  }
  func.func @transform_8(%arg0: i32) -> (i32, i32) {
    %c0_i32 = arith.constant 0 : i32
    %c0_i32_0 = arith.constant 0 : i32
    %c0_i32_1 = arith.constant 0 : i32
    return %c0_i32, %c0_i32_0 : i32, i32
  }
  func.func @transform_9(%arg0: i32) -> (i32, i32) {
    %c0_i32 = arith.constant 0 : i32
    %c0_i32_0 = arith.constant 0 : i32
    return %arg0, %c0_i32 : i32, i32
  }
}

</mosaic_0001>

<bundles_post_ra>
// kernel: net_forward.1
= control target key start
LH: loop header
LB: loop body
LE: loop exit
PB: predicated region body
PF: predicated region fallthrough
CT: control target
= control target key end

     0   :  { %14 = vsyncpa [#allocation5], 0  ;;  %s16648_s0 = inlined_call_operand.vmem [shape: f32[28,28,16,1], index: 0, kind: input, shape index: {}]   ;;  %s16649_s1 = inlined_call_operand.vmem [shape: f32[9,1,32], index: 1, kind: input, shape index: {}]   ;;  %s16650_s2 = inlined_call_operand.vmem [shape: f32[1,32], index: 2, kind: input, shape index: {}]   ;;  %s16651_s3 = inlined_call_operand.vmem [shape: f32[9,32,64], index: 3, kind: input, shape index: {}]   ;;  %s16652_s4 = inlined_call_operand.vmem [shape: f32[1,64], index: 4, kind: input, shape index: {}]   ;;  %s16653_s5 = inlined_call_operand.vmem [shape: f32[12,12,64,128], index: 5, kind: input, shape index: {}]   ;;  %s16654_s6 = inlined_call_operand.vmem [shape: f32[1,128], index: 6, kind: input, shape index: {}]   ;;  %s16655_s7 = inlined_call_operand.vmem [shape: f32[128,10], index: 7, kind: input, shape index: {}]   ;;  %s16656_s8 = inlined_call_operand.vmem [shape: f32[1,10], index: 8, kind: input, shape index: {}]   ;;  %s16657_s9 = inlined_call_operand.hbm [shape: f32[16,10], index: 9, kind: output, shape index: {}]  }
   0x1   :  { %16 = vsyncpa [#allocation5 + $0x1], 0  ;;  %s11832_s30 = smov 0   ;;  %s11834_s10 = smov 0  }
   0x2   :  { %s11836_s11 = smov 0   ;;  %s11838_s12 = smov 0  }
   0x3 LB: > { %s10914_s13 = sadd.s32 4294967295, %s11767_s12   ;;  %s10915_s14 = sadd.s32 4294967294, %s11767_s12   ;;  %s11767_s12 = sphi %s11838_s12, %s16954_s12   ;;  %s11763_s11 = sphi %s11836_s11, %s16953_s11   ;;  %s11759_s10 = sphi %s11834_s10, %s16952_s10   ;;  %s11755_s30 = sphi %s11832_s30, %s16951_s30  }
   0x4   : > { %s11855_s15 = sadd.s32 1, %s11767_s12   ;;  %s29_s16 = sadd.s32 1, %s11763_s11 }
   0x5   : > { %s26_s17 = ssub.s32 %s11767_s12, %s11855_s15  ;;  %p36_p0 = scmp.ne.s32.totalorder %s11763_s11, %s11759_s10 }
   0x6   : > { %p27_p1 = scmp.eq.s32.totalorder %s26_s17, 0  ;;  %p37_p2 = scmp.eq.s32.totalorder %s11767_s12, 0 }
   0x7   : > { %p234_p3 = scmp.eq.s32.totalorder %s10914_s13, 1  ;;  %p239_p4 = scmp.ne.s32.totalorder %s11759_s10, %s11755_s30 }
   0x8   : > { %s11868_s18 = scalar_select %p27_p1, %s11763_s11, %s29_s16  }
   0x9   : > { %p38_p5 = por %p37_p2, %p36_p0  ;;  %p11870_p6 = por %p234_p3, %p36_p0 }
   0xa   : > { %p240_p7 = scmp.eq.s32.totalorder %s10915_s14, 1  ;;  %p10917_p9 = scmp.ge.s32.totalorder %s11767_s12, 2 }
   0xc   : > { %p11874_p8 = por %p240_p7, %p239_p4  ;;  %280 = sbr.rel (%p10917_p9) target bundleno = 805 (0x325), region = 48 }
  0x11   : > { %283 = sbr.rel (!%p38_p5) target bundleno = 805 (0x325), region = 52  ;;  %s285_s21 = sand.u32 (%p38_p5), 1, %s11763_s11  }
  0x12   : > { %s10918_s22 = sshll.u32 (%p38_p5), %s11767_s12, 3  ;;  %s11559_s23 = smul.u32 (%p38_p5), 6272, %s285_s21 }
  0x13   : > { %s11886_s26 = scalar_lea.vmem (%p38_p5), %s16648_s0, %s10918_s22 }
  0x14   : > { %v1885_v0 = vld [vmem:[%s11886_s26] sm:$0xff] (%p38_p5)  ;;  %v1887_v1 = vld [vmem:[%s11886_s26 + $0x10] sm:$0xff] (%p38_p5)  ;;  %s11891_s27 = scalar_lea.vmem (%p38_p5), [#allocation3], %s11559_s23 }
  0x15   : > { %v1889_v2 = vld [vmem:[%s11886_s26 + $0x20] sm:$0xff] (%p38_p5)  ;;  %1886 = vst [vmem:[%s11891_s27] sm:$0xff] (%p38_p5), %v1885_v0  ;;  %v1891_v3 = vld [vmem:[%s11886_s26 + $0x30] sm:$0xff] (%p38_p5) }
  0x16   : > { %1888 = vst [vmem:[%s11891_s27 + $0x8] sm:$0xff] %v1887_v1  ;;  %v1893_v4 = vld [vmem:[%s11886_s26 + $0x40] sm:$0xff]  ;;  %v1895_v5 = vld [vmem:[%s11886_s26 + $0x50] sm:$0xff] }
  0x17   : > { %1890 = vst [vmem:[%s11891_s27 + $0x10] sm:$0xff] %v1889_v2  ;;  %v1897_v6 = vld [vmem:[%s11886_s26 + $0x60] sm:$0xff]  ;;  %v1899_v7 = vld [vmem:[%s11886_s26 + $0x70] sm:$0xff] }
  0x18   : > { %1892 = vst [vmem:[%s11891_s27 + $0x18] sm:$0xff] %v1891_v3  ;;  %v1901_v8 = vld [vmem:[%s11886_s26 + $0x80] sm:$0xff]  ;;  %v1903_v9 = vld [vmem:[%s11886_s26 + $0x90] sm:$0xff] }
  0x19   : > { %1894 = vst [vmem:[%s11891_s27 + $0x20] sm:$0xff] %v1893_v4  ;;  %v1905_v10 = vld [vmem:[%s11886_s26 + $0xa0] sm:$0xff]  ;;  %v1907_v11 = vld [vmem:[%s11886_s26 + $0xb0] sm:$0xff] }
  0x1a   : > { %1896 = vst [vmem:[%s11891_s27 + $0x28] sm:$0xff] %v1895_v5  ;;  %v1909_v12 = vld [vmem:[%s11886_s26 + $0xc0] sm:$0xff]  ;;  %v1911_v13 = vld [vmem:[%s11886_s26 + $0xd0] sm:$0xff] }
  0x1b   : > { %1898 = vst [vmem:[%s11891_s27 + $0x30] sm:$0xff] %v1897_v6  ;;  %v1913_v14 = vld [vmem:[%s11886_s26 + $0xe0] sm:$0xff]  ;;  %v1915_v15 = vld [vmem:[%s11886_s26 + $0xf0] sm:$0xff] }
  0x1c   : > { %1900 = vst [vmem:[%s11891_s27 + $0x38] sm:$0xff] %v1899_v7  ;;  %v1917_v16 = vld [vmem:[%s11886_s26 + $0x100] sm:$0xff]  ;;  %v1919_v17 = vld [vmem:[%s11886_s26 + $0x110] sm:$0xff] }
  0x1d   : > { %1902 = vst [vmem:[%s11891_s27 + $0x40] sm:$0xff] %v1901_v8  ;;  %v1921_v18 = vld [vmem:[%s11886_s26 + $0x120] sm:$0xff]  ;;  %v1923_v19 = vld [vmem:[%s11886_s26 + $0x130] sm:$0xff] }
  0x1e   : > { %1904 = vst [vmem:[%s11891_s27 + $0x48] sm:$0xff] %v1903_v9  ;;  %v1925_v20 = vld [vmem:[%s11886_s26 + $0x140] sm:$0xff]  ;;  %v1927_v21 = vld [vmem:[%s11886_s26 + $0x150] sm:$0xff] }
  0x1f   : > { %1906 = vst [vmem:[%s11891_s27 + $0x50] sm:$0xff] %v1905_v10  ;;  %v1929_v22 = vld [vmem:[%s11886_s26 + $0x160] sm:$0xff]  ;;  %v1931_v23 = vld [vmem:[%s11886_s26 + $0x170] sm:$0xff] }
  0x20   : > { %1908 = vst [vmem:[%s11891_s27 + $0x58] sm:$0xff] %v1907_v11  ;;  %v1933_v24 = vld [vmem:[%s11886_s26 + $0x180] sm:$0xff]  ;;  %v1935_v25 = vld [vmem:[%s11886_s26 + $0x190] sm:$0xff] }
  0x21   : > { %1910 = vst [vmem:[%s11891_s27 + $0x60] sm:$0xff] %v1909_v12  ;;  %v1937_v26 = vld [vmem:[%s11886_s26 + $0x1a0] sm:$0xff]  ;;  %v1939_v27 = vld [vmem:[%s11886_s26 + $0x1b0] sm:$0xff] }
  0x22   : > { %1912 = vst [vmem:[%s11891_s27 + $0x68] sm:$0xff] %v1911_v13  ;;  %v1941_v28 = vld [vmem:[%s11886_s26 + $0x1c0] sm:$0xff]  ;;  %v1943_v29 = vld [vmem:[%s11886_s26 + $0x1d0] sm:$0xff] }
  0x23   : > { %1914 = vst [vmem:[%s11891_s27 + $0x70] sm:$0xff] %v1913_v14  ;;  %v1945_v30 = vld [vmem:[%s11886_s26 + $0x1e0] sm:$0xff]  ;;  %v1947_v31 = vld [vmem:[%s11886_s26 + $0x1f0] sm:$0xff] }
  0x24   : > { %1916 = vst [vmem:[%s11891_s27 + $0x78] sm:$0xff] %v1915_v15  ;;  %v1949_v32 = vld [vmem:[%s11886_s26 + $0x200] sm:$0xff]  ;;  %v1951_v33 = vld [vmem:[%s11886_s26 + $0x210] sm:$0xff] }
  0x25   : > { %1918 = vst [vmem:[%s11891_s27 + $0x80] sm:$0xff] %v1917_v16  ;;  %v1953_v34 = vld [vmem:[%s11886_s26 + $0x220] sm:$0xff]  ;;  %v1955_v35 = vld [vmem:[%s11886_s26 + $0x230] sm:$0xff] }
  0x26   : > { %1920 = vst [vmem:[%s11891_s27 + $0x88] sm:$0xff] %v1919_v17  ;;  %v1957_v36 = vld [vmem:[%s11886_s26 + $0x240] sm:$0xff]  ;;  %v1959_v37 = vld [vmem:[%s11886_s26 + $0x250] sm:$0xff] }
  0x27   : > { %1922 = vst [vmem:[%s11891_s27 + $0x90] sm:$0xff] %v1921_v18  ;;  %v1961_v38 = vld [vmem:[%s11886_s26 + $0x260] sm:$0xff]  ;;  %v1963_v39 = vld [vmem:[%s11886_s26 + $0x270] sm:$0xff] }
  0x28   : > { %1924 = vst [vmem:[%s11891_s27 + $0x98] sm:$0xff] %v1923_v19  ;;  %v1965_v40 = vld [vmem:[%s11886_s26 + $0x280] sm:$0xff]  ;;  %v1967_v41 = vld [vmem:[%s11886_s26 + $0x290] sm:$0xff] }
  0x29   : > { %1926 = vst [vmem:[%s11891_s27 + $0xa0] sm:$0xff] %v1925_v20  ;;  %v1969_v42 = vld [vmem:[%s11886_s26 + $0x2a0] sm:$0xff]  ;;  %v1971_v43 = vld [vmem:[%s11886_s26 + $0x2b0] sm:$0xff] }
  0x2a   : > { %1928 = vst [vmem:[%s11891_s27 + $0xa8] sm:$0xff] %v1927_v21  ;;  %v1973_v44 = vld [vmem:[%s11886_s26 + $0x2c0] sm:$0xff]  ;;  %v1975_v45 = vld [vmem:[%s11886_s26 + $0x2d0] sm:$0xff] }
  0x2b   : > { %1930 = vst [vmem:[%s11891_s27 + $0xb0] sm:$0xff] %v1929_v22  ;;  %v1977_v46 = vld [vmem:[%s11886_s26 + $0x2e0] sm:$0xff]  ;;  %v1979_v47 = vld [vmem:[%s11886_s26 + $0x2f0] sm:$0xff] }
  0x2c   : > { %1932 = vst [vmem:[%s11891_s27 + $0xb8] sm:$0xff] %v1931_v23  ;;  %v1981_v48 = vld [vmem:[%s11886_s26 + $0x300] sm:$0xff]  ;;  %v1983_v49 = vld [vmem:[%s11886_s26 + $0x310] sm:$0xff] }
  0x2d   : > { %1934 = vst [vmem:[%s11891_s27 + $0xc0] sm:$0xff] %v1933_v24  ;;  %v1985_v50 = vld [vmem:[%s11886_s26 + $0x320] sm:$0xff]  ;;  %v1987_v51 = vld [vmem:[%s11886_s26 + $0x330] sm:$0xff] }
  0x2e   : > { %1936 = vst [vmem:[%s11891_s27 + $0xc8] sm:$0xff] %v1935_v25  ;;  %v1989_v52 = vld [vmem:[%s11886_s26 + $0x340] sm:$0xff]  ;;  %v1991_v53 = vld [vmem:[%s11886_s26 + $0x350] sm:$0xff] }
  0x2f   : > { %1938 = vst [vmem:[%s11891_s27 + $0xd0] sm:$0xff] %v1937_v26  ;;  %v1993_v54 = vld [vmem:[%s11886_s26 + $0x360] sm:$0xff]  ;;  %v1995_v55 = vld [vmem:[%s11886_s26 + $0x370] sm:$0xff] }
  0x30   : > { %1940 = vst [vmem:[%s11891_s27 + $0xd8] sm:$0xff] %v1939_v27  ;;  %v1997_v56 = vld [vmem:[%s11886_s26 + $0x380] sm:$0xff]  ;;  %v1999_v57 = vld [vmem:[%s11886_s26 + $0x390] sm:$0xff] }
  0x31   : > { %1942 = vst [vmem:[%s11891_s27 + $0xe0] sm:$0xff] %v1941_v28  ;;  %v2001_v58 = vld [vmem:[%s11886_s26 + $0x3a0] sm:$0xff]  ;;  %v2003_v59 = vld [vmem:[%s11886_s26 + $0x3b0] sm:$0xff] }
  0x32   : > { %1944 = vst [vmem:[%s11891_s27 + $0xe8] sm:$0xff] %v1943_v29  ;;  %v2005_v60 = vld [vmem:[%s11886_s26 + $0x3c0] sm:$0xff]  ;;  %v2007_v61 = vld [vmem:[%s11886_s26 + $0x3d0] sm:$0xff] }
  0x33   : > { %1946 = vst [vmem:[%s11891_s27 + $0xf0] sm:$0xff] %v1945_v30  ;;  %v2009_v62 = vld [vmem:[%s11886_s26 + $0x3e0] sm:$0xff]  ;;  %v2011_v63 = vld [vmem:[%s11886_s26 + $0x3f0] sm:$0xff] }
  0x34   : > { %1948 = vst [vmem:[%s11891_s27 + $0xf8] sm:$0xff] %v1947_v31  ;;  %v2013_v0 = vld [vmem:[%s11886_s26 + $0x400] sm:$0xff]  ;;  %v2015_v1 = vld [vmem:[%s11886_s26 + $0x410] sm:$0xff] }
  0x35   : > { %1950 = vst [vmem:[%s11891_s27 + $0x100] sm:$0xff] %v1949_v32  ;;  %v2017_v2 = vld [vmem:[%s11886_s26 + $0x420] sm:$0xff]  ;;  %v2019_v3 = vld [vmem:[%s11886_s26 + $0x430] sm:$0xff] }
  0x36   : > { %1952 = vst [vmem:[%s11891_s27 + $0x108] sm:$0xff] %v1951_v33  ;;  %v2021_v4 = vld [vmem:[%s11886_s26 + $0x440] sm:$0xff]  ;;  %v2023_v5 = vld [vmem:[%s11886_s26 + $0x450] sm:$0xff] }
  0x37   : > { %1954 = vst [vmem:[%s11891_s27 + $0x110] sm:$0xff] %v1953_v34  ;;  %v2025_v6 = vld [vmem:[%s11886_s26 + $0x460] sm:$0xff]  ;;  %v2027_v7 = vld [vmem:[%s11886_s26 + $0x470] sm:$0xff] }
  0x38   : > { %1956 = vst [vmem:[%s11891_s27 + $0x118] sm:$0xff] %v1955_v35  ;;  %v2029_v8 = vld [vmem:[%s11886_s26 + $0x480] sm:$0xff]  ;;  %v2031_v9 = vld [vmem:[%s11886_s26 + $0x490] sm:$0xff] }
  0x39   : > { %1958 = vst [vmem:[%s11891_s27 + $0x120] sm:$0xff] %v1957_v36  ;;  %v2033_v10 = vld [vmem:[%s11886_s26 + $0x4a0] sm:$0xff]  ;;  %v2035_v11 = vld [vmem:[%s11886_s26 + $0x4b0] sm:$0xff] }
  0x3a   : > { %1960 = vst [vmem:[%s11891_s27 + $0x128] sm:$0xff] %v1959_v37  ;;  %v2037_v12 = vld [vmem:[%s11886_s26 + $0x4c0] sm:$0xff]  ;;  %v2039_v13 = vld [vmem:[%s11886_s26 + $0x4d0] sm:$0xff] }
  0x3b   : > { %1962 = vst [vmem:[%s11891_s27 + $0x130] sm:$0xff] %v1961_v38  ;;  %v2041_v14 = vld [vmem:[%s11886_s26 + $0x4e0] sm:$0xff]  ;;  %v2043_v15 = vld [vmem:[%s11886_s26 + $0x4f0] sm:$0xff] }
  0x3c   : > { %1964 = vst [vmem:[%s11891_s27 + $0x138] sm:$0xff] %v1963_v39  ;;  %v2045_v16 = vld [vmem:[%s11886_s26 + $0x500] sm:$0xff]  ;;  %v2047_v17 = vld [vmem:[%s11886_s26 + $0x510] sm:$0xff] }
  0x3d   : > { %1966 = vst [vmem:[%s11891_s27 + $0x140] sm:$0xff] %v1965_v40  ;;  %v2049_v18 = vld [vmem:[%s11886_s26 + $0x520] sm:$0xff]  ;;  %v2051_v19 = vld [vmem:[%s11886_s26 + $0x530] sm:$0xff] }
  0x3e   : > { %1968 = vst [vmem:[%s11891_s27 + $0x148] sm:$0xff] %v1967_v41  ;;  %v2053_v20 = vld [vmem:[%s11886_s26 + $0x540] sm:$0xff]  ;;  %v2055_v21 = vld [vmem:[%s11886_s26 + $0x550] sm:$0xff] }
  0x3f   : > { %1970 = vst [vmem:[%s11891_s27 + $0x150] sm:$0xff] %v1969_v42  ;;  %v2057_v22 = vld [vmem:[%s11886_s26 + $0x560] sm:$0xff]  ;;  %v2059_v23 = vld [vmem:[%s11886_s26 + $0x570] sm:$0xff] }
  0x40   : > { %1972 = vst [vmem:[%s11891_s27 + $0x158] sm:$0xff] %v1971_v43  ;;  %v2061_v24 = vld [vmem:[%s11886_s26 + $0x580] sm:$0xff]  ;;  %v2063_v25 = vld [vmem:[%s11886_s26 + $0x590] sm:$0xff] }
  0x41   : > { %1974 = vst [vmem:[%s11891_s27 + $0x160] sm:$0xff] %v1973_v44  ;;  %v2065_v26 = vld [vmem:[%s11886_s26 + $0x5a0] sm:$0xff]  ;;  %v2067_v27 = vld [vmem:[%s11886_s26 + $0x5b0] sm:$0xff] }
  0x42   : > { %1976 = vst [vmem:[%s11891_s27 + $0x168] sm:$0xff] %v1975_v45  ;;  %v2069_v28 = vld [vmem:[%s11886_s26 + $0x5c0] sm:$0xff]  ;;  %v2071_v29 = vld [vmem:[%s11886_s26 + $0x5d0] sm:$0xff] }
  0x43   : > { %1978 = vst [vmem:[%s11891_s27 + $0x170] sm:$0xff] %v1977_v46  ;;  %v2073_v30 = vld [vmem:[%s11886_s26 + $0x5e0] sm:$0xff]  ;;  %v2075_v31 = vld [vmem:[%s11886_s26 + $0x5f0] sm:$0xff] }
  0x44   : > { %1980 = vst [vmem:[%s11891_s27 + $0x178] sm:$0xff] %v1979_v47  ;;  %v2077_v32 = vld [vmem:[%s11886_s26 + $0x600] sm:$0xff]  ;;  %v2079_v33 = vld [vmem:[%s11886_s26 + $0x610] sm:$0xff] }
  0x45   : > { %1982 = vst [vmem:[%s11891_s27 + $0x180] sm:$0xff] %v1981_v48  ;;  %v2081_v34 = vld [vmem:[%s11886_s26 + $0x620] sm:$0xff]  ;;  %v2083_v35 = vld [vmem:[%s11886_s26 + $0x630] sm:$0xff] }
  0x46   : > { %1984 = vst [vmem:[%s11891_s27 + $0x188] sm:$0xff] %v1983_v49  ;;  %v2085_v36 = vld [vmem:[%s11886_s26 + $0x640] sm:$0xff]  ;;  %v2087_v37 = vld [vmem:[%s11886_s26 + $0x650] sm:$0xff] }
  0x47   : > { %1986 = vst [vmem:[%s11891_s27 + $0x190] sm:$0xff] %v1985_v50  ;;  %v2089_v38 = vld [vmem:[%s11886_s26 + $0x660] sm:$0xff]  ;;  %v2091_v39 = vld [vmem:[%s11886_s26 + $0x670] sm:$0xff] }
  0x48   : > { %1988 = vst [vmem:[%s11891_s27 + $0x198] sm:$0xff] %v1987_v51  ;;  %v2093_v40 = vld [vmem:[%s11886_s26 + $0x680] sm:$0xff]  ;;  %v2095_v41 = vld [vmem:[%s11886_s26 + $0x690] sm:$0xff] }
  0x49   : > { %1990 = vst [vmem:[%s11891_s27 + $0x1a0] sm:$0xff] %v1989_v52  ;;  %v2097_v42 = vld [vmem:[%s11886_s26 + $0x6a0] sm:$0xff]  ;;  %v2099_v43 = vld [vmem:[%s11886_s26 + $0x6b0] sm:$0xff] }
  0x4a   : > { %1992 = vst [vmem:[%s11891_s27 + $0x1a8] sm:$0xff] %v1991_v53  ;;  %v2101_v44 = vld [vmem:[%s11886_s26 + $0x6c0] sm:$0xff]  ;;  %v2103_v45 = vld [vmem:[%s11886_s26 + $0x6d0] sm:$0xff] }
  0x4b   : > { %1994 = vst [vmem:[%s11891_s27 + $0x1b0] sm:$0xff] %v1993_v54  ;;  %v2105_v46 = vld [vmem:[%s11886_s26 + $0x6e0] sm:$0xff]  ;;  %v2107_v47 = vld [vmem:[%s11886_s26 + $0x6f0] sm:$0xff] }
  0x4c   : > { %1996 = vst [vmem:[%s11891_s27 + $0x1b8] sm:$0xff] %v1995_v55  ;;  %v2109_v48 = vld [vmem:[%s11886_s26 + $0x700] sm:$0xff]  ;;  %v2111_v49 = vld [vmem:[%s11886_s26 + $0x710] sm:$0xff] }
  0x4d   : > { %1998 = vst [vmem:[%s11891_s27 + $0x1c0] sm:$0xff] %v1997_v56  ;;  %v2113_v50 = vld [vmem:[%s11886_s26 + $0x720] sm:$0xff]  ;;  %v2115_v51 = vld [vmem:[%s11886_s26 + $0x730] sm:$0xff] }
  0x4e   : > { %2000 = vst [vmem:[%s11891_s27 + $0x1c8] sm:$0xff] %v1999_v57  ;;  %v2117_v52 = vld [vmem:[%s11886_s26 + $0x740] sm:$0xff]  ;;  %v2119_v53 = vld [vmem:[%s11886_s26 + $0x750] sm:$0xff] }
  0x4f   : > { %2002 = vst [vmem:[%s11891_s27 + $0x1d0] sm:$0xff] %v2001_v58  ;;  %v2121_v54 = vld [vmem:[%s11886_s26 + $0x760] sm:$0xff]  ;;  %v2123_v55 = vld [vmem:[%s11886_s26 + $0x770] sm:$0xff] }
  0x50   : > { %2004 = vst [vmem:[%s11891_s27 + $0x1d8] sm:$0xff] %v2003_v59  ;;  %v2125_v56 = vld [vmem:[%s11886_s26 + $0x780] sm:$0xff]  ;;  %v2127_v57 = vld [vmem:[%s11886_s26 + $0x790] sm:$0xff] }
  0x51   : > { %2006 = vst [vmem:[%s11891_s27 + $0x1e0] sm:$0xff] %v2005_v60  ;;  %v2129_v58 = vld [vmem:[%s11886_s26 + $0x7a0] sm:$0xff]  ;;  %v2131_v59 = vld [vmem:[%s11886_s26 + $0x7b0] sm:$0xff] }
  0x52   : > { %2008 = vst [vmem:[%s11891_s27 + $0x1e8] sm:$0xff] %v2007_v61  ;;  %v2133_v60 = vld [vmem:[%s11886_s26 + $0x7c0] sm:$0xff]  ;;  %v2135_v61 = vld [vmem:[%s11886_s26 + $0x7d0] sm:$0xff] }
  0x53   : > { %2010 = vst [vmem:[%s11891_s27 + $0x1f0] sm:$0xff] %v2009_v62  ;;  %v2137_v62 = vld [vmem:[%s11886_s26 + $0x7e0] sm:$0xff] }
  0x54   : > { %2012 = vst [vmem:[%s11891_s27 + $0x1f8] sm:$0xff] %v2011_v63  ;;  %v2139_v63 = vld [vmem:[%s11886_s26 + $0x7f0] sm:$0xff] }
  0x55   : > { %2014 = vst [vmem:[%s11891_s27 + $0x200] sm:$0xff] %v2013_v0  ;;  %v2141_v0 = vld [vmem:[%s11886_s26 + $0x800] sm:$0xff] }
  0x56   : > { %2016 = vst [vmem:[%s11891_s27 + $0x208] sm:$0xff] %v2015_v1  ;;  %v2143_v1 = vld [vmem:[%s11886_s26 + $0x810] sm:$0xff] }
  0x57   : > { %2018 = vst [vmem:[%s11891_s27 + $0x210] sm:$0xff] %v2017_v2  ;;  %v2145_v2 = vld [vmem:[%s11886_s26 + $0x820] sm:$0xff] }
  0x58   : > { %2020 = vst [vmem:[%s11891_s27 + $0x218] sm:$0xff] %v2019_v3  ;;  %v2147_v3 = vld [vmem:[%s11886_s26 + $0x830] sm:$0xff] }
  0x59   : > { %2022 = vst [vmem:[%s11891_s27 + $0x220] sm:$0xff] %v2021_v4  ;;  %v2149_v4 = vld [vmem:[%s11886_s26 + $0x840] sm:$0xff] }
  0x5a   : > { %2024 = vst [vmem:[%s11891_s27 + $0x228] sm:$0xff] %v2023_v5  ;;  %v2151_v5 = vld [vmem:[%s11886_s26 + $0x850] sm:$0xff] }
  0x5b   : > { %2026 = vst [vmem:[%s11891_s27 + $0x230] sm:$0xff] %v2025_v6  ;;  %v2153_v6 = vld [vmem:[%s11886_s26 + $0x860] sm:$0xff] }
  0x5c   : > { %2028 = vst [vmem:[%s11891_s27 + $0x238] sm:$0xff] %v2027_v7  ;;  %v2155_v7 = vld [vmem:[%s11886_s26 + $0x870] sm:$0xff] }
  0x5d   : > { %2030 = vst [vmem:[%s11891_s27 + $0x240] sm:$0xff] %v2029_v8  ;;  %v2157_v8 = vld [vmem:[%s11886_s26 + $0x880] sm:$0xff] }
  0x5e   : > { %2032 = vst [vmem:[%s11891_s27 + $0x248] sm:$0xff] %v2031_v9  ;;  %v2159_v9 = vld [vmem:[%s11886_s26 + $0x890] sm:$0xff] }
  0x5f   : > { %2034 = vst [vmem:[%s11891_s27 + $0x250] sm:$0xff] %v2033_v10  ;;  %v2161_v10 = vld [vmem:[%s11886_s26 + $0x8a0] sm:$0xff] }
  0x60   : > { %2036 = vst [vmem:[%s11891_s27 + $0x258] sm:$0xff] %v2035_v11  ;;  %v2163_v11 = vld [vmem:[%s11886_s26 + $0x8b0] sm:$0xff] }
  0x61   : > { %2038 = vst [vmem:[%s11891_s27 + $0x260] sm:$0xff] %v2037_v12  ;;  %v2165_v12 = vld [vmem:[%s11886_s26 + $0x8c0] sm:$0xff] }
  0x62   : > { %2040 = vst [vmem:[%s11891_s27 + $0x268] sm:$0xff] %v2039_v13  ;;  %v2167_v13 = vld [vmem:[%s11886_s26 + $0x8d0] sm:$0xff] }
  0x63   : > { %2042 = vst [vmem:[%s11891_s27 + $0x270] sm:$0xff] %v2041_v14  ;;  %v2169_v14 = vld [vmem:[%s11886_s26 + $0x8e0] sm:$0xff] }
  0x64   : > { %2044 = vst [vmem:[%s11891_s27 + $0x278] sm:$0xff] %v2043_v15  ;;  %v2171_v15 = vld [vmem:[%s11886_s26 + $0x8f0] sm:$0xff] }
  0x65   : > { %2046 = vst [vmem:[%s11891_s27 + $0x280] sm:$0xff] %v2045_v16  ;;  %v2173_v16 = vld [vmem:[%s11886_s26 + $0x900] sm:$0xff] }
  0x66   : > { %2048 = vst [vmem:[%s11891_s27 + $0x288] sm:$0xff] %v2047_v17  ;;  %v2175_v17 = vld [vmem:[%s11886_s26 + $0x910] sm:$0xff] }
  0x67   : > { %2050 = vst [vmem:[%s11891_s27 + $0x290] sm:$0xff] %v2049_v18  ;;  %v2177_v18 = vld [vmem:[%s11886_s26 + $0x920] sm:$0xff] }
  0x68   : > { %2052 = vst [vmem:[%s11891_s27 + $0x298] sm:$0xff] %v2051_v19  ;;  %v2179_v19 = vld [vmem:[%s11886_s26 + $0x930] sm:$0xff] }
  0x69   : > { %2054 = vst [vmem:[%s11891_s27 + $0x2a0] sm:$0xff] %v2053_v20  ;;  %v2181_v20 = vld [vmem:[%s11886_s26 + $0x940] sm:$0xff] }
  0x6a   : > { %2056 = vst [vmem:[%s11891_s27 + $0x2a8] sm:$0xff] %v2055_v21  ;;  %v2183_v21 = vld [vmem:[%s11886_s26 + $0x950] sm:$0xff] }
  0x6b   : > { %2058 = vst [vmem:[%s11891_s27 + $0x2b0] sm:$0xff] %v2057_v22  ;;  %v2185_v22 = vld [vmem:[%s11886_s26 + $0x960] sm:$0xff] }
  0x6c   : > { %2060 = vst [vmem:[%s11891_s27 + $0x2b8] sm:$0xff] %v2059_v23  ;;  %v2187_v23 = vld [vmem:[%s11886_s26 + $0x970] sm:$0xff] }
  0x6d   : > { %2062 = vst [vmem:[%s11891_s27 + $0x2c0] sm:$0xff] %v2061_v24  ;;  %v2189_v24 = vld [vmem:[%s11886_s26 + $0x980] sm:$0xff] }
  0x6e   : > { %2064 = vst [vmem:[%s11891_s27 + $0x2c8] sm:$0xff] %v2063_v25  ;;  %v2191_v25 = vld [vmem:[%s11886_s26 + $0x990] sm:$0xff] }
  0x6f   : > { %2066 = vst [vmem:[%s11891_s27 + $0x2d0] sm:$0xff] %v2065_v26  ;;  %v2193_v26 = vld [vmem:[%s11886_s26 + $0x9a0] sm:$0xff] }
  0x70   : > { %2068 = vst [vmem:[%s11891_s27 + $0x2d8] sm:$0xff] %v2067_v27  ;;  %v2195_v27 = vld [vmem:[%s11886_s26 + $0x9b0] sm:$0xff] }
  0x71   : > { %2070 = vst [vmem:[%s11891_s27 + $0x2e0] sm:$0xff] %v2069_v28  ;;  %v2197_v28 = vld [vmem:[%s11886_s26 + $0x9c0] sm:$0xff] }
  0x72   : > { %2072 = vst [vmem:[%s11891_s27 + $0x2e8] sm:$0xff] %v2071_v29  ;;  %v2199_v29 = vld [vmem:[%s11886_s26 + $0x9d0] sm:$0xff] }
  0x73   : > { %2074 = vst [vmem:[%s11891_s27 + $0x2f0] sm:$0xff] %v2073_v30  ;;  %v2201_v30 = vld [vmem:[%s11886_s26 + $0x9e0] sm:$0xff] }
  0x74   : > { %2076 = vst [vmem:[%s11891_s27 + $0x2f8] sm:$0xff] %v2075_v31  ;;  %v2203_v31 = vld [vmem:[%s11886_s26 + $0x9f0] sm:$0xff] }
  0x75   : > { %2078 = vst [vmem:[%s11891_s27 + $0x300] sm:$0xff] %v2077_v32  ;;  %v2205_v32 = vld [vmem:[%s11886_s26 + $0xa00] sm:$0xff] }
  0x76   : > { %2080 = vst [vmem:[%s11891_s27 + $0x308] sm:$0xff] %v2079_v33  ;;  %v2207_v33 = vld [vmem:[%s11886_s26 + $0xa10] sm:$0xff] }
  0x77   : > { %2082 = vst [vmem:[%s11891_s27 + $0x310] sm:$0xff] %v2081_v34  ;;  %v2209_v34 = vld [vmem:[%s11886_s26 + $0xa20] sm:$0xff] }
  0x78   : > { %2084 = vst [vmem:[%s11891_s27 + $0x318] sm:$0xff] %v2083_v35  ;;  %v2211_v35 = vld [vmem:[%s11886_s26 + $0xa30] sm:$0xff] }
  0x79   : > { %2086 = vst [vmem:[%s11891_s27 + $0x320] sm:$0xff] %v2085_v36  ;;  %v2213_v36 = vld [vmem:[%s11886_s26 + $0xa40] sm:$0xff] }
  0x7a   : > { %2088 = vst [vmem:[%s11891_s27 + $0x328] sm:$0xff] %v2087_v37  ;;  %v2215_v37 = vld [vmem:[%s11886_s26 + $0xa50] sm:$0xff] }
  0x7b   : > { %2090 = vst [vmem:[%s11891_s27 + $0x330] sm:$0xff] %v2089_v38  ;;  %v2217_v38 = vld [vmem:[%s11886_s26 + $0xa60] sm:$0xff] }
  0x7c   : > { %2092 = vst [vmem:[%s11891_s27 + $0x338] sm:$0xff] %v2091_v39  ;;  %v2219_v39 = vld [vmem:[%s11886_s26 + $0xa70] sm:$0xff] }
  0x7d   : > { %2094 = vst [vmem:[%s11891_s27 + $0x340] sm:$0xff] %v2093_v40  ;;  %v2221_v40 = vld [vmem:[%s11886_s26 + $0xa80] sm:$0xff] }
  0x7e   : > { %2096 = vst [vmem:[%s11891_s27 + $0x348] sm:$0xff] %v2095_v41  ;;  %v2223_v41 = vld [vmem:[%s11886_s26 + $0xa90] sm:$0xff] }
  0x7f   : > { %2098 = vst [vmem:[%s11891_s27 + $0x350] sm:$0xff] %v2097_v42  ;;  %v2225_v42 = vld [vmem:[%s11886_s26 + $0xaa0] sm:$0xff] }
  0x80   : > { %2100 = vst [vmem:[%s11891_s27 + $0x358] sm:$0xff] %v2099_v43  ;;  %v2227_v43 = vld [vmem:[%s11886_s26 + $0xab0] sm:$0xff] }
  0x81   : > { %2102 = vst [vmem:[%s11891_s27 + $0x360] sm:$0xff] %v2101_v44  ;;  %v2229_v44 = vld [vmem:[%s11886_s26 + $0xac0] sm:$0xff] }
  0x82   : > { %2104 = vst [vmem:[%s11891_s27 + $0x368] sm:$0xff] %v2103_v45  ;;  %v2231_v45 = vld [vmem:[%s11886_s26 + $0xad0] sm:$0xff] }
  0x83   : > { %2106 = vst [vmem:[%s11891_s27 + $0x370] sm:$0xff] %v2105_v46  ;;  %v2233_v46 = vld [vmem:[%s11886_s26 + $0xae0] sm:$0xff] }
  0x84   : > { %2108 = vst [vmem:[%s11891_s27 + $0x378] sm:$0xff] %v2107_v47  ;;  %v2235_v47 = vld [vmem:[%s11886_s26 + $0xaf0] sm:$0xff] }
  0x85   : > { %2110 = vst [vmem:[%s11891_s27 + $0x380] sm:$0xff] %v2109_v48  ;;  %v2237_v48 = vld [vmem:[%s11886_s26 + $0xb00] sm:$0xff] }
  0x86   : > { %2112 = vst [vmem:[%s11891_s27 + $0x388] sm:$0xff] %v2111_v49  ;;  %v2239_v49 = vld [vmem:[%s11886_s26 + $0xb10] sm:$0xff] }
  0x87   : > { %2114 = vst [vmem:[%s11891_s27 + $0x390] sm:$0xff] %v2113_v50  ;;  %v2241_v50 = vld [vmem:[%s11886_s26 + $0xb20] sm:$0xff] }
  0x88   : > { %2116 = vst [vmem:[%s11891_s27 + $0x398] sm:$0xff] %v2115_v51  ;;  %v2243_v51 = vld [vmem:[%s11886_s26 + $0xb30] sm:$0xff] }
  0x89   : > { %2118 = vst [vmem:[%s11891_s27 + $0x3a0] sm:$0xff] %v2117_v52  ;;  %v2245_v52 = vld [vmem:[%s11886_s26 + $0xb40] sm:$0xff] }
  0x8a   : > { %2120 = vst [vmem:[%s11891_s27 + $0x3a8] sm:$0xff] %v2119_v53  ;;  %v2247_v53 = vld [vmem:[%s11886_s26 + $0xb50] sm:$0xff] }
  0x8b   : > { %2122 = vst [vmem:[%s11891_s27 + $0x3b0] sm:$0xff] %v2121_v54  ;;  %v2249_v54 = vld [vmem:[%s11886_s26 + $0xb60] sm:$0xff] }
  0x8c   : > { %2124 = vst [vmem:[%s11891_s27 + $0x3b8] sm:$0xff] %v2123_v55  ;;  %v2251_v55 = vld [vmem:[%s11886_s26 + $0xb70] sm:$0xff] }
  0x8d   : > { %2126 = vst [vmem:[%s11891_s27 + $0x3c0] sm:$0xff] %v2125_v56  ;;  %v2253_v56 = vld [vmem:[%s11886_s26 + $0xb80] sm:$0xff] }
  0x8e   : > { %2128 = vst [vmem:[%s11891_s27 + $0x3c8] sm:$0xff] %v2127_v57  ;;  %v2255_v57 = vld [vmem:[%s11886_s26 + $0xb90] sm:$0xff] }
  0x8f   : > { %2130 = vst [vmem:[%s11891_s27 + $0x3d0] sm:$0xff] %v2129_v58  ;;  %v2257_v58 = vld [vmem:[%s11886_s26 + $0xba0] sm:$0xff] }
  0x90   : > { %2132 = vst [vmem:[%s11891_s27 + $0x3d8] sm:$0xff] %v2131_v59  ;;  %v2259_v59 = vld [vmem:[%s11886_s26 + $0xbb0] sm:$0xff] }
  0x91   : > { %2134 = vst [vmem:[%s11891_s27 + $0x3e0] sm:$0xff] %v2133_v60  ;;  %v2261_v60 = vld [vmem:[%s11886_s26 + $0xbc0] sm:$0xff] }
  0x92   : > { %2136 = vst [vmem:[%s11891_s27 + $0x3e8] sm:$0xff] %v2135_v61  ;;  %v2263_v61 = vld [vmem:[%s11886_s26 + $0xbd0] sm:$0xff] }
  0x93   : > { %2138 = vst [vmem:[%s11891_s27 + $0x3f0] sm:$0xff] %v2137_v62  ;;  %v2265_v62 = vld [vmem:[%s11886_s26 + $0xbe0] sm:$0xff] }
  0x94   : > { %2140 = vst [vmem:[%s11891_s27 + $0x3f8] sm:$0xff] %v2139_v63  ;;  %v2267_v63 = vld [vmem:[%s11886_s26 + $0xbf0] sm:$0xff] }
  0x95   : > { %2142 = vst [vmem:[%s11891_s27 + $0x400] sm:$0xff] %v2141_v0  ;;  %v2269_v0 = vld [vmem:[%s11886_s26 + $0xc00] sm:$0xff] }
  0x96   : > { %2144 = vst [vmem:[%s11891_s27 + $0x408] sm:$0xff] %v2143_v1  ;;  %v2271_v1 = vld [vmem:[%s11886_s26 + $0xc10] sm:$0xff] }
  0x97   : > { %2146 = vst [vmem:[%s11891_s27 + $0x410] sm:$0xff] %v2145_v2  ;;  %v2273_v2 = vld [vmem:[%s11886_s26 + $0xc20] sm:$0xff] }
  0x98   : > { %2148 = vst [vmem:[%s11891_s27 + $0x418] sm:$0xff] %v2147_v3  ;;  %v2275_v3 = vld [vmem:[%s11886_s26 + $0xc30] sm:$0xff] }
  0x99   : > { %2150 = vst [vmem:[%s11891_s27 + $0x420] sm:$0xff] %v2149_v4  ;;  %v2277_v4 = vld [vmem:[%s11886_s26 + $0xc40] sm:$0xff] }
  0x9a   : > { %2152 = vst [vmem:[%s11891_s27 + $0x428] sm:$0xff] %v2151_v5  ;;  %v2279_v5 = vld [vmem:[%s11886_s26 + $0xc50] sm:$0xff] }
  0x9b   : > { %2154 = vst [vmem:[%s11891_s27 + $0x430] sm:$0xff] %v2153_v6  ;;  %v2281_v6 = vld [vmem:[%s11886_s26 + $0xc60] sm:$0xff] }
  0x9c   : > { %2156 = vst [vmem:[%s11891_s27 + $0x438] sm:$0xff] %v2155_v7  ;;  %v2283_v7 = vld [vmem:[%s11886_s26 + $0xc70] sm:$0xff] }
  0x9d   : > { %2158 = vst [vmem:[%s11891_s27 + $0x440] sm:$0xff] %v2157_v8  ;;  %v2285_v8 = vld [vmem:[%s11886_s26 + $0xc80] sm:$0xff] }
  0x9e   : > { %2160 = vst [vmem:[%s11891_s27 + $0x448] sm:$0xff] %v2159_v9  ;;  %v2287_v9 = vld [vmem:[%s11886_s26 + $0xc90] sm:$0xff] }
  0x9f   : > { %2162 = vst [vmem:[%s11891_s27 + $0x450] sm:$0xff] %v2161_v10  ;;  %v2289_v10 = vld [vmem:[%s11886_s26 + $0xca0] sm:$0xff] }
  0xa0   : > { %2164 = vst [vmem:[%s11891_s27 + $0x458] sm:$0xff] %v2163_v11  ;;  %v2291_v11 = vld [vmem:[%s11886_s26 + $0xcb0] sm:$0xff] }
  0xa1   : > { %2166 = vst [vmem:[%s11891_s27 + $0x460] sm:$0xff] %v2165_v12  ;;  %v2293_v12 = vld [vmem:[%s11886_s26 + $0xcc0] sm:$0xff] }
  0xa2   : > { %2168 = vst [vmem:[%s11891_s27 + $0x468] sm:$0xff] %v2167_v13  ;;  %v2295_v13 = vld [vmem:[%s11886_s26 + $0xcd0] sm:$0xff] }
  0xa3   : > { %2170 = vst [vmem:[%s11891_s27 + $0x470] sm:$0xff] %v2169_v14  ;;  %v2297_v14 = vld [vmem:[%s11886_s26 + $0xce0] sm:$0xff] }
  0xa4   : > { %2172 = vst [vmem:[%s11891_s27 + $0x478] sm:$0xff] %v2171_v15  ;;  %v2299_v15 = vld [vmem:[%s11886_s26 + $0xcf0] sm:$0xff] }
  0xa5   : > { %2174 = vst [vmem:[%s11891_s27 + $0x480] sm:$0xff] %v2173_v16  ;;  %v2301_v16 = vld [vmem:[%s11886_s26 + $0xd00] sm:$0xff] }
  0xa6   : > { %2176 = vst [vmem:[%s11891_s27 + $0x488] sm:$0xff] %v2175_v17  ;;  %v2303_v17 = vld [vmem:[%s11886_s26 + $0xd10] sm:$0xff] }
  0xa7   : > { %2178 = vst [vmem:[%s11891_s27 + $0x490] sm:$0xff] %v2177_v18  ;;  %v2305_v18 = vld [vmem:[%s11886_s26 + $0xd20] sm:$0xff] }
  0xa8   : > { %2180 = vst [vmem:[%s11891_s27 + $0x498] sm:$0xff] %v2179_v19  ;;  %v2307_v19 = vld [vmem:[%s11886_s26 + $0xd30] sm:$0xff] }
  0xa9   : > { %2182 = vst [vmem:[%s11891_s27 + $0x4a0] sm:$0xff] %v2181_v20  ;;  %v2309_v20 = vld [vmem:[%s11886_s26 + $0xd40] sm:$0xff] }
  0xaa   : > { %2184 = vst [vmem:[%s11891_s27 + $0x4a8] sm:$0xff] %v2183_v21  ;;  %v2311_v21 = vld [vmem:[%s11886_s26 + $0xd50] sm:$0xff] }
  0xab   : > { %2186 = vst [vmem:[%s11891_s27 + $0x4b0] sm:$0xff] %v2185_v22  ;;  %v2313_v22 = vld [vmem:[%s11886_s26 + $0xd60] sm:$0xff] }
  0xac   : > { %2188 = vst [vmem:[%s11891_s27 + $0x4b8] sm:$0xff] %v2187_v23  ;;  %v2315_v23 = vld [vmem:[%s11886_s26 + $0xd70] sm:$0xff] }
  0xad   : > { %2190 = vst [vmem:[%s11891_s27 + $0x4c0] sm:$0xff] %v2189_v24  ;;  %v2317_v24 = vld [vmem:[%s11886_s26 + $0xd80] sm:$0xff] }
  0xae   : > { %2192 = vst [vmem:[%s11891_s27 + $0x4c8] sm:$0xff] %v2191_v25  ;;  %v2319_v25 = vld [vmem:[%s11886_s26 + $0xd90] sm:$0xff] }
  0xaf   : > { %2194 = vst [vmem:[%s11891_s27 + $0x4d0] sm:$0xff] %v2193_v26  ;;  %v2321_v26 = vld [vmem:[%s11886_s26 + $0xda0] sm:$0xff] }
  0xb0   : > { %2196 = vst [vmem:[%s11891_s27 + $0x4d8] sm:$0xff] %v2195_v27  ;;  %v2323_v27 = vld [vmem:[%s11886_s26 + $0xdb0] sm:$0xff] }
  0xb1   : > { %2198 = vst [vmem:[%s11891_s27 + $0x4e0] sm:$0xff] %v2197_v28  ;;  %v2325_v28 = vld [vmem:[%s11886_s26 + $0xdc0] sm:$0xff] }
  0xb2   : > { %2200 = vst [vmem:[%s11891_s27 + $0x4e8] sm:$0xff] %v2199_v29  ;;  %v2327_v29 = vld [vmem:[%s11886_s26 + $0xdd0] sm:$0xff] }
  0xb3   : > { %2202 = vst [vmem:[%s11891_s27 + $0x4f0] sm:$0xff] %v2201_v30  ;;  %v2329_v30 = vld [vmem:[%s11886_s26 + $0xde0] sm:$0xff] }
  0xb4   : > { %2204 = vst [vmem:[%s11891_s27 + $0x4f8] sm:$0xff] %v2203_v31  ;;  %v2331_v31 = vld [vmem:[%s11886_s26 + $0xdf0] sm:$0xff] }
  0xb5   : > { %2206 = vst [vmem:[%s11891_s27 + $0x500] sm:$0xff] %v2205_v32  ;;  %v2333_v32 = vld [vmem:[%s11886_s26 + $0xe00] sm:$0xff] }
  0xb6   : > { %2208 = vst [vmem:[%s11891_s27 + $0x508] sm:$0xff] %v2207_v33  ;;  %v2335_v33 = vld [vmem:[%s11886_s26 + $0xe10] sm:$0xff] }
  0xb7   : > { %2210 = vst [vmem:[%s11891_s27 + $0x510] sm:$0xff] %v2209_v34  ;;  %v2337_v34 = vld [vmem:[%s11886_s26 + $0xe20] sm:$0xff] }
  0xb8   : > { %2212 = vst [vmem:[%s11891_s27 + $0x518] sm:$0xff] %v2211_v35  ;;  %v2339_v35 = vld [vmem:[%s11886_s26 + $0xe30] sm:$0xff] }
  0xb9   : > { %2214 = vst [vmem:[%s11891_s27 + $0x520] sm:$0xff] %v2213_v36  ;;  %v2341_v36 = vld [vmem:[%s11886_s26 + $0xe40] sm:$0xff] }
  0xba   : > { %2216 = vst [vmem:[%s11891_s27 + $0x528] sm:$0xff] %v2215_v37  ;;  %v2343_v37 = vld [vmem:[%s11886_s26 + $0xe50] sm:$0xff] }
  0xbb   : > { %2218 = vst [vmem:[%s11891_s27 + $0x530] sm:$0xff] %v2217_v38  ;;  %v2345_v38 = vld [vmem:[%s11886_s26 + $0xe60] sm:$0xff] }
  0xbc   : > { %2220 = vst [vmem:[%s11891_s27 + $0x538] sm:$0xff] %v2219_v39  ;;  %v2347_v39 = vld [vmem:[%s11886_s26 + $0xe70] sm:$0xff] }
  0xbd   : > { %2222 = vst [vmem:[%s11891_s27 + $0x540] sm:$0xff] %v2221_v40  ;;  %v2349_v40 = vld [vmem:[%s11886_s26 + $0xe80] sm:$0xff] }
  0xbe   : > { %2224 = vst [vmem:[%s11891_s27 + $0x548] sm:$0xff] %v2223_v41  ;;  %v2351_v41 = vld [vmem:[%s11886_s26 + $0xe90] sm:$0xff] }
  0xbf   : > { %2226 = vst [vmem:[%s11891_s27 + $0x550] sm:$0xff] %v2225_v42  ;;  %v2353_v42 = vld [vmem:[%s11886_s26 + $0xea0] sm:$0xff] }
  0xc0   : > { %2228 = vst [vmem:[%s11891_s27 + $0x558] sm:$0xff] %v2227_v43  ;;  %v2355_v43 = vld [vmem:[%s11886_s26 + $0xeb0] sm:$0xff] }
  0xc1   : > { %2230 = vst [vmem:[%s11891_s27 + $0x560] sm:$0xff] %v2229_v44  ;;  %v2357_v44 = vld [vmem:[%s11886_s26 + $0xec0] sm:$0xff] }
  0xc2   : > { %2232 = vst [vmem:[%s11891_s27 + $0x568] sm:$0xff] %v2231_v45  ;;  %v2359_v45 = vld [vmem:[%s11886_s26 + $0xed0] sm:$0xff] }
  0xc3   : > { %2234 = vst [vmem:[%s11891_s27 + $0x570] sm:$0xff] %v2233_v46  ;;  %v2361_v46 = vld [vmem:[%s11886_s26 + $0xee0] sm:$0xff] }
  0xc4   : > { %2236 = vst [vmem:[%s11891_s27 + $0x578] sm:$0xff] %v2235_v47  ;;  %v2363_v47 = vld [vmem:[%s11886_s26 + $0xef0] sm:$0xff] }
  0xc5   : > { %2238 = vst [vmem:[%s11891_s27 + $0x580] sm:$0xff] %v2237_v48  ;;  %v2365_v48 = vld [vmem:[%s11886_s26 + $0xf00] sm:$0xff] }
  0xc6   : > { %2240 = vst [vmem:[%s11891_s27 + $0x588] sm:$0xff] %v2239_v49  ;;  %v2367_v49 = vld [vmem:[%s11886_s26 + $0xf10] sm:$0xff] }
  0xc7   : > { %2242 = vst [vmem:[%s11891_s27 + $0x590] sm:$0xff] %v2241_v50  ;;  %v2369_v50 = vld [vmem:[%s11886_s26 + $0xf20] sm:$0xff] }
  0xc8   : > { %2244 = vst [vmem:[%s11891_s27 + $0x598] sm:$0xff] %v2243_v51  ;;  %v2371_v51 = vld [vmem:[%s11886_s26 + $0xf30] sm:$0xff] }
  0xc9   : > { %2246 = vst [vmem:[%s11891_s27 + $0x5a0] sm:$0xff] %v2245_v52  ;;  %v2373_v52 = vld [vmem:[%s11886_s26 + $0xf40] sm:$0xff] }
  0xca   : > { %2248 = vst [vmem:[%s11891_s27 + $0x5a8] sm:$0xff] %v2247_v53  ;;  %v2375_v53 = vld [vmem:[%s11886_s26 + $0xf50] sm:$0xff] }
  0xcb   : > { %2250 = vst [vmem:[%s11891_s27 + $0x5b0] sm:$0xff] %v2249_v54  ;;  %v2377_v54 = vld [vmem:[%s11886_s26 + $0xf60] sm:$0xff] }
  0xcc   : > { %2252 = vst [vmem:[%s11891_s27 + $0x5b8] sm:$0xff] %v2251_v55  ;;  %v2379_v55 = vld [vmem:[%s11886_s26 + $0xf70] sm:$0xff] }
  0xcd   : > { %2254 = vst [vmem:[%s11891_s27 + $0x5c0] sm:$0xff] %v2253_v56  ;;  %v2381_v56 = vld [vmem:[%s11886_s26 + $0xf80] sm:$0xff] }
  0xce   : > { %2256 = vst [vmem:[%s11891_s27 + $0x5c8] sm:$0xff] %v2255_v57  ;;  %v2383_v57 = vld [vmem:[%s11886_s26 + $0xf90] sm:$0xff] }
  0xcf   : > { %2258 = vst [vmem:[%s11891_s27 + $0x5d0] sm:$0xff] %v2257_v58  ;;  %v2385_v58 = vld [vmem:[%s11886_s26 + $0xfa0] sm:$0xff] }
  0xd0   : > { %2260 = vst [vmem:[%s11891_s27 + $0x5d8] sm:$0xff] %v2259_v59  ;;  %v2387_v59 = vld [vmem:[%s11886_s26 + $0xfb0] sm:$0xff] }
  0xd1   : > { %2262 = vst [vmem:[%s11891_s27 + $0x5e0] sm:$0xff] %v2261_v60  ;;  %v2389_v60 = vld [vmem:[%s11886_s26 + $0xfc0] sm:$0xff] }
  0xd2   : > { %2264 = vst [vmem:[%s11891_s27 + $0x5e8] sm:$0xff] %v2263_v61  ;;  %v2391_v61 = vld [vmem:[%s11886_s26 + $0xfd0] sm:$0xff] }
  0xd3   : > { %2266 = vst [vmem:[%s11891_s27 + $0x5f0] sm:$0xff] %v2265_v62  ;;  %v2393_v62 = vld [vmem:[%s11886_s26 + $0xfe0] sm:$0xff] }
  0xd4   : > { %2268 = vst [vmem:[%s11891_s27 + $0x5f8] sm:$0xff] %v2267_v63  ;;  %v2395_v63 = vld [vmem:[%s11886_s26 + $0xff0] sm:$0xff] }
  0xd5   : > { %2270 = vst [vmem:[%s11891_s27 + $0x600] sm:$0xff] %v2269_v0  ;;  %v2397_v0 = vld [vmem:[%s11886_s26 + $0x1000] sm:$0xff] }
  0xd6   : > { %2272 = vst [vmem:[%s11891_s27 + $0x608] sm:$0xff] %v2271_v1  ;;  %v2399_v1 = vld [vmem:[%s11886_s26 + $0x1010] sm:$0xff] }
  0xd7   : > { %2274 = vst [vmem:[%s11891_s27 + $0x610] sm:$0xff] %v2273_v2  ;;  %v2401_v2 = vld [vmem:[%s11886_s26 + $0x1020] sm:$0xff] }
  0xd8   : > { %2276 = vst [vmem:[%s11891_s27 + $0x618] sm:$0xff] %v2275_v3  ;;  %v2403_v3 = vld [vmem:[%s11886_s26 + $0x1030] sm:$0xff] }
  0xd9   : > { %2278 = vst [vmem:[%s11891_s27 + $0x620] sm:$0xff] %v2277_v4  ;;  %v2405_v4 = vld [vmem:[%s11886_s26 + $0x1040] sm:$0xff] }
  0xda   : > { %2280 = vst [vmem:[%s11891_s27 + $0x628] sm:$0xff] %v2279_v5  ;;  %v2407_v5 = vld [vmem:[%s11886_s26 + $0x1050] sm:$0xff] }
  0xdb   : > { %2282 = vst [vmem:[%s11891_s27 + $0x630] sm:$0xff] %v2281_v6  ;;  %v2409_v6 = vld [vmem:[%s11886_s26 + $0x1060] sm:$0xff] }
  0xdc   : > { %2284 = vst [vmem:[%s11891_s27 + $0x638] sm:$0xff] %v2283_v7  ;;  %v2411_v7 = vld [vmem:[%s11886_s26 + $0x1070] sm:$0xff] }
  0xdd   : > { %2286 = vst [vmem:[%s11891_s27 + $0x640] sm:$0xff] %v2285_v8  ;;  %v2413_v8 = vld [vmem:[%s11886_s26 + $0x1080] sm:$0xff] }
  0xde   : > { %2288 = vst [vmem:[%s11891_s27 + $0x648] sm:$0xff] %v2287_v9  ;;  %v2415_v9 = vld [vmem:[%s11886_s26 + $0x1090] sm:$0xff] }
  0xdf   : > { %2290 = vst [vmem:[%s11891_s27 + $0x650] sm:$0xff] %v2289_v10  ;;  %v2417_v10 = vld [vmem:[%s11886_s26 + $0x10a0] sm:$0xff] }
  0xe0   : > { %2292 = vst [vmem:[%s11891_s27 + $0x658] sm:$0xff] %v2291_v11  ;;  %v2419_v11 = vld [vmem:[%s11886_s26 + $0x10b0] sm:$0xff] }
  0xe1   : > { %2294 = vst [vmem:[%s11891_s27 + $0x660] sm:$0xff] %v2293_v12  ;;  %v2421_v12 = vld [vmem:[%s11886_s26 + $0x10c0] sm:$0xff] }
  0xe2   : > { %2296 = vst [vmem:[%s11891_s27 + $0x668] sm:$0xff] %v2295_v13  ;;  %v2423_v13 = vld [vmem:[%s11886_s26 + $0x10d0] sm:$0xff] }
  0xe3   : > { %2298 = vst [vmem:[%s11891_s27 + $0x670] sm:$0xff] %v2297_v14  ;;  %v2425_v14 = vld [vmem:[%s11886_s26 + $0x10e0] sm:$0xff] }
  0xe4   : > { %2300 = vst [vmem:[%s11891_s27 + $0x678] sm:$0xff] %v2299_v15  ;;  %v2427_v15 = vld [vmem:[%s11886_s26 + $0x10f0] sm:$0xff] }
  0xe5   : > { %2302 = vst [vmem:[%s11891_s27 + $0x680] sm:$0xff] %v2301_v16  ;;  %v2429_v16 = vld [vmem:[%s11886_s26 + $0x1100] sm:$0xff] }
  0xe6   : > { %2304 = vst [vmem:[%s11891_s27 + $0x688] sm:$0xff] %v2303_v17  ;;  %v2431_v17 = vld [vmem:[%s11886_s26 + $0x1110] sm:$0xff] }
  0xe7   : > { %2306 = vst [vmem:[%s11891_s27 + $0x690] sm:$0xff] %v2305_v18  ;;  %v2433_v18 = vld [vmem:[%s11886_s26 + $0x1120] sm:$0xff] }
  0xe8   : > { %2308 = vst [vmem:[%s11891_s27 + $0x698] sm:$0xff] %v2307_v19  ;;  %v2435_v19 = vld [vmem:[%s11886_s26 + $0x1130] sm:$0xff] }
  0xe9   : > { %2310 = vst [vmem:[%s11891_s27 + $0x6a0] sm:$0xff] %v2309_v20  ;;  %v2437_v20 = vld [vmem:[%s11886_s26 + $0x1140] sm:$0xff] }
  0xea   : > { %2312 = vst [vmem:[%s11891_s27 + $0x6a8] sm:$0xff] %v2311_v21  ;;  %v2439_v21 = vld [vmem:[%s11886_s26 + $0x1150] sm:$0xff] }
  0xeb   : > { %2314 = vst [vmem:[%s11891_s27 + $0x6b0] sm:$0xff] %v2313_v22  ;;  %v2441_v22 = vld [vmem:[%s11886_s26 + $0x1160] sm:$0xff] }
  0xec   : > { %2316 = vst [vmem:[%s11891_s27 + $0x6b8] sm:$0xff] %v2315_v23  ;;  %v2443_v23 = vld [vmem:[%s11886_s26 + $0x1170] sm:$0xff] }
  0xed   : > { %2318 = vst [vmem:[%s11891_s27 + $0x6c0] sm:$0xff] %v2317_v24  ;;  %v2445_v24 = vld [vmem:[%s11886_s26 + $0x1180] sm:$0xff] }
  0xee   : > { %2320 = vst [vmem:[%s11891_s27 + $0x6c8] sm:$0xff] %v2319_v25  ;;  %v2447_v25 = vld [vmem:[%s11886_s26 + $0x1190] sm:$0xff] }
  0xef   : > { %2322 = vst [vmem:[%s11891_s27 + $0x6d0] sm:$0xff] %v2321_v26  ;;  %v2449_v26 = vld [vmem:[%s11886_s26 + $0x11a0] sm:$0xff] }
  0xf0   : > { %2324 = vst [vmem:[%s11891_s27 + $0x6d8] sm:$0xff] %v2323_v27  ;;  %v2451_v27 = vld [vmem:[%s11886_s26 + $0x11b0] sm:$0xff] }
  0xf1   : > { %2326 = vst [vmem:[%s11891_s27 + $0x6e0] sm:$0xff] %v2325_v28  ;;  %v2453_v28 = vld [vmem:[%s11886_s26 + $0x11c0] sm:$0xff] }
  0xf2   : > { %2328 = vst [vmem:[%s11891_s27 + $0x6e8] sm:$0xff] %v2327_v29  ;;  %v2455_v29 = vld [vmem:[%s11886_s26 + $0x11d0] sm:$0xff] }
  0xf3   : > { %2330 = vst [vmem:[%s11891_s27 + $0x6f0] sm:$0xff] %v2329_v30  ;;  %v2457_v30 = vld [vmem:[%s11886_s26 + $0x11e0] sm:$0xff] }
  0xf4   : > { %2332 = vst [vmem:[%s11891_s27 + $0x6f8] sm:$0xff] %v2331_v31  ;;  %v2459_v31 = vld [vmem:[%s11886_s26 + $0x11f0] sm:$0xff] }
  0xf5   : > { %2334 = vst [vmem:[%s11891_s27 + $0x700] sm:$0xff] %v2333_v32  ;;  %v2461_v32 = vld [vmem:[%s11886_s26 + $0x1200] sm:$0xff] }
  0xf6   : > { %2336 = vst [vmem:[%s11891_s27 + $0x708] sm:$0xff] %v2335_v33  ;;  %v2463_v33 = vld [vmem:[%s11886_s26 + $0x1210] sm:$0xff] }
  0xf7   : > { %2338 = vst [vmem:[%s11891_s27 + $0x710] sm:$0xff] %v2337_v34  ;;  %v2465_v34 = vld [vmem:[%s11886_s26 + $0x1220] sm:$0xff] }
  0xf8   : > { %2340 = vst [vmem:[%s11891_s27 + $0x718] sm:$0xff] %v2339_v35  ;;  %v2467_v35 = vld [vmem:[%s11886_s26 + $0x1230] sm:$0xff] }
  0xf9   : > { %2342 = vst [vmem:[%s11891_s27 + $0x720] sm:$0xff] %v2341_v36  ;;  %v2469_v36 = vld [vmem:[%s11886_s26 + $0x1240] sm:$0xff] }
  0xfa   : > { %2344 = vst [vmem:[%s11891_s27 + $0x728] sm:$0xff] %v2343_v37  ;;  %v2471_v37 = vld [vmem:[%s11886_s26 + $0x1250] sm:$0xff] }
  0xfb   : > { %2346 = vst [vmem:[%s11891_s27 + $0x730] sm:$0xff] %v2345_v38  ;;  %v2473_v38 = vld [vmem:[%s11886_s26 + $0x1260] sm:$0xff] }
  0xfc   : > { %2348 = vst [vmem:[%s11891_s27 + $0x738] sm:$0xff] %v2347_v39  ;;  %v2475_v39 = vld [vmem:[%s11886_s26 + $0x1270] sm:$0xff] }
  0xfd   : > { %2350 = vst [vmem:[%s11891_s27 + $0x740] sm:$0xff] %v2349_v40  ;;  %v2477_v40 = vld [vmem:[%s11886_s26 + $0x1280] sm:$0xff] }
  0xfe   : > { %2352 = vst [vmem:[%s11891_s27 + $0x748] sm:$0xff] %v2351_v41  ;;  %v2479_v41 = vld [vmem:[%s11886_s26 + $0x1290] sm:$0xff] }
  0xff   : > { %2354 = vst [vmem:[%s11891_s27 + $0x750] sm:$0xff] %v2353_v42  ;;  %v2481_v42 = vld [vmem:[%s11886_s26 + $0x12a0] sm:$0xff] }
 0x100   : > { %2356 = vst [vmem:[%s11891_s27 + $0x758] sm:$0xff] %v2355_v43  ;;  %v2483_v43 = vld [vmem:[%s11886_s26 + $0x12b0] sm:$0xff] }
 0x101   : > { %2358 = vst [vmem:[%s11891_s27 + $0x760] sm:$0xff] %v2357_v44  ;;  %v2485_v44 = vld [vmem:[%s11886_s26 + $0x12c0] sm:$0xff] }
 0x102   : > { %2360 = vst [vmem:[%s11891_s27 + $0x768] sm:$0xff] %v2359_v45  ;;  %v2487_v45 = vld [vmem:[%s11886_s26 + $0x12d0] sm:$0xff] }
 0x103   : > { %2362 = vst [vmem:[%s11891_s27 + $0x770] sm:$0xff] %v2361_v46  ;;  %v2489_v46 = vld [vmem:[%s11886_s26 + $0x12e0] sm:$0xff] }
 0x104   : > { %2364 = vst [vmem:[%s11891_s27 + $0x778] sm:$0xff] %v2363_v47  ;;  %v2491_v47 = vld [vmem:[%s11886_s26 + $0x12f0] sm:$0xff] }
 0x105   : > { %2366 = vst [vmem:[%s11891_s27 + $0x780] sm:$0xff] %v2365_v48  ;;  %v2493_v48 = vld [vmem:[%s11886_s26 + $0x1300] sm:$0xff] }
 0x106   : > { %2368 = vst [vmem:[%s11891_s27 + $0x788] sm:$0xff] %v2367_v49  ;;  %v2495_v49 = vld [vmem:[%s11886_s26 + $0x1310] sm:$0xff] }
 0x107   : > { %2370 = vst [vmem:[%s11891_s27 + $0x790] sm:$0xff] %v2369_v50  ;;  %v2497_v50 = vld [vmem:[%s11886_s26 + $0x1320] sm:$0xff] }
 0x108   : > { %2372 = vst [vmem:[%s11891_s27 + $0x798] sm:$0xff] %v2371_v51  ;;  %v2499_v51 = vld [vmem:[%s11886_s26 + $0x1330] sm:$0xff] }
 0x109   : > { %2374 = vst [vmem:[%s11891_s27 + $0x7a0] sm:$0xff] %v2373_v52  ;;  %v2501_v52 = vld [vmem:[%s11886_s26 + $0x1340] sm:$0xff] }
 0x10a   : > { %2376 = vst [vmem:[%s11891_s27 + $0x7a8] sm:$0xff] %v2375_v53  ;;  %v2503_v53 = vld [vmem:[%s11886_s26 + $0x1350] sm:$0xff] }
 0x10b   : > { %2378 = vst [vmem:[%s11891_s27 + $0x7b0] sm:$0xff] %v2377_v54  ;;  %v2505_v54 = vld [vmem:[%s11886_s26 + $0x1360] sm:$0xff] }
 0x10c   : > { %2380 = vst [vmem:[%s11891_s27 + $0x7b8] sm:$0xff] %v2379_v55  ;;  %v2507_v55 = vld [vmem:[%s11886_s26 + $0x1370] sm:$0xff] }
 0x10d   : > { %2382 = vst [vmem:[%s11891_s27 + $0x7c0] sm:$0xff] %v2381_v56  ;;  %v2509_v56 = vld [vmem:[%s11886_s26 + $0x1380] sm:$0xff] }
 0x10e   : > { %2384 = vst [vmem:[%s11891_s27 + $0x7c8] sm:$0xff] %v2383_v57  ;;  %v2511_v57 = vld [vmem:[%s11886_s26 + $0x1390] sm:$0xff] }
 0x10f   : > { %2386 = vst [vmem:[%s11891_s27 + $0x7d0] sm:$0xff] %v2385_v58  ;;  %v2513_v58 = vld [vmem:[%s11886_s26 + $0x13a0] sm:$0xff] }
 0x110   : > { %2388 = vst [vmem:[%s11891_s27 + $0x7d8] sm:$0xff] %v2387_v59  ;;  %v2515_v59 = vld [vmem:[%s11886_s26 + $0x13b0] sm:$0xff] }
 0x111   : > { %2390 = vst [vmem:[%s11891_s27 + $0x7e0] sm:$0xff] %v2389_v60  ;;  %v2517_v60 = vld [vmem:[%s11886_s26 + $0x13c0] sm:$0xff] }
 0x112   : > { %2392 = vst [vmem:[%s11891_s27 + $0x7e8] sm:$0xff] %v2391_v61  ;;  %v2519_v61 = vld [vmem:[%s11886_s26 + $0x13d0] sm:$0xff] }
 0x113   : > { %2394 = vst [vmem:[%s11891_s27 + $0x7f0] sm:$0xff] %v2393_v62  ;;  %v2521_v62 = vld [vmem:[%s11886_s26 + $0x13e0] sm:$0xff] }
 0x114   : > { %2396 = vst [vmem:[%s11891_s27 + $0x7f8] sm:$0xff] %v2395_v63  ;;  %v2523_v63 = vld [vmem:[%s11886_s26 + $0x13f0] sm:$0xff] }
 0x115   : > { %2398 = vst [vmem:[%s11891_s27 + $0x800] sm:$0xff] %v2397_v0  ;;  %v2525_v0 = vld [vmem:[%s11886_s26 + $0x1400] sm:$0xff] }
 0x116   : > { %2400 = vst [vmem:[%s11891_s27 + $0x808] sm:$0xff] %v2399_v1  ;;  %v2527_v1 = vld [vmem:[%s11886_s26 + $0x1410] sm:$0xff] }
 0x117   : > { %2402 = vst [vmem:[%s11891_s27 + $0x810] sm:$0xff] %v2401_v2  ;;  %v2529_v2 = vld [vmem:[%s11886_s26 + $0x1420] sm:$0xff] }
 0x118   : > { %2404 = vst [vmem:[%s11891_s27 + $0x818] sm:$0xff] %v2403_v3  ;;  %v2531_v3 = vld [vmem:[%s11886_s26 + $0x1430] sm:$0xff] }
 0x119   : > { %2406 = vst [vmem:[%s11891_s27 + $0x820] sm:$0xff] %v2405_v4  ;;  %v2533_v4 = vld [vmem:[%s11886_s26 + $0x1440] sm:$0xff] }
 0x11a   : > { %2408 = vst [vmem:[%s11891_s27 + $0x828] sm:$0xff] %v2407_v5  ;;  %v2535_v5 = vld [vmem:[%s11886_s26 + $0x1450] sm:$0xff] }
 0x11b   : > { %2410 = vst [vmem:[%s11891_s27 + $0x830] sm:$0xff] %v2409_v6  ;;  %v2537_v6 = vld [vmem:[%s11886_s26 + $0x1460] sm:$0xff] }
 0x11c   : > { %2412 = vst [vmem:[%s11891_s27 + $0x838] sm:$0xff] %v2411_v7  ;;  %v2539_v7 = vld [vmem:[%s11886_s26 + $0x1470] sm:$0xff] }
 0x11d   : > { %2414 = vst [vmem:[%s11891_s27 + $0x840] sm:$0xff] %v2413_v8  ;;  %v2541_v8 = vld [vmem:[%s11886_s26 + $0x1480] sm:$0xff] }
 0x11e   : > { %2416 = vst [vmem:[%s11891_s27 + $0x848] sm:$0xff] %v2415_v9  ;;  %v2543_v9 = vld [vmem:[%s11886_s26 + $0x1490] sm:$0xff] }
 0x11f   : > { %2418 = vst [vmem:[%s11891_s27 + $0x850] sm:$0xff] %v2417_v10  ;;  %v2545_v10 = vld [vmem:[%s11886_s26 + $0x14a0] sm:$0xff] }
 0x120   : > { %2420 = vst [vmem:[%s11891_s27 + $0x858] sm:$0xff] %v2419_v11  ;;  %v2547_v11 = vld [vmem:[%s11886_s26 + $0x14b0] sm:$0xff] }
 0x121   : > { %2422 = vst [vmem:[%s11891_s27 + $0x860] sm:$0xff] %v2421_v12  ;;  %v2549_v12 = vld [vmem:[%s11886_s26 + $0x14c0] sm:$0xff] }
 0x122   : > { %2424 = vst [vmem:[%s11891_s27 + $0x868] sm:$0xff] %v2423_v13  ;;  %v2551_v13 = vld [vmem:[%s11886_s26 + $0x14d0] sm:$0xff] }
 0x123   : > { %2426 = vst [vmem:[%s11891_s27 + $0x870] sm:$0xff] %v2425_v14  ;;  %v2553_v14 = vld [vmem:[%s11886_s26 + $0x14e0] sm:$0xff] }
 0x124   : > { %2428 = vst [vmem:[%s11891_s27 + $0x878] sm:$0xff] %v2427_v15  ;;  %v2555_v15 = vld [vmem:[%s11886_s26 + $0x14f0] sm:$0xff] }
 0x125   : > { %2430 = vst [vmem:[%s11891_s27 + $0x880] sm:$0xff] %v2429_v16  ;;  %v2557_v16 = vld [vmem:[%s11886_s26 + $0x1500] sm:$0xff] }
 0x126   : > { %2432 = vst [vmem:[%s11891_s27 + $0x888] sm:$0xff] %v2431_v17  ;;  %v2559_v17 = vld [vmem:[%s11886_s26 + $0x1510] sm:$0xff] }
 0x127   : > { %2434 = vst [vmem:[%s11891_s27 + $0x890] sm:$0xff] %v2433_v18  ;;  %v2561_v18 = vld [vmem:[%s11886_s26 + $0x1520] sm:$0xff] }
 0x128   : > { %2436 = vst [vmem:[%s11891_s27 + $0x898] sm:$0xff] %v2435_v19  ;;  %v2563_v19 = vld [vmem:[%s11886_s26 + $0x1530] sm:$0xff] }
 0x129   : > { %2438 = vst [vmem:[%s11891_s27 + $0x8a0] sm:$0xff] %v2437_v20  ;;  %v2565_v20 = vld [vmem:[%s11886_s26 + $0x1540] sm:$0xff] }
 0x12a   : > { %2440 = vst [vmem:[%s11891_s27 + $0x8a8] sm:$0xff] %v2439_v21  ;;  %v2567_v21 = vld [vmem:[%s11886_s26 + $0x1550] sm:$0xff] }
 0x12b   : > { %2442 = vst [vmem:[%s11891_s27 + $0x8b0] sm:$0xff] %v2441_v22  ;;  %v2569_v22 = vld [vmem:[%s11886_s26 + $0x1560] sm:$0xff] }
 0x12c   : > { %2444 = vst [vmem:[%s11891_s27 + $0x8b8] sm:$0xff] %v2443_v23  ;;  %v2571_v23 = vld [vmem:[%s11886_s26 + $0x1570] sm:$0xff] }
 0x12d   : > { %2446 = vst [vmem:[%s11891_s27 + $0x8c0] sm:$0xff] %v2445_v24  ;;  %v2573_v24 = vld [vmem:[%s11886_s26 + $0x1580] sm:$0xff] }
 0x12e   : > { %2448 = vst [vmem:[%s11891_s27 + $0x8c8] sm:$0xff] %v2447_v25  ;;  %v2575_v25 = vld [vmem:[%s11886_s26 + $0x1590] sm:$0xff] }
 0x12f   : > { %2450 = vst [vmem:[%s11891_s27 + $0x8d0] sm:$0xff] %v2449_v26  ;;  %v2577_v26 = vld [vmem:[%s11886_s26 + $0x15a0] sm:$0xff] }
 0x130   : > { %2452 = vst [vmem:[%s11891_s27 + $0x8d8] sm:$0xff] %v2451_v27  ;;  %v2579_v27 = vld [vmem:[%s11886_s26 + $0x15b0] sm:$0xff] }
 0x131   : > { %2454 = vst [vmem:[%s11891_s27 + $0x8e0] sm:$0xff] %v2453_v28  ;;  %v2581_v28 = vld [vmem:[%s11886_s26 + $0x15c0] sm:$0xff] }
 0x132   : > { %2456 = vst [vmem:[%s11891_s27 + $0x8e8] sm:$0xff] %v2455_v29  ;;  %v2583_v29 = vld [vmem:[%s11886_s26 + $0x15d0] sm:$0xff] }
 0x133   : > { %2458 = vst [vmem:[%s11891_s27 + $0x8f0] sm:$0xff] %v2457_v30  ;;  %v2585_v30 = vld [vmem:[%s11886_s26 + $0x15e0] sm:$0xff] }
 0x134   : > { %2460 = vst [vmem:[%s11891_s27 + $0x8f8] sm:$0xff] %v2459_v31  ;;  %v2587_v31 = vld [vmem:[%s11886_s26 + $0x15f0] sm:$0xff] }
 0x135   : > { %2462 = vst [vmem:[%s11891_s27 + $0x900] sm:$0xff] %v2461_v32  ;;  %v2589_v32 = vld [vmem:[%s11886_s26 + $0x1600] sm:$0xff] }
 0x136   : > { %2464 = vst [vmem:[%s11891_s27 + $0x908] sm:$0xff] %v2463_v33  ;;  %v2591_v33 = vld [vmem:[%s11886_s26 + $0x1610] sm:$0xff] }
 0x137   : > { %2466 = vst [vmem:[%s11891_s27 + $0x910] sm:$0xff] %v2465_v34  ;;  %v2593_v34 = vld [vmem:[%s11886_s26 + $0x1620] sm:$0xff] }
 0x138   : > { %2468 = vst [vmem:[%s11891_s27 + $0x918] sm:$0xff] %v2467_v35  ;;  %v2595_v35 = vld [vmem:[%s11886_s26 + $0x1630] sm:$0xff] }
 0x139   : > { %2470 = vst [vmem:[%s11891_s27 + $0x920] sm:$0xff] %v2469_v36  ;;  %v2597_v36 = vld [vmem:[%s11886_s26 + $0x1640] sm:$0xff] }
 0x13a   : > { %2472 = vst [vmem:[%s11891_s27 + $0x928] sm:$0xff] %v2471_v37  ;;  %v2599_v37 = vld [vmem:[%s11886_s26 + $0x1650] sm:$0xff] }
 0x13b   : > { %2474 = vst [vmem:[%s11891_s27 + $0x930] sm:$0xff] %v2473_v38  ;;  %v2601_v38 = vld [vmem:[%s11886_s26 + $0x1660] sm:$0xff] }
 0x13c   : > { %2476 = vst [vmem:[%s11891_s27 + $0x938] sm:$0xff] %v2475_v39  ;;  %v2603_v39 = vld [vmem:[%s11886_s26 + $0x1670] sm:$0xff] }
 0x13d   : > { %2478 = vst [vmem:[%s11891_s27 + $0x940] sm:$0xff] %v2477_v40  ;;  %v2605_v40 = vld [vmem:[%s11886_s26 + $0x1680] sm:$0xff] }
 0x13e   : > { %2480 = vst [vmem:[%s11891_s27 + $0x948] sm:$0xff] %v2479_v41  ;;  %v2607_v41 = vld [vmem:[%s11886_s26 + $0x1690] sm:$0xff] }
 0x13f   : > { %2482 = vst [vmem:[%s11891_s27 + $0x950] sm:$0xff] %v2481_v42  ;;  %v2609_v42 = vld [vmem:[%s11886_s26 + $0x16a0] sm:$0xff] }
 0x140   : > { %2484 = vst [vmem:[%s11891_s27 + $0x958] sm:$0xff] %v2483_v43  ;;  %v2611_v43 = vld [vmem:[%s11886_s26 + $0x16b0] sm:$0xff] }
 0x141   : > { %2486 = vst [vmem:[%s11891_s27 + $0x960] sm:$0xff] %v2485_v44  ;;  %v2613_v44 = vld [vmem:[%s11886_s26 + $0x16c0] sm:$0xff] }
 0x142   : > { %2488 = vst [vmem:[%s11891_s27 + $0x968] sm:$0xff] %v2487_v45  ;;  %v2615_v45 = vld [vmem:[%s11886_s26 + $0x16d0] sm:$0xff] }
 0x143   : > { %2490 = vst [vmem:[%s11891_s27 + $0x970] sm:$0xff] %v2489_v46  ;;  %v2617_v46 = vld [vmem:[%s11886_s26 + $0x16e0] sm:$0xff] }
 0x144   : > { %2492 = vst [vmem:[%s11891_s27 + $0x978] sm:$0xff] %v2491_v47  ;;  %v2619_v47 = vld [vmem:[%s11886_s26 + $0x16f0] sm:$0xff] }
 0x145   : > { %2494 = vst [vmem:[%s11891_s27 + $0x980] sm:$0xff] %v2493_v48  ;;  %v2621_v48 = vld [vmem:[%s11886_s26 + $0x1700] sm:$0xff] }
 0x146   : > { %2496 = vst [vmem:[%s11891_s27 + $0x988] sm:$0xff] %v2495_v49  ;;  %v2623_v49 = vld [vmem:[%s11886_s26 + $0x1710] sm:$0xff] }
 0x147   : > { %2498 = vst [vmem:[%s11891_s27 + $0x990] sm:$0xff] %v2497_v50  ;;  %v2625_v50 = vld [vmem:[%s11886_s26 + $0x1720] sm:$0xff] }
 0x148   : > { %2500 = vst [vmem:[%s11891_s27 + $0x998] sm:$0xff] %v2499_v51  ;;  %v2627_v51 = vld [vmem:[%s11886_s26 + $0x1730] sm:$0xff] }
 0x149   : > { %2502 = vst [vmem:[%s11891_s27 + $0x9a0] sm:$0xff] %v2501_v52  ;;  %v2629_v52 = vld [vmem:[%s11886_s26 + $0x1740] sm:$0xff] }
 0x14a   : > { %2504 = vst [vmem:[%s11891_s27 + $0x9a8] sm:$0xff] %v2503_v53  ;;  %v2631_v53 = vld [vmem:[%s11886_s26 + $0x1750] sm:$0xff] }
 0x14b   : > { %2506 = vst [vmem:[%s11891_s27 + $0x9b0] sm:$0xff] %v2505_v54  ;;  %v2633_v54 = vld [vmem:[%s11886_s26 + $0x1760] sm:$0xff] }
 0x14c   : > { %2508 = vst [vmem:[%s11891_s27 + $0x9b8] sm:$0xff] %v2507_v55  ;;  %v2635_v55 = vld [vmem:[%s11886_s26 + $0x1770] sm:$0xff] }
 0x14d   : > { %2510 = vst [vmem:[%s11891_s27 + $0x9c0] sm:$0xff] %v2509_v56  ;;  %v2637_v56 = vld [vmem:[%s11886_s26 + $0x1780] sm:$0xff] }
 0x14e   : > { %2512 = vst [vmem:[%s11891_s27 + $0x9c8] sm:$0xff] %v2511_v57  ;;  %v2639_v57 = vld [vmem:[%s11886_s26 + $0x1790] sm:$0xff] }
 0x14f   : > { %2514 = vst [vmem:[%s11891_s27 + $0x9d0] sm:$0xff] %v2513_v58  ;;  %v2641_v58 = vld [vmem:[%s11886_s26 + $0x17a0] sm:$0xff] }
 0x150   : > { %2516 = vst [vmem:[%s11891_s27 + $0x9d8] sm:$0xff] %v2515_v59  ;;  %v2643_v59 = vld [vmem:[%s11886_s26 + $0x17b0] sm:$0xff] }
 0x151   : > { %2518 = vst [vmem:[%s11891_s27 + $0x9e0] sm:$0xff] %v2517_v60  ;;  %v2645_v60 = vld [vmem:[%s11886_s26 + $0x17c0] sm:$0xff] }
 0x152   : > { %2520 = vst [vmem:[%s11891_s27 + $0x9e8] sm:$0xff] %v2519_v61  ;;  %v2647_v61 = vld [vmem:[%s11886_s26 + $0x17d0] sm:$0xff] }
 0x153   : > { %2522 = vst [vmem:[%s11891_s27 + $0x9f0] sm:$0xff] %v2521_v62  ;;  %v2649_v62 = vld [vmem:[%s11886_s26 + $0x17e0] sm:$0xff] }
 0x154   : > { %2524 = vst [vmem:[%s11891_s27 + $0x9f8] sm:$0xff] %v2523_v63  ;;  %v2651_v63 = vld [vmem:[%s11886_s26 + $0x17f0] sm:$0xff] }
 0x155   : > { %2526 = vst [vmem:[%s11891_s27 + $0xa00] sm:$0xff] %v2525_v0  ;;  %v2653_v0 = vld [vmem:[%s11886_s26 + $0x1800] sm:$0xff] }
 0x156   : > { %2528 = vst [vmem:[%s11891_s27 + $0xa08] sm:$0xff] %v2527_v1  ;;  %v2655_v1 = vld [vmem:[%s11886_s26 + $0x1810] sm:$0xff] }
 0x157   : > { %2530 = vst [vmem:[%s11891_s27 + $0xa10] sm:$0xff] %v2529_v2  ;;  %v2657_v2 = vld [vmem:[%s11886_s26 + $0x1820] sm:$0xff] }
 0x158   : > { %2532 = vst [vmem:[%s11891_s27 + $0xa18] sm:$0xff] %v2531_v3  ;;  %v2659_v3 = vld [vmem:[%s11886_s26 + $0x1830] sm:$0xff] }
 0x159   : > { %2534 = vst [vmem:[%s11891_s27 + $0xa20] sm:$0xff] %v2533_v4  ;;  %v2661_v4 = vld [vmem:[%s11886_s26 + $0x1840] sm:$0xff] }
 0x15a   : > { %2536 = vst [vmem:[%s11891_s27 + $0xa28] sm:$0xff] %v2535_v5  ;;  %v2663_v5 = vld [vmem:[%s11886_s26 + $0x1850] sm:$0xff] }
 0x15b   : > { %2538 = vst [vmem:[%s11891_s27 + $0xa30] sm:$0xff] %v2537_v6  ;;  %v2665_v6 = vld [vmem:[%s11886_s26 + $0x1860] sm:$0xff] }
 0x15c   : > { %2540 = vst [vmem:[%s11891_s27 + $0xa38] sm:$0xff] %v2539_v7  ;;  %v2667_v7 = vld [vmem:[%s11886_s26 + $0x1870] sm:$0xff] }
 0x15d   : > { %2542 = vst [vmem:[%s11891_s27 + $0xa40] sm:$0xff] %v2541_v8  ;;  %v2669_v8 = vld [vmem:[%s11886_s26 + $0x1880] sm:$0xff] }
 0x15e   : > { %2544 = vst [vmem:[%s11891_s27 + $0xa48] sm:$0xff] %v2543_v9  ;;  %v2671_v9 = vld [vmem:[%s11886_s26 + $0x1890] sm:$0xff] }
 0x15f   : > { %2546 = vst [vmem:[%s11891_s27 + $0xa50] sm:$0xff] %v2545_v10  ;;  %v2673_v10 = vld [vmem:[%s11886_s26 + $0x18a0] sm:$0xff] }
 0x160   : > { %2548 = vst [vmem:[%s11891_s27 + $0xa58] sm:$0xff] %v2547_v11  ;;  %v2675_v11 = vld [vmem:[%s11886_s26 + $0x18b0] sm:$0xff] }
 0x161   : > { %2550 = vst [vmem:[%s11891_s27 + $0xa60] sm:$0xff] %v2549_v12  ;;  %v2677_v12 = vld [vmem:[%s11886_s26 + $0x18c0] sm:$0xff] }
 0x162   : > { %2552 = vst [vmem:[%s11891_s27 + $0xa68] sm:$0xff] %v2551_v13  ;;  %v2679_v13 = vld [vmem:[%s11886_s26 + $0x18d0] sm:$0xff] }
 0x163   : > { %2554 = vst [vmem:[%s11891_s27 + $0xa70] sm:$0xff] %v2553_v14  ;;  %v2681_v14 = vld [vmem:[%s11886_s26 + $0x18e0] sm:$0xff] }
 0x164   : > { %2556 = vst [vmem:[%s11891_s27 + $0xa78] sm:$0xff] %v2555_v15  ;;  %v2683_v15 = vld [vmem:[%s11886_s26 + $0x18f0] sm:$0xff] }
 0x165   : > { %2558 = vst [vmem:[%s11891_s27 + $0xa80] sm:$0xff] %v2557_v16  ;;  %v2685_v16 = vld [vmem:[%s11886_s26 + $0x1900] sm:$0xff] }
 0x166   : > { %2560 = vst [vmem:[%s11891_s27 + $0xa88] sm:$0xff] %v2559_v17  ;;  %v2687_v17 = vld [vmem:[%s11886_s26 + $0x1910] sm:$0xff] }
 0x167   : > { %2562 = vst [vmem:[%s11891_s27 + $0xa90] sm:$0xff] %v2561_v18  ;;  %v2689_v18 = vld [vmem:[%s11886_s26 + $0x1920] sm:$0xff] }
 0x168   : > { %2564 = vst [vmem:[%s11891_s27 + $0xa98] sm:$0xff] %v2563_v19  ;;  %v2691_v19 = vld [vmem:[%s11886_s26 + $0x1930] sm:$0xff] }
 0x169   : > { %2566 = vst [vmem:[%s11891_s27 + $0xaa0] sm:$0xff] %v2565_v20  ;;  %v2693_v20 = vld [vmem:[%s11886_s26 + $0x1940] sm:$0xff] }
 0x16a   : > { %2568 = vst [vmem:[%s11891_s27 + $0xaa8] sm:$0xff] %v2567_v21  ;;  %v2695_v21 = vld [vmem:[%s11886_s26 + $0x1950] sm:$0xff] }
 0x16b   : > { %2570 = vst [vmem:[%s11891_s27 + $0xab0] sm:$0xff] %v2569_v22  ;;  %v2697_v22 = vld [vmem:[%s11886_s26 + $0x1960] sm:$0xff] }
 0x16c   : > { %2572 = vst [vmem:[%s11891_s27 + $0xab8] sm:$0xff] %v2571_v23  ;;  %v2699_v23 = vld [vmem:[%s11886_s26 + $0x1970] sm:$0xff] }
 0x16d   : > { %2574 = vst [vmem:[%s11891_s27 + $0xac0] sm:$0xff] %v2573_v24  ;;  %v2701_v24 = vld [vmem:[%s11886_s26 + $0x1980] sm:$0xff] }
 0x16e   : > { %2576 = vst [vmem:[%s11891_s27 + $0xac8] sm:$0xff] %v2575_v25  ;;  %v2703_v25 = vld [vmem:[%s11886_s26 + $0x1990] sm:$0xff] }
 0x16f   : > { %2578 = vst [vmem:[%s11891_s27 + $0xad0] sm:$0xff] %v2577_v26  ;;  %v2705_v26 = vld [vmem:[%s11886_s26 + $0x19a0] sm:$0xff] }
 0x170   : > { %2580 = vst [vmem:[%s11891_s27 + $0xad8] sm:$0xff] %v2579_v27  ;;  %v2707_v27 = vld [vmem:[%s11886_s26 + $0x19b0] sm:$0xff] }
 0x171   : > { %2582 = vst [vmem:[%s11891_s27 + $0xae0] sm:$0xff] %v2581_v28  ;;  %v2709_v28 = vld [vmem:[%s11886_s26 + $0x19c0] sm:$0xff] }
 0x172   : > { %2584 = vst [vmem:[%s11891_s27 + $0xae8] sm:$0xff] %v2583_v29  ;;  %v2711_v29 = vld [vmem:[%s11886_s26 + $0x19d0] sm:$0xff] }
 0x173   : > { %2586 = vst [vmem:[%s11891_s27 + $0xaf0] sm:$0xff] %v2585_v30  ;;  %v2713_v30 = vld [vmem:[%s11886_s26 + $0x19e0] sm:$0xff] }
 0x174   : > { %2588 = vst [vmem:[%s11891_s27 + $0xaf8] sm:$0xff] %v2587_v31  ;;  %v2715_v31 = vld [vmem:[%s11886_s26 + $0x19f0] sm:$0xff] }
 0x175   : > { %2590 = vst [vmem:[%s11891_s27 + $0xb00] sm:$0xff] %v2589_v32  ;;  %v2717_v32 = vld [vmem:[%s11886_s26 + $0x1a00] sm:$0xff] }
 0x176   : > { %2592 = vst [vmem:[%s11891_s27 + $0xb08] sm:$0xff] %v2591_v33  ;;  %v2719_v33 = vld [vmem:[%s11886_s26 + $0x1a10] sm:$0xff] }
 0x177   : > { %2594 = vst [vmem:[%s11891_s27 + $0xb10] sm:$0xff] %v2593_v34  ;;  %v2721_v34 = vld [vmem:[%s11886_s26 + $0x1a20] sm:$0xff] }
 0x178   : > { %2596 = vst [vmem:[%s11891_s27 + $0xb18] sm:$0xff] %v2595_v35  ;;  %v2723_v35 = vld [vmem:[%s11886_s26 + $0x1a30] sm:$0xff] }
 0x179   : > { %2598 = vst [vmem:[%s11891_s27 + $0xb20] sm:$0xff] %v2597_v36  ;;  %v2725_v36 = vld [vmem:[%s11886_s26 + $0x1a40] sm:$0xff] }
 0x17a   : > { %2600 = vst [vmem:[%s11891_s27 + $0xb28] sm:$0xff] %v2599_v37  ;;  %v2727_v37 = vld [vmem:[%s11886_s26 + $0x1a50] sm:$0xff] }
 0x17b   : > { %2602 = vst [vmem:[%s11891_s27 + $0xb30] sm:$0xff] %v2601_v38  ;;  %v2729_v38 = vld [vmem:[%s11886_s26 + $0x1a60] sm:$0xff] }
 0x17c   : > { %2604 = vst [vmem:[%s11891_s27 + $0xb38] sm:$0xff] %v2603_v39  ;;  %v2731_v39 = vld [vmem:[%s11886_s26 + $0x1a70] sm:$0xff] }
 0x17d   : > { %2606 = vst [vmem:[%s11891_s27 + $0xb40] sm:$0xff] %v2605_v40  ;;  %v2733_v40 = vld [vmem:[%s11886_s26 + $0x1a80] sm:$0xff] }
 0x17e   : > { %2608 = vst [vmem:[%s11891_s27 + $0xb48] sm:$0xff] %v2607_v41  ;;  %v2735_v41 = vld [vmem:[%s11886_s26 + $0x1a90] sm:$0xff] }
 0x17f   : > { %2610 = vst [vmem:[%s11891_s27 + $0xb50] sm:$0xff] %v2609_v42  ;;  %v2737_v42 = vld [vmem:[%s11886_s26 + $0x1aa0] sm:$0xff] }
 0x180   : > { %2612 = vst [vmem:[%s11891_s27 + $0xb58] sm:$0xff] %v2611_v43  ;;  %v2739_v43 = vld [vmem:[%s11886_s26 + $0x1ab0] sm:$0xff] }
 0x181   : > { %2614 = vst [vmem:[%s11891_s27 + $0xb60] sm:$0xff] %v2613_v44  ;;  %v2741_v44 = vld [vmem:[%s11886_s26 + $0x1ac0] sm:$0xff] }
 0x182   : > { %2616 = vst [vmem:[%s11891_s27 + $0xb68] sm:$0xff] %v2615_v45  ;;  %v2743_v45 = vld [vmem:[%s11886_s26 + $0x1ad0] sm:$0xff] }
 0x183   : > { %2618 = vst [vmem:[%s11891_s27 + $0xb70] sm:$0xff] %v2617_v46  ;;  %v2745_v46 = vld [vmem:[%s11886_s26 + $0x1ae0] sm:$0xff] }
 0x184   : > { %2620 = vst [vmem:[%s11891_s27 + $0xb78] sm:$0xff] %v2619_v47  ;;  %v2747_v47 = vld [vmem:[%s11886_s26 + $0x1af0] sm:$0xff] }
 0x185   : > { %2622 = vst [vmem:[%s11891_s27 + $0xb80] sm:$0xff] %v2621_v48  ;;  %v2749_v48 = vld [vmem:[%s11886_s26 + $0x1b00] sm:$0xff] }
 0x186   : > { %2624 = vst [vmem:[%s11891_s27 + $0xb88] sm:$0xff] %v2623_v49  ;;  %v2751_v49 = vld [vmem:[%s11886_s26 + $0x1b10] sm:$0xff] }
 0x187   : > { %2626 = vst [vmem:[%s11891_s27 + $0xb90] sm:$0xff] %v2625_v50  ;;  %v2753_v50 = vld [vmem:[%s11886_s26 + $0x1b20] sm:$0xff] }
 0x188   : > { %2628 = vst [vmem:[%s11891_s27 + $0xb98] sm:$0xff] %v2627_v51  ;;  %v2755_v51 = vld [vmem:[%s11886_s26 + $0x1b30] sm:$0xff] }
 0x189   : > { %2630 = vst [vmem:[%s11891_s27 + $0xba0] sm:$0xff] %v2629_v52  ;;  %v2757_v52 = vld [vmem:[%s11886_s26 + $0x1b40] sm:$0xff] }
 0x18a   : > { %2632 = vst [vmem:[%s11891_s27 + $0xba8] sm:$0xff] %v2631_v53  ;;  %v2759_v53 = vld [vmem:[%s11886_s26 + $0x1b50] sm:$0xff] }
 0x18b   : > { %2634 = vst [vmem:[%s11891_s27 + $0xbb0] sm:$0xff] %v2633_v54  ;;  %v2761_v54 = vld [vmem:[%s11886_s26 + $0x1b60] sm:$0xff] }
 0x18c   : > { %2636 = vst [vmem:[%s11891_s27 + $0xbb8] sm:$0xff] %v2635_v55  ;;  %v2763_v55 = vld [vmem:[%s11886_s26 + $0x1b70] sm:$0xff] }
 0x18d   : > { %2638 = vst [vmem:[%s11891_s27 + $0xbc0] sm:$0xff] %v2637_v56  ;;  %v2765_v56 = vld [vmem:[%s11886_s26 + $0x1b80] sm:$0xff] }
 0x18e   : > { %2640 = vst [vmem:[%s11891_s27 + $0xbc8] sm:$0xff] %v2639_v57  ;;  %v2767_v57 = vld [vmem:[%s11886_s26 + $0x1b90] sm:$0xff] }
 0x18f   : > { %2642 = vst [vmem:[%s11891_s27 + $0xbd0] sm:$0xff] %v2641_v58  ;;  %v2769_v58 = vld [vmem:[%s11886_s26 + $0x1ba0] sm:$0xff] }
 0x190   : > { %2644 = vst [vmem:[%s11891_s27 + $0xbd8] sm:$0xff] %v2643_v59  ;;  %v2771_v59 = vld [vmem:[%s11886_s26 + $0x1bb0] sm:$0xff] }
 0x191   : > { %2646 = vst [vmem:[%s11891_s27 + $0xbe0] sm:$0xff] %v2645_v60  ;;  %v2773_v60 = vld [vmem:[%s11886_s26 + $0x1bc0] sm:$0xff] }
 0x192   : > { %2648 = vst [vmem:[%s11891_s27 + $0xbe8] sm:$0xff] %v2647_v61  ;;  %v2775_v61 = vld [vmem:[%s11886_s26 + $0x1bd0] sm:$0xff] }
 0x193   : > { %2650 = vst [vmem:[%s11891_s27 + $0xbf0] sm:$0xff] %v2649_v62  ;;  %v2777_v62 = vld [vmem:[%s11886_s26 + $0x1be0] sm:$0xff] }
 0x194   : > { %2652 = vst [vmem:[%s11891_s27 + $0xbf8] sm:$0xff] %v2651_v63  ;;  %v2779_v63 = vld [vmem:[%s11886_s26 + $0x1bf0] sm:$0xff] }
 0x195   : > { %2654 = vst [vmem:[%s11891_s27 + $0xc00] sm:$0xff] %v2653_v0  ;;  %v2781_v0 = vld [vmem:[%s11886_s26 + $0x1c00] sm:$0xff] }
 0x196   : > { %2656 = vst [vmem:[%s11891_s27 + $0xc08] sm:$0xff] %v2655_v1  ;;  %v2783_v1 = vld [vmem:[%s11886_s26 + $0x1c10] sm:$0xff] }
 0x197   : > { %2658 = vst [vmem:[%s11891_s27 + $0xc10] sm:$0xff] %v2657_v2  ;;  %v2785_v2 = vld [vmem:[%s11886_s26 + $0x1c20] sm:$0xff] }
 0x198   : > { %2660 = vst [vmem:[%s11891_s27 + $0xc18] sm:$0xff] %v2659_v3  ;;  %v2787_v3 = vld [vmem:[%s11886_s26 + $0x1c30] sm:$0xff] }
 0x199   : > { %2662 = vst [vmem:[%s11891_s27 + $0xc20] sm:$0xff] %v2661_v4  ;;  %v2789_v4 = vld [vmem:[%s11886_s26 + $0x1c40] sm:$0xff] }
 0x19a   : > { %2664 = vst [vmem:[%s11891_s27 + $0xc28] sm:$0xff] %v2663_v5  ;;  %v2791_v5 = vld [vmem:[%s11886_s26 + $0x1c50] sm:$0xff] }
 0x19b   : > { %2666 = vst [vmem:[%s11891_s27 + $0xc30] sm:$0xff] %v2665_v6  ;;  %v2793_v6 = vld [vmem:[%s11886_s26 + $0x1c60] sm:$0xff] }
 0x19c   : > { %2668 = vst [vmem:[%s11891_s27 + $0xc38] sm:$0xff] %v2667_v7  ;;  %v2795_v7 = vld [vmem:[%s11886_s26 + $0x1c70] sm:$0xff] }
 0x19d   : > { %2670 = vst [vmem:[%s11891_s27 + $0xc40] sm:$0xff] %v2669_v8  ;;  %v2797_v8 = vld [vmem:[%s11886_s26 + $0x1c80] sm:$0xff] }
 0x19e   : > { %2672 = vst [vmem:[%s11891_s27 + $0xc48] sm:$0xff] %v2671_v9  ;;  %v2799_v9 = vld [vmem:[%s11886_s26 + $0x1c90] sm:$0xff] }
 0x19f   : > { %2674 = vst [vmem:[%s11891_s27 + $0xc50] sm:$0xff] %v2673_v10  ;;  %v2801_v10 = vld [vmem:[%s11886_s26 + $0x1ca0] sm:$0xff] }
 0x1a0   : > { %2676 = vst [vmem:[%s11891_s27 + $0xc58] sm:$0xff] %v2675_v11  ;;  %v2803_v11 = vld [vmem:[%s11886_s26 + $0x1cb0] sm:$0xff] }
 0x1a1   : > { %2678 = vst [vmem:[%s11891_s27 + $0xc60] sm:$0xff] %v2677_v12  ;;  %v2805_v12 = vld [vmem:[%s11886_s26 + $0x1cc0] sm:$0xff] }
 0x1a2   : > { %2680 = vst [vmem:[%s11891_s27 + $0xc68] sm:$0xff] %v2679_v13  ;;  %v2807_v13 = vld [vmem:[%s11886_s26 + $0x1cd0] sm:$0xff] }
 0x1a3   : > { %2682 = vst [vmem:[%s11891_s27 + $0xc70] sm:$0xff] %v2681_v14  ;;  %v2809_v14 = vld [vmem:[%s11886_s26 + $0x1ce0] sm:$0xff] }
 0x1a4   : > { %2684 = vst [vmem:[%s11891_s27 + $0xc78] sm:$0xff] %v2683_v15  ;;  %v2811_v15 = vld [vmem:[%s11886_s26 + $0x1cf0] sm:$0xff] }
 0x1a5   : > { %2686 = vst [vmem:[%s11891_s27 + $0xc80] sm:$0xff] %v2685_v16  ;;  %v2813_v16 = vld [vmem:[%s11886_s26 + $0x1d00] sm:$0xff] }
 0x1a6   : > { %2688 = vst [vmem:[%s11891_s27 + $0xc88] sm:$0xff] %v2687_v17  ;;  %v2815_v17 = vld [vmem:[%s11886_s26 + $0x1d10] sm:$0xff] }
 0x1a7   : > { %2690 = vst [vmem:[%s11891_s27 + $0xc90] sm:$0xff] %v2689_v18  ;;  %v2817_v18 = vld [vmem:[%s11886_s26 + $0x1d20] sm:$0xff] }
 0x1a8   : > { %2692 = vst [vmem:[%s11891_s27 + $0xc98] sm:$0xff] %v2691_v19  ;;  %v2819_v19 = vld [vmem:[%s11886_s26 + $0x1d30] sm:$0xff] }
 0x1a9   : > { %2694 = vst [vmem:[%s11891_s27 + $0xca0] sm:$0xff] %v2693_v20  ;;  %v2821_v20 = vld [vmem:[%s11886_s26 + $0x1d40] sm:$0xff] }
 0x1aa   : > { %2696 = vst [vmem:[%s11891_s27 + $0xca8] sm:$0xff] %v2695_v21  ;;  %v2823_v21 = vld [vmem:[%s11886_s26 + $0x1d50] sm:$0xff] }
 0x1ab   : > { %2698 = vst [vmem:[%s11891_s27 + $0xcb0] sm:$0xff] %v2697_v22  ;;  %v2825_v22 = vld [vmem:[%s11886_s26 + $0x1d60] sm:$0xff] }
 0x1ac   : > { %2700 = vst [vmem:[%s11891_s27 + $0xcb8] sm:$0xff] %v2699_v23  ;;  %v2827_v23 = vld [vmem:[%s11886_s26 + $0x1d70] sm:$0xff] }
 0x1ad   : > { %2702 = vst [vmem:[%s11891_s27 + $0xcc0] sm:$0xff] %v2701_v24  ;;  %v2829_v24 = vld [vmem:[%s11886_s26 + $0x1d80] sm:$0xff] }
 0x1ae   : > { %2704 = vst [vmem:[%s11891_s27 + $0xcc8] sm:$0xff] %v2703_v25  ;;  %v2831_v25 = vld [vmem:[%s11886_s26 + $0x1d90] sm:$0xff] }
 0x1af   : > { %2706 = vst [vmem:[%s11891_s27 + $0xcd0] sm:$0xff] %v2705_v26  ;;  %v2833_v26 = vld [vmem:[%s11886_s26 + $0x1da0] sm:$0xff] }
 0x1b0   : > { %2708 = vst [vmem:[%s11891_s27 + $0xcd8] sm:$0xff] %v2707_v27  ;;  %v2835_v27 = vld [vmem:[%s11886_s26 + $0x1db0] sm:$0xff] }
 0x1b1   : > { %2710 = vst [vmem:[%s11891_s27 + $0xce0] sm:$0xff] %v2709_v28  ;;  %v2837_v28 = vld [vmem:[%s11886_s26 + $0x1dc0] sm:$0xff] }
 0x1b2   : > { %2712 = vst [vmem:[%s11891_s27 + $0xce8] sm:$0xff] %v2711_v29  ;;  %v2839_v29 = vld [vmem:[%s11886_s26 + $0x1dd0] sm:$0xff] }
 0x1b3   : > { %2714 = vst [vmem:[%s11891_s27 + $0xcf0] sm:$0xff] %v2713_v30  ;;  %v2841_v30 = vld [vmem:[%s11886_s26 + $0x1de0] sm:$0xff] }
 0x1b4   : > { %2716 = vst [vmem:[%s11891_s27 + $0xcf8] sm:$0xff] %v2715_v31  ;;  %v2843_v31 = vld [vmem:[%s11886_s26 + $0x1df0] sm:$0xff] }
 0x1b5   : > { %2718 = vst [vmem:[%s11891_s27 + $0xd00] sm:$0xff] %v2717_v32  ;;  %v2845_v32 = vld [vmem:[%s11886_s26 + $0x1e00] sm:$0xff] }
 0x1b6   : > { %2720 = vst [vmem:[%s11891_s27 + $0xd08] sm:$0xff] %v2719_v33  ;;  %v2847_v33 = vld [vmem:[%s11886_s26 + $0x1e10] sm:$0xff] }
 0x1b7   : > { %2722 = vst [vmem:[%s11891_s27 + $0xd10] sm:$0xff] %v2721_v34  ;;  %v2849_v34 = vld [vmem:[%s11886_s26 + $0x1e20] sm:$0xff] }
 0x1b8   : > { %2724 = vst [vmem:[%s11891_s27 + $0xd18] sm:$0xff] %v2723_v35  ;;  %v2851_v35 = vld [vmem:[%s11886_s26 + $0x1e30] sm:$0xff] }
 0x1b9   : > { %2726 = vst [vmem:[%s11891_s27 + $0xd20] sm:$0xff] %v2725_v36  ;;  %v2853_v36 = vld [vmem:[%s11886_s26 + $0x1e40] sm:$0xff] }
 0x1ba   : > { %2728 = vst [vmem:[%s11891_s27 + $0xd28] sm:$0xff] %v2727_v37  ;;  %v2855_v37 = vld [vmem:[%s11886_s26 + $0x1e50] sm:$0xff] }
 0x1bb   : > { %2730 = vst [vmem:[%s11891_s27 + $0xd30] sm:$0xff] %v2729_v38  ;;  %v2857_v38 = vld [vmem:[%s11886_s26 + $0x1e60] sm:$0xff] }
 0x1bc   : > { %2732 = vst [vmem:[%s11891_s27 + $0xd38] sm:$0xff] %v2731_v39  ;;  %v2859_v39 = vld [vmem:[%s11886_s26 + $0x1e70] sm:$0xff] }
 0x1bd   : > { %2734 = vst [vmem:[%s11891_s27 + $0xd40] sm:$0xff] %v2733_v40  ;;  %v2861_v40 = vld [vmem:[%s11886_s26 + $0x1e80] sm:$0xff] }
 0x1be   : > { %2736 = vst [vmem:[%s11891_s27 + $0xd48] sm:$0xff] %v2735_v41  ;;  %v2863_v41 = vld [vmem:[%s11886_s26 + $0x1e90] sm:$0xff] }
 0x1bf   : > { %2738 = vst [vmem:[%s11891_s27 + $0xd50] sm:$0xff] %v2737_v42  ;;  %v2865_v42 = vld [vmem:[%s11886_s26 + $0x1ea0] sm:$0xff] }
 0x1c0   : > { %2740 = vst [vmem:[%s11891_s27 + $0xd58] sm:$0xff] %v2739_v43  ;;  %v2867_v43 = vld [vmem:[%s11886_s26 + $0x1eb0] sm:$0xff] }
 0x1c1   : > { %2742 = vst [vmem:[%s11891_s27 + $0xd60] sm:$0xff] %v2741_v44  ;;  %v2869_v44 = vld [vmem:[%s11886_s26 + $0x1ec0] sm:$0xff] }
 0x1c2   : > { %2744 = vst [vmem:[%s11891_s27 + $0xd68] sm:$0xff] %v2743_v45  ;;  %v2871_v45 = vld [vmem:[%s11886_s26 + $0x1ed0] sm:$0xff] }
 0x1c3   : > { %2746 = vst [vmem:[%s11891_s27 + $0xd70] sm:$0xff] %v2745_v46  ;;  %v2873_v46 = vld [vmem:[%s11886_s26 + $0x1ee0] sm:$0xff] }
 0x1c4   : > { %2748 = vst [vmem:[%s11891_s27 + $0xd78] sm:$0xff] %v2747_v47  ;;  %v2875_v47 = vld [vmem:[%s11886_s26 + $0x1ef0] sm:$0xff] }
 0x1c5   : > { %2750 = vst [vmem:[%s11891_s27 + $0xd80] sm:$0xff] %v2749_v48  ;;  %v2877_v48 = vld [vmem:[%s11886_s26 + $0x1f00] sm:$0xff] }
 0x1c6   : > { %2752 = vst [vmem:[%s11891_s27 + $0xd88] sm:$0xff] %v2751_v49  ;;  %v2879_v49 = vld [vmem:[%s11886_s26 + $0x1f10] sm:$0xff] }
 0x1c7   : > { %2754 = vst [vmem:[%s11891_s27 + $0xd90] sm:$0xff] %v2753_v50  ;;  %v2881_v50 = vld [vmem:[%s11886_s26 + $0x1f20] sm:$0xff] }
 0x1c8   : > { %2756 = vst [vmem:[%s11891_s27 + $0xd98] sm:$0xff] %v2755_v51  ;;  %v2883_v51 = vld [vmem:[%s11886_s26 + $0x1f30] sm:$0xff] }
 0x1c9   : > { %2758 = vst [vmem:[%s11891_s27 + $0xda0] sm:$0xff] %v2757_v52  ;;  %v2885_v52 = vld [vmem:[%s11886_s26 + $0x1f40] sm:$0xff] }
 0x1ca   : > { %2760 = vst [vmem:[%s11891_s27 + $0xda8] sm:$0xff] %v2759_v53  ;;  %v2887_v53 = vld [vmem:[%s11886_s26 + $0x1f50] sm:$0xff] }
 0x1cb   : > { %2762 = vst [vmem:[%s11891_s27 + $0xdb0] sm:$0xff] %v2761_v54  ;;  %v2889_v54 = vld [vmem:[%s11886_s26 + $0x1f60] sm:$0xff] }
 0x1cc   : > { %2764 = vst [vmem:[%s11891_s27 + $0xdb8] sm:$0xff] %v2763_v55  ;;  %v2891_v55 = vld [vmem:[%s11886_s26 + $0x1f70] sm:$0xff] }
 0x1cd   : > { %2766 = vst [vmem:[%s11891_s27 + $0xdc0] sm:$0xff] %v2765_v56  ;;  %v2893_v56 = vld [vmem:[%s11886_s26 + $0x1f80] sm:$0xff] }
 0x1ce   : > { %2768 = vst [vmem:[%s11891_s27 + $0xdc8] sm:$0xff] %v2767_v57  ;;  %v2895_v57 = vld [vmem:[%s11886_s26 + $0x1f90] sm:$0xff] }
 0x1cf   : > { %2770 = vst [vmem:[%s11891_s27 + $0xdd0] sm:$0xff] %v2769_v58  ;;  %v2897_v58 = vld [vmem:[%s11886_s26 + $0x1fa0] sm:$0xff] }
 0x1d0   : > { %2772 = vst [vmem:[%s11891_s27 + $0xdd8] sm:$0xff] %v2771_v59  ;;  %v2899_v59 = vld [vmem:[%s11886_s26 + $0x1fb0] sm:$0xff] }
 0x1d1   : > { %2774 = vst [vmem:[%s11891_s27 + $0xde0] sm:$0xff] %v2773_v60  ;;  %v2901_v60 = vld [vmem:[%s11886_s26 + $0x1fc0] sm:$0xff] }
 0x1d2   : > { %2776 = vst [vmem:[%s11891_s27 + $0xde8] sm:$0xff] %v2775_v61  ;;  %v2903_v61 = vld [vmem:[%s11886_s26 + $0x1fd0] sm:$0xff] }
 0x1d3   : > { %2778 = vst [vmem:[%s11891_s27 + $0xdf0] sm:$0xff] %v2777_v62  ;;  %v2905_v62 = vld [vmem:[%s11886_s26 + $0x1fe0] sm:$0xff] }
 0x1d4   : > { %2780 = vst [vmem:[%s11891_s27 + $0xdf8] sm:$0xff] %v2779_v63  ;;  %v2907_v63 = vld [vmem:[%s11886_s26 + $0x1ff0] sm:$0xff] }
 0x1d5   : > { %2782 = vst [vmem:[%s11891_s27 + $0xe00] sm:$0xff] %v2781_v0  ;;  %v2909_v0 = vld [vmem:[%s11886_s26 + $0x2000] sm:$0xff] }
 0x1d6   : > { %2784 = vst [vmem:[%s11891_s27 + $0xe08] sm:$0xff] %v2783_v1  ;;  %v2911_v1 = vld [vmem:[%s11886_s26 + $0x2010] sm:$0xff] }
 0x1d7   : > { %2786 = vst [vmem:[%s11891_s27 + $0xe10] sm:$0xff] %v2785_v2  ;;  %v2913_v2 = vld [vmem:[%s11886_s26 + $0x2020] sm:$0xff] }
 0x1d8   : > { %2788 = vst [vmem:[%s11891_s27 + $0xe18] sm:$0xff] %v2787_v3  ;;  %v2915_v3 = vld [vmem:[%s11886_s26 + $0x2030] sm:$0xff] }
 0x1d9   : > { %2790 = vst [vmem:[%s11891_s27 + $0xe20] sm:$0xff] %v2789_v4  ;;  %v2917_v4 = vld [vmem:[%s11886_s26 + $0x2040] sm:$0xff] }
 0x1da   : > { %2792 = vst [vmem:[%s11891_s27 + $0xe28] sm:$0xff] %v2791_v5  ;;  %v2919_v5 = vld [vmem:[%s11886_s26 + $0x2050] sm:$0xff] }
 0x1db   : > { %2794 = vst [vmem:[%s11891_s27 + $0xe30] sm:$0xff] %v2793_v6  ;;  %v2921_v6 = vld [vmem:[%s11886_s26 + $0x2060] sm:$0xff] }
 0x1dc   : > { %2796 = vst [vmem:[%s11891_s27 + $0xe38] sm:$0xff] %v2795_v7  ;;  %v2923_v7 = vld [vmem:[%s11886_s26 + $0x2070] sm:$0xff] }
 0x1dd   : > { %2798 = vst [vmem:[%s11891_s27 + $0xe40] sm:$0xff] %v2797_v8  ;;  %v2925_v8 = vld [vmem:[%s11886_s26 + $0x2080] sm:$0xff] }
 0x1de   : > { %2800 = vst [vmem:[%s11891_s27 + $0xe48] sm:$0xff] %v2799_v9  ;;  %v2927_v9 = vld [vmem:[%s11886_s26 + $0x2090] sm:$0xff] }
 0x1df   : > { %2802 = vst [vmem:[%s11891_s27 + $0xe50] sm:$0xff] %v2801_v10  ;;  %v2929_v10 = vld [vmem:[%s11886_s26 + $0x20a0] sm:$0xff] }
 0x1e0   : > { %2804 = vst [vmem:[%s11891_s27 + $0xe58] sm:$0xff] %v2803_v11  ;;  %v2931_v11 = vld [vmem:[%s11886_s26 + $0x20b0] sm:$0xff] }
 0x1e1   : > { %2806 = vst [vmem:[%s11891_s27 + $0xe60] sm:$0xff] %v2805_v12  ;;  %v2933_v12 = vld [vmem:[%s11886_s26 + $0x20c0] sm:$0xff] }
 0x1e2   : > { %2808 = vst [vmem:[%s11891_s27 + $0xe68] sm:$0xff] %v2807_v13  ;;  %v2935_v13 = vld [vmem:[%s11886_s26 + $0x20d0] sm:$0xff] }
 0x1e3   : > { %2810 = vst [vmem:[%s11891_s27 + $0xe70] sm:$0xff] %v2809_v14  ;;  %v2937_v14 = vld [vmem:[%s11886_s26 + $0x20e0] sm:$0xff] }
 0x1e4   : > { %2812 = vst [vmem:[%s11891_s27 + $0xe78] sm:$0xff] %v2811_v15  ;;  %v2939_v15 = vld [vmem:[%s11886_s26 + $0x20f0] sm:$0xff] }
 0x1e5   : > { %2814 = vst [vmem:[%s11891_s27 + $0xe80] sm:$0xff] %v2813_v16  ;;  %v2941_v16 = vld [vmem:[%s11886_s26 + $0x2100] sm:$0xff] }
 0x1e6   : > { %2816 = vst [vmem:[%s11891_s27 + $0xe88] sm:$0xff] %v2815_v17  ;;  %v2943_v17 = vld [vmem:[%s11886_s26 + $0x2110] sm:$0xff] }
 0x1e7   : > { %2818 = vst [vmem:[%s11891_s27 + $0xe90] sm:$0xff] %v2817_v18  ;;  %v2945_v18 = vld [vmem:[%s11886_s26 + $0x2120] sm:$0xff] }
 0x1e8   : > { %2820 = vst [vmem:[%s11891_s27 + $0xe98] sm:$0xff] %v2819_v19  ;;  %v2947_v19 = vld [vmem:[%s11886_s26 + $0x2130] sm:$0xff] }
 0x1e9   : > { %2822 = vst [vmem:[%s11891_s27 + $0xea0] sm:$0xff] %v2821_v20  ;;  %v2949_v20 = vld [vmem:[%s11886_s26 + $0x2140] sm:$0xff] }
 0x1ea   : > { %2824 = vst [vmem:[%s11891_s27 + $0xea8] sm:$0xff] %v2823_v21  ;;  %v2951_v21 = vld [vmem:[%s11886_s26 + $0x2150] sm:$0xff] }
 0x1eb   : > { %2826 = vst [vmem:[%s11891_s27 + $0xeb0] sm:$0xff] %v2825_v22  ;;  %v2953_v22 = vld [vmem:[%s11886_s26 + $0x2160] sm:$0xff] }
 0x1ec   : > { %2828 = vst [vmem:[%s11891_s27 + $0xeb8] sm:$0xff] %v2827_v23  ;;  %v2955_v23 = vld [vmem:[%s11886_s26 + $0x2170] sm:$0xff] }
 0x1ed   : > { %2830 = vst [vmem:[%s11891_s27 + $0xec0] sm:$0xff] %v2829_v24  ;;  %v2957_v24 = vld [vmem:[%s11886_s26 + $0x2180] sm:$0xff] }
 0x1ee   : > { %2832 = vst [vmem:[%s11891_s27 + $0xec8] sm:$0xff] %v2831_v25  ;;  %v2959_v25 = vld [vmem:[%s11886_s26 + $0x2190] sm:$0xff] }
 0x1ef   : > { %2834 = vst [vmem:[%s11891_s27 + $0xed0] sm:$0xff] %v2833_v26  ;;  %v2961_v26 = vld [vmem:[%s11886_s26 + $0x21a0] sm:$0xff] }
 0x1f0   : > { %2836 = vst [vmem:[%s11891_s27 + $0xed8] sm:$0xff] %v2835_v27  ;;  %v2963_v27 = vld [vmem:[%s11886_s26 + $0x21b0] sm:$0xff] }
 0x1f1   : > { %2838 = vst [vmem:[%s11891_s27 + $0xee0] sm:$0xff] %v2837_v28  ;;  %v2965_v28 = vld [vmem:[%s11886_s26 + $0x21c0] sm:$0xff] }
 0x1f2   : > { %2840 = vst [vmem:[%s11891_s27 + $0xee8] sm:$0xff] %v2839_v29  ;;  %v2967_v29 = vld [vmem:[%s11886_s26 + $0x21d0] sm:$0xff] }
 0x1f3   : > { %2842 = vst [vmem:[%s11891_s27 + $0xef0] sm:$0xff] %v2841_v30  ;;  %v2969_v30 = vld [vmem:[%s11886_s26 + $0x21e0] sm:$0xff] }
 0x1f4   : > { %2844 = vst [vmem:[%s11891_s27 + $0xef8] sm:$0xff] %v2843_v31  ;;  %v2971_v31 = vld [vmem:[%s11886_s26 + $0x21f0] sm:$0xff] }
 0x1f5   : > { %2846 = vst [vmem:[%s11891_s27 + $0xf00] sm:$0xff] %v2845_v32  ;;  %v2973_v32 = vld [vmem:[%s11886_s26 + $0x2200] sm:$0xff] }
 0x1f6   : > { %2848 = vst [vmem:[%s11891_s27 + $0xf08] sm:$0xff] %v2847_v33  ;;  %v2975_v33 = vld [vmem:[%s11886_s26 + $0x2210] sm:$0xff] }
 0x1f7   : > { %2850 = vst [vmem:[%s11891_s27 + $0xf10] sm:$0xff] %v2849_v34  ;;  %v2977_v34 = vld [vmem:[%s11886_s26 + $0x2220] sm:$0xff] }
 0x1f8   : > { %2852 = vst [vmem:[%s11891_s27 + $0xf18] sm:$0xff] %v2851_v35  ;;  %v2979_v35 = vld [vmem:[%s11886_s26 + $0x2230] sm:$0xff] }
 0x1f9   : > { %2854 = vst [vmem:[%s11891_s27 + $0xf20] sm:$0xff] %v2853_v36  ;;  %v2981_v36 = vld [vmem:[%s11886_s26 + $0x2240] sm:$0xff] }
 0x1fa   : > { %2856 = vst [vmem:[%s11891_s27 + $0xf28] sm:$0xff] %v2855_v37  ;;  %v2983_v37 = vld [vmem:[%s11886_s26 + $0x2250] sm:$0xff] }
 0x1fb   : > { %2858 = vst [vmem:[%s11891_s27 + $0xf30] sm:$0xff] %v2857_v38  ;;  %v2985_v38 = vld [vmem:[%s11886_s26 + $0x2260] sm:$0xff] }
 0x1fc   : > { %2860 = vst [vmem:[%s11891_s27 + $0xf38] sm:$0xff] %v2859_v39  ;;  %v2987_v39 = vld [vmem:[%s11886_s26 + $0x2270] sm:$0xff] }
 0x1fd   : > { %2862 = vst [vmem:[%s11891_s27 + $0xf40] sm:$0xff] %v2861_v40  ;;  %v2989_v40 = vld [vmem:[%s11886_s26 + $0x2280] sm:$0xff] }
 0x1fe   : > { %2864 = vst [vmem:[%s11891_s27 + $0xf48] sm:$0xff] %v2863_v41  ;;  %v2991_v41 = vld [vmem:[%s11886_s26 + $0x2290] sm:$0xff] }
 0x1ff   : > { %2866 = vst [vmem:[%s11891_s27 + $0xf50] sm:$0xff] %v2865_v42  ;;  %v2993_v42 = vld [vmem:[%s11886_s26 + $0x22a0] sm:$0xff] }
 0x200   : > { %2868 = vst [vmem:[%s11891_s27 + $0xf58] sm:$0xff] %v2867_v43  ;;  %v2995_v43 = vld [vmem:[%s11886_s26 + $0x22b0] sm:$0xff] }
 0x201   : > { %2870 = vst [vmem:[%s11891_s27 + $0xf60] sm:$0xff] %v2869_v44  ;;  %v2997_v44 = vld [vmem:[%s11886_s26 + $0x22c0] sm:$0xff] }
 0x202   : > { %2872 = vst [vmem:[%s11891_s27 + $0xf68] sm:$0xff] %v2871_v45  ;;  %v2999_v45 = vld [vmem:[%s11886_s26 + $0x22d0] sm:$0xff] }
 0x203   : > { %2874 = vst [vmem:[%s11891_s27 + $0xf70] sm:$0xff] %v2873_v46  ;;  %v3001_v46 = vld [vmem:[%s11886_s26 + $0x22e0] sm:$0xff] }
 0x204   : > { %2876 = vst [vmem:[%s11891_s27 + $0xf78] sm:$0xff] %v2875_v47  ;;  %v3003_v47 = vld [vmem:[%s11886_s26 + $0x22f0] sm:$0xff] }
 0x205   : > { %2878 = vst [vmem:[%s11891_s27 + $0xf80] sm:$0xff] %v2877_v48  ;;  %v3005_v48 = vld [vmem:[%s11886_s26 + $0x2300] sm:$0xff] }
 0x206   : > { %2880 = vst [vmem:[%s11891_s27 + $0xf88] sm:$0xff] %v2879_v49  ;;  %v3007_v49 = vld [vmem:[%s11886_s26 + $0x2310] sm:$0xff] }
 0x207   : > { %2882 = vst [vmem:[%s11891_s27 + $0xf90] sm:$0xff] %v2881_v50  ;;  %v3009_v50 = vld [vmem:[%s11886_s26 + $0x2320] sm:$0xff] }
 0x208   : > { %2884 = vst [vmem:[%s11891_s27 + $0xf98] sm:$0xff] %v2883_v51  ;;  %v3011_v51 = vld [vmem:[%s11886_s26 + $0x2330] sm:$0xff] }
 0x209   : > { %2886 = vst [vmem:[%s11891_s27 + $0xfa0] sm:$0xff] %v2885_v52  ;;  %v3013_v52 = vld [vmem:[%s11886_s26 + $0x2340] sm:$0xff] }
 0x20a   : > { %2888 = vst [vmem:[%s11891_s27 + $0xfa8] sm:$0xff] %v2887_v53  ;;  %v3015_v53 = vld [vmem:[%s11886_s26 + $0x2350] sm:$0xff] }
 0x20b   : > { %2890 = vst [vmem:[%s11891_s27 + $0xfb0] sm:$0xff] %v2889_v54  ;;  %v3017_v54 = vld [vmem:[%s11886_s26 + $0x2360] sm:$0xff] }
 0x20c   : > { %2892 = vst [vmem:[%s11891_s27 + $0xfb8] sm:$0xff] %v2891_v55  ;;  %v3019_v55 = vld [vmem:[%s11886_s26 + $0x2370] sm:$0xff] }
 0x20d   : > { %2894 = vst [vmem:[%s11891_s27 + $0xfc0] sm:$0xff] %v2893_v56  ;;  %v3021_v56 = vld [vmem:[%s11886_s26 + $0x2380] sm:$0xff] }
 0x20e   : > { %2896 = vst [vmem:[%s11891_s27 + $0xfc8] sm:$0xff] %v2895_v57  ;;  %v3023_v57 = vld [vmem:[%s11886_s26 + $0x2390] sm:$0xff] }
 0x20f   : > { %2898 = vst [vmem:[%s11891_s27 + $0xfd0] sm:$0xff] %v2897_v58  ;;  %v3025_v58 = vld [vmem:[%s11886_s26 + $0x23a0] sm:$0xff] }
 0x210   : > { %2900 = vst [vmem:[%s11891_s27 + $0xfd8] sm:$0xff] %v2899_v59  ;;  %v3027_v59 = vld [vmem:[%s11886_s26 + $0x23b0] sm:$0xff] }
 0x211   : > { %2902 = vst [vmem:[%s11891_s27 + $0xfe0] sm:$0xff] %v2901_v60  ;;  %v3029_v60 = vld [vmem:[%s11886_s26 + $0x23c0] sm:$0xff] }
 0x212   : > { %2904 = vst [vmem:[%s11891_s27 + $0xfe8] sm:$0xff] %v2903_v61  ;;  %v3031_v61 = vld [vmem:[%s11886_s26 + $0x23d0] sm:$0xff] }
 0x213   : > { %2906 = vst [vmem:[%s11891_s27 + $0xff0] sm:$0xff] %v2905_v62  ;;  %v3033_v62 = vld [vmem:[%s11886_s26 + $0x23e0] sm:$0xff] }
 0x214   : > { %2908 = vst [vmem:[%s11891_s27 + $0xff8] sm:$0xff] %v2907_v63  ;;  %v3035_v63 = vld [vmem:[%s11886_s26 + $0x23f0] sm:$0xff] }
 0x215   : > { %2910 = vst [vmem:[%s11891_s27 + $0x1000] sm:$0xff] %v2909_v0  ;;  %v3037_v0 = vld [vmem:[%s11886_s26 + $0x2400] sm:$0xff] }
 0x216   : > { %2912 = vst [vmem:[%s11891_s27 + $0x1008] sm:$0xff] %v2911_v1  ;;  %v3039_v1 = vld [vmem:[%s11886_s26 + $0x2410] sm:$0xff] }
 0x217   : > { %2914 = vst [vmem:[%s11891_s27 + $0x1010] sm:$0xff] %v2913_v2  ;;  %v3041_v2 = vld [vmem:[%s11886_s26 + $0x2420] sm:$0xff] }
 0x218   : > { %2916 = vst [vmem:[%s11891_s27 + $0x1018] sm:$0xff] %v2915_v3  ;;  %v3043_v3 = vld [vmem:[%s11886_s26 + $0x2430] sm:$0xff] }
 0x219   : > { %2918 = vst [vmem:[%s11891_s27 + $0x1020] sm:$0xff] %v2917_v4  ;;  %v3045_v4 = vld [vmem:[%s11886_s26 + $0x2440] sm:$0xff] }
 0x21a   : > { %2920 = vst [vmem:[%s11891_s27 + $0x1028] sm:$0xff] %v2919_v5  ;;  %v3047_v5 = vld [vmem:[%s11886_s26 + $0x2450] sm:$0xff] }
 0x21b   : > { %2922 = vst [vmem:[%s11891_s27 + $0x1030] sm:$0xff] %v2921_v6  ;;  %v3049_v6 = vld [vmem:[%s11886_s26 + $0x2460] sm:$0xff] }
 0x21c   : > { %2924 = vst [vmem:[%s11891_s27 + $0x1038] sm:$0xff] %v2923_v7  ;;  %v3051_v7 = vld [vmem:[%s11886_s26 + $0x2470] sm:$0xff] }
 0x21d   : > { %2926 = vst [vmem:[%s11891_s27 + $0x1040] sm:$0xff] %v2925_v8  ;;  %v3053_v8 = vld [vmem:[%s11886_s26 + $0x2480] sm:$0xff] }
 0x21e   : > { %2928 = vst [vmem:[%s11891_s27 + $0x1048] sm:$0xff] %v2927_v9  ;;  %v3055_v9 = vld [vmem:[%s11886_s26 + $0x2490] sm:$0xff] }
 0x21f   : > { %2930 = vst [vmem:[%s11891_s27 + $0x1050] sm:$0xff] %v2929_v10  ;;  %v3057_v10 = vld [vmem:[%s11886_s26 + $0x24a0] sm:$0xff] }
 0x220   : > { %2932 = vst [vmem:[%s11891_s27 + $0x1058] sm:$0xff] %v2931_v11  ;;  %v3059_v11 = vld [vmem:[%s11886_s26 + $0x24b0] sm:$0xff] }
 0x221   : > { %2934 = vst [vmem:[%s11891_s27 + $0x1060] sm:$0xff] %v2933_v12  ;;  %v3061_v12 = vld [vmem:[%s11886_s26 + $0x24c0] sm:$0xff] }
 0x222   : > { %2936 = vst [vmem:[%s11891_s27 + $0x1068] sm:$0xff] %v2935_v13  ;;  %v3063_v13 = vld [vmem:[%s11886_s26 + $0x24d0] sm:$0xff] }
 0x223   : > { %2938 = vst [vmem:[%s11891_s27 + $0x1070] sm:$0xff] %v2937_v14  ;;  %v3065_v14 = vld [vmem:[%s11886_s26 + $0x24e0] sm:$0xff] }
 0x224   : > { %2940 = vst [vmem:[%s11891_s27 + $0x1078] sm:$0xff] %v2939_v15  ;;  %v3067_v15 = vld [vmem:[%s11886_s26 + $0x24f0] sm:$0xff] }
 0x225   : > { %2942 = vst [vmem:[%s11891_s27 + $0x1080] sm:$0xff] %v2941_v16  ;;  %v3069_v16 = vld [vmem:[%s11886_s26 + $0x2500] sm:$0xff] }
 0x226   : > { %2944 = vst [vmem:[%s11891_s27 + $0x1088] sm:$0xff] %v2943_v17  ;;  %v3071_v17 = vld [vmem:[%s11886_s26 + $0x2510] sm:$0xff] }
 0x227   : > { %2946 = vst [vmem:[%s11891_s27 + $0x1090] sm:$0xff] %v2945_v18  ;;  %v3073_v18 = vld [vmem:[%s11886_s26 + $0x2520] sm:$0xff] }
 0x228   : > { %2948 = vst [vmem:[%s11891_s27 + $0x1098] sm:$0xff] %v2947_v19  ;;  %v3075_v19 = vld [vmem:[%s11886_s26 + $0x2530] sm:$0xff] }
 0x229   : > { %2950 = vst [vmem:[%s11891_s27 + $0x10a0] sm:$0xff] %v2949_v20  ;;  %v3077_v20 = vld [vmem:[%s11886_s26 + $0x2540] sm:$0xff] }
 0x22a   : > { %2952 = vst [vmem:[%s11891_s27 + $0x10a8] sm:$0xff] %v2951_v21  ;;  %v3079_v21 = vld [vmem:[%s11886_s26 + $0x2550] sm:$0xff] }
 0x22b   : > { %2954 = vst [vmem:[%s11891_s27 + $0x10b0] sm:$0xff] %v2953_v22  ;;  %v3081_v22 = vld [vmem:[%s11886_s26 + $0x2560] sm:$0xff] }
 0x22c   : > { %2956 = vst [vmem:[%s11891_s27 + $0x10b8] sm:$0xff] %v2955_v23  ;;  %v3083_v23 = vld [vmem:[%s11886_s26 + $0x2570] sm:$0xff] }
 0x22d   : > { %2958 = vst [vmem:[%s11891_s27 + $0x10c0] sm:$0xff] %v2957_v24  ;;  %v3085_v24 = vld [vmem:[%s11886_s26 + $0x2580] sm:$0xff] }
 0x22e   : > { %2960 = vst [vmem:[%s11891_s27 + $0x10c8] sm:$0xff] %v2959_v25  ;;  %v3087_v25 = vld [vmem:[%s11886_s26 + $0x2590] sm:$0xff] }
 0x22f   : > { %2962 = vst [vmem:[%s11891_s27 + $0x10d0] sm:$0xff] %v2961_v26  ;;  %v3089_v26 = vld [vmem:[%s11886_s26 + $0x25a0] sm:$0xff] }
 0x230   : > { %2964 = vst [vmem:[%s11891_s27 + $0x10d8] sm:$0xff] %v2963_v27  ;;  %v3091_v27 = vld [vmem:[%s11886_s26 + $0x25b0] sm:$0xff] }
 0x231   : > { %2966 = vst [vmem:[%s11891_s27 + $0x10e0] sm:$0xff] %v2965_v28  ;;  %v3093_v28 = vld [vmem:[%s11886_s26 + $0x25c0] sm:$0xff] }
 0x232   : > { %2968 = vst [vmem:[%s11891_s27 + $0x10e8] sm:$0xff] %v2967_v29  ;;  %v3095_v29 = vld [vmem:[%s11886_s26 + $0x25d0] sm:$0xff] }
 0x233   : > { %2970 = vst [vmem:[%s11891_s27 + $0x10f0] sm:$0xff] %v2969_v30  ;;  %v3097_v30 = vld [vmem:[%s11886_s26 + $0x25e0] sm:$0xff] }
 0x234   : > { %2972 = vst [vmem:[%s11891_s27 + $0x10f8] sm:$0xff] %v2971_v31  ;;  %v3099_v31 = vld [vmem:[%s11886_s26 + $0x25f0] sm:$0xff] }
 0x235   : > { %2974 = vst [vmem:[%s11891_s27 + $0x1100] sm:$0xff] %v2973_v32  ;;  %v3101_v32 = vld [vmem:[%s11886_s26 + $0x2600] sm:$0xff] }
 0x236   : > { %2976 = vst [vmem:[%s11891_s27 + $0x1108] sm:$0xff] %v2975_v33  ;;  %v3103_v33 = vld [vmem:[%s11886_s26 + $0x2610] sm:$0xff] }
 0x237   : > { %2978 = vst [vmem:[%s11891_s27 + $0x1110] sm:$0xff] %v2977_v34  ;;  %v3105_v34 = vld [vmem:[%s11886_s26 + $0x2620] sm:$0xff] }
 0x238   : > { %2980 = vst [vmem:[%s11891_s27 + $0x1118] sm:$0xff] %v2979_v35  ;;  %v3107_v35 = vld [vmem:[%s11886_s26 + $0x2630] sm:$0xff] }
 0x239   : > { %2982 = vst [vmem:[%s11891_s27 + $0x1120] sm:$0xff] %v2981_v36  ;;  %v3109_v36 = vld [vmem:[%s11886_s26 + $0x2640] sm:$0xff] }
 0x23a   : > { %2984 = vst [vmem:[%s11891_s27 + $0x1128] sm:$0xff] %v2983_v37  ;;  %v3111_v37 = vld [vmem:[%s11886_s26 + $0x2650] sm:$0xff] }
 0x23b   : > { %2986 = vst [vmem:[%s11891_s27 + $0x1130] sm:$0xff] %v2985_v38  ;;  %v3113_v38 = vld [vmem:[%s11886_s26 + $0x2660] sm:$0xff] }
 0x23c   : > { %2988 = vst [vmem:[%s11891_s27 + $0x1138] sm:$0xff] %v2987_v39  ;;  %v3115_v39 = vld [vmem:[%s11886_s26 + $0x2670] sm:$0xff] }
 0x23d   : > { %2990 = vst [vmem:[%s11891_s27 + $0x1140] sm:$0xff] %v2989_v40  ;;  %v3117_v40 = vld [vmem:[%s11886_s26 + $0x2680] sm:$0xff] }
 0x23e   : > { %2992 = vst [vmem:[%s11891_s27 + $0x1148] sm:$0xff] %v2991_v41  ;;  %v3119_v41 = vld [vmem:[%s11886_s26 + $0x2690] sm:$0xff] }
 0x23f   : > { %2994 = vst [vmem:[%s11891_s27 + $0x1150] sm:$0xff] %v2993_v42  ;;  %v3121_v42 = vld [vmem:[%s11886_s26 + $0x26a0] sm:$0xff] }
 0x240   : > { %2996 = vst [vmem:[%s11891_s27 + $0x1158] sm:$0xff] %v2995_v43  ;;  %v3123_v43 = vld [vmem:[%s11886_s26 + $0x26b0] sm:$0xff] }
 0x241   : > { %2998 = vst [vmem:[%s11891_s27 + $0x1160] sm:$0xff] %v2997_v44  ;;  %v3125_v44 = vld [vmem:[%s11886_s26 + $0x26c0] sm:$0xff] }
 0x242   : > { %3000 = vst [vmem:[%s11891_s27 + $0x1168] sm:$0xff] %v2999_v45  ;;  %v3127_v45 = vld [vmem:[%s11886_s26 + $0x26d0] sm:$0xff] }
 0x243   : > { %3002 = vst [vmem:[%s11891_s27 + $0x1170] sm:$0xff] %v3001_v46  ;;  %v3129_v46 = vld [vmem:[%s11886_s26 + $0x26e0] sm:$0xff] }
 0x244   : > { %3004 = vst [vmem:[%s11891_s27 + $0x1178] sm:$0xff] %v3003_v47  ;;  %v3131_v47 = vld [vmem:[%s11886_s26 + $0x26f0] sm:$0xff] }
 0x245   : > { %3006 = vst [vmem:[%s11891_s27 + $0x1180] sm:$0xff] %v3005_v48  ;;  %v3133_v48 = vld [vmem:[%s11886_s26 + $0x2700] sm:$0xff] }
 0x246   : > { %3008 = vst [vmem:[%s11891_s27 + $0x1188] sm:$0xff] %v3007_v49  ;;  %v3135_v49 = vld [vmem:[%s11886_s26 + $0x2710] sm:$0xff] }
 0x247   : > { %3010 = vst [vmem:[%s11891_s27 + $0x1190] sm:$0xff] %v3009_v50  ;;  %v3137_v50 = vld [vmem:[%s11886_s26 + $0x2720] sm:$0xff] }
 0x248   : > { %3012 = vst [vmem:[%s11891_s27 + $0x1198] sm:$0xff] %v3011_v51  ;;  %v3139_v51 = vld [vmem:[%s11886_s26 + $0x2730] sm:$0xff] }
 0x249   : > { %3014 = vst [vmem:[%s11891_s27 + $0x11a0] sm:$0xff] %v3013_v52  ;;  %v3141_v52 = vld [vmem:[%s11886_s26 + $0x2740] sm:$0xff] }
 0x24a   : > { %3016 = vst [vmem:[%s11891_s27 + $0x11a8] sm:$0xff] %v3015_v53  ;;  %v3143_v53 = vld [vmem:[%s11886_s26 + $0x2750] sm:$0xff] }
 0x24b   : > { %3018 = vst [vmem:[%s11891_s27 + $0x11b0] sm:$0xff] %v3017_v54  ;;  %v3145_v54 = vld [vmem:[%s11886_s26 + $0x2760] sm:$0xff] }
 0x24c   : > { %3020 = vst [vmem:[%s11891_s27 + $0x11b8] sm:$0xff] %v3019_v55  ;;  %v3147_v55 = vld [vmem:[%s11886_s26 + $0x2770] sm:$0xff] }
 0x24d   : > { %3022 = vst [vmem:[%s11891_s27 + $0x11c0] sm:$0xff] %v3021_v56  ;;  %v3149_v56 = vld [vmem:[%s11886_s26 + $0x2780] sm:$0xff] }
 0x24e   : > { %3024 = vst [vmem:[%s11891_s27 + $0x11c8] sm:$0xff] %v3023_v57  ;;  %v3151_v57 = vld [vmem:[%s11886_s26 + $0x2790] sm:$0xff] }
 0x24f   : > { %3026 = vst [vmem:[%s11891_s27 + $0x11d0] sm:$0xff] %v3025_v58  ;;  %v3153_v58 = vld [vmem:[%s11886_s26 + $0x27a0] sm:$0xff] }
 0x250   : > { %3028 = vst [vmem:[%s11891_s27 + $0x11d8] sm:$0xff] %v3027_v59  ;;  %v3155_v59 = vld [vmem:[%s11886_s26 + $0x27b0] sm:$0xff] }
 0x251   : > { %3030 = vst [vmem:[%s11891_s27 + $0x11e0] sm:$0xff] %v3029_v60  ;;  %v3157_v60 = vld [vmem:[%s11886_s26 + $0x27c0] sm:$0xff] }
 0x252   : > { %3032 = vst [vmem:[%s11891_s27 + $0x11e8] sm:$0xff] %v3031_v61  ;;  %v3159_v61 = vld [vmem:[%s11886_s26 + $0x27d0] sm:$0xff] }
 0x253   : > { %3034 = vst [vmem:[%s11891_s27 + $0x11f0] sm:$0xff] %v3033_v62  ;;  %v3161_v62 = vld [vmem:[%s11886_s26 + $0x27e0] sm:$0xff] }
 0x254   : > { %3036 = vst [vmem:[%s11891_s27 + $0x11f8] sm:$0xff] %v3035_v63  ;;  %v3163_v63 = vld [vmem:[%s11886_s26 + $0x27f0] sm:$0xff] }
 0x255   : > { %3038 = vst [vmem:[%s11891_s27 + $0x1200] sm:$0xff] %v3037_v0  ;;  %v3165_v0 = vld [vmem:[%s11886_s26 + $0x2800] sm:$0xff] }
 0x256   : > { %3040 = vst [vmem:[%s11891_s27 + $0x1208] sm:$0xff] %v3039_v1  ;;  %v3167_v1 = vld [vmem:[%s11886_s26 + $0x2810] sm:$0xff] }
 0x257   : > { %3042 = vst [vmem:[%s11891_s27 + $0x1210] sm:$0xff] %v3041_v2  ;;  %v3169_v2 = vld [vmem:[%s11886_s26 + $0x2820] sm:$0xff] }
 0x258   : > { %3044 = vst [vmem:[%s11891_s27 + $0x1218] sm:$0xff] %v3043_v3  ;;  %v3171_v3 = vld [vmem:[%s11886_s26 + $0x2830] sm:$0xff] }
 0x259   : > { %3046 = vst [vmem:[%s11891_s27 + $0x1220] sm:$0xff] %v3045_v4  ;;  %v3173_v4 = vld [vmem:[%s11886_s26 + $0x2840] sm:$0xff] }
 0x25a   : > { %3048 = vst [vmem:[%s11891_s27 + $0x1228] sm:$0xff] %v3047_v5  ;;  %v3175_v5 = vld [vmem:[%s11886_s26 + $0x2850] sm:$0xff] }
 0x25b   : > { %3050 = vst [vmem:[%s11891_s27 + $0x1230] sm:$0xff] %v3049_v6  ;;  %v3177_v6 = vld [vmem:[%s11886_s26 + $0x2860] sm:$0xff] }
 0x25c   : > { %3052 = vst [vmem:[%s11891_s27 + $0x1238] sm:$0xff] %v3051_v7  ;;  %v3179_v7 = vld [vmem:[%s11886_s26 + $0x2870] sm:$0xff] }
 0x25d   : > { %3054 = vst [vmem:[%s11891_s27 + $0x1240] sm:$0xff] %v3053_v8  ;;  %v3181_v8 = vld [vmem:[%s11886_s26 + $0x2880] sm:$0xff] }
 0x25e   : > { %3056 = vst [vmem:[%s11891_s27 + $0x1248] sm:$0xff] %v3055_v9  ;;  %v3183_v9 = vld [vmem:[%s11886_s26 + $0x2890] sm:$0xff] }
 0x25f   : > { %3058 = vst [vmem:[%s11891_s27 + $0x1250] sm:$0xff] %v3057_v10  ;;  %v3185_v10 = vld [vmem:[%s11886_s26 + $0x28a0] sm:$0xff] }
 0x260   : > { %3060 = vst [vmem:[%s11891_s27 + $0x1258] sm:$0xff] %v3059_v11  ;;  %v3187_v11 = vld [vmem:[%s11886_s26 + $0x28b0] sm:$0xff] }
 0x261   : > { %3062 = vst [vmem:[%s11891_s27 + $0x1260] sm:$0xff] %v3061_v12  ;;  %v3189_v12 = vld [vmem:[%s11886_s26 + $0x28c0] sm:$0xff] }
 0x262   : > { %3064 = vst [vmem:[%s11891_s27 + $0x1268] sm:$0xff] %v3063_v13  ;;  %v3191_v13 = vld [vmem:[%s11886_s26 + $0x28d0] sm:$0xff] }
 0x263   : > { %3066 = vst [vmem:[%s11891_s27 + $0x1270] sm:$0xff] %v3065_v14  ;;  %v3193_v14 = vld [vmem:[%s11886_s26 + $0x28e0] sm:$0xff] }
 0x264   : > { %3068 = vst [vmem:[%s11891_s27 + $0x1278] sm:$0xff] %v3067_v15  ;;  %v3195_v15 = vld [vmem:[%s11886_s26 + $0x28f0] sm:$0xff] }
 0x265   : > { %3070 = vst [vmem:[%s11891_s27 + $0x1280] sm:$0xff] %v3069_v16  ;;  %v3197_v16 = vld [vmem:[%s11886_s26 + $0x2900] sm:$0xff] }
 0x266   : > { %3072 = vst [vmem:[%s11891_s27 + $0x1288] sm:$0xff] %v3071_v17  ;;  %v3199_v17 = vld [vmem:[%s11886_s26 + $0x2910] sm:$0xff] }
 0x267   : > { %3074 = vst [vmem:[%s11891_s27 + $0x1290] sm:$0xff] %v3073_v18  ;;  %v3201_v18 = vld [vmem:[%s11886_s26 + $0x2920] sm:$0xff] }
 0x268   : > { %3076 = vst [vmem:[%s11891_s27 + $0x1298] sm:$0xff] %v3075_v19  ;;  %v3203_v19 = vld [vmem:[%s11886_s26 + $0x2930] sm:$0xff] }
 0x269   : > { %3078 = vst [vmem:[%s11891_s27 + $0x12a0] sm:$0xff] %v3077_v20  ;;  %v3205_v20 = vld [vmem:[%s11886_s26 + $0x2940] sm:$0xff] }
 0x26a   : > { %3080 = vst [vmem:[%s11891_s27 + $0x12a8] sm:$0xff] %v3079_v21  ;;  %v3207_v21 = vld [vmem:[%s11886_s26 + $0x2950] sm:$0xff] }
 0x26b   : > { %3082 = vst [vmem:[%s11891_s27 + $0x12b0] sm:$0xff] %v3081_v22  ;;  %v3209_v22 = vld [vmem:[%s11886_s26 + $0x2960] sm:$0xff] }
 0x26c   : > { %3084 = vst [vmem:[%s11891_s27 + $0x12b8] sm:$0xff] %v3083_v23  ;;  %v3211_v23 = vld [vmem:[%s11886_s26 + $0x2970] sm:$0xff] }
 0x26d   : > { %3086 = vst [vmem:[%s11891_s27 + $0x12c0] sm:$0xff] %v3085_v24  ;;  %v3213_v24 = vld [vmem:[%s11886_s26 + $0x2980] sm:$0xff] }
 0x26e   : > { %3088 = vst [vmem:[%s11891_s27 + $0x12c8] sm:$0xff] %v3087_v25  ;;  %v3215_v25 = vld [vmem:[%s11886_s26 + $0x2990] sm:$0xff] }
 0x26f   : > { %3090 = vst [vmem:[%s11891_s27 + $0x12d0] sm:$0xff] %v3089_v26  ;;  %v3217_v26 = vld [vmem:[%s11886_s26 + $0x29a0] sm:$0xff] }
 0x270   : > { %3092 = vst [vmem:[%s11891_s27 + $0x12d8] sm:$0xff] %v3091_v27  ;;  %v3219_v27 = vld [vmem:[%s11886_s26 + $0x29b0] sm:$0xff] }
 0x271   : > { %3094 = vst [vmem:[%s11891_s27 + $0x12e0] sm:$0xff] %v3093_v28  ;;  %v3221_v28 = vld [vmem:[%s11886_s26 + $0x29c0] sm:$0xff] }
 0x272   : > { %3096 = vst [vmem:[%s11891_s27 + $0x12e8] sm:$0xff] %v3095_v29  ;;  %v3223_v29 = vld [vmem:[%s11886_s26 + $0x29d0] sm:$0xff] }
 0x273   : > { %3098 = vst [vmem:[%s11891_s27 + $0x12f0] sm:$0xff] %v3097_v30  ;;  %v3225_v30 = vld [vmem:[%s11886_s26 + $0x29e0] sm:$0xff] }
 0x274   : > { %3100 = vst [vmem:[%s11891_s27 + $0x12f8] sm:$0xff] %v3099_v31  ;;  %v3227_v31 = vld [vmem:[%s11886_s26 + $0x29f0] sm:$0xff] }
 0x275   : > { %3102 = vst [vmem:[%s11891_s27 + $0x1300] sm:$0xff] %v3101_v32  ;;  %v3229_v32 = vld [vmem:[%s11886_s26 + $0x2a00] sm:$0xff] }
 0x276   : > { %3104 = vst [vmem:[%s11891_s27 + $0x1308] sm:$0xff] %v3103_v33  ;;  %v3231_v33 = vld [vmem:[%s11886_s26 + $0x2a10] sm:$0xff] }
 0x277   : > { %3106 = vst [vmem:[%s11891_s27 + $0x1310] sm:$0xff] %v3105_v34  ;;  %v3233_v34 = vld [vmem:[%s11886_s26 + $0x2a20] sm:$0xff] }
 0x278   : > { %3108 = vst [vmem:[%s11891_s27 + $0x1318] sm:$0xff] %v3107_v35  ;;  %v3235_v35 = vld [vmem:[%s11886_s26 + $0x2a30] sm:$0xff] }
 0x279   : > { %3110 = vst [vmem:[%s11891_s27 + $0x1320] sm:$0xff] %v3109_v36  ;;  %v3237_v36 = vld [vmem:[%s11886_s26 + $0x2a40] sm:$0xff] }
 0x27a   : > { %3112 = vst [vmem:[%s11891_s27 + $0x1328] sm:$0xff] %v3111_v37  ;;  %v3239_v37 = vld [vmem:[%s11886_s26 + $0x2a50] sm:$0xff] }
 0x27b   : > { %3114 = vst [vmem:[%s11891_s27 + $0x1330] sm:$0xff] %v3113_v38  ;;  %v3241_v38 = vld [vmem:[%s11886_s26 + $0x2a60] sm:$0xff] }
 0x27c   : > { %3116 = vst [vmem:[%s11891_s27 + $0x1338] sm:$0xff] %v3115_v39  ;;  %v3243_v39 = vld [vmem:[%s11886_s26 + $0x2a70] sm:$0xff] }
 0x27d   : > { %3118 = vst [vmem:[%s11891_s27 + $0x1340] sm:$0xff] %v3117_v40  ;;  %v3245_v40 = vld [vmem:[%s11886_s26 + $0x2a80] sm:$0xff] }
 0x27e   : > { %3120 = vst [vmem:[%s11891_s27 + $0x1348] sm:$0xff] %v3119_v41  ;;  %v3247_v41 = vld [vmem:[%s11886_s26 + $0x2a90] sm:$0xff] }
 0x27f   : > { %3122 = vst [vmem:[%s11891_s27 + $0x1350] sm:$0xff] %v3121_v42  ;;  %v3249_v42 = vld [vmem:[%s11886_s26 + $0x2aa0] sm:$0xff] }
 0x280   : > { %3124 = vst [vmem:[%s11891_s27 + $0x1358] sm:$0xff] %v3123_v43  ;;  %v3251_v43 = vld [vmem:[%s11886_s26 + $0x2ab0] sm:$0xff] }
 0x281   : > { %3126 = vst [vmem:[%s11891_s27 + $0x1360] sm:$0xff] %v3125_v44  ;;  %v3253_v44 = vld [vmem:[%s11886_s26 + $0x2ac0] sm:$0xff] }
 0x282   : > { %3128 = vst [vmem:[%s11891_s27 + $0x1368] sm:$0xff] %v3127_v45  ;;  %v3255_v45 = vld [vmem:[%s11886_s26 + $0x2ad0] sm:$0xff] }
 0x283   : > { %3130 = vst [vmem:[%s11891_s27 + $0x1370] sm:$0xff] %v3129_v46  ;;  %v3257_v46 = vld [vmem:[%s11886_s26 + $0x2ae0] sm:$0xff] }
 0x284   : > { %3132 = vst [vmem:[%s11891_s27 + $0x1378] sm:$0xff] %v3131_v47  ;;  %v3259_v47 = vld [vmem:[%s11886_s26 + $0x2af0] sm:$0xff] }
 0x285   : > { %3134 = vst [vmem:[%s11891_s27 + $0x1380] sm:$0xff] %v3133_v48  ;;  %v3261_v48 = vld [vmem:[%s11886_s26 + $0x2b00] sm:$0xff] }
 0x286   : > { %3136 = vst [vmem:[%s11891_s27 + $0x1388] sm:$0xff] %v3135_v49  ;;  %v3263_v49 = vld [vmem:[%s11886_s26 + $0x2b10] sm:$0xff] }
 0x287   : > { %3138 = vst [vmem:[%s11891_s27 + $0x1390] sm:$0xff] %v3137_v50  ;;  %v3265_v50 = vld [vmem:[%s11886_s26 + $0x2b20] sm:$0xff] }
 0x288   : > { %3140 = vst [vmem:[%s11891_s27 + $0x1398] sm:$0xff] %v3139_v51  ;;  %v3267_v51 = vld [vmem:[%s11886_s26 + $0x2b30] sm:$0xff] }
 0x289   : > { %3142 = vst [vmem:[%s11891_s27 + $0x13a0] sm:$0xff] %v3141_v52  ;;  %v3269_v52 = vld [vmem:[%s11886_s26 + $0x2b40] sm:$0xff] }
 0x28a   : > { %3144 = vst [vmem:[%s11891_s27 + $0x13a8] sm:$0xff] %v3143_v53  ;;  %v3271_v53 = vld [vmem:[%s11886_s26 + $0x2b50] sm:$0xff] }
 0x28b   : > { %3146 = vst [vmem:[%s11891_s27 + $0x13b0] sm:$0xff] %v3145_v54  ;;  %v3273_v54 = vld [vmem:[%s11886_s26 + $0x2b60] sm:$0xff] }
 0x28c   : > { %3148 = vst [vmem:[%s11891_s27 + $0x13b8] sm:$0xff] %v3147_v55  ;;  %v3275_v55 = vld [vmem:[%s11886_s26 + $0x2b70] sm:$0xff] }
 0x28d   : > { %3150 = vst [vmem:[%s11891_s27 + $0x13c0] sm:$0xff] %v3149_v56  ;;  %v3277_v56 = vld [vmem:[%s11886_s26 + $0x2b80] sm:$0xff] }
 0x28e   : > { %3152 = vst [vmem:[%s11891_s27 + $0x13c8] sm:$0xff] %v3151_v57  ;;  %v3279_v57 = vld [vmem:[%s11886_s26 + $0x2b90] sm:$0xff] }
 0x28f   : > { %3154 = vst [vmem:[%s11891_s27 + $0x13d0] sm:$0xff] %v3153_v58  ;;  %v3281_v58 = vld [vmem:[%s11886_s26 + $0x2ba0] sm:$0xff] }
 0x290   : > { %3156 = vst [vmem:[%s11891_s27 + $0x13d8] sm:$0xff] %v3155_v59  ;;  %v3283_v59 = vld [vmem:[%s11886_s26 + $0x2bb0] sm:$0xff] }
 0x291   : > { %3158 = vst [vmem:[%s11891_s27 + $0x13e0] sm:$0xff] %v3157_v60  ;;  %v3285_v60 = vld [vmem:[%s11886_s26 + $0x2bc0] sm:$0xff] }
 0x292   : > { %3160 = vst [vmem:[%s11891_s27 + $0x13e8] sm:$0xff] %v3159_v61  ;;  %v3287_v61 = vld [vmem:[%s11886_s26 + $0x2bd0] sm:$0xff] }
 0x293   : > { %3162 = vst [vmem:[%s11891_s27 + $0x13f0] sm:$0xff] %v3161_v62  ;;  %v3289_v62 = vld [vmem:[%s11886_s26 + $0x2be0] sm:$0xff] }
 0x294   : > { %3164 = vst [vmem:[%s11891_s27 + $0x13f8] sm:$0xff] %v3163_v63  ;;  %v3291_v63 = vld [vmem:[%s11886_s26 + $0x2bf0] sm:$0xff] }
 0x295   : > { %3166 = vst [vmem:[%s11891_s27 + $0x1400] sm:$0xff] %v3165_v0  ;;  %v3293_v0 = vld [vmem:[%s11886_s26 + $0x2c00] sm:$0xff] }
 0x296   : > { %3168 = vst [vmem:[%s11891_s27 + $0x1408] sm:$0xff] %v3167_v1  ;;  %v3295_v1 = vld [vmem:[%s11886_s26 + $0x2c10] sm:$0xff] }
 0x297   : > { %3170 = vst [vmem:[%s11891_s27 + $0x1410] sm:$0xff] %v3169_v2  ;;  %v3297_v2 = vld [vmem:[%s11886_s26 + $0x2c20] sm:$0xff] }
 0x298   : > { %3172 = vst [vmem:[%s11891_s27 + $0x1418] sm:$0xff] %v3171_v3  ;;  %v3299_v3 = vld [vmem:[%s11886_s26 + $0x2c30] sm:$0xff] }
 0x299   : > { %3174 = vst [vmem:[%s11891_s27 + $0x1420] sm:$0xff] %v3173_v4  ;;  %v3301_v4 = vld [vmem:[%s11886_s26 + $0x2c40] sm:$0xff] }
 0x29a   : > { %3176 = vst [vmem:[%s11891_s27 + $0x1428] sm:$0xff] %v3175_v5  ;;  %v3303_v5 = vld [vmem:[%s11886_s26 + $0x2c50] sm:$0xff] }
 0x29b   : > { %3178 = vst [vmem:[%s11891_s27 + $0x1430] sm:$0xff] %v3177_v6  ;;  %v3305_v6 = vld [vmem:[%s11886_s26 + $0x2c60] sm:$0xff] }
 0x29c   : > { %3180 = vst [vmem:[%s11891_s27 + $0x1438] sm:$0xff] %v3179_v7  ;;  %v3307_v7 = vld [vmem:[%s11886_s26 + $0x2c70] sm:$0xff] }
 0x29d   : > { %3182 = vst [vmem:[%s11891_s27 + $0x1440] sm:$0xff] %v3181_v8  ;;  %v3309_v8 = vld [vmem:[%s11886_s26 + $0x2c80] sm:$0xff] }
 0x29e   : > { %3184 = vst [vmem:[%s11891_s27 + $0x1448] sm:$0xff] %v3183_v9  ;;  %v3311_v9 = vld [vmem:[%s11886_s26 + $0x2c90] sm:$0xff] }
 0x29f   : > { %3186 = vst [vmem:[%s11891_s27 + $0x1450] sm:$0xff] %v3185_v10  ;;  %v3313_v10 = vld [vmem:[%s11886_s26 + $0x2ca0] sm:$0xff] }
 0x2a0   : > { %3188 = vst [vmem:[%s11891_s27 + $0x1458] sm:$0xff] %v3187_v11  ;;  %v3315_v11 = vld [vmem:[%s11886_s26 + $0x2cb0] sm:$0xff] }
 0x2a1   : > { %3190 = vst [vmem:[%s11891_s27 + $0x1460] sm:$0xff] %v3189_v12  ;;  %v3317_v12 = vld [vmem:[%s11886_s26 + $0x2cc0] sm:$0xff] }
 0x2a2   : > { %3192 = vst [vmem:[%s11891_s27 + $0x1468] sm:$0xff] %v3191_v13  ;;  %v3319_v13 = vld [vmem:[%s11886_s26 + $0x2cd0] sm:$0xff] }
 0x2a3   : > { %3194 = vst [vmem:[%s11891_s27 + $0x1470] sm:$0xff] %v3193_v14  ;;  %v3321_v14 = vld [vmem:[%s11886_s26 + $0x2ce0] sm:$0xff] }
 0x2a4   : > { %3196 = vst [vmem:[%s11891_s27 + $0x1478] sm:$0xff] %v3195_v15  ;;  %v3323_v15 = vld [vmem:[%s11886_s26 + $0x2cf0] sm:$0xff] }
 0x2a5   : > { %3198 = vst [vmem:[%s11891_s27 + $0x1480] sm:$0xff] %v3197_v16  ;;  %v3325_v16 = vld [vmem:[%s11886_s26 + $0x2d00] sm:$0xff] }
 0x2a6   : > { %3200 = vst [vmem:[%s11891_s27 + $0x1488] sm:$0xff] %v3199_v17  ;;  %v3327_v17 = vld [vmem:[%s11886_s26 + $0x2d10] sm:$0xff] }
 0x2a7   : > { %3202 = vst [vmem:[%s11891_s27 + $0x1490] sm:$0xff] %v3201_v18  ;;  %v3329_v18 = vld [vmem:[%s11886_s26 + $0x2d20] sm:$0xff] }
 0x2a8   : > { %3204 = vst [vmem:[%s11891_s27 + $0x1498] sm:$0xff] %v3203_v19  ;;  %v3331_v19 = vld [vmem:[%s11886_s26 + $0x2d30] sm:$0xff] }
 0x2a9   : > { %3206 = vst [vmem:[%s11891_s27 + $0x14a0] sm:$0xff] %v3205_v20  ;;  %v3333_v20 = vld [vmem:[%s11886_s26 + $0x2d40] sm:$0xff] }
 0x2aa   : > { %3208 = vst [vmem:[%s11891_s27 + $0x14a8] sm:$0xff] %v3207_v21  ;;  %v3335_v21 = vld [vmem:[%s11886_s26 + $0x2d50] sm:$0xff] }
 0x2ab   : > { %3210 = vst [vmem:[%s11891_s27 + $0x14b0] sm:$0xff] %v3209_v22  ;;  %v3337_v22 = vld [vmem:[%s11886_s26 + $0x2d60] sm:$0xff] }
 0x2ac   : > { %3212 = vst [vmem:[%s11891_s27 + $0x14b8] sm:$0xff] %v3211_v23  ;;  %v3339_v23 = vld [vmem:[%s11886_s26 + $0x2d70] sm:$0xff] }
 0x2ad   : > { %3214 = vst [vmem:[%s11891_s27 + $0x14c0] sm:$0xff] %v3213_v24  ;;  %v3341_v24 = vld [vmem:[%s11886_s26 + $0x2d80] sm:$0xff] }
 0x2ae   : > { %3216 = vst [vmem:[%s11891_s27 + $0x14c8] sm:$0xff] %v3215_v25  ;;  %v3343_v25 = vld [vmem:[%s11886_s26 + $0x2d90] sm:$0xff] }
 0x2af   : > { %3218 = vst [vmem:[%s11891_s27 + $0x14d0] sm:$0xff] %v3217_v26  ;;  %v3345_v26 = vld [vmem:[%s11886_s26 + $0x2da0] sm:$0xff] }
 0x2b0   : > { %3220 = vst [vmem:[%s11891_s27 + $0x14d8] sm:$0xff] %v3219_v27  ;;  %v3347_v27 = vld [vmem:[%s11886_s26 + $0x2db0] sm:$0xff] }
 0x2b1   : > { %3222 = vst [vmem:[%s11891_s27 + $0x14e0] sm:$0xff] %v3221_v28  ;;  %v3349_v28 = vld [vmem:[%s11886_s26 + $0x2dc0] sm:$0xff] }
 0x2b2   : > { %3224 = vst [vmem:[%s11891_s27 + $0x14e8] sm:$0xff] %v3223_v29  ;;  %v3351_v29 = vld [vmem:[%s11886_s26 + $0x2dd0] sm:$0xff] }
 0x2b3   : > { %3226 = vst [vmem:[%s11891_s27 + $0x14f0] sm:$0xff] %v3225_v30  ;;  %v3353_v30 = vld [vmem:[%s11886_s26 + $0x2de0] sm:$0xff] }
 0x2b4   : > { %3228 = vst [vmem:[%s11891_s27 + $0x14f8] sm:$0xff] %v3227_v31  ;;  %v3355_v31 = vld [vmem:[%s11886_s26 + $0x2df0] sm:$0xff] }
 0x2b5   : > { %3230 = vst [vmem:[%s11891_s27 + $0x1500] sm:$0xff] %v3229_v32  ;;  %v3357_v32 = vld [vmem:[%s11886_s26 + $0x2e00] sm:$0xff] }
 0x2b6   : > { %3232 = vst [vmem:[%s11891_s27 + $0x1508] sm:$0xff] %v3231_v33  ;;  %v3359_v33 = vld [vmem:[%s11886_s26 + $0x2e10] sm:$0xff] }
 0x2b7   : > { %3234 = vst [vmem:[%s11891_s27 + $0x1510] sm:$0xff] %v3233_v34  ;;  %v3361_v34 = vld [vmem:[%s11886_s26 + $0x2e20] sm:$0xff] }
 0x2b8   : > { %3236 = vst [vmem:[%s11891_s27 + $0x1518] sm:$0xff] %v3235_v35  ;;  %v3363_v35 = vld [vmem:[%s11886_s26 + $0x2e30] sm:$0xff] }
 0x2b9   : > { %3238 = vst [vmem:[%s11891_s27 + $0x1520] sm:$0xff] %v3237_v36  ;;  %v3365_v36 = vld [vmem:[%s11886_s26 + $0x2e40] sm:$0xff] }
 0x2ba   : > { %3240 = vst [vmem:[%s11891_s27 + $0x1528] sm:$0xff] %v3239_v37  ;;  %v3367_v37 = vld [vmem:[%s11886_s26 + $0x2e50] sm:$0xff] }
 0x2bb   : > { %3242 = vst [vmem:[%s11891_s27 + $0x1530] sm:$0xff] %v3241_v38  ;;  %v3369_v38 = vld [vmem:[%s11886_s26 + $0x2e60] sm:$0xff] }
 0x2bc   : > { %3244 = vst [vmem:[%s11891_s27 + $0x1538] sm:$0xff] %v3243_v39  ;;  %v3371_v39 = vld [vmem:[%s11886_s26 + $0x2e70] sm:$0xff] }
 0x2bd   : > { %3246 = vst [vmem:[%s11891_s27 + $0x1540] sm:$0xff] %v3245_v40  ;;  %v3373_v40 = vld [vmem:[%s11886_s26 + $0x2e80] sm:$0xff] }
 0x2be   : > { %3248 = vst [vmem:[%s11891_s27 + $0x1548] sm:$0xff] %v3247_v41  ;;  %v3375_v41 = vld [vmem:[%s11886_s26 + $0x2e90] sm:$0xff] }
 0x2bf   : > { %3250 = vst [vmem:[%s11891_s27 + $0x1550] sm:$0xff] %v3249_v42  ;;  %v3377_v42 = vld [vmem:[%s11886_s26 + $0x2ea0] sm:$0xff] }
 0x2c0   : > { %3252 = vst [vmem:[%s11891_s27 + $0x1558] sm:$0xff] %v3251_v43  ;;  %v3379_v43 = vld [vmem:[%s11886_s26 + $0x2eb0] sm:$0xff] }
 0x2c1   : > { %3254 = vst [vmem:[%s11891_s27 + $0x1560] sm:$0xff] %v3253_v44  ;;  %v3381_v44 = vld [vmem:[%s11886_s26 + $0x2ec0] sm:$0xff] }
 0x2c2   : > { %3256 = vst [vmem:[%s11891_s27 + $0x1568] sm:$0xff] %v3255_v45  ;;  %v3383_v45 = vld [vmem:[%s11886_s26 + $0x2ed0] sm:$0xff] }
 0x2c3   : > { %3258 = vst [vmem:[%s11891_s27 + $0x1570] sm:$0xff] %v3257_v46  ;;  %v3385_v46 = vld [vmem:[%s11886_s26 + $0x2ee0] sm:$0xff] }
 0x2c4   : > { %3260 = vst [vmem:[%s11891_s27 + $0x1578] sm:$0xff] %v3259_v47  ;;  %v3387_v47 = vld [vmem:[%s11886_s26 + $0x2ef0] sm:$0xff] }
 0x2c5   : > { %3262 = vst [vmem:[%s11891_s27 + $0x1580] sm:$0xff] %v3261_v48  ;;  %v3389_v48 = vld [vmem:[%s11886_s26 + $0x2f00] sm:$0xff] }
 0x2c6   : > { %3264 = vst [vmem:[%s11891_s27 + $0x1588] sm:$0xff] %v3263_v49  ;;  %v3391_v49 = vld [vmem:[%s11886_s26 + $0x2f10] sm:$0xff] }
 0x2c7   : > { %3266 = vst [vmem:[%s11891_s27 + $0x1590] sm:$0xff] %v3265_v50  ;;  %v3393_v50 = vld [vmem:[%s11886_s26 + $0x2f20] sm:$0xff] }
 0x2c8   : > { %3268 = vst [vmem:[%s11891_s27 + $0x1598] sm:$0xff] %v3267_v51  ;;  %v3395_v51 = vld [vmem:[%s11886_s26 + $0x2f30] sm:$0xff] }
 0x2c9   : > { %3270 = vst [vmem:[%s11891_s27 + $0x15a0] sm:$0xff] %v3269_v52  ;;  %v3397_v52 = vld [vmem:[%s11886_s26 + $0x2f40] sm:$0xff] }
 0x2ca   : > { %3272 = vst [vmem:[%s11891_s27 + $0x15a8] sm:$0xff] %v3271_v53  ;;  %v3399_v53 = vld [vmem:[%s11886_s26 + $0x2f50] sm:$0xff] }
 0x2cb   : > { %3274 = vst [vmem:[%s11891_s27 + $0x15b0] sm:$0xff] %v3273_v54  ;;  %v3401_v54 = vld [vmem:[%s11886_s26 + $0x2f60] sm:$0xff] }
 0x2cc   : > { %3276 = vst [vmem:[%s11891_s27 + $0x15b8] sm:$0xff] %v3275_v55  ;;  %v3403_v55 = vld [vmem:[%s11886_s26 + $0x2f70] sm:$0xff] }
 0x2cd   : > { %3278 = vst [vmem:[%s11891_s27 + $0x15c0] sm:$0xff] %v3277_v56  ;;  %v3405_v56 = vld [vmem:[%s11886_s26 + $0x2f80] sm:$0xff] }
 0x2ce   : > { %3280 = vst [vmem:[%s11891_s27 + $0x15c8] sm:$0xff] %v3279_v57  ;;  %v3407_v57 = vld [vmem:[%s11886_s26 + $0x2f90] sm:$0xff] }
 0x2cf   : > { %3282 = vst [vmem:[%s11891_s27 + $0x15d0] sm:$0xff] %v3281_v58  ;;  %v3409_v58 = vld [vmem:[%s11886_s26 + $0x2fa0] sm:$0xff] }
 0x2d0   : > { %3284 = vst [vmem:[%s11891_s27 + $0x15d8] sm:$0xff] %v3283_v59  ;;  %v3411_v59 = vld [vmem:[%s11886_s26 + $0x2fb0] sm:$0xff] }
 0x2d1   : > { %3286 = vst [vmem:[%s11891_s27 + $0x15e0] sm:$0xff] %v3285_v60  ;;  %v3413_v60 = vld [vmem:[%s11886_s26 + $0x2fc0] sm:$0xff] }
 0x2d2   : > { %3288 = vst [vmem:[%s11891_s27 + $0x15e8] sm:$0xff] %v3287_v61  ;;  %v3415_v61 = vld [vmem:[%s11886_s26 + $0x2fd0] sm:$0xff] }
 0x2d3   : > { %3290 = vst [vmem:[%s11891_s27 + $0x15f0] sm:$0xff] %v3289_v62  ;;  %v3417_v62 = vld [vmem:[%s11886_s26 + $0x2fe0] sm:$0xff] }
 0x2d4   : > { %3292 = vst [vmem:[%s11891_s27 + $0x15f8] sm:$0xff] %v3291_v63  ;;  %v3419_v63 = vld [vmem:[%s11886_s26 + $0x2ff0] sm:$0xff] }
 0x2d5   : > { %3294 = vst [vmem:[%s11891_s27 + $0x1600] sm:$0xff] %v3293_v0  ;;  %v3421_v0 = vld [vmem:[%s11886_s26 + $0x3000] sm:$0xff] }
 0x2d6   : > { %3296 = vst [vmem:[%s11891_s27 + $0x1608] sm:$0xff] %v3295_v1  ;;  %v3423_v1 = vld [vmem:[%s11886_s26 + $0x3010] sm:$0xff] }
 0x2d7   : > { %3298 = vst [vmem:[%s11891_s27 + $0x1610] sm:$0xff] %v3297_v2  ;;  %v3425_v2 = vld [vmem:[%s11886_s26 + $0x3020] sm:$0xff] }
 0x2d8   : > { %3300 = vst [vmem:[%s11891_s27 + $0x1618] sm:$0xff] %v3299_v3  ;;  %v3427_v3 = vld [vmem:[%s11886_s26 + $0x3030] sm:$0xff] }
 0x2d9   : > { %3302 = vst [vmem:[%s11891_s27 + $0x1620] sm:$0xff] %v3301_v4  ;;  %v3429_v4 = vld [vmem:[%s11886_s26 + $0x3040] sm:$0xff] }
 0x2da   : > { %3304 = vst [vmem:[%s11891_s27 + $0x1628] sm:$0xff] %v3303_v5  ;;  %v3431_v5 = vld [vmem:[%s11886_s26 + $0x3050] sm:$0xff] }
 0x2db   : > { %3306 = vst [vmem:[%s11891_s27 + $0x1630] sm:$0xff] %v3305_v6  ;;  %v3433_v6 = vld [vmem:[%s11886_s26 + $0x3060] sm:$0xff] }
 0x2dc   : > { %3308 = vst [vmem:[%s11891_s27 + $0x1638] sm:$0xff] %v3307_v7  ;;  %v3435_v7 = vld [vmem:[%s11886_s26 + $0x3070] sm:$0xff] }
 0x2dd   : > { %3310 = vst [vmem:[%s11891_s27 + $0x1640] sm:$0xff] %v3309_v8  ;;  %v3437_v8 = vld [vmem:[%s11886_s26 + $0x3080] sm:$0xff] }
 0x2de   : > { %3312 = vst [vmem:[%s11891_s27 + $0x1648] sm:$0xff] %v3311_v9  ;;  %v3439_v9 = vld [vmem:[%s11886_s26 + $0x3090] sm:$0xff] }
 0x2df   : > { %3314 = vst [vmem:[%s11891_s27 + $0x1650] sm:$0xff] %v3313_v10  ;;  %v3441_v10 = vld [vmem:[%s11886_s26 + $0x30a0] sm:$0xff] }
 0x2e0   : > { %3316 = vst [vmem:[%s11891_s27 + $0x1658] sm:$0xff] %v3315_v11  ;;  %v3443_v11 = vld [vmem:[%s11886_s26 + $0x30b0] sm:$0xff] }
 0x2e1   : > { %3318 = vst [vmem:[%s11891_s27 + $0x1660] sm:$0xff] %v3317_v12  ;;  %v3445_v12 = vld [vmem:[%s11886_s26 + $0x30c0] sm:$0xff] }
 0x2e2   : > { %3320 = vst [vmem:[%s11891_s27 + $0x1668] sm:$0xff] %v3319_v13  ;;  %v3447_v13 = vld [vmem:[%s11886_s26 + $0x30d0] sm:$0xff] }
 0x2e3   : > { %3322 = vst [vmem:[%s11891_s27 + $0x1670] sm:$0xff] %v3321_v14  ;;  %v3449_v14 = vld [vmem:[%s11886_s26 + $0x30e0] sm:$0xff] }
 0x2e4   : > { %3324 = vst [vmem:[%s11891_s27 + $0x1678] sm:$0xff] %v3323_v15  ;;  %v3451_v15 = vld [vmem:[%s11886_s26 + $0x30f0] sm:$0xff] }
 0x2e5   : > { %3326 = vst [vmem:[%s11891_s27 + $0x1680] sm:$0xff] %v3325_v16 }
 0x2e6   : > { %3328 = vst [vmem:[%s11891_s27 + $0x1688] sm:$0xff] %v3327_v17 }
 0x2e7   : > { %3330 = vst [vmem:[%s11891_s27 + $0x1690] sm:$0xff] %v3329_v18 }
 0x2e8   : > { %3332 = vst [vmem:[%s11891_s27 + $0x1698] sm:$0xff] %v3331_v19 }
 0x2e9   : > { %3334 = vst [vmem:[%s11891_s27 + $0x16a0] sm:$0xff] %v3333_v20 }
 0x2ea   : > { %3336 = vst [vmem:[%s11891_s27 + $0x16a8] sm:$0xff] %v3335_v21 }
 0x2eb   : > { %3338 = vst [vmem:[%s11891_s27 + $0x16b0] sm:$0xff] %v3337_v22 }
 0x2ec   : > { %3340 = vst [vmem:[%s11891_s27 + $0x16b8] sm:$0xff] %v3339_v23 }
 0x2ed   : > { %3342 = vst [vmem:[%s11891_s27 + $0x16c0] sm:$0xff] %v3341_v24 }
 0x2ee   : > { %3344 = vst [vmem:[%s11891_s27 + $0x16c8] sm:$0xff] %v3343_v25 }
 0x2ef   : > { %3346 = vst [vmem:[%s11891_s27 + $0x16d0] sm:$0xff] %v3345_v26 }
 0x2f0   : > { %3348 = vst [vmem:[%s11891_s27 + $0x16d8] sm:$0xff] %v3347_v27 }
 0x2f1   : > { %3350 = vst [vmem:[%s11891_s27 + $0x16e0] sm:$0xff] %v3349_v28 }
 0x2f2   : > { %3352 = vst [vmem:[%s11891_s27 + $0x16e8] sm:$0xff] %v3351_v29 }
 0x2f3   : > { %3354 = vst [vmem:[%s11891_s27 + $0x16f0] sm:$0xff] %v3353_v30 }
 0x2f4   : > { %3356 = vst [vmem:[%s11891_s27 + $0x16f8] sm:$0xff] %v3355_v31 }
 0x2f5   : > { %3358 = vst [vmem:[%s11891_s27 + $0x1700] sm:$0xff] %v3357_v32 }
 0x2f6   : > { %3360 = vst [vmem:[%s11891_s27 + $0x1708] sm:$0xff] %v3359_v33 }
 0x2f7   : > { %3362 = vst [vmem:[%s11891_s27 + $0x1710] sm:$0xff] %v3361_v34 }
 0x2f8   : > { %3364 = vst [vmem:[%s11891_s27 + $0x1718] sm:$0xff] %v3363_v35 }
 0x2f9   : > { %3366 = vst [vmem:[%s11891_s27 + $0x1720] sm:$0xff] %v3365_v36 }
 0x2fa   : > { %3368 = vst [vmem:[%s11891_s27 + $0x1728] sm:$0xff] %v3367_v37 }
 0x2fb   : > { %3370 = vst [vmem:[%s11891_s27 + $0x1730] sm:$0xff] %v3369_v38 }
 0x2fc   : > { %3372 = vst [vmem:[%s11891_s27 + $0x1738] sm:$0xff] %v3371_v39 }
 0x2fd   : > { %3374 = vst [vmem:[%s11891_s27 + $0x1740] sm:$0xff] %v3373_v40 }
 0x2fe   : > { %3376 = vst [vmem:[%s11891_s27 + $0x1748] sm:$0xff] %v3375_v41 }
 0x2ff   : > { %3378 = vst [vmem:[%s11891_s27 + $0x1750] sm:$0xff] %v3377_v42 }
 0x300   : > { %3380 = vst [vmem:[%s11891_s27 + $0x1758] sm:$0xff] %v3379_v43 }
 0x301   : > { %3382 = vst [vmem:[%s11891_s27 + $0x1760] sm:$0xff] %v3381_v44 }
 0x302   : > { %3384 = vst [vmem:[%s11891_s27 + $0x1768] sm:$0xff] %v3383_v45 }
 0x303   : > { %3386 = vst [vmem:[%s11891_s27 + $0x1770] sm:$0xff] %v3385_v46 }
 0x304   : > { %3388 = vst [vmem:[%s11891_s27 + $0x1778] sm:$0xff] %v3387_v47 }
 0x305   : > { %3390 = vst [vmem:[%s11891_s27 + $0x1780] sm:$0xff] %v3389_v48 }
 0x306   : > { %3392 = vst [vmem:[%s11891_s27 + $0x1788] sm:$0xff] %v3391_v49 }
 0x307   : > { %3394 = vst [vmem:[%s11891_s27 + $0x1790] sm:$0xff] %v3393_v50 }
 0x308   : > { %3396 = vst [vmem:[%s11891_s27 + $0x1798] sm:$0xff] %v3395_v51 }
 0x309   : > { %3398 = vst [vmem:[%s11891_s27 + $0x17a0] sm:$0xff] %v3397_v52 }
 0x30a   : > { %3400 = vst [vmem:[%s11891_s27 + $0x17a8] sm:$0xff] %v3399_v53 }
 0x30b   : > { %3402 = vst [vmem:[%s11891_s27 + $0x17b0] sm:$0xff] %v3401_v54 }
 0x30c   : > { %3404 = vst [vmem:[%s11891_s27 + $0x17b8] sm:$0xff] %v3403_v55 }
 0x30d   : > { %3406 = vst [vmem:[%s11891_s27 + $0x17c0] sm:$0xff] %v3405_v56 }
 0x30e   : > { %3408 = vst [vmem:[%s11891_s27 + $0x17c8] sm:$0xff] %v3407_v57 }
 0x30f   : > { %3410 = vst [vmem:[%s11891_s27 + $0x17d0] sm:$0xff] %v3409_v58 }
 0x310   : > { %3412 = vst [vmem:[%s11891_s27 + $0x17d8] sm:$0xff] %v3411_v59 }
 0x311   : > { %3414 = vst [vmem:[%s11891_s27 + $0x17e0] sm:$0xff] %v3413_v60 }
 0x312   : > { %3416 = vst [vmem:[%s11891_s27 + $0x17e8] sm:$0xff] %v3415_v61 }
 0x313   : > { %3418 = vst [vmem:[%s11891_s27 + $0x17f0] sm:$0xff] %v3417_v62 }
 0x314   : > { %3420 = vst [vmem:[%s11891_s27 + $0x17f8] sm:$0xff] %v3419_v63 }
 0x315   : > { %3422 = vst [vmem:[%s11891_s27 + $0x1800] sm:$0xff] %v3421_v0 }
 0x316   : > { %3424 = vst [vmem:[%s11891_s27 + $0x1808] sm:$0xff] %v3423_v1 }
 0x317   : > { %3426 = vst [vmem:[%s11891_s27 + $0x1810] sm:$0xff] %v3425_v2 }
 0x318   : > { %3428 = vst [vmem:[%s11891_s27 + $0x1818] sm:$0xff] %v3427_v3 }
 0x319   : > { %3430 = vst [vmem:[%s11891_s27 + $0x1820] sm:$0xff] %v3429_v4 }
 0x31a   : > { %3432 = vst [vmem:[%s11891_s27 + $0x1828] sm:$0xff] %v3431_v5 }
 0x31b   : > { %3434 = vst [vmem:[%s11891_s27 + $0x1830] sm:$0xff] %v3433_v6 }
 0x31c   : > { %3436 = vst [vmem:[%s11891_s27 + $0x1838] sm:$0xff] %v3435_v7 }
 0x31d   : > { %3438 = vst [vmem:[%s11891_s27 + $0x1840] sm:$0xff] %v3437_v8 }
 0x31e   : > { %3440 = vst [vmem:[%s11891_s27 + $0x1848] sm:$0xff] %v3439_v9 }
 0x31f   : > { %3442 = vst [vmem:[%s11891_s27 + $0x1850] sm:$0xff] %v3441_v10 }
 0x320   : > { %3444 = vst [vmem:[%s11891_s27 + $0x1858] sm:$0xff] %v3443_v11 }
 0x321   : > { %3446 = vst [vmem:[%s11891_s27 + $0x1860] sm:$0xff] %v3445_v12 }
 0x322   : > { %3448 = vst [vmem:[%s11891_s27 + $0x1868] sm:$0xff] %v3447_v13 }
 0x323   : > { %3450 = vst [vmem:[%s11891_s27 + $0x1870] sm:$0xff] %v3449_v14 }
 0x324   : > { %3452 = vst [vmem:[%s11891_s27 + $0x1878] sm:$0xff] %v3451_v15 }
 0x325 PF: > { %p10919_p10 = scmp.ge.s32.totalorder %s11767_s12, 1  ;;  %p6628_p11 = scmp.lt.s32.totalorder %s11767_s12, 3 }
 0x327   : > { %p6629_p12 = pnand %p10919_p10, %p6628_p11 }
 0x328   : > { %s13461_s28 = sand.u32 (!%p6629_p12), 1, %s11759_s10   ;;  %s13469_s21 = smov (!%p6629_p12), 0  }
 0x329   : > { %6632 = sbr.rel (%p6629_p12) target bundleno = 2767 (0xacf), region = 104  ;;  %s10920_s14 = sshll.u32 (!%p6629_p12), %s13461_s28, 3 }
 0x32a   : > { %s11560_s29 = smul.u32 (!%p6629_p12), 6272, %s13461_s28  ;;  %s13467_s17 = scalar_lea.vmem (!%p6629_p12), [#allocation4], %s10920_s14 }
 0x32c   : > { %s13465_s16 = scalar_lea.vmem (!%p6629_p12), [#allocation3], %s11560_s29 }
 0x32e LB: >> { %v11781_v16 = vmov 0   ;;  %s6676_s22 = smul.u32 224, %s11771_s21  ;;  %v13520_v57 = vld [vmem:[%s16649_s1] ss:$0 sm:$0xff]  ;;  %v13525_v58 = vld [vmem:[%s16649_s1 + $0x1] ss:$0 sm:$0xff]  ;;  %s11771_s21 = sphi %s13469_s21, %s6675_s21  }
 0x32f   : >> { %11627 = vset.pattern.permute.xlu2 %v11781_v16  ;;  %11626 = vset.pattern.permute.xlu1 %v11781_v16  ;;  %v13547_v12 = vld [vmem:[%s16649_s1 + $0x2] ss:$0 sm:$0xff]  ;;  %vm7758_vm0 = vcmask 261120  }
 0x330   : >> { %11625 = vset.pattern.permute.xlu0 %v11781_v16  ;;  %s13476_s23 = scalar_lea.vmem %s13465_s16, %s6676_s22 [#allocation3] }
 0x331   : >> { %v6682_v17 = vld [vmem:[%s13476_s23 + $0x20] sm:$0xff]  ;;  %v6680_v18 = vld [vmem:[%s13476_s23 + $0x10] sm:$0xff]  ;;  %v6683_v20 = vld [vmem:[%s13476_s23 + $0x28] sm:$0xff] }
 0x332   : >> { %v6678_v19 = vld [vmem:[%s13476_s23] sm:$0xff]  ;;  %6729 = vperm.xlu2 %11627, %v6682_v17   ;;  %6719 = vperm.xlu1 %11626, %v6680_v18   ;;  %v6681_v21 = vld [vmem:[%s13476_s23 + $0x18] sm:$0xff]  ;;  %v6679_v22 = vld [vmem:[%s13476_s23 + $0x8] sm:$0xff] }
 0x333   : >> { %6709 = vperm.xlu0 %11625, %v6678_v19   ;;  %v6686_v23 = vld [vmem:[%s13476_s23 + $0x40] sm:$0xff]  ;;  %v6685_v24 = vld [vmem:[%s13476_s23 + $0x38] sm:$0xff]  ;;  %v6684_v25 = vld [vmem:[%s13476_s23 + $0x30] sm:$0xff] }
 0x334   : >> { %v6689_v26 = vld [vmem:[%s13476_s23 + $0x58] sm:$0xff]  ;;  %v6688_v27 = vld [vmem:[%s13476_s23 + $0x50] sm:$0xff]  ;;  %v6687_v28 = vld [vmem:[%s13476_s23 + $0x48] sm:$0xff] }
 0x335   : >> { %v6692_v29 = vld [vmem:[%s13476_s23 + $0x70] sm:$0xff]  ;;  %v6691_v30 = vld [vmem:[%s13476_s23 + $0x68] sm:$0xff]  ;;  %v6690_v31 = vld [vmem:[%s13476_s23 + $0x60] sm:$0xff] }
 0x336   : >> { %v6695_v32 = vld [vmem:[%s13476_s23 + $0x88] sm:$0xff]  ;;  %v6694_v33 = vld [vmem:[%s13476_s23 + $0x80] sm:$0xff]  ;;  %v6693_v34 = vld [vmem:[%s13476_s23 + $0x78] sm:$0xff] }
 0x337   : >> { %v6698_v35 = vld [vmem:[%s13476_s23 + $0xa0] sm:$0xff]  ;;  %v6697_v36 = vld [vmem:[%s13476_s23 + $0x98] sm:$0xff]  ;;  %v6696_v37 = vld [vmem:[%s13476_s23 + $0x90] sm:$0xff] }
 0x338   : >> { %v6701_v38 = vld [vmem:[%s13476_s23 + $0xb8] sm:$0xff]  ;;  %v6700_v39 = vld [vmem:[%s13476_s23 + $0xb0] sm:$0xff]  ;;  %v6699_v40 = vld [vmem:[%s13476_s23 + $0xa8] sm:$0xff] }
 0x339   : >> { %v6704_v41 = vld [vmem:[%s13476_s23 + $0xd0] sm:$0xff]  ;;  %v6703_v42 = vld [vmem:[%s13476_s23 + $0xc8] sm:$0xff]  ;;  %v6702_v43 = vld [vmem:[%s13476_s23 + $0xc0] sm:$0xff] }
 0x33a   : >> { %6734 = vperm.xlu2 %11627, %v6683_v20   ;;  %6724 = vperm.xlu1 %11626, %v6681_v21   ;;  %v10924_v44 = vld [vmem:[%s13476_s23 + $0xe8] sm:$0xff]  ;;  %v10923_v45 = vld [vmem:[%s13476_s23 + $0xe0] sm:$0xff]  ;;  %v6705_v46 = vld [vmem:[%s13476_s23 + $0xd8] sm:$0xff] }
 0x33b   : >> { %6714 = vperm.xlu0 %11625, %v6679_v22   ;;  %v10927_v47 = vld [vmem:[%s13476_s23 + $0x100] sm:$0xff]  ;;  %v10926_v48 = vld [vmem:[%s13476_s23 + $0xf8] sm:$0xff]  ;;  %v10925_v49 = vld [vmem:[%s13476_s23 + $0xf0] sm:$0xff] }
 0x33c   : >> { %v10930_v50 = vld [vmem:[%s13476_s23 + $0x118] sm:$0xff]  ;;  %v10929_v51 = vld [vmem:[%s13476_s23 + $0x110] sm:$0xff]  ;;  %v10928_v52 = vld [vmem:[%s13476_s23 + $0x108] sm:$0xff] }
 0x33d   : >> { %v10933_v54 = vld [vmem:[%s13476_s23 + $0x130] sm:$0xff]  ;;  %v10932_v55 = vld [vmem:[%s13476_s23 + $0x128] sm:$0xff]  ;;  %v10931_v56 = vld [vmem:[%s13476_s23 + $0x120] sm:$0xff] }
 0x33e   : >> { %v10936_v63 = vld [vmem:[%s13476_s23 + $0x148] sm:$0xff]  ;;  %v10935_v0 = vld [vmem:[%s13476_s23 + $0x140] sm:$0xff]  ;;  %v10934_v1 = vld [vmem:[%s13476_s23 + $0x138] sm:$0xff] }
 0x33f   : >> { %v10939_v3 = vld [vmem:[%s13476_s23 + $0x160] sm:$0xff]  ;;  %v10938_v4 = vld [vmem:[%s13476_s23 + $0x158] sm:$0xff]  ;;  %v10937_v5 = vld [vmem:[%s13476_s23 + $0x150] sm:$0xff] }
 0x340   : >> { %v10942_v9 = vld [vmem:[%s13476_s23 + $0x178] sm:$0xff]  ;;  %v10941_v10 = vld [vmem:[%s13476_s23 + $0x170] sm:$0xff]  ;;  %v10940_v11 = vld [vmem:[%s13476_s23 + $0x168] sm:$0xff] }
 0x342   : >> { %6749 = vperm.xlu2 %11627, %v6686_v23   ;;  %6744 = vperm.xlu1 %11626, %v6685_v24  }
 0x343   : >> { %6739 = vperm.xlu0 %11625, %v6684_v25  }
 0x34a   : >> { %6764 = vperm.xlu2 %11627, %v6689_v26   ;;  %6759 = vperm.xlu1 %11626, %v6688_v27  }
 0x34b   : >> { %6754 = vperm.xlu0 %11625, %v6687_v28   ;;  %v10945_v28 = vld [vmem:[%s13476_s23 + $0x190] sm:$0xff] }
 0x352   : >> { %6779 = vperm.xlu2 %11627, %v6692_v29   ;;  %6774 = vperm.xlu1 %11626, %v6691_v30   ;;  %v10944_v29 = vld [vmem:[%s13476_s23 + $0x188] sm:$0xff] }
 0x353   : >> { %6769 = vperm.xlu0 %11625, %v6690_v31  }
 0x35a   : >> { %6794 = vperm.xlu2 %11627, %v6695_v32   ;;  %6789 = vperm.xlu1 %11626, %v6694_v33  }
 0x35b   : >> { %6784 = vperm.xlu0 %11625, %v6693_v34   ;;  %v10943_v34 = vld [vmem:[%s13476_s23 + $0x180] sm:$0xff] }
 0x362   : >> { %6809 = vperm.xlu2 %11627, %v6698_v35   ;;  %6804 = vperm.xlu1 %11626, %v6697_v36  }
 0x363   : >> { %6799 = vperm.xlu0 %11625, %v6696_v37  }
 0x36a   : >> { %6824 = vperm.xlu2 %11627, %v6701_v38   ;;  %6819 = vperm.xlu1 %11626, %v6700_v39  }
 0x36b   : >> { %6814 = vperm.xlu0 %11625, %v6699_v40  }
 0x372   : >> { %6896 = vperm.xlu2 %11627, %v6704_v41   ;;  %6834 = vperm.xlu1 %11626, %v6703_v42  }
 0x373   : >> { %6829 = vperm.xlu0 %11625, %v6702_v43  }
 0x37a   : >> { %7056 = vperm.xlu2 %11627, %v10924_v44   ;;  %7051 = vperm.xlu1 %11626, %v10923_v45  }
 0x37b   : >> { %6958 = vperm.xlu0 %11625, %v6705_v46  }
 0x382   : >> { %7071 = vperm.xlu2 %11627, %v10927_v47   ;;  %7066 = vperm.xlu1 %11626, %v10926_v48  }
 0x383   : >> { %7061 = vperm.xlu0 %11625, %v10925_v49  }
 0x38a   : >> { %7086 = vperm.xlu2 %11627, %v10930_v50   ;;  %7081 = vperm.xlu1 %11626, %v10929_v51   ;;  %v10948_v50 = vld [vmem:[%s13476_s23 + $0x1a8] sm:$0xff]  ;;  %v10947_v51 = vld [vmem:[%s13476_s23 + $0x1a0] sm:$0xff] }
 0x38b   : >> { %7076 = vperm.xlu0 %11625, %v10928_v52  }
 0x38c   : >> { %v6730_v53 = vpop.permute.xlu2 %6729 }
 0x38d   : >> { %v6844_v59 = vmul.f32 %v13520_v57, %v6730_v53  ;;  %v6905_v15 = vmul.f32 %v13525_v58, %v6730_v53  ;;  %v6966_v24 = vmul.f32 %v13547_v12, %v6730_v53 }
 0x392   : >> { %7101 = vperm.xlu2 %11627, %v10933_v54   ;;  %7096 = vperm.xlu1 %11626, %v10932_v55  }
 0x393   : >> { %7091 = vperm.xlu0 %11625, %v10931_v56   ;;  %v10946_v56 = vld [vmem:[%s13476_s23 + $0x198] sm:$0xff] }
 0x394   : >> { %v6735_v60 = vpop.permute.xlu2 %6734 }
 0x395   : >> { %v6906_v61 = vmul.f32 %v13525_v58, %v6735_v60  ;;  %v6967_v25 = vmul.f32 %v13547_v12, %v6735_v60  ;;  %v6845_v44 = vmul.f32 %v13520_v57, %v6735_v60 }
 0x397   : >> { %v13529_v62 = vadd.f32 %v6906_v61, %v6844_v59 }
 0x39a   : >> { %7116 = vperm.xlu2 %11627, %v10936_v63   ;;  %7111 = vperm.xlu1 %11626, %v10935_v0  }
 0x39b   : >> { %7106 = vperm.xlu0 %11625, %v10934_v1  }
 0x39c   : >> { %v13534_v2 = vpop.permute.xlu2 %6749 }
 0x39d   : >> { %v6909_v41 = vmul.f32 %v13525_v58, %v13534_v2  ;;  %v6970_v52 = vmul.f32 %v13547_v12, %v13534_v2 }
 0x3a2   : >> { %7131 = vperm.xlu2 %11627, %v10939_v3   ;;  %7126 = vperm.xlu1 %11626, %v10938_v4   ;;  %v6848_v4 = vmul.f32 %v13520_v57, %v13534_v2 }
 0x3a3   : >> { %7121 = vperm.xlu0 %11625, %v10937_v5  }
 0x3a4   : >> { %v13539_v6 = vpop.permute.xlu2 %6764  ;;  %v6720_v7 = vpop.permute.xlu1 %6719 }
 0x3a5   : >> { %v6710_v8 = vpop.permute.xlu0 %6709  ;;  %v6842_v16 = vmul.f32 %v13520_v57, %v6720_v7  ;;  %v6903_v17 = vmul.f32 %v13525_v58, %v6720_v7  ;;  %v6964_v26 = vmul.f32 %v13547_v12, %v6720_v7  ;;  %v6912_v1 = vmul.f32 %v13525_v58, %v13539_v6 }
 0x3a6   : >> { %v6840_v20 = vmul.f32 %v13520_v57, %v6710_v8 }
 0x3aa   : >> { %7146 = vperm.xlu2 %11627, %v10942_v9   ;;  %7141 = vperm.xlu1 %11626, %v10941_v10  }
 0x3ab   : >> { %7136 = vperm.xlu0 %11625, %v10940_v11   ;;  %v10954_v11 = vld [vmem:[%s13476_s23 + $0x1c0] sm:$0xff] }
 0x3ac   : >> { %v13549_v13 = vpop.permute.xlu2 %6779  ;;  %v6725_v14 = vpop.permute.xlu1 %6724 }
 0x3ad   : >> { %v6843_v18 = vmul.f32 %v13520_v57, %v6725_v14  ;;  %v6715_v19 = vpop.permute.xlu0 %6714  ;;  %v6904_v21 = vmul.f32 %v13525_v58, %v6725_v14  ;;  %v6965_v31 = vmul.f32 %v13547_v12, %v6725_v14  ;;  %v10950_v14 = vld [vmem:[%s13476_s23 + $0x1b8] sm:$0xff] }
 0x3ae   : >> { %v6841_v22 = vmul.f32 %v13520_v57, %v6715_v19  ;;  %v6902_v23 = vmul.f32 %v13525_v58, %v6715_v19  ;;  %v10949_v19 = vld [vmem:[%s13476_s23 + $0x1b0] sm:$0xff] }
 0x3af   : >> { %v6931_v27 = vadd.f32 %v6905_v15, %v6843_v18  ;;  %v6930_v30 = vadd.f32 %v6904_v21, %v6842_v16  ;;  %v6973_v15 = vmul.f32 %v13547_v12, %v13539_v6 }
 0x3b0   : >> { %v6928_v32 = vadd.f32 %v6902_v23, %v6840_v20  ;;  %v6929_v33 = vadd.f32 %v6903_v17, %v6841_v22 }
 0x3b1   : >> { %v13566_v35 = vadd.f32 %v6967_v25, %v6931_v27  ;;  %v13572_v38 = vadd.f32 %v6966_v24, %v6930_v30  ;;  %v6915_v24 = vmul.f32 %v13525_v58, %v13549_v13  ;;  %v6851_v27 = vmul.f32 %v13520_v57, %v13539_v6 }
 0x3b2   : >> { %7161 = vperm.xlu2 %11627, %v10945_v28   ;;  %7156 = vperm.xlu1 %11626, %v10944_v29   ;;  %v13568_v36 = vadd.f32 %v6965_v31, %v6929_v33  ;;  %v13570_v37 = vadd.f32 %v6964_v26, %v6928_v32  ;;  %v10957_v33 = vld [vmem:[%s13476_s23 + $0x1d8] sm:$0xff] }
 0x3b3   : >> { %7151 = vperm.xlu0 %11625, %v10943_v34   ;;  %v10956_v34 = vld [vmem:[%s13476_s23 + $0x1d0] sm:$0xff] }
 0x3b4   : >> { %v13574_v39 = vpop.permute.xlu2 %6794  ;;  %v6745_v40 = vpop.permute.xlu1 %6744 }
 0x3b5   : >> { %v6847_v42 = vmul.f32 %v13520_v57, %v6745_v40  ;;  %v6740_v43 = vpop.permute.xlu0 %6739  ;;  %v6908_v45 = vmul.f32 %v13525_v58, %v6745_v40  ;;  %v6969_v53 = vmul.f32 %v13547_v12, %v6745_v40  ;;  %v6976_v40 = vmul.f32 %v13547_v12, %v13549_v13 }
 0x3b6   : >> { %v6846_v46 = vmul.f32 %v13520_v57, %v6740_v43  ;;  %v6907_v47 = vmul.f32 %v13525_v58, %v6740_v43  ;;  %v6968_v49 = vmul.f32 %v13547_v12, %v6740_v43 }
 0x3b7   : >> { %v6935_v48 = vadd.f32 %v6909_v41, %v6847_v42 }
 0x3b8   : >> { %v6933_v54 = vadd.f32 %v6907_v47, %v6845_v44  ;;  %v6934_v55 = vadd.f32 %v6908_v45, %v6846_v46  ;;  %v13591_v59 = vadd.f32 %v6968_v49, %v13529_v62  ;;  %v10955_v44 = vld [vmem:[%s13476_s23 + $0x1c8] sm:$0xff]  ;;  %v6918_v49 = vmul.f32 %v13525_v58, %v13574_v39 }
 0x3ba   : >> { %7176 = vperm.xlu2 %11627, %v10948_v50   ;;  %7171 = vperm.xlu1 %11626, %v10947_v51   ;;  %v13593_v60 = vadd.f32 %v6970_v52, %v6934_v55  ;;  %v13595_v61 = vadd.f32 %v6969_v53, %v6933_v54  ;;  %v6854_v53 = vmul.f32 %v13520_v57, %v13549_v13  ;;  %v13665_v13 = vld [vmem:[%s16649_s1 + $0x3] ss:$0 sm:$0xff] }
 0x3bb   : >> { %7166 = vperm.xlu0 %11625, %v10946_v56  }
 0x3bc   : >> { %v13597_v63 = vpop.permute.xlu2 %6809  ;;  %v6760_v0 = vpop.permute.xlu1 %6759 }
 0x3bd   : >> { %v6850_v3 = vmul.f32 %v13520_v57, %v6760_v0  ;;  %v6755_v62 = vpop.permute.xlu0 %6754  ;;  %v6911_v5 = vmul.f32 %v13525_v58, %v6760_v0  ;;  %v6972_v16 = vmul.f32 %v13547_v12, %v6760_v0  ;;  %v6979_v0 = vmul.f32 %v13547_v12, %v13574_v39 }
 0x3be   : >> { %v6849_v7 = vmul.f32 %v13520_v57, %v6755_v62  ;;  %v6910_v8 = vmul.f32 %v13525_v58, %v6755_v62  ;;  %v6971_v10 = vmul.f32 %v13547_v12, %v6755_v62  ;;  %v10959_v62 = vld [vmem:[%s13476_s23 + $0x1e8] sm:$0xff] }
 0x3bf   : >> { %v6938_v9 = vadd.f32 %v6912_v1, %v6850_v3  ;;  %v10960_v3 = vld [vmem:[%s13476_s23 + $0x1f0] sm:$0xff] }
 0x3c0   : >> { %v6936_v17 = vadd.f32 %v6910_v8, %v6848_v4  ;;  %v6937_v18 = vadd.f32 %v6911_v5, %v6849_v7  ;;  %v13614_v2 = vadd.f32 %v6971_v10, %v6935_v48 }
 0x3c2   : >> { %7393 = vperm.xlu2 %11627, %v10954_v11   ;;  %7300 = vperm.xlu1 %11626, %v10950_v14   ;;  %v13616_v20 = vadd.f32 %v6973_v15, %v6937_v18  ;;  %v13618_v21 = vadd.f32 %v6972_v16, %v6936_v17  ;;  %v6921_v16 = vmul.f32 %v13525_v58, %v13597_v63 }
 0x3c3   : >> { %7238 = vperm.xlu0 %11625, %v10949_v19  }
 0x3c4   : >> { %v13620_v22 = vpop.permute.xlu2 %6824  ;;  %v6775_v23 = vpop.permute.xlu1 %6774 }
 0x3c5   : >> { %v6853_v25 = vmul.f32 %v13520_v57, %v6775_v23  ;;  %v6770_v26 = vpop.permute.xlu0 %6769  ;;  %v6914_v28 = vmul.f32 %v13525_v58, %v6775_v23  ;;  %v6975_v41 = vmul.f32 %v13547_v12, %v6775_v23 }
 0x3c6   : >> { %v6852_v29 = vmul.f32 %v13520_v57, %v6770_v26  ;;  %v6913_v30 = vmul.f32 %v13525_v58, %v6770_v26  ;;  %v6974_v32 = vmul.f32 %v13547_v12, %v6770_v26 }
 0x3c7   : >> { %v6941_v31 = vadd.f32 %v6915_v24, %v6853_v25  ;;  %v6857_v24 = vmul.f32 %v13520_v57, %v13574_v39 }
 0x3c8   : >> { %v6939_v42 = vadd.f32 %v6913_v30, %v6851_v27  ;;  %v6940_v43 = vadd.f32 %v6914_v28, %v6852_v29  ;;  %v13637_v6 = vadd.f32 %v6974_v32, %v6938_v9  ;;  %v10958_v9 = vld [vmem:[%s13476_s23 + $0x1e0] sm:$0xff]  ;;  %v6982_v28 = vmul.f32 %v13547_v12, %v13597_v63 }
 0x3c9   : >> { %v10962_v32 = vld [vmem:[%s13476_s23 + $0x200] sm:$0xff] }
 0x3ca   : >> { %7408 = vperm.xlu2 %11627, %v10957_v33   ;;  %7403 = vperm.xlu1 %11626, %v10956_v34   ;;  %v13639_v45 = vadd.f32 %v6976_v40, %v6940_v43  ;;  %v13641_v46 = vadd.f32 %v6975_v41, %v6939_v42  ;;  %v10961_v41 = vld [vmem:[%s13476_s23 + $0x1f8] sm:$0xff] }
 0x3cb   : >> { %7398 = vperm.xlu0 %11625, %v10955_v44  }
 0x3cc   : >> { %v13643_v47 = vpop.permute.xlu2 %6896  ;;  %v6790_v48 = vpop.permute.xlu1 %6789 }
 0x3cd   : >> { %v6856_v50 = vmul.f32 %v13520_v57, %v6790_v48  ;;  %v6917_v51 = vmul.f32 %v13525_v58, %v6790_v48  ;;  %v6785_v52 = vpop.permute.xlu0 %6784  ;;  %v6978_v4 = vmul.f32 %v13547_v12, %v6790_v48  ;;  %v6924_v48 = vmul.f32 %v13525_v58, %v13620_v22 }
 0x3ce   : >> { %v6855_v54 = vmul.f32 %v13520_v57, %v6785_v52  ;;  %v6916_v55 = vmul.f32 %v13525_v58, %v6785_v52  ;;  %v6977_v56 = vmul.f32 %v13547_v12, %v6785_v52  ;;  %v6860_v52 = vmul.f32 %v13520_v57, %v13597_v63 }
 0x3cf   : >> { %v6944_v1 = vadd.f32 %v6918_v49, %v6856_v50 }
 0x3d0   : >> { %v6942_v5 = vadd.f32 %v6916_v55, %v6854_v53  ;;  %v6943_v7 = vadd.f32 %v6917_v51, %v6855_v54  ;;  %v13659_v8 = vadd.f32 %v6977_v56, %v6941_v31  ;;  %v10963_v31 = vld [vmem:[%s13476_s23 + $0x208] sm:$0xff] }
 0x3d2   : >> { %7423 = vperm.xlu2 %11627, %v10960_v3   ;;  %7418 = vperm.xlu1 %11626, %v10959_v62   ;;  %v13667_v10 = vadd.f32 %v6979_v0, %v6943_v7  ;;  %v13669_v11 = vadd.f32 %v6978_v4, %v6942_v5  ;;  %v10966_v3 = vld [vmem:[%s13476_s23 + $0x220] sm:$0xff]  ;;  %v10965_v62 = vld [vmem:[%s13476_s23 + $0x218] sm:$0xff]  ;;  %v6985_v4 = vmul.f32 %v13547_v12, %v13620_v22 }
 0x3d3   : >> { %7413 = vperm.xlu0 %11625, %v10958_v9   ;;  %v10964_v9 = vld [vmem:[%s13476_s23 + $0x210] sm:$0xff] }
 0x3d4   : >> { %v13671_v14 = vpop.permute.xlu2 %7056  ;;  %v6805_v15 = vpop.permute.xlu1 %6804 }
 0x3d5   : >> { %v7183_v17 = vmul.f32 %v13665_v13, %v13671_v14  ;;  %v6859_v18 = vmul.f32 %v13520_v57, %v6805_v15  ;;  %v6920_v19 = vmul.f32 %v13525_v58, %v6805_v15  ;;  %v6800_v23 = vpop.permute.xlu0 %6799  ;;  %v6981_v33 = vmul.f32 %v13547_v12, %v6805_v15 }
 0x3d6   : >> { %v6858_v25 = vmul.f32 %v13520_v57, %v6800_v23  ;;  %v6919_v26 = vmul.f32 %v13525_v58, %v6800_v23  ;;  %v6980_v27 = vmul.f32 %v13547_v12, %v6800_v23 }
 0x3d7   : >> { %v13687_v29 = vadd.f32 %v7183_v17, %v13568_v36  ;;  %v6947_v30 = vadd.f32 %v6921_v16, %v6859_v18 }
 0x3d8   : >> { %v6945_v34 = vadd.f32 %v6919_v26, %v6857_v24  ;;  %v6946_v40 = vadd.f32 %v6920_v19, %v6858_v25  ;;  %v13692_v39 = vadd.f32 %v6980_v27, %v6944_v1  ;;  %v6927_v19 = vmul.f32 %v13525_v58, %v13643_v47 }
 0x3d9   : >> { %v6863_v26 = vmul.f32 %v13520_v57, %v13620_v22 }
 0x3da   : >> { %7438 = vperm.xlu2 %11627, %v10963_v31   ;;  %7433 = vperm.xlu1 %11626, %v10962_v32   ;;  %v13695_v42 = vadd.f32 %v6982_v28, %v6946_v40  ;;  %v13697_v43 = vadd.f32 %v6981_v33, %v6945_v34  ;;  %v10969_v33 = vld [vmem:[%s13476_s23 + $0x238] sm:$0xff]  ;;  %v10968_v34 = vld [vmem:[%s13476_s23 + $0x230] sm:$0xff] }
 0x3db   : >> { %7428 = vperm.xlu0 %11625, %v10961_v41   ;;  %v6988_v41 = vmul.f32 %v13547_v12, %v13643_v47 }
 0x3dc   : >> { %v13699_v36 = vpop.permute.xlu2 %7071  ;;  %v6820_v44 = vpop.permute.xlu1 %6819 }
 0x3dd   : >> { %v7186_v49 = vmul.f32 %v13665_v13, %v13699_v36  ;;  %v6862_v50 = vmul.f32 %v13520_v57, %v6820_v44  ;;  %v6815_v51 = vpop.permute.xlu0 %6814  ;;  %v6923_v53 = vmul.f32 %v13525_v58, %v6820_v44  ;;  %v6984_v5 = vmul.f32 %v13547_v12, %v6820_v44 }
 0x3de   : >> { %v6861_v54 = vmul.f32 %v13520_v57, %v6815_v51  ;;  %v6922_v55 = vmul.f32 %v13525_v58, %v6815_v51  ;;  %v6983_v1 = vmul.f32 %v13547_v12, %v6815_v51 }
 0x3df   : >> { %v13712_v56 = vadd.f32 %v7186_v49, %v13591_v59  ;;  %v6950_v0 = vadd.f32 %v6924_v48, %v6862_v50  ;;  %v10967_v49 = vld [vmem:[%s13476_s23 + $0x228] sm:$0xff] }
 0x3e0   : >> { %v6948_v63 = vadd.f32 %v6922_v55, %v6860_v52  ;;  %v6949_v7 = vadd.f32 %v6923_v53, %v6861_v54  ;;  %v13721_v15 = vadd.f32 %v6983_v1, %v6947_v30 }
 0x3e2   : >> { %7453 = vperm.xlu2 %11627, %v10966_v3   ;;  %7448 = vperm.xlu1 %11626, %v10965_v62   ;;  %v13723_v59 = vadd.f32 %v6985_v4, %v6949_v7  ;;  %v13725_v16 = vadd.f32 %v6984_v5, %v6948_v63  ;;  %v10972_v62 = vld [vmem:[%s13476_s23 + $0x250] sm:$0xff]  ;;  %v10971_v4 = vld [vmem:[%s13476_s23 + $0x248] sm:$0xff]  ;;  %v10970_v63 = vld [vmem:[%s13476_s23 + $0x240] sm:$0xff] }
 0x3e3   : >> { %7443 = vperm.xlu0 %11625, %v10964_v9  }
 0x3e4   : >> { %v13727_v17 = vpop.permute.xlu2 %7086  ;;  %v6835_v18 = vpop.permute.xlu1 %6834 }
 0x3e5   : >> { %v7189_v23 = vmul.f32 %v13665_v13, %v13727_v17  ;;  %v6865_v24 = vmul.f32 %v13520_v57, %v6835_v18  ;;  %v6830_v25 = vpop.permute.xlu0 %6829  ;;  %v6926_v27 = vmul.f32 %v13525_v58, %v6835_v18  ;;  %v6987_v44 = vmul.f32 %v13547_v12, %v6835_v18 }
 0x3e6   : >> { %v6864_v28 = vmul.f32 %v13520_v57, %v6830_v25  ;;  %v6925_v30 = vmul.f32 %v13525_v58, %v6830_v25  ;;  %v6986_v32 = vmul.f32 %v13547_v12, %v6830_v25 }
 0x3e7   : >> { %v13740_v31 = vadd.f32 %v7189_v23, %v13614_v2  ;;  %v6953_v40 = vadd.f32 %v6927_v19, %v6865_v24  ;;  %v13758_v2 = vld [vmem:[%s16649_s1 + $0x4] ss:$0 sm:$0xff] }
 0x3e8   : >> { %v6951_v22 = vadd.f32 %v6925_v30, %v6863_v26  ;;  %v6952_v48 = vadd.f32 %v6926_v27, %v6864_v28  ;;  %v13749_v50 = vadd.f32 %v6986_v32, %v6950_v0  ;;  %v7244_v0 = vmul.f32 %v13758_v2, %v13671_v14  ;;  %v10975_v28 = vld [vmem:[%s13476_s23 + $0x268] sm:$0xff]  ;;  %v10974_v30 = vld [vmem:[%s13476_s23 + $0x260] sm:$0xff] }
 0x3e9   : >> { %v7247_v24 = vmul.f32 %v13758_v2, %v13699_v36 }
 0x3ea   : >> { %7468 = vperm.xlu2 %11627, %v10969_v33   ;;  %7463 = vperm.xlu1 %11626, %v10968_v34   ;;  %v13751_v57 = vadd.f32 %v6988_v41, %v6952_v48  ;;  %v13753_v58 = vadd.f32 %v6987_v44, %v6951_v22  ;;  %v10973_v41 = vld [vmem:[%s13476_s23 + $0x258] sm:$0xff] }
 0x3eb   : >> { %7458 = vperm.xlu0 %11625, %v10967_v49  }
 0x3ec   : >> { %v13760_v47 = vpop.permute.xlu2 %7101  ;;  %v7052_v51 = vpop.permute.xlu1 %7051 }
 0x3ed   : >> { %v7192_v52 = vmul.f32 %v13665_v13, %v13760_v47  ;;  %v7182_v53 = vmul.f32 %v13665_v13, %v7052_v51  ;;  %v6959_v54 = vpop.permute.xlu0 %6958 }
 0x3ee   : >> { %v6989_v55 = vmul.f32 %v13547_v12, %v6959_v54 }
 0x3ef   : >> { %v13769_v1 = vadd.f32 %v7192_v52, %v13637_v6  ;;  %v7208_v3 = vadd.f32 %v7182_v53, %v13570_v37  ;;  %v13782_v6 = vld [vmem:[%s16649_s1 + $0x5] ss:$0 sm:$0xff] }
 0x3f0   : >> { %v13774_v5 = vadd.f32 %v6989_v55, %v6953_v40  ;;  %v7250_v55 = vmul.f32 %v13758_v2, %v13727_v17 }
 0x3f1   : >> { %v7270_v7 = vadd.f32 %v7244_v0, %v7208_v3 }
 0x3f2   : >> { %7483 = vperm.xlu2 %11627, %v10972_v62   ;;  %7478 = vperm.xlu1 %11626, %v10971_v4   ;;  %v10978_v4 = vld [vmem:[%s13476_s23 + $0x280] sm:$0xff] }
 0x3f3   : >> { %7473 = vperm.xlu0 %11625, %v10970_v63   ;;  %v10977_v63 = vld [vmem:[%s13476_s23 + $0x278] sm:$0xff] }
 0x3f4   : >> { %v13777_v12 = vpop.permute.xlu2 %7116  ;;  %v7067_v9 = vpop.permute.xlu1 %7066 }
 0x3f5   : >> { %v7195_v37 = vmul.f32 %v13665_v13, %v13777_v12  ;;  %v7185_v14 = vmul.f32 %v13665_v13, %v7067_v9  ;;  %v7062_v18 = vpop.permute.xlu0 %7061  ;;  %v7246_v32 = vmul.f32 %v13758_v2, %v7067_v9  ;;  %v7307_v33 = vmul.f32 %v13782_v6, %v7067_v9 }
 0x3f6   : >> { %v7184_v19 = vmul.f32 %v13665_v13, %v7062_v18  ;;  %v7245_v23 = vmul.f32 %v13758_v2, %v7062_v18  ;;  %v7306_v27 = vmul.f32 %v13782_v6, %v7062_v18  ;;  %v10976_v18 = vld [vmem:[%s13476_s23 + $0x270] sm:$0xff] }
 0x3f7   : >> { %v13792_v25 = vadd.f32 %v7195_v37, %v13659_v8  ;;  %v7211_v26 = vadd.f32 %v7185_v14, %v13566_v35  ;;  %v7308_v8 = vmul.f32 %v13782_v6, %v13699_v36 }
 0x3f8   : >> { %v7210_v34 = vadd.f32 %v7184_v19, %v13572_v38  ;;  %v7271_v40 = vadd.f32 %v7245_v23, %v13687_v29  ;;  %v13803_v22 = vadd.f32 %v7306_v27, %v7270_v7 }
 0x3f9   : >> { %v7273_v44 = vadd.f32 %v7247_v24, %v7211_v26 }
 0x3fa   : >> { %v7272_v35 = vadd.f32 %v7246_v32, %v7210_v34  ;;  %7498 = vperm.xlu2 %11627, %v10975_v28   ;;  %7493 = vperm.xlu1 %11626, %v10974_v30   ;;  %v13807_v48 = vadd.f32 %v7307_v33, %v7271_v40  ;;  %v7253_v33 = vmul.f32 %v13758_v2, %v13760_v47 }
 0x3fb   : >> { %7488 = vperm.xlu0 %11625, %v10973_v41  }
 0x3fc   : >> { %v13809_v49 = vpop.permute.xlu2 %7131  ;;  %v7082_v38 = vpop.permute.xlu1 %7081  ;;  %v13811_v51 = vadd.f32 %v7308_v8, %v7272_v35  ;;  %v10980_v8 = vld [vmem:[%s13476_s23 + $0x290] sm:$0xff] }
 0x3fd   : >> { %v7198_v29 = vmul.f32 %v13665_v13, %v13809_v49  ;;  %v7188_v52 = vmul.f32 %v13665_v13, %v7082_v38  ;;  %v7077_v36 = vpop.permute.xlu0 %7076  ;;  %v7249_v7 = vmul.f32 %v13758_v2, %v7082_v38  ;;  %v7310_v9 = vmul.f32 %v13782_v6, %v7082_v38 }
 0x3fe   : >> { %v7187_v53 = vmul.f32 %v13665_v13, %v7077_v36  ;;  %v7248_v54 = vmul.f32 %v13758_v2, %v7077_v36  ;;  %v7309_v62 = vmul.f32 %v13782_v6, %v7077_v36  ;;  %v10979_v36 = vld [vmem:[%s13476_s23 + $0x288] sm:$0xff] }
 0x3ff   : >> { %v13821_v0 = vadd.f32 %v7198_v29, %v13692_v39  ;;  %v7214_v3 = vadd.f32 %v7188_v52, %v13593_v60  ;;  %v7311_v39 = vmul.f32 %v13782_v6, %v13727_v17 }
 0x400   : >> { %v7213_v37 = vadd.f32 %v7187_v53, %v13595_v61  ;;  %v7274_v14 = vadd.f32 %v7248_v54, %v13712_v56  ;;  %v13832_v19 = vadd.f32 %v7309_v62, %v7273_v44  ;;  %v10981_v44 = vld [vmem:[%s13476_s23 + $0x298] sm:$0xff]  ;;  %s7756_s23 = smul.u32 208, %s11771_s21  ;;  %s6675_s21 = sadd.s32 1, %s11771_s21  }
 0x401   : >> { %v7276_v23 = vadd.f32 %v7250_v55, %v7214_v3  ;;  %p6672_p13 = scmp.ge.s32.totalorder %s6675_s21, 26  }
 0x402   : >> { %v7275_v60 = vadd.f32 %v7249_v7, %v7213_v37  ;;  %7513 = vperm.xlu2 %11627, %v10978_v4   ;;  %7508 = vperm.xlu1 %11626, %v10977_v63   ;;  %v13836_v24 = vadd.f32 %v7310_v9, %v7274_v14  ;;  %v7256_v9 = vmul.f32 %v13758_v2, %v13777_v12  ;;  %s14024_s14 = scalar_lea.vmem [#allocation2], %s7756_s23  ;;  %s14196_s22 = smov (%p6672_p13), 0  }
 0x403   : >> { %7503 = vperm.xlu0 %11625, %v10976_v18  }
 0x404   : >> { %v13838_v26 = vpop.permute.xlu2 %7146  ;;  %v7097_v61 = vpop.permute.xlu1 %7096  ;;  %v13840_v27 = vadd.f32 %v7311_v39, %v7275_v60 }
 0x405   : >> { %v7201_v56 = vmul.f32 %v13665_v13, %v13838_v26  ;;  %v7191_v28 = vmul.f32 %v13665_v13, %v7097_v61  ;;  %v7092_v17 = vpop.permute.xlu0 %7091  ;;  %v7252_v35 = vmul.f32 %v13758_v2, %v7097_v61  ;;  %v7313_v38 = vmul.f32 %v13782_v6, %v7097_v61 }
 0x406   : >> { %v7190_v30 = vmul.f32 %v13665_v13, %v7092_v17  ;;  %v7251_v32 = vmul.f32 %v13758_v2, %v7092_v17  ;;  %v7312_v41 = vmul.f32 %v13782_v6, %v7092_v17  ;;  %v7317_v17 = vmul.f32 %v13782_v6, %v13777_v12 }
 0x407   : >> { %v13850_v34 = vadd.f32 %v7201_v56, %v13721_v15  ;;  %v7217_v40 = vadd.f32 %v7191_v28, %v13616_v20  ;;  %v7314_v15 = vmul.f32 %v13782_v6, %v13760_v47  ;;  %v7259_v12 = vmul.f32 %v13758_v2, %v13809_v49 }
 0x408   : >> { %v7216_v29 = vadd.f32 %v7190_v30, %v13618_v21  ;;  %v7277_v52 = vadd.f32 %v7251_v32, %v13740_v31  ;;  %v13861_v53 = vadd.f32 %v7312_v41, %v7276_v23 }
 0x409   : >> { %v7279_v54 = vadd.f32 %v7253_v33, %v7217_v40 }
 0x40a   : >> { %v7278_v20 = vadd.f32 %v7252_v35, %v7216_v29  ;;  %7642 = vperm.xlu2 %11627, %v10981_v44   ;;  %7580 = vperm.xlu1 %11626, %v10980_v8   ;;  %v13865_v55 = vadd.f32 %v7313_v38, %v7277_v52 }
 0x40b   : >> { %7518 = vperm.xlu0 %11625, %v10979_v36  }
 0x40c   : >> { %v13867_v3 = vpop.permute.xlu2 %7161  ;;  %v7112_v62 = vpop.permute.xlu1 %7111  ;;  %v13869_v4 = vadd.f32 %v7314_v15, %v7278_v20 }
 0x40d   : >> { %v7204_v21 = vmul.f32 %v13665_v13, %v13867_v3  ;;  %v7194_v31 = vmul.f32 %v13665_v13, %v7112_v62  ;;  %v7107_v63 = vpop.permute.xlu0 %7106  ;;  %v7255_v23 = vmul.f32 %v13758_v2, %v7112_v62  ;;  %v7316_v39 = vmul.f32 %v13782_v6, %v7112_v62 }
 0x40e   : >> { %v7193_v7 = vmul.f32 %v13665_v13, %v7107_v63  ;;  %v7254_v47 = vmul.f32 %v13758_v2, %v7107_v63  ;;  %v7315_v18 = vmul.f32 %v13782_v6, %v7107_v63  ;;  %v7320_v62 = vmul.f32 %v13782_v6, %v13809_v49 }
 0x40f   : >> { %v13879_v37 = vadd.f32 %v7204_v21, %v13749_v50  ;;  %v7220_v14 = vadd.f32 %v7194_v31, %v13639_v45 }
 0x410   : >> { %v7219_v60 = vadd.f32 %v7193_v7, %v13641_v46  ;;  %v7280_v61 = vadd.f32 %v7254_v47, %v13769_v1  ;;  %v13887_v56 = vadd.f32 %v7315_v18, %v7279_v54 }
 0x411   : >> { %v7282_v28 = vadd.f32 %v7256_v9, %v7220_v14  ;;  %v7262_v9 = vmul.f32 %v13758_v2, %v13838_v26 }
 0x412   : >> { %v7281_v50 = vadd.f32 %v7255_v23, %v7219_v60  ;;  %v13891_v30 = vadd.f32 %v7316_v39, %v7280_v61 }
 0x414   : >> { %v13893_v45 = vpop.permute.xlu2 %7176  ;;  %v7127_v32 = vpop.permute.xlu1 %7126  ;;  %v13895_v33 = vadd.f32 %v7317_v17, %v7281_v50 }
 0x415   : >> { %v7207_v40 = vmul.f32 %v13665_v13, %v13893_v45  ;;  %v7197_v46 = vmul.f32 %v13665_v13, %v7127_v32  ;;  %v7122_v1 = vpop.permute.xlu0 %7121  ;;  %v7258_v29 = vmul.f32 %v13758_v2, %v7127_v32  ;;  %v7319_v52 = vmul.f32 %v13782_v6, %v7127_v32 }
 0x416   : >> { %v7196_v41 = vmul.f32 %v13665_v13, %v7122_v1  ;;  %v7257_v44 = vmul.f32 %v13758_v2, %v7122_v1  ;;  %v7318_v38 = vmul.f32 %v13782_v6, %v7122_v1 }
 0x417   : >> { %v13905_v8 = vadd.f32 %v7207_v40, %v13774_v5  ;;  %v7223_v35 = vadd.f32 %v7197_v46, %v13667_v10 }
 0x418   : >> { %v7222_v36 = vadd.f32 %v7196_v41, %v13669_v11  ;;  %v7283_v54 = vadd.f32 %v7257_v44, %v13792_v25  ;;  %v13913_v15 = vadd.f32 %v7318_v38, %v7282_v28  ;;  %v7323_v28 = vmul.f32 %v13782_v6, %v13838_v26 }
 0x419   : >> { %v7285_v20 = vadd.f32 %v7259_v12, %v7223_v35  ;;  %v7265_v41 = vmul.f32 %v13758_v2, %v13867_v3 }
 0x41a   : >> { %v7284_v5 = vadd.f32 %v7258_v29, %v7222_v36  ;;  %v13917_v21 = vadd.f32 %v7319_v52, %v7283_v54  ;;  %v7326_v54 = vmul.f32 %v13782_v6, %v13867_v3 }
 0x41c   : >> { %v7142_v10 = vpop.permute.xlu1 %7141  ;;  %v13919_v31 = vadd.f32 %v7320_v62, %v7284_v5 }
 0x41d   : >> { %v7200_v63 = vmul.f32 %v13665_v13, %v7142_v10  ;;  %v7137_v7 = vpop.permute.xlu0 %7136  ;;  %v7261_v14 = vmul.f32 %v13758_v2, %v7142_v10  ;;  %v7322_v18 = vmul.f32 %v13782_v6, %v7142_v10 }
 0x41e   : >> { %v7199_v47 = vmul.f32 %v13665_v13, %v7137_v7  ;;  %v7260_v11 = vmul.f32 %v13758_v2, %v7137_v7  ;;  %v7321_v25 = vmul.f32 %v13782_v6, %v7137_v7 }
 0x41f   : >> { %v7226_v49 = vadd.f32 %v7200_v63, %v13695_v42  ;;  %v7394_v42 = vpop.permute.xlu2 %7393 }
 0x420   : >> { %v7225_v23 = vadd.f32 %v7199_v47, %v13697_v43  ;;  %v7286_v39 = vadd.f32 %v7260_v11, %v13821_v0  ;;  %v13932_v60 = vadd.f32 %v7321_v25, %v7285_v20 }
 0x421   : >> { %v7288_v61 = vadd.f32 %v7262_v9, %v7226_v49 }
 0x422   : >> { %v7287_v17 = vadd.f32 %v7261_v14, %v7225_v23  ;;  %v13936_v50 = vadd.f32 %v7322_v18, %v7286_v39  ;;  %v7329_v23 = vmul.f32 %v13782_v6, %v13893_v45 }
 0x424   : >> { %v7157_v32 = vpop.permute.xlu1 %7156  ;;  %v13938_v40 = vadd.f32 %v7323_v28, %v7287_v17 }
 0x425   : >> { %v7203_v46 = vmul.f32 %v13665_v13, %v7157_v32  ;;  %v7152_v1 = vpop.permute.xlu0 %7151  ;;  %v7264_v12 = vmul.f32 %v13758_v2, %v7157_v32  ;;  %v7325_v35 = vmul.f32 %v13782_v6, %v7157_v32  ;;  %v13981_v32 = vld [vmem:[%s16649_s1 + $0x6] ss:$0 sm:$0xff] }
 0x426   : >> { %v7202_v43 = vmul.f32 %v13665_v13, %v7152_v1  ;;  %v7263_v0 = vmul.f32 %v13758_v2, %v7152_v1  ;;  %v7324_v26 = vmul.f32 %v13782_v6, %v7152_v1 }
 0x427   : >> { %v7229_v44 = vadd.f32 %v7203_v46, %v13723_v59  ;;  %v7409_v47 = vpop.permute.xlu2 %7408 }
 0x428   : >> { %v7228_v38 = vadd.f32 %v7202_v43, %v13725_v16  ;;  %v7289_v29 = vadd.f32 %v7263_v0, %v13850_v34  ;;  %v13951_v52 = vadd.f32 %v7324_v26, %v7288_v61  ;;  %v7268_v34 = vmul.f32 %v13758_v2, %v13893_v45 }
 0x429   : >> { %v7291_v36 = vadd.f32 %v7265_v41, %v7229_v44  ;;  %v7524_v0 = vmul.f32 %v13981_v32, %v7394_v42  ;;  %v13995_v44 = vld [vmem:[%s16649_s1 + $0x7] ss:$0 sm:$0xff] }
 0x42a   : >> { %v7290_v20 = vadd.f32 %v7264_v12, %v7228_v38  ;;  %v13955_v62 = vadd.f32 %v7325_v35, %v7289_v29 }
 0x42b   : >> { %v7550_v12 = vadd.f32 %v7524_v0, %v13803_v22 }
 0x42c   : >> { %v7172_v59 = vpop.permute.xlu1 %7171  ;;  %v13957_v5 = vadd.f32 %v7326_v54, %v7290_v20 }
 0x42d   : >> { %v7206_v10 = vmul.f32 %v13665_v13, %v7172_v59  ;;  %v7167_v63 = vpop.permute.xlu0 %7166  ;;  %v7267_v25 = vmul.f32 %v13758_v2, %v7172_v59  ;;  %v7328_v9 = vmul.f32 %v13782_v6, %v7172_v59 }
 0x42e   : >> { %v7205_v7 = vmul.f32 %v13665_v13, %v7167_v63  ;;  %v7266_v16 = vmul.f32 %v13758_v2, %v7167_v63  ;;  %v7327_v3 = vmul.f32 %v13782_v6, %v7167_v63  ;;  %v7527_v63 = vmul.f32 %v13981_v32, %v7409_v47 }
 0x42f   : >> { %v7232_v11 = vadd.f32 %v7206_v10, %v13751_v57  ;;  %v7424_v43 = vpop.permute.xlu2 %7423 }
 0x430   : >> { %v7231_v49 = vadd.f32 %v7205_v7, %v13753_v58  ;;  %v7292_v14 = vadd.f32 %v7266_v16, %v13879_v37  ;;  %v13970_v18 = vadd.f32 %v7327_v3, %v7291_v36  ;;  %v14011_v36 = vld [vmem:[%s16650_s2] ss:$0 sm:$0xff] }
 0x431   : >> { %v7294_v13 = vadd.f32 %v7268_v34, %v7232_v11 }
 0x432   : >> { %v7293_v39 = vadd.f32 %v7267_v25, %v7231_v49  ;;  %v13974_v61 = vadd.f32 %v7328_v9, %v7292_v14  ;;  %v7588_v9 = vmul.f32 %v13995_v44, %v7409_v47  ;;  %v7553_v14 = vadd.f32 %v7527_v63, %v13832_v19 }
 0x434   : >> { %v7301_v57 = vpop.permute.xlu1 %7300  ;;  %v13976_v28 = vadd.f32 %v7329_v23, %v7293_v39 }
 0x435   : >> { %v7239_v17 = vpop.permute.xlu0 %7238  ;;  %v7331_v46 = vmul.f32 %v13782_v6, %v7301_v57 }
 0x436   : >> { %v7269_v58 = vmul.f32 %v13758_v2, %v7239_v17  ;;  %v7330_v37 = vmul.f32 %v13782_v6, %v7239_v17  ;;  %v14001_v6 = vld [vmem:[%s16649_s1 + $0x8] ss:$0 sm:$0xff] }
 0x437   : >> { %v7649_v20 = vmul.f32 %v14001_v6, %v7409_v47  ;;  %v7439_v7 = vpop.permute.xlu2 %7438  ;;  %v7652_v0 = vmul.f32 %v14001_v6, %v7424_v43 }
 0x438   : >> { %v7295_v45 = vadd.f32 %v7269_v58, %v13905_v8  ;;  %v13987_v1 = vadd.f32 %v7330_v37, %v7294_v13 }
 0x43a   : >> { %v13990_v41 = vadd.f32 %v7331_v46, %v7295_v45  ;;  %v7530_v45 = vmul.f32 %v13981_v32, %v7424_v43 }
 0x43c   : >> { %v7404_v2 = vpop.permute.xlu1 %7403 }
 0x43d   : >> { %v7399_v26 = vpop.permute.xlu0 %7398  ;;  %v7526_v35 = vmul.f32 %v13981_v32, %v7404_v2  ;;  %v7587_v38 = vmul.f32 %v13995_v44, %v7404_v2  ;;  %v7648_v29 = vmul.f32 %v14001_v6, %v7404_v2 }
 0x43e   : >> { %v7525_v8 = vmul.f32 %v13981_v32, %v7399_v26  ;;  %v7586_v42 = vmul.f32 %v13995_v44, %v7399_v26 }
 0x43f   : >> { %v7552_v16 = vadd.f32 %v7526_v35, %v13811_v51  ;;  %v7454_v35 = vpop.permute.xlu2 %7453 }
 0x440   : >> { %v7551_v22 = vadd.f32 %v7525_v8, %v13807_v48  ;;  %v7612_v54 = vadd.f32 %v7586_v42, %v7550_v12 }
 0x441   : >> { %v7614_v57 = vadd.f32 %v7588_v9, %v7552_v16 }
 0x442   : >> { %v7613_v59 = vadd.f32 %v7587_v38, %v7551_v22  ;;  %v7674_v10 = vadd.f32 %v7648_v29, %v7612_v54  ;;  %v7591_v22 = vmul.f32 %v13995_v44, %v7424_v43 }
 0x444   : >> { %v7675_v34 = vadd.f32 %v7649_v20, %v7613_v59  ;;  %v7704_v11 = vadd.f32 %v14011_v36, %v7674_v10  ;;  %v7419_v3 = vpop.permute.xlu1 %7418  ;;  %v7556_v20 = vadd.f32 %v7530_v45, %v13861_v53 }
 0x445   : >> { %v7414_v25 = vpop.permute.xlu0 %7413  ;;  %v7529_v51 = vmul.f32 %v13981_v32, %v7419_v3  ;;  %v7590_v17 = vmul.f32 %v13995_v44, %v7419_v3  ;;  %v7651_v19 = vmul.f32 %v14001_v6, %v7419_v3 }
 0x446   : >> { %v7705_v48 = vadd.f32 %v14011_v36, %v7675_v34  ;;  %v7730_v49 = vmax.f32 %v7704_v11, 0.0  ;;  %v7528_v13 = vmul.f32 %v13981_v32, %v7414_v25  ;;  %v7589_v23 = vmul.f32 %v13995_v44, %v7414_v25 }
 0x447   : >> { %v7650_v47 = vmul.f32 %v14001_v6, %v7414_v25  ;;  %v7555_v12 = vadd.f32 %v7529_v51, %v13840_v27 }
 0x448   : >> { %v7731_v39 = vmax.f32 %v7705_v48, 0.0  ;;  %7759 = vst.msk [vmem:[%s14024_s14] sm:$0xff] %vm7758_vm0, %v7730_v49  ;;  %v7554_v58 = vadd.f32 %v7528_v13, %v13836_v24  ;;  %v7615_v37 = vadd.f32 %v7589_v23, %v7553_v14  ;;  %v7533_v49 = vmul.f32 %v13981_v32, %v7439_v7 }
 0x449   : >> { %v7676_v46 = vadd.f32 %v7650_v47, %v7614_v57  ;;  %v7617_v63 = vadd.f32 %v7591_v22, %v7555_v12  ;;  %v7655_v13 = vmul.f32 %v14001_v6, %v7439_v7  ;;  %v7594_v47 = vmul.f32 %v13995_v44, %v7439_v7 }
 0x44a   : >> { %7760 = vst.msk [vmem:[%s14024_s14 + $0x8] sm:$0xff] %vm7758_vm0, %v7731_v39  ;;  %v7616_v2 = vadd.f32 %v7590_v17, %v7554_v58  ;;  %v7677_v26 = vadd.f32 %v7651_v19, %v7615_v37  ;;  %v7559_v37 = vadd.f32 %v7533_v49, %v13887_v56  ;;  %v7536_v22 = vmul.f32 %v13981_v32, %v7454_v35 }
 0x44b   : >> { %v7706_v8 = vadd.f32 %v14011_v36, %v7676_v46  ;;  %v7469_v46 = vpop.permute.xlu2 %7468 }
 0x44c   : >> { %v7434_v42 = vpop.permute.xlu1 %7433  ;;  %v7678_v38 = vadd.f32 %v7652_v0, %v7616_v2  ;;  %v7707_v24 = vadd.f32 %v14011_v36, %v7677_v26 }
 0x44d   : >> { %v7429_v29 = vpop.permute.xlu0 %7428  ;;  %v7732_v54 = vmax.f32 %v7706_v8, 0.0  ;;  %v7532_v27 = vmul.f32 %v13981_v32, %v7434_v42  ;;  %v7593_v53 = vmul.f32 %v13995_v44, %v7434_v42  ;;  %v7654_v43 = vmul.f32 %v14001_v6, %v7434_v42 }
 0x44e   : >> { %v7708_v59 = vadd.f32 %v14011_v36, %v7678_v38  ;;  %v7733_v10 = vmax.f32 %v7707_v24, 0.0  ;;  %v7531_v16 = vmul.f32 %v13981_v32, %v7429_v29  ;;  %v7592_v34 = vmul.f32 %v13995_v44, %v7429_v29 }
 0x44f   : >> { %7761 = vst.msk [vmem:[%s14024_s14 + $0x10] sm:$0xff] %vm7758_vm0, %v7732_v54  ;;  %v7653_v11 = vmul.f32 %v14001_v6, %v7429_v29  ;;  %v7558_v14 = vadd.f32 %v7532_v27, %v13869_v4  ;;  %v7658_v54 = vmul.f32 %v14001_v6, %v7454_v35 }
 0x450   : >> { %v7734_v3 = vmax.f32 %v7708_v59, 0.0  ;;  %7762 = vst.msk [vmem:[%s14024_s14 + $0x18] sm:$0xff] %vm7758_vm0, %v7733_v10  ;;  %v7557_v25 = vadd.f32 %v7531_v16, %v13865_v55  ;;  %v7618_v9 = vadd.f32 %v7592_v34, %v7556_v20  ;;  %v7597_v34 = vmul.f32 %v13995_v44, %v7454_v35 }
 0x451   : >> { %v7679_v48 = vadd.f32 %v7653_v11, %v7617_v63  ;;  %v7620_v45 = vadd.f32 %v7594_v47, %v7558_v14  ;;  %v7539_v14 = vmul.f32 %v13981_v32, %v7469_v46 }
 0x452   : >> { %7763 = vst.msk [vmem:[%s14024_s14 + $0x20] sm:$0xff] %vm7758_vm0, %v7734_v3  ;;  %v7619_v23 = vadd.f32 %v7593_v53, %v7557_v25  ;;  %v7680_v39 = vadd.f32 %v7654_v43, %v7618_v9  ;;  %v7562_v53 = vadd.f32 %v7536_v22, %v13913_v15 }
 0x453   : >> { %v7709_v51 = vadd.f32 %v14011_v36, %v7679_v48 }
 0x454   : >> { %v7449_v57 = vpop.permute.xlu1 %7448  ;;  %v7681_v55 = vadd.f32 %v7655_v13, %v7619_v23  ;;  %v7710_v19 = vadd.f32 %v14011_v36, %v7680_v39  ;;  %v7484_v13 = vpop.permute.xlu2 %7483 }
 0x455   : >> { %v7444_v17 = vpop.permute.xlu0 %7443  ;;  %v7735_v58 = vmax.f32 %v7709_v51, 0.0  ;;  %v7535_v4 = vmul.f32 %v13981_v32, %v7449_v57  ;;  %v7596_v8 = vmul.f32 %v13995_v44, %v7449_v57  ;;  %v7657_v38 = vmul.f32 %v14001_v6, %v7449_v57 }
 0x456   : >> { %v7534_v0 = vmul.f32 %v13981_v32, %v7444_v17  ;;  %v7711_v2 = vadd.f32 %v14011_v36, %v7681_v55  ;;  %v7736_v26 = vmax.f32 %v7710_v19, 0.0  ;;  %v7595_v7 = vmul.f32 %v13995_v44, %v7444_v17 }
 0x457   : >> { %7764 = vst.msk [vmem:[%s14024_s14 + $0x28] sm:$0xff] %vm7758_vm0, %v7735_v58  ;;  %v7656_v12 = vmul.f32 %v14001_v6, %v7444_v17  ;;  %v7561_v59 = vadd.f32 %v7535_v4, %v13895_v33  ;;  %v7661_v17 = vmul.f32 %v14001_v6, %v7469_v46 }
 0x458   : >> { %v7560_v56 = vadd.f32 %v7534_v0, %v13891_v30  ;;  %v7737_v42 = vmax.f32 %v7711_v2, 0.0  ;;  %7765 = vst.msk [vmem:[%s14024_s14 + $0x30] sm:$0xff] %vm7758_vm0, %v7736_v26  ;;  %v7621_v24 = vadd.f32 %v7595_v7, %v7559_v37 }
 0x459   : >> { %v7682_v29 = vadd.f32 %v7656_v12, %v7620_v45  ;;  %v7623_v48 = vadd.f32 %v7597_v34, %v7561_v59  ;;  %v7600_v45 = vmul.f32 %v13995_v44, %v7469_v46  ;;  %v7542_v46 = vmul.f32 %v13981_v32, %v7484_v13 }
 0x45a   : >> { %v7622_v20 = vadd.f32 %v7596_v8, %v7560_v56  ;;  %7766 = vst.msk [vmem:[%s14024_s14 + $0x38] sm:$0xff] %vm7758_vm0, %v7737_v42  ;;  %v7683_v10 = vadd.f32 %v7657_v38, %v7621_v24 }
 0x45b   : >> { %v7712_v30 = vadd.f32 %v14011_v36, %v7682_v29 }
 0x45c   : >> { %v7464_v27 = vpop.permute.xlu1 %7463  ;;  %v7684_v63 = vadd.f32 %v7658_v54, %v7622_v20  ;;  %v7713_v11 = vadd.f32 %v14011_v36, %v7683_v10  ;;  %v7664_v10 = vmul.f32 %v14001_v6, %v7484_v13 }
 0x45d   : >> { %v7459_v16 = vpop.permute.xlu0 %7458  ;;  %v7738_v3 = vmax.f32 %v7712_v30, 0.0  ;;  %v7538_v25 = vmul.f32 %v13981_v32, %v7464_v27  ;;  %v7599_v15 = vmul.f32 %v13995_v44, %v7464_v27  ;;  %v7660_v51 = vmul.f32 %v14001_v6, %v7464_v27 }
 0x45e   : >> { %v7714_v43 = vadd.f32 %v14011_v36, %v7684_v63  ;;  %v7537_v33 = vmul.f32 %v13981_v32, %v7459_v16  ;;  %v7739_v9 = vmax.f32 %v7713_v11, 0.0  ;;  %v7598_v49 = vmul.f32 %v13995_v44, %v7459_v16  ;;  %v7499_v63 = vpop.permute.xlu2 %7498 }
 0x45f   : >> { %7767 = vst.msk [vmem:[%s14024_s14 + $0x40] sm:$0xff] %vm7758_vm0, %v7738_v3  ;;  %v7659_v35 = vmul.f32 %v14001_v6, %v7459_v16  ;;  %v7564_v55 = vadd.f32 %v7538_v25, %v13919_v31 }
 0x460   : >> { %v7740_v23 = vmax.f32 %v7714_v43, 0.0  ;;  %v7563_v39 = vadd.f32 %v7537_v33, %v13917_v21  ;;  %7768 = vst.msk [vmem:[%s14024_s14 + $0x48] sm:$0xff] %vm7758_vm0, %v7739_v9  ;;  %v7624_v57 = vadd.f32 %v7598_v49, %v7562_v53  ;;  %v7565_v21 = vadd.f32 %v7539_v14, %v13932_v60 }
 0x461   : >> { %v7685_v47 = vadd.f32 %v7659_v35, %v7623_v48  ;;  %v7626_v56 = vadd.f32 %v7600_v45, %v7564_v55  ;;  %v7568_v53 = vadd.f32 %v7542_v46, %v13951_v52 }
 0x462   : >> { %7769 = vst.msk [vmem:[%s14024_s14 + $0x50] sm:$0xff] %vm7758_vm0, %v7740_v23  ;;  %v7625_v19 = vadd.f32 %v7599_v15, %v7563_v39  ;;  %v7686_v58 = vadd.f32 %v7660_v51, %v7624_v57  ;;  %v7545_v57 = vmul.f32 %v13981_v32, %v7499_v63 }
 0x463   : >> { %v7715_v37 = vadd.f32 %v14011_v36, %v7685_v47 }
 0x464   : >> { %v7479_v4 = vpop.permute.xlu1 %7478  ;;  %v7687_v0 = vadd.f32 %v7661_v17, %v7625_v19  ;;  %v7716_v26 = vadd.f32 %v14011_v36, %v7686_v58  ;;  %v7667_v17 = vmul.f32 %v14001_v6, %v7499_v63  ;;  %v7571_v45 = vadd.f32 %v7545_v57, %v13970_v18 }
 0x465   : >> { %v7474_v2 = vpop.permute.xlu0 %7473  ;;  %v7741_v7 = vmax.f32 %v7715_v37, 0.0  ;;  %v7541_v12 = vmul.f32 %v13981_v32, %v7479_v4  ;;  %v7602_v24 = vmul.f32 %v13995_v44, %v7479_v4  ;;  %v7663_v54 = vmul.f32 %v14001_v6, %v7479_v4 }
 0x466   : >> { %v7540_v31 = vmul.f32 %v13981_v32, %v7474_v2  ;;  %v7717_v8 = vadd.f32 %v14011_v36, %v7687_v0  ;;  %v7601_v42 = vmul.f32 %v13995_v44, %v7474_v2  ;;  %v7662_v60 = vmul.f32 %v14001_v6, %v7474_v2  ;;  %v7514_v2 = vpop.permute.xlu2 %7513 }
 0x467   : >> { %v7742_v38 = vmax.f32 %v7716_v26, 0.0  ;;  %7770 = vst.msk [vmem:[%s14024_s14 + $0x58] sm:$0xff] %vm7758_vm0, %v7741_v7  ;;  %v7567_v30 = vadd.f32 %v7541_v12, %v13938_v40  ;;  %v7606_v0 = vmul.f32 %v13995_v44, %v7499_v63 }
 0x468   : >> { %v7566_v29 = vadd.f32 %v7540_v31, %v13936_v50  ;;  %v7743_v22 = vmax.f32 %v7717_v8, 0.0  ;;  %v7627_v20 = vadd.f32 %v7601_v42, %v7565_v21  ;;  %v7688_v59 = vadd.f32 %v7662_v60, %v7626_v56 }
 0x469   : >> { %7771 = vst.msk [vmem:[%s14024_s14 + $0x60] sm:$0xff] %vm7758_vm0, %v7742_v38  ;;  %v7603_v50 = vmul.f32 %v13995_v44, %v7484_v13 }
 0x46a   : >> { %v7628_v27 = vadd.f32 %v7602_v24, %v7566_v29  ;;  %7772 = vst.msk [vmem:[%s14024_s14 + $0x68] sm:$0xff] %vm7758_vm0, %v7743_v22  ;;  %v7689_v16 = vadd.f32 %v7663_v54, %v7627_v20  ;;  %v7718_v34 = vadd.f32 %v14011_v36, %v7688_v59  ;;  %v7548_v22 = vmul.f32 %v13981_v32, %v7514_v2 }
 0x46b   : >> { %v7629_v9 = vadd.f32 %v7603_v50, %v7567_v30  ;;  %v7670_v20 = vmul.f32 %v14001_v6, %v7514_v2  ;;  %v7609_v50 = vmul.f32 %v13995_v44, %v7514_v2 }
 0x46c   : >> { %v7690_v11 = vadd.f32 %v7664_v10, %v7628_v27  ;;  %v7494_v3 = vpop.permute.xlu1 %7493  ;;  %v7719_v43 = vadd.f32 %v14011_v36, %v7689_v16  ;;  %v7744_v25 = vmax.f32 %v7718_v34, 0.0  ;;  %v7574_v34 = vadd.f32 %v7548_v22, %v13987_v1 }
 0x46d   : >> { %v7489_v33 = vpop.permute.xlu0 %7488  ;;  %v7544_v14 = vmul.f32 %v13981_v32, %v7494_v3  ;;  %v7605_v52 = vmul.f32 %v13995_v44, %v7494_v3  ;;  %v7666_v15 = vmul.f32 %v14001_v6, %v7494_v3 }
 0x46e   : >> { %v7720_v40 = vadd.f32 %v14011_v36, %v7690_v11  ;;  %v7543_v48 = vmul.f32 %v13981_v32, %v7489_v33  ;;  %v7604_v49 = vmul.f32 %v13995_v44, %v7489_v33  ;;  %v7745_v35 = vmax.f32 %v7719_v43, 0.0  ;;  %7773 = vst.msk [vmem:[%s14024_s14 + $0x70] sm:$0xff] %vm7758_vm0, %v7744_v25 }
 0x46f   : >> { %v7665_v13 = vmul.f32 %v14001_v6, %v7489_v33  ;;  %v7570_v58 = vadd.f32 %v7544_v14, %v13957_v5  ;;  %v7643_v33 = vpop.permute.xlu2 %7642 }
 0x470   : >> { %v7746_v23 = vmax.f32 %v7720_v40, 0.0  ;;  %v7569_v39 = vadd.f32 %v7543_v48, %v13955_v62  ;;  %v7630_v51 = vadd.f32 %v7604_v49, %v7568_v53  ;;  %7774 = vst.msk [vmem:[%s14024_s14 + $0x78] sm:$0xff] %vm7758_vm0, %v7745_v35 }
 0x471   : >> { %v7691_v47 = vadd.f32 %v7665_v13, %v7629_v9  ;;  %v7632_v18 = vadd.f32 %v7606_v0, %v7570_v58 }
 0x472   : >> { %7775 = vst.msk [vmem:[%s14024_s14 + $0x80] sm:$0xff] %vm7758_vm0, %v7746_v23  ;;  %v7631_v55 = vadd.f32 %v7605_v52, %v7569_v39  ;;  %v7692_v19 = vadd.f32 %v7666_v15, %v7630_v51  ;;  %v7673_v52 = vmul.f32 %v14001_v6, %v7643_v33 }
 0x473   : >> { %v7721_v37 = vadd.f32 %v14011_v36, %v7691_v47 }
 0x474   : >> { %v7693_v4 = vadd.f32 %v7667_v17, %v7631_v55  ;;  %v7722_v62 = vadd.f32 %v14011_v36, %v7692_v19  ;;  %v7509_v21 = vpop.permute.xlu1 %7508 }
 0x475   : >> { %v7747_v26 = vmax.f32 %v7721_v37, 0.0  ;;  %v7504_v7 = vpop.permute.xlu0 %7503  ;;  %v7547_v56 = vmul.f32 %v13981_v32, %v7509_v21  ;;  %v7608_v42 = vmul.f32 %v13995_v44, %v7509_v21  ;;  %v7669_v38 = vmul.f32 %v14001_v6, %v7509_v21 }
 0x476   : >> { %v7723_v12 = vadd.f32 %v14011_v36, %v7693_v4  ;;  %v7748_v31 = vmax.f32 %v7722_v62, 0.0  ;;  %v7546_v5 = vmul.f32 %v13981_v32, %v7504_v7  ;;  %v7607_v8 = vmul.f32 %v13995_v44, %v7504_v7 }
 0x477   : >> { %7776 = vst.msk [vmem:[%s14024_s14 + $0x88] sm:$0xff] %vm7758_vm0, %v7747_v26  ;;  %v7668_v60 = vmul.f32 %v14001_v6, %v7504_v7  ;;  %v7573_v30 = vadd.f32 %v7547_v56, %v13976_v28 }
 0x478   : >> { %v7749_v46 = vmax.f32 %v7723_v12, 0.0  ;;  %7777 = vst.msk [vmem:[%s14024_s14 + $0x90] sm:$0xff] %vm7758_vm0, %v7748_v31  ;;  %v7572_v24 = vadd.f32 %v7546_v5, %v13974_v61  ;;  %v7633_v29 = vadd.f32 %v7607_v8, %v7571_v45 }
 0x479   : >> { %v7694_v54 = vadd.f32 %v7668_v60, %v7632_v18  ;;  %v7635_v9 = vadd.f32 %v7609_v50, %v7573_v30 }
 0x47a   : >> { %7778 = vst.msk [vmem:[%s14024_s14 + $0x98] sm:$0xff] %vm7758_vm0, %v7749_v46  ;;  %v7634_v59 = vadd.f32 %v7608_v42, %v7572_v24  ;;  %v7695_v10 = vadd.f32 %v7669_v38, %v7633_v29 }
 0x47b   : >> { %v7724_v27 = vadd.f32 %v14011_v36, %v7694_v54 }
 0x47c   : >> { %v7696_v63 = vadd.f32 %v7670_v20, %v7634_v59  ;;  %v7725_v16 = vadd.f32 %v14011_v36, %v7695_v10  ;;  %v7581_v61 = vpop.permute.xlu1 %7580 }
 0x47d   : >> { %v7750_v11 = vmax.f32 %v7724_v27, 0.0  ;;  %v7519_v3 = vpop.permute.xlu0 %7518  ;;  %v7611_v40 = vmul.f32 %v13995_v44, %v7581_v61  ;;  %v7672_v49 = vmul.f32 %v14001_v6, %v7581_v61 }
 0x47e   : >> { %v7726_v53 = vadd.f32 %v14011_v36, %v7696_v63  ;;  %v7751_v43 = vmax.f32 %v7725_v16, 0.0  ;;  %v7549_v25 = vmul.f32 %v13981_v32, %v7519_v3  ;;  %v7610_v28 = vmul.f32 %v13995_v44, %v7519_v3 }
 0x47f   : >> { %7779 = vst.msk [vmem:[%s14024_s14 + $0xa0] sm:$0xff] %vm7758_vm0, %v7750_v11  ;;  %v7671_v1 = vmul.f32 %v14001_v6, %v7519_v3  ;;  %v14194_v6 = vmov (%p6672_p13), 0.0  }
 0x480   : >> { %v7752_v48 = vmax.f32 %v7726_v53, 0.0  ;;  %7780 = vst.msk [vmem:[%s14024_s14 + $0xa8] sm:$0xff] %vm7758_vm0, %v7751_v43  ;;  %v7575_v35 = vadd.f32 %v7549_v25, %v13990_v41  ;;  %v7636_v32 = vadd.f32 %v7610_v28, %v7574_v34 }
 0x481   : >> { %v7697_v14 = vadd.f32 %v7671_v1, %v7635_v9 }
 0x482   : >> { %7781 = vst.msk [vmem:[%s14024_s14 + $0xb0] sm:$0xff] %vm7758_vm0, %v7752_v48  ;;  %v7637_v44 = vadd.f32 %v7611_v40, %v7575_v35  ;;  %v7698_v13 = vadd.f32 %v7672_v49, %v7636_v32 }
 0x483   : >> { %v7727_v23 = vadd.f32 %v14011_v36, %v7697_v14 }
 0x484   : >> { %v7699_v15 = vadd.f32 %v7673_v52, %v7637_v44  ;;  %v7728_v39 = vadd.f32 %v14011_v36, %v7698_v13 }
 0x485   : >> { %v7753_v51 = vmax.f32 %v7727_v23, 0.0 }
 0x486   : >> { %v7729_v57 = vadd.f32 %v14011_v36, %v7699_v15  ;;  %v7754_v47 = vmax.f32 %v7728_v39, 0.0  ;;  %6674 = sbr.rel (!%p6672_p13) target bundleno = 814 (0x32e), region = 193 }
 0x487   : >> { %7782 = vst.msk [vmem:[%s14024_s14 + $0xb8] sm:$0xff] %vm7758_vm0, %v7753_v51 }
 0x488   : >> { %v7755_v41 = vmax.f32 %v7729_v57, 0.0  ;;  %7783 = vst.msk [vmem:[%s14024_s14 + $0xc0] sm:$0xff] %vm7758_vm0, %v7754_v47 }
 0x48a   : >> { %7784 = vst.msk [vmem:[%s14024_s14 + $0xc8] sm:$0xff] %vm7758_vm0, %v7755_v41 }
 0x48b LB: >> { %16694 = vst [vmem:[#allocation7_spill] sm:$0xff] %v11775_v6  ;;  %v14207_v36 = vld [vmem:[%s16651_s3 + $0x38] sm:$0xff]  ;;  %v14217_v55 = vld [vmem:[%s16651_s3 + $0x30] sm:$0xff]  ;;  %v14231_v58 = vld [vmem:[%s16651_s3 + $0x28] sm:$0xff]  ;;  %s10986_s25 = smul.u32 416, %s11779_s22  ;;  %vm10437_vm1 = vcmask 523264   ;;  %s11779_s22 = sphi %s14196_s22, %s7790_s22   ;;  %v11775_v6 = vphi %v14194_v6, %v16950_v6  }
 0x48c   : >> { %v14212_v17 = vld [vmem:[%s16651_s3 + $0x18] sm:$0xff]  ;;  %7915 = vmatpush.msra.mxu0 %v14207_v36  ;;  %11551 = vmatpush.msra.mxu2 %v14207_v36  ;;  %v14224_v19 = vld [vmem:[%s16651_s3 + $0x10] sm:$0xff]  ;;  %v14239_v37 = vld [vmem:[%s16651_s3 + $0x8] sm:$0xff]  ;;  %s10339_s24 = smul.u32 768, %s11779_s22  ;;  %s7790_s22 = sadd.s32 1, %s11779_s22  }
 0x48d   : >> { %8007 = vmatpush.msra.mxu1 %v14212_v17  ;;  %11555 = vmatpush.msra.mxu3 %v14212_v17  ;;  %v14246_v4 = vld [vmem:[%s16651_s3 + $0x20] sm:$0xff]  ;;  %s14255_s14 = scalar_lea.vmem [#allocation2], %s10986_s25  ;;  %v14269_v2 = vld [vmem:[%s16651_s3 + $0x98] sm:$0xff]  ;;  %v14292_v12 = vld [vmem:[%s16651_s3 + $0x90] sm:$0xff]  ;;  %p7787_p0 = scmp.ge.s32.totalorder %s7790_s22, 12  }
 0x48e   : >> { %7916 = vmatpush.msra.mxu0 %v14217_v55  ;;  %11552 = vmatpush.msra.mxu2 %v14217_v55  ;;  %v14253_v62 = vld [vmem:[%s16651_s3] sm:$0xff]  ;;  %v14279_v7 = vld [vmem:[%s16651_s3 + $0xb8] sm:$0xff]  ;;  %v14297_v31 = vld [vmem:[%s16651_s3 + $0xb0] sm:$0xff]  ;;  %s16047_s26 = scalar_lea.vmem %s16653_s5, %s10339_s24  ;;  %vm10772_vm2 = vcmask (%p7787_p0), 80896   ;;  %s11548_s27 = sshll.u32 (%p7787_p0), %s10914_s13, 3 }
 0x48f   : >> { %8008 = vmatpush.msra.mxu1 %v14224_v19  ;;  %11556 = vmatpush.msra.mxu3 %v14224_v19  ;;  %v14312_v56 = vld [vmem:[%s16651_s3 + $0x58] sm:$0xff]  ;;  %v14320_v42 = vld [vmem:[%s16651_s3 + $0x50] sm:$0xff]  ;;  %v14330_v60 = vld [vmem:[%s16651_s3 + $0x48] sm:$0xff]  ;;  %s10797_s29 = scalar_lea.hbm (%p7787_p0), %s16657_s9, %s11548_s27  ;;  %s10799_s23 = sshll.u32 (%p7787_p0), %s13467_s17, 4  ;;  %s10800_s23 = int_to_ptr.vmem [resolvable:$true] %s10799_s23 }
 0x490   : >> { %7917 = vmatpush.msra.mxu0 %v14231_v58  ;;  %11553 = vmatpush.msra.mxu2 %v14231_v58  ;;  %v14325_v18 = vld [vmem:[%s16651_s3 + $0x78] sm:$0xff]  ;;  %v14337_v46 = vld [vmem:[%s16651_s3 + $0x70] sm:$0xff]  ;;  %v14343_v24 = vld [vmem:[%s16651_s3 + $0x40] sm:$0xff]  ;;  %s10801_s24 = sshll.u32 (%p7787_p0), %s10797_s29, 4  ;;  %s10787_s25 = scalar_lea.sflag (%p7787_p0), [#allocation5], %s13461_s28  ;;  %s10802_s24 = int_to_ptr.hbm [resolvable:$true] %s10801_s24 }
 0x491   : >> { %v7796_v21 = vld [vmem:[%s14255_s14 + $0x8] sm:$0xff]  ;;  %8009 = vmatpush.msra.mxu1 %v14239_v37  ;;  %11557 = vmatpush.msra.mxu3 %v14239_v37  ;;  %v14261_v45 = vld [vmem:[%s14255_s14 + $0x98] sm:$0xff]  ;;  %v7795_v0 = vld [vmem:[%s14255_s14] sm:$0xff]  ;;  %s11707_s21 = sshra.s32 (%p7787_p0), %s10802_s24, 4  ;;  %s11713_s27 = scalar_lea.hbm (%p7787_p0), %s16657_s9, 16  ;;  %s11708_s21 = int_to_ptr.hbm [resolvable:$true] %s11707_s21 }
 0x492   : >> { %7918 = vmatpush.msra.mxu0 %v14246_v4  ;;  %11554 = vmatpush.msra.mxu2 %v14246_v4  ;;  %v14274_v26 = vld [vmem:[%s14255_s14 + $0x90] sm:$0xff]  ;;  %v14303_v8 = vld [vmem:[%s14255_s14 + $0xa0] sm:$0xff]  ;;  %v7798_v38 = vld [vmem:[%s14255_s14 + $0x18] sm:$0xff]  ;;  %p11714_p4 = scmp.lt.s32.totalorder (%p7787_p0), %s11708_s21, %s16657_s9 }
 0x493   : >> { %8010 = vmatpush.msra.mxu1 %v14253_v62  ;;  %10991 = vmatmul.msk.f32.vlgmr.msra.gmra.mxu0 %vm7758_vm0, %v7796_v21  ;;  %v7797_v5 = vld [vmem:[%s14255_s14 + $0x10] sm:$0xff]  ;;  %v14346_v29 = vld [vmem:[%s14255_s14 + $0xa8] sm:$0xff]  ;;  %v14363_v54 = vld [vmem:[%s16651_s3 + $0x60] sm:$0xff] }
 0x494   : >> { %11009 = vmatmul.msk.f32.vlgmr.msra.gmra.mxu2 %vm7758_vm0, %v14261_v45  ;;  %11015 = vmatmul.msk.f32.vlgmr.msra.gmra.mxu1 %vm7758_vm0, %v7795_v0  ;;  %v14353_v22 = vld [vmem:[%s16651_s3 + $0x68] sm:$0xff]  ;;  %v7799_v20 = vld [vmem:[%s14255_s14 + $0x20] sm:$0xff]  ;;  %v14371_v59 = vld [vmem:[%s14255_s14 + $0xb0] sm:$0xff] }
 0x495   : >> { %8444 = vmatpush.msrb.mxu0 %v14269_v2  ;;  %11558 = vmatpush.msra.mxu3 %v14253_v62  ;;  %v7800_v10 = vld [vmem:[%s14255_s14 + $0x28] sm:$0xff]  ;;  %v14381_v30 = vld [vmem:[%s14255_s14 + $0xb8] sm:$0xff]  ;;  %v7801_v27 = vld [vmem:[%s14255_s14 + $0x30] sm:$0xff] }
 0x496   : >> { %11033 = vmatmul.msk.f32.vlgmr.msra.gmra.mxu3 %vm7758_vm0, %v14274_v26  ;;  %8565 = vmatpush.msrb.mxu1 %v14279_v7  ;;  %v14391_v63 = vld [vmem:[%s14255_s14 + $0xc0] sm:$0xff]  ;;  %v14400_v16 = vld [vmem:[%s16651_s3 + $0x88] sm:$0xff]  ;;  %v7802_v34 = vld [vmem:[%s14255_s14 + $0x38] sm:$0xff] }
 0x497   : >> { %8445 = vmatpush.msrb.mxu0 %v14292_v12  ;;  %8104 = vmatpush.msrb.mxu2 %v14312_v56  ;;  %v14408_v61 = vld [vmem:[%s16651_s3 + $0xa8] sm:$0xff]  ;;  %v11069_v50 = vld [vmem:[%s14255_s14 + $0xd0] sm:$0xff]  ;;  %v7803_v11 = vld [vmem:[%s14255_s14 + $0x40] sm:$0xff] }
 0x498   : >> { %8566 = vmatpush.msrb.mxu1 %v14297_v31  ;;  %8323 = vmatpush.msrb.mxu3 %v14325_v18  ;;  %v14420_v3 = vld [vmem:[%s14255_s14 + $0xd8] sm:$0xff]  ;;  %v7804_v53 = vld [vmem:[%s14255_s14 + $0x48] sm:$0xff]  ;;  %v14429_v43 = vld [vmem:[%s14255_s14 + $0xe0] sm:$0xff] }
 0x499   : >> { %8105 = vmatpush.msrb.mxu2 %v14320_v42  ;;  %8446 = vmatpush.msrb.mxu0 %v14400_v16  ;;  %16695 = vst [vmem:[#allocation8_spill] sm:$0xff] %v14429_v43  ;;  %v7805_v25 = vld [vmem:[%s14255_s14 + $0x50] sm:$0xff]  ;;  %v14438_v28 = vld [vmem:[%s14255_s14 + $0xe8] sm:$0xff]  ;;  %v14447_v33 = vld [vmem:[%s16651_s3 + $0x80] sm:$0xff] }
 0x49a   : >> { %8324 = vmatpush.msrb.mxu3 %v14337_v46  ;;  %8567 = vmatpush.msrb.mxu1 %v14408_v61  ;;  %16696 = vst [vmem:[#allocation9_spill] sm:$0xff] %v14438_v28  ;;  %v14452_v40 = vld [vmem:[%s16651_s3 + $0xa0] sm:$0xff]  ;;  %v7806_v9 = vld [vmem:[%s14255_s14 + $0x58] sm:$0xff]  ;;  %v14461_v1 = vld [vmem:[%s14255_s14 + $0xf0] sm:$0xff] }
 0x49b   : >> { %10992 = vmatmul.msk.f32.gmra.mxu0 %vm7758_vm0, %v7797_v5  ;;  %8106 = vmatpush.msrb.mxu2 %v14330_v60  ;;  %16697 = vst [vmem:[#allocation10_spill] sm:$0xff] %v14461_v1  ;;  %v7807_v48 = vld [vmem:[%s14255_s14 + $0x60] sm:$0xff]  ;;  %v14472_v49 = vld [vmem:[%s14255_s14 + $0xf8] sm:$0xff]  ;;  %v7808_v35 = vld [vmem:[%s14255_s14 + $0x68] sm:$0xff] }
 0x49c   : >> { %11010 = vmatmul.msk.f32.gmra.mxu2 %vm7758_vm0, %v14303_v8  ;;  %11016 = vmatmul.msk.f32.gmra.mxu1 %vm7758_vm0, %v7796_v21  ;;  %16698 = vst [vmem:[#allocation11_spill] sm:$0xff] %v14472_v49  ;;  %v14481_v32 = vld [vmem:[%s14255_s14 + $0x100] sm:$0xff]  ;;  %v7809_v14 = vld [vmem:[%s14255_s14 + $0x70] sm:$0xff]  ;;  %v14491_v52 = vld [vmem:[%s16651_s3 + $0xd8] sm:$0xff] }
 0x49d   : >> { %8107 = vmatpush.msrb.mxu2 %v14343_v24  ;;  %8325 = vmatpush.msrb.mxu3 %v14353_v22  ;;  %16699 = vst [vmem:[#allocation12_spill] sm:$0xff] %v14481_v32  ;;  %v14495_v44 = vld [vmem:[%s14255_s14 + $0x108] sm:$0xff]  ;;  %v14503_v13 = vld [vmem:[%s16651_s3 + $0xf8] sm:$0xff]  ;;  %v14511_v15 = vld [vmem:[%s14255_s14 + $0x110] sm:$0xff] }
 0x49e   : >> { %11034 = vmatmul.msk.f32.gmra.mxu3 %vm7758_vm0, %v14261_v45  ;;  %8447 = vmatpush.msrb.mxu0 %v14447_v33  ;;  %16700 = vst [vmem:[#allocation13_spill] sm:$0xff] %v14495_v44  ;;  %v7810_v23 = vld [vmem:[%s14255_s14 + $0x78] sm:$0xff]  ;;  %v7811_v51 = vld [vmem:[%s14255_s14 + $0x80] sm:$0xff]  ;;  %v14535_v41 = vld [vmem:[%s14255_s14 + $0x88] sm:$0xff] }
 0x49f   : >> { %8326 = vmatpush.msrb.mxu3 %v14363_v54  ;;  %8568 = vmatpush.msrb.mxu1 %v14452_v40  ;;  %16701 = vst [vmem:[#allocation14_spill] sm:$0xff] %v14511_v15  ;;  %v14518_v39 = vld [vmem:[%s16651_s3 + $0x118] sm:$0xff]  ;;  %v14643_v6 = vld [vmem:[%s14255_s14 + $0x148] sm:$0xff] }
 0x4a0   : >> { %8784 = vmatpush.msra.mxu2 %v14491_v52  ;;  %9026 = vmatpush.msra.mxu0 %v14518_v39  ;;  %v14526_v57 = vld [vmem:[%s14255_s14 + $0x118] sm:$0xff] }
 0x4a1   : >> { %9191 = vmatpush.msra.mxu1 %v14207_v36  ;;  %8905 = vmatpush.msra.mxu3 %v14503_v13  ;;  %16702 = vst [vmem:[#allocation15_spill] sm:$0xff] %v14526_v57 }
 0x4a3   : >> { %10993 = vmatmul.msk.f32.gmra.mxu0 %vm7758_vm0, %v7798_v38  ;;  %9192 = vmatpush.msra.mxu1 %v14217_v55  ;;  %v14542_v55 = vld [vmem:[%s14255_s14 + $0x120] sm:$0xff] }
 0x4a4   : >> { %11011 = vmatmul.msk.f32.gmra.mxu2 %vm7758_vm0, %v14346_v29  ;;  %11017 = vmatmul.msk.f32.gmra.mxu1 %vm7758_vm0, %v7797_v5 }
 0x4a5   : >> { %9193 = vmatpush.msra.mxu1 %v14231_v58 }
 0x4a6   : >> { %11035 = vmatmul.msk.f32.gmra.mxu3 %vm7758_vm0, %v14303_v8 }
 0x4a7   : >> { %9194 = vmatpush.msra.mxu1 %v14246_v4 }
 0x4ab   : >> { %10994 = vmatmul.msk.f32.gmra.mxu0 %vm7758_vm0, %v7799_v20 }
 0x4ac   : >> { %11012 = vmatmul.msk.f32.gmra.mxu2 %vm7758_vm0, %v14371_v59  ;;  %11018 = vmatmul.msk.f32.gmra.mxu1 %vm7758_vm0, %v7798_v38 }
 0x4ae   : >> { %11036 = vmatmul.msk.f32.gmra.mxu3 %vm7758_vm0, %v14346_v29 }
 0x4b3   : >> { %10995 = vmatmul.msk.f32.gmra.mxu0 %vm7758_vm0, %v7800_v10 }
 0x4b4   : >> { %11013 = vmatmul.msk.f32.gmra.mxu2 %vm7758_vm0, %v14381_v30  ;;  %11019 = vmatmul.msk.f32.gmra.mxu1 %vm7758_vm0, %v7799_v20 }
 0x4b6   : >> { %11037 = vmatmul.msk.f32.gmra.mxu3 %vm7758_vm0, %v14371_v59 }
 0x4bb   : >> { %10996 = vmatmul.msk.f32.gmra.mxu0 %vm7758_vm0, %v7801_v27 }
 0x4bc   : >> { %11014 = vmatmul.msk.f32.gmra.mxu2 %vm7758_vm0, %v14391_v63  ;;  %11020 = vmatmul.msk.f32.gmra.mxu1 %vm7758_vm0, %v7800_v10 }
 0x4be   : >> { %11038 = vmatmul.msk.f32.gmra.mxu3 %vm7758_vm0, %v14381_v30 }
 0x4c3   : >> { %10997 = vmatmul.msk.f32.gmra.mxu0 %vm7758_vm0, %v7802_v34 }
 0x4c4   : >> { %11021 = vmatmul.msk.f32.gmra.mxu1 %vm7758_vm0, %v7801_v27  ;;  %11043 = vmatmul.msk.f32.vlgmr.msrb.gmra.mxu2 %vm7758_vm0, %v7797_v5 }
 0x4c6   : >> { %11099 = vmatmul.msk.f32.vlgmr.msrb.gmra.mxu3 %vm7758_vm0, %v11069_v50 }
 0x4cb   : >> { %10998 = vmatmul.msk.f32.gmra.mxu0 %vm7758_vm0, %v7803_v11 }
 0x4cc   : >> { %11022 = vmatmul.msk.f32.gmra.mxu1 %vm7758_vm0, %v7802_v34  ;;  %11044 = vmatmul.msk.f32.gmra.mxu2 %vm7758_vm0, %v7798_v38  ;;  %v14557_v38 = vld [vmem:[%s14255_s14 + $0x128] sm:$0xff] }
 0x4ce   : >> { %11100 = vmatmul.msk.f32.gmra.mxu3 %vm7758_vm0, %v14420_v3 }
 0x4d3   : >> { %10999 = vmatmul.msk.f32.gmra.mxu0 %vm7758_vm0, %v7804_v53 }
 0x4d4   : >> { %11023 = vmatmul.msk.f32.gmra.mxu1 %vm7758_vm0, %v7803_v11  ;;  %11045 = vmatmul.msk.f32.gmra.mxu2 %vm7758_vm0, %v7799_v20 }
 0x4d6   : >> { %11101 = vmatmul.msk.f32.gmra.mxu3 %vm7758_vm0, %v14429_v43 }
 0x4db   : >> { %11000 = vmatmul.msk.f32.gmra.mxu0 %vm7758_vm0, %v7805_v25 }
 0x4dc   : >> { %11024 = vmatmul.msk.f32.gmra.mxu1 %vm7758_vm0, %v7804_v53  ;;  %11046 = vmatmul.msk.f32.gmra.mxu2 %vm7758_vm0, %v7800_v10 }
 0x4de   : >> { %11102 = vmatmul.msk.f32.gmra.mxu3 %vm7758_vm0, %v14438_v28 }
 0x4e3   : >> { %11001 = vmatmul.msk.f32.gmra.mxu0 %vm7758_vm0, %v7806_v9 }
 0x4e4   : >> { %11025 = vmatmul.msk.f32.gmra.mxu1 %vm7758_vm0, %v7805_v25  ;;  %11047 = vmatmul.msk.f32.gmra.mxu2 %vm7758_vm0, %v7801_v27 }
 0x4e6   : >> { %11103 = vmatmul.msk.f32.gmra.mxu3 %vm7758_vm0, %v14461_v1 }
 0x4eb   : >> { %11002 = vmatmul.msk.f32.gmra.mxu0 %vm7758_vm0, %v7807_v48 }
 0x4ec   : >> { %11026 = vmatmul.msk.f32.gmra.mxu1 %vm7758_vm0, %v7806_v9  ;;  %11048 = vmatmul.msk.f32.gmra.mxu2 %vm7758_vm0, %v7802_v34 }
 0x4ee   : >> { %11104 = vmatmul.msk.f32.gmra.mxu3 %vm7758_vm0, %v14472_v49 }
 0x4f3   : >> { %11003 = vmatmul.msk.f32.gmra.mxu0 %vm7758_vm0, %v7808_v35 }
 0x4f4   : >> { %11027 = vmatmul.msk.f32.gmra.mxu1 %vm7758_vm0, %v7807_v48  ;;  %11049 = vmatmul.msk.f32.gmra.mxu2 %vm7758_vm0, %v7803_v11  ;;  %v14573_v11 = vld [vmem:[%s14255_s14 + $0x130] sm:$0xff] }
 0x4f6   : >> { %11105 = vmatmul.msk.f32.gmra.mxu3 %vm7758_vm0, %v14481_v32 }
 0x4fb   : >> { %11004 = vmatmul.msk.f32.gmra.mxu0 %vm7758_vm0, %v7809_v14 }
 0x4fc   : >> { %11028 = vmatmul.msk.f32.gmra.mxu1 %vm7758_vm0, %v7808_v35  ;;  %11050 = vmatmul.msk.f32.gmra.mxu2 %vm7758_vm0, %v7804_v53 }
 0x4fe   : >> { %11106 = vmatmul.msk.f32.gmra.mxu3 %vm7758_vm0, %v14495_v44 }
 0x503   : >> { %11005 = vmatmul.msk.f32.gmra.mxu0 %vm7758_vm0, %v7810_v23 }
 0x504   : >> { %11029 = vmatmul.msk.f32.gmra.mxu1 %vm7758_vm0, %v7809_v14  ;;  %11051 = vmatmul.msk.f32.gmra.mxu2 %vm7758_vm0, %v7805_v25 }
 0x506   : >> { %11107 = vmatmul.msk.f32.gmra.mxu3 %vm7758_vm0, %v14511_v15 }
 0x50b   : >> { %11006 = vmatmul.msk.f32.gmra.mxu0 %vm7758_vm0, %v7811_v51 }
 0x50c   : >> { %11030 = vmatmul.msk.f32.gmra.mxu1 %vm7758_vm0, %v7810_v23  ;;  %11052 = vmatmul.msk.f32.gmra.mxu2 %vm7758_vm0, %v7806_v9 }
 0x50e   : >> { %11108 = vmatmul.msk.f32.gmra.mxu3 %vm7758_vm0, %v14526_v57 }
 0x510   : >> { %v14532_v47 = vpop.f32.mrf.mxu0 }
 0x511   : >> { %v14537_v36 = vpop.f32.mrf.mxu1 }
 0x513   : >> { %11007 = vmatmul.msk.f32.gmra.mxu0 %vm7758_vm0, %v14535_v41 }
 0x514   : >> { %11031 = vmatmul.msk.f32.gmra.mxu1 %vm7758_vm0, %v7811_v51  ;;  %11053 = vmatmul.msk.f32.gmra.mxu2 %vm7758_vm0, %v7807_v48 }
 0x516   : >> { %11109 = vmatmul.msk.f32.gmra.mxu3 %vm7758_vm0, %v14542_v55 }
 0x517   : >> { %v7974_v58 = vpop.f32.mrf.mxu2 }
 0x518   : >> { %v14548_v4 = vpop.f32.mrf.mxu0 }
 0x519   : >> { %v14550_v21 = vpop.f32.mrf.mxu1  ;;  %v8066_v0 = vpop.f32.mrf.mxu3 }
 0x51a   : >> { %v14552_v5 = vadd.f32 %v8066_v0, %v7974_v58 }
 0x51b   : >> { %11008 = vmatmul.msk.f32.gmra.mxu0 %vm7758_vm0, %v14274_v26 }
 0x51c   : >> { %11032 = vmatmul.msk.f32.gmra.mxu1 %vm7758_vm0, %v14535_v41  ;;  %11054 = vmatmul.msk.f32.gmra.mxu2 %vm7758_vm0, %v7808_v35 }
 0x51e   : >> { %11110 = vmatmul.msk.f32.gmra.mxu3 %vm7758_vm0, %v14557_v38 }
 0x51f   : >> { %v7977_v20 = vpop.f32.mrf.mxu2 }
 0x520   : >> { %v14564_v10 = vpop.f32.mrf.mxu0 }
 0x521   : >> { %v14566_v27 = vpop.f32.mrf.mxu1  ;;  %v8069_v34 = vpop.f32.mrf.mxu3 }
 0x522   : >> { %v14568_v50 = vadd.f32 %v8069_v34, %v7977_v20  ;;  %v14621_v34 = vld [vmem:[%s14255_s14 + $0x140] sm:$0xff] }
 0x523   : >> { %11127 = vmatmul.msk.f32.vlgmr.msrb.gmra.mxu0 %vm7758_vm0, %v14420_v3 }
 0x524   : >> { %11055 = vmatmul.msk.f32.gmra.mxu2 %vm7758_vm0, %v7809_v14  ;;  %11155 = vmatmul.msk.f32.vlgmr.msrb.gmra.mxu1 %vm7758_vm0, %v14429_v43  ;;  %v14592_v14 = vld [vmem:[%s16651_s3 + $0xd0] sm:$0xff] }
 0x525   : >> { %9595 = vmatpush.msrb.mxu1 %v14269_v2  ;;  %v14597_v2 = vld [vmem:[%s14255_s14 + $0x138] sm:$0xff]  ;;  %8785 = vmatpush.msra.mxu2 %v14592_v14 }
 0x526   : >> { %11111 = vmatmul.msk.f32.gmra.mxu3 %vm7758_vm0, %v14573_v11 }
 0x527   : >> { %v7980_v53 = vpop.f32.mrf.mxu2  ;;  %9596 = vmatpush.msrb.mxu1 %v14292_v12  ;;  %v14606_v12 = vld [vmem:[%s16651_s3 + $0xf0] sm:$0xff] }
 0x528   : >> { %v14582_v25 = vpop.f32.mrf.mxu0  ;;  %8906 = vmatpush.msra.mxu3 %v14606_v12 }
 0x529   : >> { %v14584_v9 = vpop.f32.mrf.mxu1  ;;  %v8072_v48 = vpop.f32.mrf.mxu3  ;;  %9597 = vmatpush.msrb.mxu1 %v14400_v16 }
 0x52a   : >> { %v14587_v35 = vadd.f32 %v8072_v48, %v7980_v53 }
 0x52b   : >> { %11128 = vmatmul.msk.f32.gmra.mxu0 %vm7758_vm0, %v14429_v43  ;;  %9598 = vmatpush.msrb.mxu1 %v14447_v33  ;;  %v14629_v33 = vld [vmem:[%s16651_s3 + $0x110] sm:$0xff] }
 0x52c   : >> { %16703 = vst [vmem:[#allocation16_spill] sm:$0xff] %v14587_v35  ;;  %11056 = vmatmul.msk.f32.gmra.mxu2 %vm7758_vm0, %v7810_v23  ;;  %11156 = vmatmul.msk.f32.gmra.mxu1 %vm7758_vm0, %v14438_v28 }
 0x52d   : >> { %9027 = vmatpush.msra.mxu0 %v14629_v33 }
 0x52e   : >> { %11112 = vmatmul.msk.f32.gmra.mxu3 %vm7758_vm0, %v14597_v2 }
 0x52f   : >> { %v7983_v16 = vpop.f32.mrf.mxu2 }
 0x530   : >> { %v14612_v58 = vpop.f32.mrf.mxu0 }
 0x531   : >> { %v14614_v0 = vpop.f32.mrf.mxu1  ;;  %v8075_v23 = vpop.f32.mrf.mxu3 }
 0x532   : >> { %v14616_v20 = vadd.f32 %v8075_v23, %v7983_v16 }
 0x533   : >> { %11129 = vmatmul.msk.f32.gmra.mxu0 %vm7758_vm0, %v14438_v28 }
 0x534   : >> { %16704 = vst [vmem:[#allocation17_spill] sm:$0xff] %v14616_v20  ;;  %11057 = vmatmul.msk.f32.gmra.mxu2 %vm7758_vm0, %v7811_v51  ;;  %11157 = vmatmul.msk.f32.gmra.mxu1 %vm7758_vm0, %v14461_v1 }
 0x536   : >> { %11113 = vmatmul.msk.f32.gmra.mxu3 %vm7758_vm0, %v14621_v34 }
 0x537   : >> { %v7986_v53 = vpop.f32.mrf.mxu2 }
 0x538   : >> { %v14634_v48 = vpop.f32.mrf.mxu0 }
 0x539   : >> { %v14636_v16 = vpop.f32.mrf.mxu1  ;;  %v8078_v51 = vpop.f32.mrf.mxu3 }
 0x53a   : >> { %v14638_v23 = vadd.f32 %v8078_v51, %v7986_v53 }
 0x53b   : >> { %11130 = vmatmul.msk.f32.gmra.mxu0 %vm7758_vm0, %v14461_v1  ;;  %v14660_v1 = vld [vmem:[%s14255_s14 + $0x150] sm:$0xff] }
 0x53c   : >> { %16705 = vst [vmem:[#allocation18_spill] sm:$0xff] %v14638_v23  ;;  %11058 = vmatmul.msk.f32.gmra.mxu2 %vm7758_vm0, %v14535_v41  ;;  %11158 = vmatmul.msk.f32.gmra.mxu1 %vm7758_vm0, %v14472_v49  ;;  %v8013_v41 = vadd.f32 %v14537_v36, %v14532_v47  ;;  %v8016_v47 = vadd.f32 %v14550_v21, %v14548_v4 }
 0x53d   : >> { %v8019_v4 = vadd.f32 %v14566_v27, %v14564_v10  ;;  %v14722_v10 = vld [vmem:[%s14255_s14 + $0x168] sm:$0xff] }
 0x53e   : >> { %11114 = vmatmul.msk.f32.gmra.mxu3 %vm7758_vm0, %v14643_v6  ;;  %16711 = vst [vmem:[#allocation24_spill] sm:$0xff] %v14722_v10  ;;  %v14732_v27 = vld [vmem:[%s16651_s3 + $0xe8] sm:$0xff] }
 0x53f   : >> { %v7989_v28 = vpop.f32.mrf.mxu2  ;;  %8907 = vmatpush.msra.mxu3 %v14732_v27 }
 0x540   : >> { %v14651_v20 = vpop.f32.mrf.mxu0 }
 0x541   : >> { %v14653_v43 = vpop.f32.mrf.mxu1  ;;  %v8081_v53 = vpop.f32.mrf.mxu3 }
 0x542   : >> { %v14655_v51 = vadd.f32 %v8081_v53, %v7989_v28 }
 0x543   : >> { %11131 = vmatmul.msk.f32.gmra.mxu0 %vm7758_vm0, %v14472_v49 }
 0x544   : >> { %16706 = vst [vmem:[#allocation19_spill] sm:$0xff] %v14655_v51  ;;  %11059 = vmatmul.msk.f32.gmra.mxu2 %vm7758_vm0, %v14274_v26  ;;  %11159 = vmatmul.msk.f32.gmra.mxu1 %vm7758_vm0, %v14481_v32  ;;  %v14679_v26 = vld [vmem:[%s14255_s14 + $0x158] sm:$0xff] }
 0x546   : >> { %11115 = vmatmul.msk.f32.gmra.mxu3 %vm7758_vm0, %v14660_v1 }
 0x547   : >> { %v8109_v23 = vpop.f32.mrf.mxu2 }
 0x548   : >> { %v8181_v28 = vadd.f32 %v8109_v23, %v8013_v41  ;;  %v14670_v53 = vpop.f32.mrf.mxu0 }
 0x549   : >> { %v14672_v51 = vpop.f32.mrf.mxu1  ;;  %v8328_v49 = vpop.f32.mrf.mxu3 }
 0x54a   : >> { %v14674_v35 = vadd.f32 %v8328_v49, %v8181_v28 }
 0x54b   : >> { %11132 = vmatmul.msk.f32.gmra.mxu0 %vm7758_vm0, %v14481_v32 }
 0x54c   : >> { %16707 = vst [vmem:[#allocation20_spill] sm:$0xff] %v14674_v35  ;;  %11060 = vmatmul.msk.f32.gmra.mxu2 %vm7758_vm0, %v14261_v45  ;;  %11160 = vmatmul.msk.f32.gmra.mxu1 %vm7758_vm0, %v14495_v44  ;;  %v14698_v45 = vld [vmem:[%s14255_s14 + $0x160] sm:$0xff] }
 0x54d   : >> { %16709 = vst [vmem:[#allocation22_spill] sm:$0xff] %v14698_v45 }
 0x54e   : >> { %11116 = vmatmul.msk.f32.gmra.mxu3 %vm7758_vm0, %v14679_v26 }
 0x54f   : >> { %v8112_v36 = vpop.f32.mrf.mxu2 }
 0x550   : >> { %v8182_v49 = vadd.f32 %v8112_v36, %v8016_v47  ;;  %v14689_v23 = vpop.f32.mrf.mxu0 }
 0x551   : >> { %v14691_v41 = vpop.f32.mrf.mxu1  ;;  %v8331_v28 = vpop.f32.mrf.mxu3 }
 0x552   : >> { %v14693_v32 = vadd.f32 %v8331_v28, %v8182_v49 }
 0x553   : >> { %11133 = vmatmul.msk.f32.gmra.mxu0 %vm7758_vm0, %v14495_v44 }
 0x554   : >> { %16708 = vst [vmem:[#allocation21_spill] sm:$0xff] %v14693_v32  ;;  %11061 = vmatmul.msk.f32.gmra.mxu2 %vm7758_vm0, %v14303_v8  ;;  %11161 = vmatmul.msk.f32.gmra.mxu1 %vm7758_vm0, %v14511_v15  ;;  %v14717_v8 = vld [vmem:[%s16651_s3 + $0xc8] sm:$0xff]  ;;  %v14748_v32 = vld [vmem:[%s16651_s3 + $0xc0] sm:$0xff] }
 0x555   : >> { %8786 = vmatpush.msra.mxu2 %v14717_v8 }
 0x556   : >> { %11117 = vmatmul.msk.f32.gmra.mxu3 %vm7758_vm0, %v14698_v45 }
 0x557   : >> { %v8115_v21 = vpop.f32.mrf.mxu2  ;;  %8787 = vmatpush.msra.mxu2 %v14748_v32 }
 0x558   : >> { %v8183_v47 = vadd.f32 %v8115_v21, %v8019_v4  ;;  %v14708_v36 = vpop.f32.mrf.mxu0  ;;  %v8022_v4 = vadd.f32 %v14584_v9, %v14582_v25  ;;  %v14753_v25 = vld [vmem:[%s14255_s14 + $0x170] sm:$0xff]  ;;  %v14768_v9 = vld [vmem:[%s16651_s3 + $0xe0] sm:$0xff] }
 0x559   : >> { %v14710_v49 = vpop.f32.mrf.mxu1  ;;  %v8334_v28 = vpop.f32.mrf.mxu3  ;;  %16713 = vst [vmem:[#allocation26_spill] sm:$0xff] %v14753_v25  ;;  %8908 = vmatpush.msra.mxu3 %v14768_v9  ;;  %9280 = vmatpush.msrb.mxu2 %v14212_v17  ;;  %v14790_v17 = vld [vmem:[%s14255_s14 + $0x178] sm:$0xff] }
 0x55a   : >> { %v14712_v44 = vadd.f32 %v8334_v28, %v8183_v47  ;;  %16714 = vst [vmem:[#allocation27_spill] sm:$0xff] %v14790_v17 }
 0x55b   : >> { %11134 = vmatmul.msk.f32.gmra.mxu0 %vm7758_vm0, %v14511_v15  ;;  %9369 = vmatpush.msrb.mxu3 %v14312_v56 }
 0x55c   : >> { %16710 = vst [vmem:[#allocation23_spill] sm:$0xff] %v14712_v44  ;;  %11062 = vmatmul.msk.f32.gmra.mxu2 %vm7758_vm0, %v14346_v29  ;;  %11162 = vmatmul.msk.f32.gmra.mxu1 %vm7758_vm0, %v14526_v57 }
 0x55d   : >> { %9281 = vmatpush.msrb.mxu2 %v14224_v19  ;;  %9370 = vmatpush.msrb.mxu3 %v14320_v42  ;;  %v8028_v19 = vadd.f32 %v14636_v16, %v14634_v48 }
 0x55e   : >> { %11118 = vmatmul.msk.f32.gmra.mxu3 %vm7758_vm0, %v14722_v10 }
 0x55f   : >> { %v8118_v21 = vpop.f32.mrf.mxu2  ;;  %9282 = vmatpush.msrb.mxu2 %v14239_v37  ;;  %9371 = vmatpush.msrb.mxu3 %v14330_v60 }
 0x560   : >> { %v8184_v47 = vadd.f32 %v8118_v21, %v8022_v4  ;;  %v14739_v28 = vpop.f32.mrf.mxu0 }
 0x561   : >> { %v14741_v29 = vpop.f32.mrf.mxu1  ;;  %v8337_v15 = vpop.f32.mrf.mxu3  ;;  %9283 = vmatpush.msrb.mxu2 %v14253_v62  ;;  %9372 = vmatpush.msrb.mxu3 %v14343_v24  ;;  %v14812_v62 = vld [vmem:[%s14255_s14 + $0x180] sm:$0xff]  ;;  %v8031_v24 = vadd.f32 %v14653_v43, %v14651_v20  ;;  %v8034_v43 = vadd.f32 %v14672_v51, %v14670_v53  ;;  %v8037_v51 = vadd.f32 %v14691_v41, %v14689_v23  ;;  %v14877_v23 = vld [vmem:[%s14255_s14 + $0x1b0] sm:$0xff] }
 0x562   : >> { %v14743_v44 = vadd.f32 %v8337_v15, %v8184_v47  ;;  %v14763_v15 = vld [vmem:[%s16651_s3 + $0x108] sm:$0xff]  ;;  %16715 = vst [vmem:[#allocation28_spill] sm:$0xff] %v14812_v62 }
 0x563   : >> { %11135 = vmatmul.msk.f32.gmra.mxu0 %vm7758_vm0, %v14526_v57  ;;  %16719 = vst [vmem:[#allocation32_spill] sm:$0xff] %v14877_v23 }
 0x564   : >> { %16712 = vst [vmem:[#allocation25_spill] sm:$0xff] %v14743_v44  ;;  %11063 = vmatmul.msk.f32.gmra.mxu2 %vm7758_vm0, %v14371_v59  ;;  %11163 = vmatmul.msk.f32.gmra.mxu1 %vm7758_vm0, %v14542_v55  ;;  %v8025_v59 = vadd.f32 %v14614_v0, %v14612_v58 }
 0x565   : >> { %9028 = vmatpush.msra.mxu0 %v14763_v15 }
 0x566   : >> { %11119 = vmatmul.msk.f32.gmra.mxu3 %vm7758_vm0, %v14753_v25 }
 0x567   : >> { %v8121_v4 = vpop.f32.mrf.mxu2 }
 0x568   : >> { %v8185_v21 = vadd.f32 %v8121_v4, %v8025_v59  ;;  %v14778_v47 = vpop.f32.mrf.mxu0  ;;  %v7820_v4 = vld [vmem:[%s14255_s14 + $0xc8] sm:$0xff] }
 0x569   : >> { %v14781_v57 = vpop.f32.mrf.mxu1  ;;  %v8340_v44 = vpop.f32.mrf.mxu3 }
 0x56a   : >> { %v14784_v35 = vadd.f32 %v8340_v44, %v8185_v21  ;;  %v14832_v21 = vld [vmem:[%s14255_s14 + $0x188] sm:$0xff] }
 0x56b   : >> { %11136 = vmatmul.msk.f32.gmra.mxu0 %vm7758_vm0, %v14542_v55  ;;  %16716 = vst [vmem:[#allocation29_spill] sm:$0xff] %v14832_v21 }
 0x56c   : >> { %11064 = vmatmul.msk.f32.gmra.mxu2 %vm7758_vm0, %v14381_v30  ;;  %11164 = vmatmul.msk.f32.gmra.mxu1 %vm7758_vm0, %v14557_v38 }
 0x56e   : >> { %11120 = vmatmul.msk.f32.gmra.mxu3 %vm7758_vm0, %v14790_v17 }
 0x56f   : >> { %v8124_v37 = vpop.f32.mrf.mxu2 }
 0x570   : >> { %v8186_v56 = vadd.f32 %v8124_v37, %v8028_v19  ;;  %v14803_v42 = vpop.f32.mrf.mxu0 }
 0x571   : >> { %v14805_v60 = vpop.f32.mrf.mxu1  ;;  %v8343_v30 = vpop.f32.mrf.mxu3 }
 0x572   : >> { %v14807_v44 = vadd.f32 %v8343_v30, %v8186_v56 }
 0x573   : >> { %11137 = vmatmul.msk.f32.gmra.mxu0 %vm7758_vm0, %v14557_v38 }
 0x574   : >> { %11065 = vmatmul.msk.f32.gmra.mxu2 %vm7758_vm0, %v14391_v63  ;;  %11165 = vmatmul.msk.f32.gmra.mxu1 %vm7758_vm0, %v14573_v11 }
 0x576   : >> { %11121 = vmatmul.msk.f32.gmra.mxu3 %vm7758_vm0, %v14812_v62 }
 0x577   : >> { %v8127_v58 = vpop.f32.mrf.mxu2 }
 0x578   : >> { %v8187_v0 = vadd.f32 %v8127_v58, %v8031_v24  ;;  %v14822_v48 = vpop.f32.mrf.mxu0  ;;  %v14846_v24 = vld [vmem:[%s14255_s14 + $0x1a0] sm:$0xff] }
 0x579   : >> { %v14824_v16 = vpop.f32.mrf.mxu1  ;;  %v8346_v59 = vpop.f32.mrf.mxu3  ;;  %16717 = vst [vmem:[#allocation30_spill] sm:$0xff] %v14846_v24 }
 0x57a   : >> { %v14827_v63 = vadd.f32 %v8346_v59, %v8187_v0  ;;  %v14853_v0 = vld [vmem:[%s14255_s14 + $0x1a8] sm:$0xff] }
 0x57b   : >> { %11138 = vmatmul.msk.f32.gmra.mxu0 %vm7758_vm0, %v14573_v11  ;;  %16718 = vst [vmem:[#allocation31_spill] sm:$0xff] %v14853_v0 }
 0x57c   : >> { %11066 = vmatmul.msk.f32.gmra.mxu2 %vm7758_vm0, %v7820_v4  ;;  %11166 = vmatmul.msk.f32.gmra.mxu1 %vm7758_vm0, %v14597_v2 }
 0x57e   : >> { %11122 = vmatmul.msk.f32.gmra.mxu3 %vm7758_vm0, %v14832_v21 }
 0x57f   : >> { %v8130_v20 = vpop.f32.mrf.mxu2 }
 0x580   : >> { %v8188_v19 = vadd.f32 %v8130_v20, %v8034_v43  ;;  %v14841_v37 = vpop.f32.mrf.mxu0 }
 0x581   : >> { %v14843_v56 = vpop.f32.mrf.mxu1  ;;  %v8349_v30 = vpop.f32.mrf.mxu3 }
 0x582   : >> { %v14848_v58 = vadd.f32 %v8349_v30, %v8188_v19 }
 0x583   : >> { %11139 = vmatmul.msk.f32.gmra.mxu0 %vm7758_vm0, %v14597_v2 }
 0x584   : >> { %11211 = vmatmul.msk.f32.vlgmr.msra.gmra.mxu2 %vm7758_vm0, %v14846_v24  ;;  %11167 = vmatmul.msk.f32.gmra.mxu1 %vm7758_vm0, %v14621_v34 }
 0x585   : >> { %9708 = vmatpush.msra.mxu2 %v14279_v7 }
 0x586   : >> { %11239 = vmatmul.msk.f32.vlgmr.msra.gmra.mxu3 %vm7758_vm0, %v14853_v0 }
 0x587   : >> { %v8133_v53 = vpop.f32.mrf.mxu2  ;;  %9922 = vmatpush.msra.mxu3 %v14491_v52  ;;  %9709 = vmatpush.msra.mxu2 %v14297_v31  ;;  %v8040_v31 = vadd.f32 %v14710_v49, %v14708_v36  ;;  %v8043_v36 = vadd.f32 %v14741_v29, %v14739_v28  ;;  %v14927_v28 = vld [vmem:[%s14255_s14 + $0x1c0] sm:$0xff] }
 0x588   : >> { %v8189_v59 = vadd.f32 %v8133_v53, %v8037_v51  ;;  %v14866_v4 = vpop.f32.mrf.mxu0  ;;  %16721 = vst [vmem:[#allocation34_spill] sm:$0xff] %v14927_v28 }
 0x589   : >> { %v14868_v43 = vpop.f32.mrf.mxu1  ;;  %v8352_v20 = vpop.f32.mrf.mxu3  ;;  %9923 = vmatpush.msra.mxu3 %v14592_v14  ;;  %9710 = vmatpush.msra.mxu2 %v14408_v61 }
 0x58a   : >> { %v14872_v7 = vadd.f32 %v8352_v20, %v8189_v59 }
 0x58b   : >> { %11140 = vmatmul.msk.f32.gmra.mxu0 %vm7758_vm0, %v14621_v34  ;;  %9924 = vmatpush.msra.mxu3 %v14717_v8 }
 0x58c   : >> { %11212 = vmatmul.msk.f32.gmra.mxu2 %vm7758_vm0, %v14853_v0  ;;  %11168 = vmatmul.msk.f32.gmra.mxu1 %vm7758_vm0, %v14643_v6  ;;  %v15004_v0 = vld [vmem:[%s14255_s14 + $0x1e0] sm:$0xff] }
 0x58d   : >> { %9711 = vmatpush.msra.mxu2 %v14452_v40  ;;  %9925 = vmatpush.msra.mxu3 %v14748_v32  ;;  %v14899_v40 = vld [vmem:[%s14255_s14 + $0x1b8] sm:$0xff]  ;;  %v14908_v32 = vld [vmem:[%s16651_s3 + $0x100] sm:$0xff]  ;;  %16727 = vst [vmem:[#allocation40_spill] sm:$0xff] %v15004_v0 }
 0x58e   : >> { %11240 = vmatmul.msk.f32.gmra.mxu3 %vm7758_vm0, %v14877_v23  ;;  %16720 = vst [vmem:[#allocation33_spill] sm:$0xff] %v14899_v40  ;;  %9029 = vmatpush.msra.mxu0 %v14908_v32 }
 0x58f   : >> { %v8136_v61 = vpop.f32.mrf.mxu2 }
 0x590   : >> { %v8190_v52 = vadd.f32 %v8136_v61, %v8040_v31  ;;  %v14890_v14 = vpop.f32.mrf.mxu0  ;;  %9482 = vmatpush.msrb.mxu0 %v14325_v18  ;;  %v8046_v18 = vadd.f32 %v14781_v57, %v14778_v47  ;;  %v8049_v57 = vadd.f32 %v14805_v60, %v14803_v42  ;;  %v8052_v42 = vadd.f32 %v14824_v16, %v14822_v48 }
 0x591   : >> { %v14892_v41 = vpop.f32.mrf.mxu1  ;;  %v8355_v8 = vpop.f32.mrf.mxu3  ;;  %v8055_v48 = vadd.f32 %v14843_v56, %v14841_v37  ;;  %v8058_v37 = vadd.f32 %v14868_v43, %v14866_v4 }
 0x592   : >> { %v14894_v19 = vadd.f32 %v8355_v8, %v8190_v52  ;;  %9483 = vmatpush.msrb.mxu0 %v14337_v46  ;;  %v8061_v4 = vadd.f32 %v14892_v41, %v14890_v14 }
 0x593   : >> { %11141 = vmatmul.msk.f32.gmra.mxu0 %vm7758_vm0, %v14643_v6 }
 0x594   : >> { %11213 = vmatmul.msk.f32.gmra.mxu2 %vm7758_vm0, %v14877_v23  ;;  %11169 = vmatmul.msk.f32.gmra.mxu1 %vm7758_vm0, %v14660_v1 }
 0x595   : >> { %9484 = vmatpush.msrb.mxu0 %v14353_v22 }
 0x596   : >> { %11241 = vmatmul.msk.f32.gmra.mxu3 %vm7758_vm0, %v14899_v40 }
 0x597   : >> { %v8139_v49 = vpop.f32.mrf.mxu2  ;;  %9485 = vmatpush.msrb.mxu0 %v14363_v54  ;;  %v14947_v54 = vld [vmem:[%s14255_s14 + $0x1c8] sm:$0xff] }
 0x598   : >> { %v8191_v30 = vadd.f32 %v8139_v49, %v8043_v36  ;;  %v14916_v51 = vpop.f32.mrf.mxu0  ;;  %16722 = vst [vmem:[#allocation35_spill] sm:$0xff] %v14947_v54 }
 0x599   : >> { %v14919_v53 = vpop.f32.mrf.mxu1  ;;  %v8358_v59 = vpop.f32.mrf.mxu3 }
 0x59a   : >> { %v14921_v20 = vadd.f32 %v8358_v59, %v8191_v30  ;;  %v8064_v14 = vadd.f32 %v14919_v53, %v14916_v51  ;;  %v15064_v51 = vld [vmem:[%s14255_s14 + $0x1f8] sm:$0xff] }
 0x59b   : >> { %11142 = vmatmul.msk.f32.gmra.mxu0 %vm7758_vm0, %v14660_v1 }
 0x59c   : >> { %11214 = vmatmul.msk.f32.gmra.mxu2 %vm7758_vm0, %v14899_v40  ;;  %11170 = vmatmul.msk.f32.gmra.mxu1 %vm7758_vm0, %v14679_v26 }
 0x59e   : >> { %11242 = vmatmul.msk.f32.gmra.mxu3 %vm7758_vm0, %v14927_v28 }
 0x59f   : >> { %v8142_v46 = vpop.f32.mrf.mxu2 }
 0x5a0   : >> { %v8192_v22 = vadd.f32 %v8142_v46, %v8046_v18  ;;  %v14938_v29 = vpop.f32.mrf.mxu0  ;;  %v14966_v18 = vld [vmem:[%s14255_s14 + $0x1d0] sm:$0xff] }
 0x5a1   : >> { %v8361_v31 = vpop.f32.mrf.mxu3  ;;  %v14940_v61 = vpop.f32.mrf.mxu1  ;;  %16723 = vst [vmem:[#allocation36_spill] sm:$0xff] %v14966_v18 }
 0x5a2   : >> { %v14942_v52 = vadd.f32 %v8361_v31, %v8192_v22 }
 0x5a3   : >> { %11143 = vmatmul.msk.f32.gmra.mxu0 %vm7758_vm0, %v14679_v26 }
 0x5a4   : >> { %11215 = vmatmul.msk.f32.gmra.mxu2 %vm7758_vm0, %v14927_v28  ;;  %11171 = vmatmul.msk.f32.gmra.mxu1 %vm7758_vm0, %v14698_v45 }
 0x5a6   : >> { %11243 = vmatmul.msk.f32.gmra.mxu3 %vm7758_vm0, %v14947_v54 }
 0x5a7   : >> { %v8145_v47 = vpop.f32.mrf.mxu2 }
 0x5a8   : >> { %v8193_v8 = vadd.f32 %v8145_v47, %v8049_v57  ;;  %v14957_v36 = vpop.f32.mrf.mxu0 }
 0x5a9   : >> { %v8364_v49 = vpop.f32.mrf.mxu3  ;;  %v14959_v30 = vpop.f32.mrf.mxu1 }
 0x5aa   : >> { %v14961_v59 = vadd.f32 %v8364_v49, %v8193_v8  ;;  %v14985_v8 = vld [vmem:[%s14255_s14 + $0x1d8] sm:$0xff] }
 0x5ab   : >> { %11144 = vmatmul.msk.f32.gmra.mxu0 %vm7758_vm0, %v14698_v45  ;;  %16725 = vst [vmem:[#allocation38_spill] sm:$0xff] %v14985_v8 }
 0x5ac   : >> { %11216 = vmatmul.msk.f32.gmra.mxu2 %vm7758_vm0, %v14947_v54  ;;  %11172 = vmatmul.msk.f32.gmra.mxu1 %vm7758_vm0, %v14722_v10 }
 0x5ae   : >> { %11244 = vmatmul.msk.f32.gmra.mxu3 %vm7758_vm0, %v14966_v18 }
 0x5af   : >> { %v8148_v60 = vpop.f32.mrf.mxu2 }
 0x5b0   : >> { %v8194_v46 = vadd.f32 %v8148_v60, %v8052_v42  ;;  %v14976_v22 = vpop.f32.mrf.mxu0 }
 0x5b1   : >> { %v8367_v31 = vpop.f32.mrf.mxu3  ;;  %v14978_v57 = vpop.f32.mrf.mxu1 }
 0x5b2   : >> { %v14980_v47 = vadd.f32 %v8367_v31, %v8194_v46 }
 0x5b3   : >> { %11145 = vmatmul.msk.f32.gmra.mxu0 %vm7758_vm0, %v14722_v10  ;;  %v15085_v10 = vld [vmem:[%s14255_s14 + $0x200] sm:$0xff] }
 0x5b4   : >> { %16724 = vst [vmem:[#allocation37_spill] sm:$0xff] %v14980_v47  ;;  %11217 = vmatmul.msk.f32.gmra.mxu2 %vm7758_vm0, %v14966_v18  ;;  %11173 = vmatmul.msk.f32.gmra.mxu1 %vm7758_vm0, %v14753_v25 }
 0x5b6   : >> { %11245 = vmatmul.msk.f32.gmra.mxu3 %vm7758_vm0, %v14985_v8 }
 0x5b7   : >> { %v8151_v16 = vpop.f32.mrf.mxu2 }
 0x5b8   : >> { %v8195_v49 = vadd.f32 %v8151_v16, %v8055_v48  ;;  %v14995_v42 = vpop.f32.mrf.mxu0 }
 0x5b9   : >> { %v8370_v60 = vpop.f32.mrf.mxu3  ;;  %v14997_v46 = vpop.f32.mrf.mxu1 }
 0x5ba   : >> { %v14999_v31 = vadd.f32 %v8370_v60, %v8195_v49 }
 0x5bb   : >> { %11146 = vmatmul.msk.f32.gmra.mxu0 %vm7758_vm0, %v14753_v25  ;;  %v15023_v25 = vld [vmem:[%s14255_s14 + $0x1e8] sm:$0xff] }
 0x5bc   : >> { %16726 = vst [vmem:[#allocation39_spill] sm:$0xff] %v14999_v31  ;;  %11218 = vmatmul.msk.f32.gmra.mxu2 %vm7758_vm0, %v14985_v8  ;;  %11174 = vmatmul.msk.f32.gmra.mxu1 %vm7758_vm0, %v14790_v17 }
 0x5be   : >> { %11246 = vmatmul.msk.f32.gmra.mxu3 %vm7758_vm0, %v15004_v0 }
 0x5bf   : >> { %v8154_v56 = vpop.f32.mrf.mxu2 }
 0x5c0   : >> { %v8196_v48 = vadd.f32 %v8154_v56, %v8058_v37  ;;  %v15014_v16 = vpop.f32.mrf.mxu0 }
 0x5c1   : >> { %v8373_v49 = vpop.f32.mrf.mxu3  ;;  %v15016_v60 = vpop.f32.mrf.mxu1 }
 0x5c2   : >> { %v15018_v24 = vadd.f32 %v8373_v49, %v8196_v48 }
 0x5c3   : >> { %11147 = vmatmul.msk.f32.gmra.mxu0 %vm7758_vm0, %v14790_v17 }
 0x5c4   : >> { %16728 = vst [vmem:[#allocation41_spill] sm:$0xff] %v15018_v24  ;;  %11219 = vmatmul.msk.f32.gmra.mxu2 %vm7758_vm0, %v15004_v0  ;;  %11175 = vmatmul.msk.f32.gmra.mxu1 %vm7758_vm0, %v14812_v62  ;;  %v15042_v24 = vld [vmem:[%s14255_s14 + $0x1f0] sm:$0xff] }
 0x5c6   : >> { %11247 = vmatmul.msk.f32.gmra.mxu3 %vm7758_vm0, %v15023_v25 }
 0x5c7   : >> { %v8157_v43 = vpop.f32.mrf.mxu2 }
 0x5c8   : >> { %v8197_v37 = vadd.f32 %v8157_v43, %v8061_v4  ;;  %v15033_v56 = vpop.f32.mrf.mxu0 }
 0x5c9   : >> { %v8376_v48 = vpop.f32.mrf.mxu3  ;;  %v15035_v49 = vpop.f32.mrf.mxu1 }
 0x5ca   : >> { %v15037_v17 = vadd.f32 %v8376_v48, %v8197_v37 }
 0x5cb   : >> { %11148 = vmatmul.msk.f32.gmra.mxu0 %vm7758_vm0, %v14812_v62  ;;  %v15057_v62 = vld [vmem:[%s14255_s14 + $0x190] sm:$0xff] }
 0x5cc   : >> { %16729 = vst [vmem:[#allocation42_spill] sm:$0xff] %v15037_v17  ;;  %11220 = vmatmul.msk.f32.gmra.mxu2 %vm7758_vm0, %v15023_v25  ;;  %11176 = vmatmul.msk.f32.gmra.mxu1 %vm7758_vm0, %v14832_v21 }
 0x5cd   : >> { %16730 = vst [vmem:[#allocation43_spill] sm:$0xff] %v15057_v62 }
 0x5ce   : >> { %11248 = vmatmul.msk.f32.gmra.mxu3 %vm7758_vm0, %v15042_v24 }
 0x5cf   : >> { %v8160_v41 = vpop.f32.mrf.mxu2 }
 0x5d0   : >> { %v8198_v4 = vadd.f32 %v8160_v41, %v8064_v14  ;;  %v15052_v43 = vpop.f32.mrf.mxu0 }
 0x5d1   : >> { %v8379_v37 = vpop.f32.mrf.mxu3  ;;  %v15054_v48 = vpop.f32.mrf.mxu1 }
 0x5d2   : >> { %v15059_v17 = vadd.f32 %v8379_v37, %v8198_v4 }
 0x5d3   : >> { %11149 = vmatmul.msk.f32.gmra.mxu0 %vm7758_vm0, %v14832_v21  ;;  %v15078_v21 = vld [vmem:[%s14255_s14 + $0x198] sm:$0xff] }
 0x5d4   : >> { %16731 = vst [vmem:[#allocation44_spill] sm:$0xff] %v15059_v17  ;;  %11221 = vmatmul.msk.f32.gmra.mxu2 %vm7758_vm0, %v15042_v24  ;;  %11177 = vmatmul.msk.f32.gmra.mxu1 %vm7758_vm0, %v15057_v62 }
 0x5d5   : >> { %16732 = vst [vmem:[#allocation45_spill] sm:$0xff] %v15078_v21 }
 0x5d6   : >> { %11249 = vmatmul.msk.f32.gmra.mxu3 %vm7758_vm0, %v15064_v51 }
 0x5d7   : >> { %v8163_v53 = vpop.f32.mrf.mxu2 }
 0x5d8   : >> { %v8199_v14 = vadd.f32 %v8163_v53, %v14552_v5  ;;  %v15073_v41 = vpop.f32.mrf.mxu0 }
 0x5d9   : >> { %v8382_v4 = vpop.f32.mrf.mxu3  ;;  %v15075_v37 = vpop.f32.mrf.mxu1 }
 0x5da   : >> { %v15080_v17 = vadd.f32 %v8382_v4, %v8199_v14 }
 0x5db   : >> { %11150 = vmatmul.msk.f32.gmra.mxu0 %vm7758_vm0, %v15057_v62 }
 0x5dc   : >> { %16733 = vst [vmem:[#allocation46_spill] sm:$0xff] %v15080_v17  ;;  %11222 = vmatmul.msk.f32.gmra.mxu2 %vm7758_vm0, %v15064_v51  ;;  %11178 = vmatmul.msk.f32.gmra.mxu1 %vm7758_vm0, %v15078_v21  ;;  %v15103_v17 = vld [vmem:[%s14255_s14 + $0x208] sm:$0xff] }
 0x5de   : >> { %11250 = vmatmul.msk.f32.gmra.mxu3 %vm7758_vm0, %v15085_v10 }
 0x5df   : >> { %v8166_v5 = vpop.f32.mrf.mxu2 }
 0x5e0   : >> { %v8200_v53 = vadd.f32 %v8166_v5, %v14568_v50  ;;  %v15094_v31 = vpop.f32.mrf.mxu0  ;;  %v16735_v5 = vld [vmem:[#allocation16_spill] sm:$0xff] }
 0x5e1   : >> { %v8385_v14 = vpop.f32.mrf.mxu3  ;;  %v15096_v4 = vpop.f32.mrf.mxu1 }
 0x5e2   : >> { %v15098_v62 = vadd.f32 %v8385_v14, %v8200_v53 }
 0x5e3   : >> { %11267 = vmatmul.msk.f32.vlgmr.msra.gmra.mxu0 %vm7758_vm0, %v14877_v23 }
 0x5e4   : >> { %16734 = vst [vmem:[#allocation47_spill] sm:$0xff] %v15098_v62  ;;  %11223 = vmatmul.msk.f32.gmra.mxu2 %vm7758_vm0, %v15085_v10  ;;  %11291 = vmatmul.msk.f32.vlgmr.msra.gmra.mxu1 %vm7758_vm0, %v14420_v3 }
 0x5e5   : >> { %10038 = vmatpush.msra.mxu0 %v14503_v13  ;;  %10154 = vmatpush.msra.mxu1 %v14518_v39  ;;  %v15127_v13 = vld [vmem:[%s14255_s14 + $0x210] sm:$0xff]  ;;  %v16737_v39 = vld [vmem:[#allocation8_spill] sm:$0xff] }
 0x5e6   : >> { %11251 = vmatmul.msk.f32.gmra.mxu3 %vm7758_vm0, %v15103_v17 }
 0x5e7   : >> { %v8169_v50 = vpop.f32.mrf.mxu2  ;;  %10039 = vmatpush.msra.mxu0 %v14606_v12  ;;  %10155 = vmatpush.msra.mxu1 %v14629_v33  ;;  %v16738_v33 = vld [vmem:[#allocation17_spill] sm:$0xff] }
 0x5e8   : >> { %v8201_v53 = vadd.f32 %v8169_v50, %v16735_v5  ;;  %v15116_v14 = vpop.f32.mrf.mxu0  ;;  %v15147_v5 = vld [vmem:[%s14255_s14 + $0x218] sm:$0xff] }
 0x5e9   : >> { %v8388_v21 = vpop.f32.mrf.mxu3  ;;  %v15118_v23 = vpop.f32.mrf.mxu1  ;;  %10040 = vmatpush.msra.mxu0 %v14732_v27  ;;  %10156 = vmatpush.msra.mxu1 %v14763_v15 }
 0x5ea   : >> { %v15122_v3 = vadd.f32 %v8388_v21, %v8201_v53 }
 0x5eb   : >> { %11268 = vmatmul.msk.f32.gmra.mxu0 %vm7758_vm0, %v14899_v40  ;;  %10157 = vmatpush.msra.mxu1 %v14908_v32  ;;  %v15165_v40 = vld [vmem:[%s14255_s14 + $0x220] sm:$0xff] }
 0x5ec   : >> { %16736 = vst [vmem:[#allocation16_spill] sm:$0xff] %v15122_v3  ;;  %11224 = vmatmul.msk.f32.gmra.mxu2 %vm7758_vm0, %v15103_v17  ;;  %11292 = vmatmul.msk.f32.gmra.mxu1 %vm7758_vm0, %v16737_v39  ;;  %v16741_v39 = vld [vmem:[#allocation18_spill] sm:$0xff] }
 0x5ed   : >> { %10041 = vmatpush.msra.mxu0 %v14768_v9  ;;  %v16740_v9 = vld [vmem:[#allocation9_spill] sm:$0xff] }
 0x5ee   : >> { %11252 = vmatmul.msk.f32.gmra.mxu3 %vm7758_vm0, %v15127_v13 }
 0x5ef   : >> { %v8172_v12 = vpop.f32.mrf.mxu2 }
 0x5f0   : >> { %v8202_v27 = vadd.f32 %v8172_v12, %v16738_v33  ;;  %v15138_v15 = vpop.f32.mrf.mxu0 }
 0x5f1   : >> { %v8391_v21 = vpop.f32.mrf.mxu3  ;;  %v15140_v50 = vpop.f32.mrf.mxu1 }
 0x5f2   : >> { %v15142_v32 = vadd.f32 %v8391_v21, %v8202_v27 }
 0x5f3   : >> { %11269 = vmatmul.msk.f32.gmra.mxu0 %vm7758_vm0, %v14927_v28 }
 0x5f4   : >> { %16739 = vst [vmem:[#allocation8_spill] sm:$0xff] %v15142_v32  ;;  %11225 = vmatmul.msk.f32.gmra.mxu2 %vm7758_vm0, %v15127_v13  ;;  %11293 = vmatmul.msk.f32.gmra.mxu1 %vm7758_vm0, %v16740_v9  ;;  %v16743_v9 = vld [vmem:[#allocation10_spill] sm:$0xff] }
 0x5f6   : >> { %11253 = vmatmul.msk.f32.gmra.mxu3 %vm7758_vm0, %v15147_v5 }
 0x5f7   : >> { %v8175_v53 = vpop.f32.mrf.mxu2 }
 0x5f8   : >> { %v8203_v12 = vadd.f32 %v8175_v53, %v16741_v39  ;;  %v15156_v33 = vpop.f32.mrf.mxu0  ;;  %v16744_v39 = vld [vmem:[#allocation19_spill] sm:$0xff] }
 0x5f9   : >> { %v8394_v27 = vpop.f32.mrf.mxu3  ;;  %v15158_v21 = vpop.f32.mrf.mxu1 }
 0x5fa   : >> { %v15160_v28 = vadd.f32 %v8394_v27, %v8203_v12 }
 0x5fb   : >> { %11270 = vmatmul.msk.f32.gmra.mxu0 %vm7758_vm0, %v14947_v54  ;;  %v16745_v54 = vld [vmem:[#allocation20_spill] sm:$0xff] }
 0x5fc   : >> { %16742 = vst [vmem:[#allocation17_spill] sm:$0xff] %v15160_v28  ;;  %11226 = vmatmul.msk.f32.gmra.mxu2 %vm7758_vm0, %v15147_v5  ;;  %11294 = vmatmul.msk.f32.gmra.mxu1 %vm7758_vm0, %v16743_v9  ;;  %v8521_v28 = vadd.f32 %v14938_v29, %v16745_v54  ;;  %v15185_v9 = vld [vmem:[%s14255_s14 + $0x228] sm:$0xff] }
 0x5fe   : >> { %11254 = vmatmul.msk.f32.gmra.mxu3 %vm7758_vm0, %v15165_v40 }
 0x5ff   : >> { %v8178_v53 = vpop.f32.mrf.mxu2 }
 0x600   : >> { %v8204_v32 = vadd.f32 %v8178_v53, %v16744_v39  ;;  %v15174_v3 = vpop.f32.mrf.mxu0  ;;  %v16747_v53 = vld [vmem:[#allocation11_spill] sm:$0xff]  ;;  %v8642_v39 = vadd.f32 %v14940_v61, %v8521_v28  ;;  %v16750_v61 = vld [vmem:[#allocation12_spill] sm:$0xff] }
 0x601   : >> { %v8397_v12 = vpop.f32.mrf.mxu3  ;;  %v15176_v27 = vpop.f32.mrf.mxu1  ;;  %v15205_v28 = vld [vmem:[%s14255_s14 + $0x230] sm:$0xff] }
 0x602   : >> { %v15180_v62 = vadd.f32 %v8397_v12, %v8204_v32 }
 0x603   : >> { %11271 = vmatmul.msk.f32.gmra.mxu0 %vm7758_vm0, %v14966_v18  ;;  %v16748_v18 = vld [vmem:[#allocation21_spill] sm:$0xff] }
 0x604   : >> { %16746 = vst [vmem:[#allocation9_spill] sm:$0xff] %v15180_v62  ;;  %11227 = vmatmul.msk.f32.gmra.mxu2 %vm7758_vm0, %v15165_v40  ;;  %11295 = vmatmul.msk.f32.gmra.mxu1 %vm7758_vm0, %v16747_v53  ;;  %v8522_v45 = vadd.f32 %v14957_v36, %v16748_v18 }
 0x606   : >> { %11255 = vmatmul.msk.f32.gmra.mxu3 %vm7758_vm0, %v15185_v9  ;;  %v8643_v53 = vadd.f32 %v14959_v30, %v8522_v45  ;;  %v15225_v45 = vld [vmem:[%s14255_s14 + $0x238] sm:$0xff]  ;;  %v16753_v30 = vld [vmem:[#allocation13_spill] sm:$0xff] }
 0x607   : >> { %v8789_v29 = vpop.f32.mrf.mxu2 }
 0x608   : >> { %v8861_v54 = vadd.f32 %v8789_v29, %v8642_v39  ;;  %v15194_v32 = vpop.f32.mrf.mxu0 }
 0x609   : >> { %v8910_v12 = vpop.f32.mrf.mxu3  ;;  %v15196_v62 = vpop.f32.mrf.mxu1 }
 0x60a   : >> { %v15200_v47 = vadd.f32 %v8910_v12, %v8861_v54  ;;  %v16751_v12 = vld [vmem:[#allocation23_spill] sm:$0xff] }
 0x60b   : >> { %11272 = vmatmul.msk.f32.gmra.mxu0 %vm7758_vm0, %v14985_v8 }
 0x60c   : >> { %16749 = vst [vmem:[#allocation18_spill] sm:$0xff] %v15200_v47  ;;  %11228 = vmatmul.msk.f32.gmra.mxu2 %vm7758_vm0, %v15185_v9  ;;  %11296 = vmatmul.msk.f32.gmra.mxu1 %vm7758_vm0, %v16750_v61  ;;  %v8523_v47 = vadd.f32 %v14976_v22, %v16751_v12  ;;  %v16754_v12 = vld [vmem:[#allocation25_spill] sm:$0xff] }
 0x60e   : >> { %11256 = vmatmul.msk.f32.gmra.mxu3 %vm7758_vm0, %v15205_v28  ;;  %v8644_v61 = vadd.f32 %v14978_v57, %v8523_v47  ;;  %v15245_v57 = vld [vmem:[%s14255_s14 + $0x240] sm:$0xff]  ;;  %v16756_v47 = vld [vmem:[#allocation14_spill] sm:$0xff] }
 0x60f   : >> { %v8792_v36 = vpop.f32.mrf.mxu2 }
 0x610   : >> { %v8862_v18 = vadd.f32 %v8792_v36, %v8643_v53  ;;  %v15214_v39 = vpop.f32.mrf.mxu0 }
 0x611   : >> { %v8913_v29 = vpop.f32.mrf.mxu3  ;;  %v15216_v54 = vpop.f32.mrf.mxu1 }
 0x612   : >> { %v15220_v8 = vadd.f32 %v8913_v29, %v8862_v18 }
 0x613   : >> { %11273 = vmatmul.msk.f32.gmra.mxu0 %vm7758_vm0, %v15004_v0 }
 0x614   : >> { %16752 = vst [vmem:[#allocation10_spill] sm:$0xff] %v15220_v8  ;;  %11229 = vmatmul.msk.f32.gmra.mxu2 %vm7758_vm0, %v15205_v28  ;;  %11297 = vmatmul.msk.f32.gmra.mxu1 %vm7758_vm0, %v16753_v30  ;;  %v8524_v8 = vadd.f32 %v14995_v42, %v16754_v12  ;;  %v8525_v12 = vadd.f32 %v15014_v16, %v14784_v35 }
 0x616   : >> { %11257 = vmatmul.msk.f32.gmra.mxu3 %vm7758_vm0, %v15225_v45  ;;  %v8645_v30 = vadd.f32 %v14997_v46, %v8524_v8  ;;  %v15265_v8 = vld [vmem:[%s14255_s14 + $0x248] sm:$0xff]  ;;  %v16758_v46 = vld [vmem:[#allocation15_spill] sm:$0xff] }
 0x617   : >> { %v8795_v22 = vpop.f32.mrf.mxu2 }
 0x618   : >> { %v8863_v53 = vadd.f32 %v8795_v22, %v8644_v61  ;;  %v15234_v36 = vpop.f32.mrf.mxu0 }
 0x619   : >> { %v8916_v18 = vpop.f32.mrf.mxu3  ;;  %v15236_v29 = vpop.f32.mrf.mxu1 }
 0x61a   : >> { %v15240_v0 = vadd.f32 %v8916_v18, %v8863_v53 }
 0x61b   : >> { %11274 = vmatmul.msk.f32.gmra.mxu0 %vm7758_vm0, %v15023_v25 }
 0x61c   : >> { %16755 = vst [vmem:[#allocation19_spill] sm:$0xff] %v15240_v0  ;;  %11230 = vmatmul.msk.f32.gmra.mxu2 %vm7758_vm0, %v15225_v45  ;;  %11298 = vmatmul.msk.f32.gmra.mxu1 %vm7758_vm0, %v16756_v47  ;;  %v8646_v47 = vadd.f32 %v15016_v60, %v8525_v12  ;;  %v15285_v60 = vld [vmem:[%s14255_s14 + $0x250] sm:$0xff] }
 0x61e   : >> { %11258 = vmatmul.msk.f32.gmra.mxu3 %vm7758_vm0, %v15245_v57 }
 0x61f   : >> { %v8798_v42 = vpop.f32.mrf.mxu2 }
 0x620   : >> { %v8864_v61 = vadd.f32 %v8798_v42, %v8645_v30  ;;  %v15254_v22 = vpop.f32.mrf.mxu0 }
 0x621   : >> { %v8919_v53 = vpop.f32.mrf.mxu3  ;;  %v15256_v18 = vpop.f32.mrf.mxu1 }
 0x622   : >> { %v15260_v0 = vadd.f32 %v8919_v53, %v8864_v61  ;;  %v8526_v53 = vadd.f32 %v15033_v56, %v14807_v44 }
 0x623   : >> { %11275 = vmatmul.msk.f32.gmra.mxu0 %vm7758_vm0, %v15042_v24 }
 0x624   : >> { %16757 = vst [vmem:[#allocation20_spill] sm:$0xff] %v15260_v0  ;;  %11231 = vmatmul.msk.f32.gmra.mxu2 %vm7758_vm0, %v15245_v57  ;;  %11299 = vmatmul.msk.f32.gmra.mxu1 %vm7758_vm0, %v16758_v46  ;;  %v8647_v12 = vadd.f32 %v15035_v49, %v8526_v53 }
 0x626   : >> { %11259 = vmatmul.msk.f32.gmra.mxu3 %vm7758_vm0, %v15265_v8 }
 0x627   : >> { %v8801_v35 = vpop.f32.mrf.mxu2 }
 0x628   : >> { %v8865_v16 = vadd.f32 %v8801_v35, %v8646_v47  ;;  %v15274_v30 = vpop.f32.mrf.mxu0 }
 0x629   : >> { %v8922_v42 = vpop.f32.mrf.mxu3  ;;  %v15276_v61 = vpop.f32.mrf.mxu1 }
 0x62a   : >> { %v15280_v0 = vadd.f32 %v8922_v42, %v8865_v16  ;;  %v8527_v16 = vadd.f32 %v15052_v43, %v14827_v63 }
 0x62b   : >> { %11276 = vmatmul.msk.f32.gmra.mxu0 %vm7758_vm0, %v15064_v51 }
 0x62c   : >> { %11232 = vmatmul.msk.f32.gmra.mxu2 %vm7758_vm0, %v15265_v8  ;;  %11300 = vmatmul.msk.f32.gmra.mxu1 %vm7758_vm0, %v14542_v55  ;;  %v15305_v55 = vld [vmem:[%s14255_s14 + $0x258] sm:$0xff]  ;;  %v8648_v49 = vadd.f32 %v15054_v48, %v8527_v16 }
 0x62e   : >> { %11260 = vmatmul.msk.f32.gmra.mxu3 %vm7758_vm0, %v15285_v60 }
 0x62f   : >> { %v8804_v44 = vpop.f32.mrf.mxu2 }
 0x630   : >> { %v8866_v56 = vadd.f32 %v8804_v44, %v8647_v12  ;;  %v15294_v46 = vpop.f32.mrf.mxu0 }
 0x631   : >> { %v8925_v47 = vpop.f32.mrf.mxu3  ;;  %v15296_v35 = vpop.f32.mrf.mxu1 }
 0x632   : >> { %v15300_v42 = vadd.f32 %v8925_v47, %v8866_v56  ;;  %v8528_v56 = vadd.f32 %v15073_v41, %v14848_v58 }
 0x633   : >> { %11277 = vmatmul.msk.f32.gmra.mxu0 %vm7758_vm0, %v15085_v10 }
 0x634   : >> { %11233 = vmatmul.msk.f32.gmra.mxu2 %vm7758_vm0, %v15285_v60  ;;  %11301 = vmatmul.msk.f32.gmra.mxu1 %vm7758_vm0, %v14557_v38  ;;  %v15325_v38 = vld [vmem:[%s14255_s14 + $0x260] sm:$0xff]  ;;  %v8649_v48 = vadd.f32 %v15075_v37, %v8528_v56 }
 0x635   : >> { %v11640_v56 = vld [vmem:[%s14255_s14 + $0xe0] sm:$0xff] }
 0x636   : >> { %11261 = vmatmul.msk.f32.gmra.mxu3 %vm7758_vm0, %v15305_v55 }
 0x637   : >> { %v8807_v63 = vpop.f32.mrf.mxu2 }
 0x638   : >> { %v8867_v43 = vadd.f32 %v8807_v63, %v8648_v49  ;;  %v15314_v53 = vpop.f32.mrf.mxu0 }
 0x639   : >> { %v8928_v12 = vpop.f32.mrf.mxu3  ;;  %v15316_v44 = vpop.f32.mrf.mxu1 }
 0x63a   : >> { %v15320_v47 = vadd.f32 %v8928_v12, %v8867_v43  ;;  %v8529_v43 = vadd.f32 %v15094_v31, %v14872_v7 }
 0x63b   : >> { %11278 = vmatmul.msk.f32.gmra.mxu0 %vm7758_vm0, %v15103_v17 }
 0x63c   : >> { %11234 = vmatmul.msk.f32.gmra.mxu2 %vm7758_vm0, %v15305_v55  ;;  %11302 = vmatmul.msk.f32.gmra.mxu1 %vm7758_vm0, %v14573_v11  ;;  %v11639_v11 = vld [vmem:[%s14255_s14 + $0xd0] sm:$0xff]  ;;  %v8650_v37 = vadd.f32 %v15096_v4, %v8529_v43  ;;  %v11642_v43 = vld [vmem:[%s14255_s14 + $0xe8] sm:$0xff] }
 0x63e   : >> { %11262 = vmatmul.msk.f32.gmra.mxu3 %vm7758_vm0, %v15325_v38 }
 0x63f   : >> { %v8810_v58 = vpop.f32.mrf.mxu2 }
 0x640   : >> { %v8868_v41 = vadd.f32 %v8810_v58, %v8649_v48  ;;  %v15334_v16 = vpop.f32.mrf.mxu0 }
 0x641   : >> { %v8931_v49 = vpop.f32.mrf.mxu3  ;;  %v15336_v63 = vpop.f32.mrf.mxu1 }
 0x642   : >> { %v15340_v12 = vadd.f32 %v8931_v49, %v8868_v41  ;;  %v8530_v49 = vadd.f32 %v15116_v14, %v14894_v19 }
 0x643   : >> { %11279 = vmatmul.msk.f32.gmra.mxu0 %vm7758_vm0, %v15127_v13 }
 0x644   : >> { %11315 = vmatmul.msk.f32.vlgmr.msrb.gmra.mxu2 %vm7758_vm0, %v11639_v11  ;;  %11303 = vmatmul.msk.f32.gmra.mxu1 %vm7758_vm0, %v14597_v2  ;;  %v11641_v2 = vld [vmem:[%s14255_s14 + $0xd8] sm:$0xff]  ;;  %v8651_v4 = vadd.f32 %v15118_v23, %v8530_v49  ;;  %v11643_v23 = vld [vmem:[%s14255_s14 + $0xf0] sm:$0xff] }
 0x646   : >> { %11339 = vmatmul.msk.f32.vlgmr.msrb.gmra.mxu3 %vm7758_vm0, %v11640_v56 }
 0x647   : >> { %v8813_v48 = vpop.f32.mrf.mxu2 }
 0x648   : >> { %v8869_v7 = vadd.f32 %v8813_v48, %v8650_v37  ;;  %v15351_v31 = vpop.f32.mrf.mxu0 }
 0x649   : >> { %v8934_v58 = vpop.f32.mrf.mxu3  ;;  %v15353_v41 = vpop.f32.mrf.mxu1 }
 0x64a   : >> { %v15357_v11 = vadd.f32 %v8934_v58, %v8869_v7  ;;  %v8531_v58 = vadd.f32 %v15138_v15, %v14921_v20 }
 0x64b   : >> { %11280 = vmatmul.msk.f32.gmra.mxu0 %vm7758_vm0, %v15147_v5 }
 0x64c   : >> { %16759 = vst [vmem:[#allocation11_spill] sm:$0xff] %v15357_v11  ;;  %11316 = vmatmul.msk.f32.gmra.mxu2 %vm7758_vm0, %v11641_v2  ;;  %11304 = vmatmul.msk.f32.gmra.mxu1 %vm7758_vm0, %v14621_v34  ;;  %v8652_v34 = vadd.f32 %v15140_v50, %v8531_v58  ;;  %v11644_v50 = vld [vmem:[%s14255_s14 + $0xf8] sm:$0xff] }
 0x64e   : >> { %11340 = vmatmul.msk.f32.gmra.mxu3 %vm7758_vm0, %v11642_v43 }
 0x64f   : >> { %v8816_v37 = vpop.f32.mrf.mxu2 }
 0x650   : >> { %v8870_v48 = vadd.f32 %v8816_v37, %v8651_v4  ;;  %v15368_v19 = vpop.f32.mrf.mxu0 }
 0x651   : >> { %v8937_v14 = vpop.f32.mrf.mxu3  ;;  %v15370_v7 = vpop.f32.mrf.mxu1 }
 0x652   : >> { %v15374_v2 = vadd.f32 %v8937_v14, %v8870_v48  ;;  %v8532_v48 = vadd.f32 %v15156_v33, %v14942_v52 }
 0x653   : >> { %11281 = vmatmul.msk.f32.gmra.mxu0 %vm7758_vm0, %v15165_v40 }
 0x654   : >> { %16760 = vst [vmem:[#allocation21_spill] sm:$0xff] %v15374_v2  ;;  %11317 = vmatmul.msk.f32.gmra.mxu2 %vm7758_vm0, %v11640_v56  ;;  %11305 = vmatmul.msk.f32.gmra.mxu1 %vm7758_vm0, %v14643_v6  ;;  %v8653_v6 = vadd.f32 %v15158_v21, %v8532_v48  ;;  %v11645_v21 = vld [vmem:[%s14255_s14 + $0x100] sm:$0xff] }
 0x656   : >> { %11341 = vmatmul.msk.f32.gmra.mxu3 %vm7758_vm0, %v11643_v23 }
 0x657   : >> { %v8819_v49 = vpop.f32.mrf.mxu2 }
 0x658   : >> { %v8871_v4 = vadd.f32 %v8819_v49, %v8652_v34  ;;  %v15384_v37 = vpop.f32.mrf.mxu0  ;;  %v8533_v49 = vadd.f32 %v15174_v3, %v14961_v59 }
 0x659   : >> { %v8940_v20 = vpop.f32.mrf.mxu3  ;;  %v15386_v15 = vpop.f32.mrf.mxu1 }
 0x65a   : >> { %v15390_v56 = vadd.f32 %v8940_v20, %v8871_v4 }
 0x65b   : >> { %11282 = vmatmul.msk.f32.gmra.mxu0 %vm7758_vm0, %v15185_v9 }
 0x65c   : >> { %16761 = vst [vmem:[#allocation12_spill] sm:$0xff] %v15390_v56  ;;  %11318 = vmatmul.msk.f32.gmra.mxu2 %vm7758_vm0, %v11642_v43  ;;  %11306 = vmatmul.msk.f32.gmra.mxu1 %vm7758_vm0, %v14660_v1  ;;  %v8654_v1 = vadd.f32 %v15176_v27, %v8533_v49 }
 0x65e   : >> { %11342 = vmatmul.msk.f32.gmra.mxu3 %vm7758_vm0, %v11644_v50 }
 0x65f   : >> { %v8822_v14 = vpop.f32.mrf.mxu2 }
 0x660   : >> { %v8872_v58 = vadd.f32 %v8822_v14, %v8653_v6  ;;  %v15400_v34 = vpop.f32.mrf.mxu0  ;;  %v16763_v6 = vld [vmem:[#allocation37_spill] sm:$0xff] }
 0x661   : >> { %v8943_v52 = vpop.f32.mrf.mxu3  ;;  %v15402_v33 = vpop.f32.mrf.mxu1  ;;  %v8534_v14 = vadd.f32 %v15194_v32, %v16763_v6 }
 0x662   : >> { %v15406_v43 = vadd.f32 %v8943_v52, %v8872_v58  ;;  %v11646_v58 = vld [vmem:[%s14255_s14 + $0x108] sm:$0xff] }
 0x663   : >> { %11283 = vmatmul.msk.f32.gmra.mxu0 %vm7758_vm0, %v15205_v28  ;;  %v8655_v27 = vadd.f32 %v15196_v62, %v8534_v14  ;;  %v16768_v62 = vld [vmem:[#allocation24_spill] sm:$0xff]  ;;  %v11647_v14 = vld [vmem:[%s14255_s14 + $0x110] sm:$0xff] }
 0x664   : >> { %16762 = vst [vmem:[#allocation23_spill] sm:$0xff] %v15406_v43  ;;  %11319 = vmatmul.msk.f32.gmra.mxu2 %vm7758_vm0, %v11643_v23  ;;  %11307 = vmatmul.msk.f32.gmra.mxu1 %vm7758_vm0, %v14679_v26  ;;  %v16765_v26 = vld [vmem:[#allocation22_spill] sm:$0xff] }
 0x666   : >> { %11343 = vmatmul.msk.f32.gmra.mxu3 %vm7758_vm0, %v11645_v21 }
 0x667   : >> { %v8825_v4 = vpop.f32.mrf.mxu2 }
 0x668   : >> { %v8873_v20 = vadd.f32 %v8825_v4, %v8654_v1  ;;  %v15416_v48 = vpop.f32.mrf.mxu0 }
 0x669   : >> { %v8946_v59 = vpop.f32.mrf.mxu3  ;;  %v15418_v3 = vpop.f32.mrf.mxu1 }
 0x66a   : >> { %v15422_v23 = vadd.f32 %v8946_v59, %v8873_v20  ;;  %v16766_v20 = vld [vmem:[#allocation39_spill] sm:$0xff] }
 0x66b   : >> { %11284 = vmatmul.msk.f32.gmra.mxu0 %vm7758_vm0, %v15225_v45  ;;  %v8535_v59 = vadd.f32 %v15214_v39, %v16766_v20 }
 0x66c   : >> { %16764 = vst [vmem:[#allocation13_spill] sm:$0xff] %v15422_v23  ;;  %11320 = vmatmul.msk.f32.gmra.mxu2 %vm7758_vm0, %v11644_v50  ;;  %11308 = vmatmul.msk.f32.gmra.mxu1 %vm7758_vm0, %v16765_v26 }
 0x66d   : >> { %v8656_v6 = vadd.f32 %v15216_v54, %v8535_v59  ;;  %v16771_v54 = vld [vmem:[#allocation26_spill] sm:$0xff] }
 0x66e   : >> { %11344 = vmatmul.msk.f32.gmra.mxu3 %vm7758_vm0, %v11646_v58 }
 0x66f   : >> { %v8828_v52 = vpop.f32.mrf.mxu2 }
 0x670   : >> { %v8874_v49 = vadd.f32 %v8828_v52, %v8655_v27  ;;  %v15432_v1 = vpop.f32.mrf.mxu0 }
 0x671   : >> { %v8949_v32 = vpop.f32.mrf.mxu3  ;;  %v15434_v4 = vpop.f32.mrf.mxu1 }
 0x672   : >> { %v15438_v50 = vadd.f32 %v8949_v32, %v8874_v49  ;;  %v16769_v32 = vld [vmem:[#allocation41_spill] sm:$0xff] }
 0x673   : >> { %11285 = vmatmul.msk.f32.gmra.mxu0 %vm7758_vm0, %v15245_v57  ;;  %v8536_v20 = vadd.f32 %v15234_v36, %v16769_v32 }
 0x674   : >> { %16767 = vst [vmem:[#allocation25_spill] sm:$0xff] %v15438_v50  ;;  %11321 = vmatmul.msk.f32.gmra.mxu2 %vm7758_vm0, %v11645_v21  ;;  %11309 = vmatmul.msk.f32.gmra.mxu1 %vm7758_vm0, %v16768_v62  ;;  %v11648_v62 = vld [vmem:[%s14255_s14 + $0x118] sm:$0xff] }
 0x675   : >> { %v8657_v59 = vadd.f32 %v15236_v29, %v8536_v20  ;;  %v16774_v29 = vld [vmem:[#allocation27_spill] sm:$0xff] }
 0x676   : >> { %11345 = vmatmul.msk.f32.gmra.mxu3 %vm7758_vm0, %v11647_v14 }
 0x677   : >> { %v8831_v26 = vpop.f32.mrf.mxu2 }
 0x678   : >> { %v8875_v27 = vadd.f32 %v8831_v26, %v8656_v6  ;;  %v15448_v52 = vpop.f32.mrf.mxu0 }
 0x679   : >> { %v8952_v39 = vpop.f32.mrf.mxu3  ;;  %v15450_v49 = vpop.f32.mrf.mxu1 }
 0x67a   : >> { %v15454_v21 = vadd.f32 %v8952_v39, %v8875_v27  ;;  %v16772_v39 = vld [vmem:[#allocation42_spill] sm:$0xff] }
 0x67b   : >> { %11286 = vmatmul.msk.f32.gmra.mxu0 %vm7758_vm0, %v15265_v8  ;;  %v8537_v32 = vadd.f32 %v15254_v22, %v16772_v39 }
 0x67c   : >> { %16770 = vst [vmem:[#allocation14_spill] sm:$0xff] %v15454_v21  ;;  %11322 = vmatmul.msk.f32.gmra.mxu2 %vm7758_vm0, %v11646_v58  ;;  %11310 = vmatmul.msk.f32.gmra.mxu1 %vm7758_vm0, %v16771_v54  ;;  %v11649_v54 = vld [vmem:[%s14255_s14 + $0x120] sm:$0xff] }
 0x67d   : >> { %v8658_v20 = vadd.f32 %v15256_v18, %v8537_v32  ;;  %v16777_v18 = vld [vmem:[#allocation28_spill] sm:$0xff] }
 0x67e   : >> { %11346 = vmatmul.msk.f32.gmra.mxu3 %vm7758_vm0, %v11648_v62 }
 0x67f   : >> { %v8834_v6 = vpop.f32.mrf.mxu2 }
 0x680   : >> { %v8876_v26 = vadd.f32 %v8834_v6, %v8657_v59  ;;  %v15464_v50 = vpop.f32.mrf.mxu0 }
 0x681   : >> { %v8955_v36 = vpop.f32.mrf.mxu3  ;;  %v15466_v27 = vpop.f32.mrf.mxu1 }
 0x682   : >> { %v15470_v58 = vadd.f32 %v8955_v36, %v8876_v26  ;;  %v16775_v36 = vld [vmem:[#allocation44_spill] sm:$0xff] }
 0x683   : >> { %11287 = vmatmul.msk.f32.gmra.mxu0 %vm7758_vm0, %v15285_v60  ;;  %v8538_v39 = vadd.f32 %v15274_v30, %v16775_v36  ;;  %v16778_v36 = vld [vmem:[#allocation46_spill] sm:$0xff] }
 0x684   : >> { %16773 = vst [vmem:[#allocation15_spill] sm:$0xff] %v15470_v58  ;;  %11323 = vmatmul.msk.f32.gmra.mxu2 %vm7758_vm0, %v11647_v14  ;;  %11311 = vmatmul.msk.f32.gmra.mxu1 %vm7758_vm0, %v16774_v29  ;;  %v11650_v29 = vld [vmem:[%s14255_s14 + $0x128] sm:$0xff] }
 0x685   : >> { %v8659_v32 = vadd.f32 %v15276_v61, %v8538_v39  ;;  %v16780_v61 = vld [vmem:[#allocation29_spill] sm:$0xff] }
 0x686   : >> { %11347 = vmatmul.msk.f32.gmra.mxu3 %vm7758_vm0, %v11649_v54 }
 0x687   : >> { %v8837_v59 = vpop.f32.mrf.mxu2 }
 0x688   : >> { %v8877_v6 = vadd.f32 %v8837_v59, %v8658_v20  ;;  %v15480_v21 = vpop.f32.mrf.mxu0 }
 0x689   : >> { %v8958_v22 = vpop.f32.mrf.mxu3  ;;  %v15482_v26 = vpop.f32.mrf.mxu1 }
 0x68a   : >> { %v15486_v14 = vadd.f32 %v8958_v22, %v8877_v6 }
 0x68b   : >> { %11288 = vmatmul.msk.f32.gmra.mxu0 %vm7758_vm0, %v15305_v55 }
 0x68c   : >> { %16776 = vst [vmem:[#allocation37_spill] sm:$0xff] %v15486_v14  ;;  %11324 = vmatmul.msk.f32.gmra.mxu2 %vm7758_vm0, %v11648_v62  ;;  %11312 = vmatmul.msk.f32.gmra.mxu1 %vm7758_vm0, %v16777_v18  ;;  %v8539_v62 = vadd.f32 %v15294_v46, %v16778_v36  ;;  %v11651_v18 = vld [vmem:[%s14255_s14 + $0x130] sm:$0xff]  ;;  %v15515_v46 = vld [vmem:[%s14255_s14 + $0x268] sm:$0xff] }
 0x68d   : >> { %v16782_v36 = vld [vmem:[#allocation47_spill] sm:$0xff] }
 0x68e   : >> { %11348 = vmatmul.msk.f32.gmra.mxu3 %vm7758_vm0, %v11650_v29  ;;  %v8660_v39 = vadd.f32 %v15296_v35, %v8539_v62  ;;  %v16784_v35 = vld [vmem:[#allocation43_spill] sm:$0xff] }
 0x68f   : >> { %v8840_v20 = vpop.f32.mrf.mxu2 }
 0x690   : >> { %v8878_v59 = vadd.f32 %v8840_v20, %v8659_v32  ;;  %v15496_v30 = vpop.f32.mrf.mxu0 }
 0x691   : >> { %v8961_v6 = vpop.f32.mrf.mxu3  ;;  %v15498_v22 = vpop.f32.mrf.mxu1 }
 0x692   : >> { %v15502_v14 = vadd.f32 %v8961_v6, %v8878_v59 }
 0x693   : >> { %11289 = vmatmul.msk.f32.gmra.mxu0 %vm7758_vm0, %v15325_v38 }
 0x694   : >> { %16779 = vst [vmem:[#allocation22_spill] sm:$0xff] %v15502_v14  ;;  %11325 = vmatmul.msk.f32.gmra.mxu2 %vm7758_vm0, %v11649_v54  ;;  %11313 = vmatmul.msk.f32.gmra.mxu1 %vm7758_vm0, %v16780_v61  ;;  %v8540_v54 = vadd.f32 %v15314_v53, %v16782_v36  ;;  %v11652_v61 = vld [vmem:[%s14255_s14 + $0x138] sm:$0xff] }
 0x696   : >> { %11349 = vmatmul.msk.f32.gmra.mxu3 %vm7758_vm0, %v11651_v18  ;;  %v8661_v62 = vadd.f32 %v15316_v44, %v8540_v54  ;;  %v16789_v44 = vld [vmem:[#allocation31_spill] sm:$0xff] }
 0x697   : >> { %v8843_v32 = vpop.f32.mrf.mxu2 }
 0x698   : >> { %v8879_v20 = vadd.f32 %v8843_v32, %v8660_v39  ;;  %v15512_v58 = vpop.f32.mrf.mxu0 }
 0x699   : >> { %16781 = vst [vmem:[#allocation39_spill] sm:$0xff] %v15512_v58  ;;  %v8964_v59 = vpop.f32.mrf.mxu3  ;;  %v15517_v6 = vpop.f32.mrf.mxu1 }
 0x69a   : >> { %v15521_v14 = vadd.f32 %v8964_v59, %v8879_v20  ;;  %v16786_v59 = vld [vmem:[#allocation16_spill] sm:$0xff] }
 0x69b   : >> { %11290 = vmatmul.msk.f32.gmra.mxu0 %vm7758_vm0, %v15515_v46  ;;  %v8541_v36 = vadd.f32 %v15334_v16, %v16786_v59 }
 0x69c   : >> { %16783 = vst [vmem:[#allocation24_spill] sm:$0xff] %v15521_v14  ;;  %11326 = vmatmul.msk.f32.gmra.mxu2 %vm7758_vm0, %v11650_v29  ;;  %11314 = vmatmul.msk.f32.gmra.mxu1 %vm7758_vm0, %v16784_v35  ;;  %v16788_v14 = vld [vmem:[#allocation30_spill] sm:$0xff] }
 0x69d   : >> { %v8662_v54 = vadd.f32 %v15336_v63, %v8541_v36  ;;  %v16793_v63 = vld [vmem:[#allocation32_spill] sm:$0xff]  ;;  %v11654_v36 = vld [vmem:[%s14255_s14 + $0x148] sm:$0xff] }
 0x69e   : >> { %11350 = vmatmul.msk.f32.gmra.mxu3 %vm7758_vm0, %v11652_v61 }
 0x69f   : >> { %v8846_v39 = vpop.f32.mrf.mxu2 }
 0x6a0   : >> { %v8880_v32 = vadd.f32 %v8846_v39, %v8661_v62  ;;  %v15531_v23 = vpop.f32.mrf.mxu0  ;;  %v11653_v62 = vld [vmem:[%s14255_s14 + $0x140] sm:$0xff] }
 0x6a1   : >> { %16785 = vst [vmem:[#allocation41_spill] sm:$0xff] %v15531_v23  ;;  %v8967_v53 = vpop.f32.mrf.mxu3  ;;  %v15533_v20 = vpop.f32.mrf.mxu1 }
 0x6a2   : >> { %v15537_v29 = vadd.f32 %v8967_v53, %v8880_v32  ;;  %v16791_v53 = vld [vmem:[#allocation8_spill] sm:$0xff] }
 0x6a3   : >> { %11363 = vmatmul.msk.f32.vlgmr.msrb.gmra.mxu0 %vm7758_vm0, %v16788_v14  ;;  %v8542_v14 = vadd.f32 %v15351_v31, %v16791_v53 }
 0x6a4   : >> { %16787 = vst [vmem:[#allocation26_spill] sm:$0xff] %v15537_v29  ;;  %11327 = vmatmul.msk.f32.gmra.mxu2 %vm7758_vm0, %v11651_v18  ;;  %11387 = vmatmul.msk.f32.vlgmr.msrb.gmra.mxu1 %vm7758_vm0, %v16789_v44 }
 0x6a5   : >> { %v8663_v59 = vadd.f32 %v15353_v41, %v8542_v14  ;;  %v16797_v41 = vld [vmem:[#allocation33_spill] sm:$0xff]  ;;  %v11655_v14 = vld [vmem:[%s14255_s14 + $0x150] sm:$0xff] }
 0x6a6   : >> { %11351 = vmatmul.msk.f32.gmra.mxu3 %vm7758_vm0, %v11653_v62 }
 0x6a7   : >> { %v8849_v39 = vpop.f32.mrf.mxu2 }
 0x6a8   : >> { %v8881_v43 = vadd.f32 %v8849_v39, %v8662_v54  ;;  %v15547_v56 = vpop.f32.mrf.mxu0 }
 0x6a9   : >> { %16790 = vst [vmem:[#allocation42_spill] sm:$0xff] %v15547_v56  ;;  %v8970_v16 = vpop.f32.mrf.mxu3  ;;  %v15549_v32 = vpop.f32.mrf.mxu1 }
 0x6aa   : >> { %v15553_v18 = vadd.f32 %v8970_v16, %v8881_v43  ;;  %v16795_v16 = vld [vmem:[#allocation17_spill] sm:$0xff] }
 0x6ab   : >> { %11364 = vmatmul.msk.f32.gmra.mxu0 %vm7758_vm0, %v16789_v44  ;;  %v8543_v44 = vadd.f32 %v15368_v19, %v16795_v16 }
 0x6ac   : >> { %16792 = vst [vmem:[#allocation27_spill] sm:$0xff] %v15553_v18  ;;  %11328 = vmatmul.msk.f32.gmra.mxu2 %vm7758_vm0, %v11652_v61  ;;  %11388 = vmatmul.msk.f32.gmra.mxu1 %vm7758_vm0, %v16793_v63 }
 0x6ad   : >> { %v8664_v53 = vadd.f32 %v15370_v7, %v8543_v44  ;;  %v16801_v7 = vld [vmem:[#allocation34_spill] sm:$0xff]  ;;  %v11656_v44 = vld [vmem:[%s14255_s14 + $0x158] sm:$0xff] }
 0x6ae   : >> { %11352 = vmatmul.msk.f32.gmra.mxu3 %vm7758_vm0, %v11654_v36 }
 0x6af   : >> { %v8852_v54 = vpop.f32.mrf.mxu2 }
 0x6b0   : >> { %v8882_v39 = vadd.f32 %v8852_v54, %v8663_v59  ;;  %v15563_v29 = vpop.f32.mrf.mxu0 }
 0x6b1   : >> { %16794 = vst [vmem:[#allocation44_spill] sm:$0xff] %v15563_v29  ;;  %v8973_v31 = vpop.f32.mrf.mxu3  ;;  %v15565_v43 = vpop.f32.mrf.mxu1 }
 0x6b2   : >> { %v15569_v61 = vadd.f32 %v8973_v31, %v8882_v39  ;;  %v16799_v31 = vld [vmem:[#allocation9_spill] sm:$0xff] }
 0x6b3   : >> { %11365 = vmatmul.msk.f32.gmra.mxu0 %vm7758_vm0, %v16793_v63  ;;  %v8544_v63 = vadd.f32 %v15384_v37, %v16799_v31 }
 0x6b4   : >> { %16796 = vst [vmem:[#allocation28_spill] sm:$0xff] %v15569_v61  ;;  %11329 = vmatmul.msk.f32.gmra.mxu2 %vm7758_vm0, %v11653_v62  ;;  %11389 = vmatmul.msk.f32.gmra.mxu1 %vm7758_vm0, %v16797_v41 }
 0x6b5   : >> { %v8665_v16 = vadd.f32 %v15386_v15, %v8544_v63  ;;  %v11657_v15 = vld [vmem:[%s14255_s14 + $0x160] sm:$0xff] }
 0x6b6   : >> { %11353 = vmatmul.msk.f32.gmra.mxu3 %vm7758_vm0, %v11655_v14 }
 0x6b7   : >> { %v8855_v59 = vpop.f32.mrf.mxu2 }
 0x6b8   : >> { %v8883_v54 = vadd.f32 %v8855_v59, %v8664_v53  ;;  %v15579_v18 = vpop.f32.mrf.mxu0 }
 0x6b9   : >> { %16798 = vst [vmem:[#allocation46_spill] sm:$0xff] %v15579_v18  ;;  %v8976_v19 = vpop.f32.mrf.mxu3  ;;  %v15581_v39 = vpop.f32.mrf.mxu1  ;;  %v11668_v18 = vld [vmem:[%s14255_s14 + $0x1d8] sm:$0xff] }
 0x6ba   : >> { %v15585_v62 = vadd.f32 %v8976_v19, %v8883_v54 }
 0x6bb   : >> { %11366 = vmatmul.msk.f32.gmra.mxu0 %vm7758_vm0, %v16797_v41 }
 0x6bc   : >> { %16800 = vst [vmem:[#allocation29_spill] sm:$0xff] %v15585_v62  ;;  %11330 = vmatmul.msk.f32.gmra.mxu2 %vm7758_vm0, %v11654_v36  ;;  %11390 = vmatmul.msk.f32.gmra.mxu1 %vm7758_vm0, %v16801_v7  ;;  %v16804_v36 = vld [vmem:[#allocation35_spill] sm:$0xff] }
 0x6be   : >> { %11354 = vmatmul.msk.f32.gmra.mxu3 %vm7758_vm0, %v11656_v44 }
 0x6bf   : >> { %v8858_v53 = vpop.f32.mrf.mxu2 }
 0x6c0   : >> { %v8884_v59 = vadd.f32 %v8858_v53, %v8665_v16  ;;  %v15595_v61 = vpop.f32.mrf.mxu0 }
 0x6c1   : >> { %16802 = vst [vmem:[#allocation47_spill] sm:$0xff] %v15595_v61  ;;  %v8979_v37 = vpop.f32.mrf.mxu3  ;;  %v15597_v54 = vpop.f32.mrf.mxu1 }
 0x6c2   : >> { %v15599_v19 = vadd.f32 %v8979_v37, %v8884_v59 }
 0x6c3   : >> { %11367 = vmatmul.msk.f32.gmra.mxu0 %vm7758_vm0, %v16801_v7  ;;  %v11658_v7 = vld [vmem:[%s14255_s14 + $0x168] sm:$0xff] }
 0x6c4   : >> { %16803 = vst [vmem:[#allocation43_spill] sm:$0xff] %v15599_v19  ;;  %11331 = vmatmul.msk.f32.gmra.mxu2 %vm7758_vm0, %v11655_v14  ;;  %11391 = vmatmul.msk.f32.gmra.mxu1 %vm7758_vm0, %v16804_v36  ;;  %v16806_v14 = vld [vmem:[#allocation36_spill] sm:$0xff] }
 0x6c6   : >> { %11355 = vmatmul.msk.f32.gmra.mxu3 %vm7758_vm0, %v11657_v15 }
 0x6c7   : >> { %v9285_v41 = vpop.f32.mrf.mxu2 }
 0x6c8   : >> { %v9286_v31 = vadd.f32 %v9285_v41, %v15402_v33  ;;  %v15609_v63 = vpop.f32.mrf.mxu0 }
 0x6c9   : >> { %16805 = vst [vmem:[#allocation16_spill] sm:$0xff] %v15609_v63  ;;  %v9374_v16 = vpop.f32.mrf.mxu3  ;;  %v15611_v53 = vpop.f32.mrf.mxu1 }
 0x6ca   : >> { %v15613_v59 = vadd.f32 %v9374_v16, %v9286_v31 }
 0x6cb   : >> { %11368 = vmatmul.msk.f32.gmra.mxu0 %vm7758_vm0, %v16804_v36  ;;  %v11659_v36 = vld [vmem:[%s14255_s14 + $0x170] sm:$0xff] }
 0x6cc   : >> { %11332 = vmatmul.msk.f32.gmra.mxu2 %vm7758_vm0, %v11656_v44  ;;  %11392 = vmatmul.msk.f32.gmra.mxu1 %vm7758_vm0, %v16806_v14  ;;  %v16808_v44 = vld [vmem:[#allocation38_spill] sm:$0xff] }
 0x6ce   : >> { %11356 = vmatmul.msk.f32.gmra.mxu3 %vm7758_vm0, %v11658_v7 }
 0x6cf   : >> { %v9288_v33 = vpop.f32.mrf.mxu2 }
 0x6d0   : >> { %v9289_v37 = vadd.f32 %v9288_v33, %v15418_v3  ;;  %v15623_v41 = vpop.f32.mrf.mxu0 }
 0x6d1   : >> { %16807 = vst [vmem:[#allocation30_spill] sm:$0xff] %v15623_v41  ;;  %v9377_v19 = vpop.f32.mrf.mxu3  ;;  %v15625_v62 = vpop.f32.mrf.mxu1 }
 0x6d2   : >> { %v15627_v31 = vadd.f32 %v9377_v19, %v9289_v37 }
 0x6d3   : >> { %11369 = vmatmul.msk.f32.gmra.mxu0 %vm7758_vm0, %v16806_v14  ;;  %v11660_v14 = vld [vmem:[%s14255_s14 + $0x178] sm:$0xff] }
 0x6d4   : >> { %11333 = vmatmul.msk.f32.gmra.mxu2 %vm7758_vm0, %v11657_v15  ;;  %11393 = vmatmul.msk.f32.gmra.mxu1 %vm7758_vm0, %v16808_v44  ;;  %v16810_v15 = vld [vmem:[#allocation40_spill] sm:$0xff] }
 0x6d6   : >> { %11357 = vmatmul.msk.f32.gmra.mxu3 %vm7758_vm0, %v11659_v36 }
 0x6d7   : >> { %v9291_v3 = vpop.f32.mrf.mxu2 }
 0x6d8   : >> { %v9292_v16 = vadd.f32 %v9291_v3, %v15434_v4  ;;  %v15637_v33 = vpop.f32.mrf.mxu0 }
 0x6d9   : >> { %16809 = vst [vmem:[#allocation31_spill] sm:$0xff] %v15637_v33  ;;  %v9380_v41 = vpop.f32.mrf.mxu3  ;;  %v15639_v63 = vpop.f32.mrf.mxu1 }
 0x6da   : >> { %v15641_v19 = vadd.f32 %v9380_v41, %v9292_v16 }
 0x6db   : >> { %11370 = vmatmul.msk.f32.gmra.mxu0 %vm7758_vm0, %v16808_v44 }
 0x6dc   : >> { %11334 = vmatmul.msk.f32.gmra.mxu2 %vm7758_vm0, %v11658_v7  ;;  %11394 = vmatmul.msk.f32.gmra.mxu1 %vm7758_vm0, %v16810_v15  ;;  %v11661_v7 = vld [vmem:[%s14255_s14 + $0x180] sm:$0xff] }
 0x6de   : >> { %11358 = vmatmul.msk.f32.gmra.mxu3 %vm7758_vm0, %v11660_v14 }
 0x6df   : >> { %v9294_v4 = vpop.f32.mrf.mxu2 }
 0x6e0   : >> { %v9295_v37 = vadd.f32 %v9294_v4, %v15450_v49  ;;  %v15651_v3 = vpop.f32.mrf.mxu0 }
 0x6e1   : >> { %16811 = vst [vmem:[#allocation8_spill] sm:$0xff] %v15651_v3  ;;  %v9383_v33 = vpop.f32.mrf.mxu3  ;;  %v15653_v61 = vpop.f32.mrf.mxu1 }
 0x6e2   : >> { %v15655_v41 = vadd.f32 %v9383_v33, %v9295_v37 }
 0x6e3   : >> { %11371 = vmatmul.msk.f32.gmra.mxu0 %vm7758_vm0, %v16810_v15 }
 0x6e4   : >> { %11335 = vmatmul.msk.f32.gmra.mxu2 %vm7758_vm0, %v11659_v36  ;;  %11395 = vmatmul.msk.f32.gmra.mxu1 %vm7758_vm0, %v15023_v25  ;;  %v11662_v36 = vld [vmem:[%s14255_s14 + $0x188] sm:$0xff] }
 0x6e6   : >> { %11359 = vmatmul.msk.f32.gmra.mxu3 %vm7758_vm0, %v11661_v7 }
 0x6e7   : >> { %v9297_v49 = vpop.f32.mrf.mxu2 }
 0x6e8   : >> { %v9298_v44 = vadd.f32 %v9297_v49, %v15466_v27  ;;  %v15665_v16 = vpop.f32.mrf.mxu0 }
 0x6e9   : >> { %16812 = vst [vmem:[#allocation32_spill] sm:$0xff] %v15665_v16  ;;  %v9386_v4 = vpop.f32.mrf.mxu3  ;;  %v15667_v3 = vpop.f32.mrf.mxu1 }
 0x6ea   : >> { %v15669_v33 = vadd.f32 %v9386_v4, %v9298_v44 }
 0x6eb   : >> { %11372 = vmatmul.msk.f32.gmra.mxu0 %vm7758_vm0, %v15023_v25 }
 0x6ec   : >> { %11336 = vmatmul.msk.f32.gmra.mxu2 %vm7758_vm0, %v11660_v14  ;;  %11396 = vmatmul.msk.f32.gmra.mxu1 %vm7758_vm0, %v15042_v24 }
 0x6ee   : >> { %11360 = vmatmul.msk.f32.gmra.mxu3 %vm7758_vm0, %v11662_v36 }
 0x6ef   : >> { %v9300_v15 = vpop.f32.mrf.mxu2 }
 0x6f0   : >> { %v9301_v27 = vadd.f32 %v9300_v15, %v15482_v26  ;;  %v15679_v37 = vpop.f32.mrf.mxu0 }
 0x6f1   : >> { %16813 = vst [vmem:[#allocation17_spill] sm:$0xff] %v15679_v37  ;;  %v9389_v49 = vpop.f32.mrf.mxu3  ;;  %v15681_v16 = vpop.f32.mrf.mxu1 }
 0x6f2   : >> { %v15683_v44 = vadd.f32 %v9389_v49, %v9301_v27 }
 0x6f3   : >> { %11373 = vmatmul.msk.f32.gmra.mxu0 %vm7758_vm0, %v15042_v24  ;;  %v16815_v24 = vld [vmem:[#allocation45_spill] sm:$0xff] }
 0x6f4   : >> { %11337 = vmatmul.msk.f32.gmra.mxu2 %vm7758_vm0, %v11661_v7  ;;  %11397 = vmatmul.msk.f32.gmra.mxu1 %vm7758_vm0, %v15064_v51 }
 0x6f6   : >> { %11361 = vmatmul.msk.f32.gmra.mxu3 %vm7758_vm0, %v16784_v35 }
 0x6f7   : >> { %v9303_v25 = vpop.f32.mrf.mxu2 }
 0x6f8   : >> { %v9304_v26 = vadd.f32 %v9303_v25, %v15498_v22  ;;  %v15693_v14 = vpop.f32.mrf.mxu0 }
 0x6f9   : >> { %16814 = vst [vmem:[#allocation33_spill] sm:$0xff] %v15693_v14  ;;  %v9392_v4 = vpop.f32.mrf.mxu3  ;;  %v15695_v15 = vpop.f32.mrf.mxu1  ;;  %v11667_v14 = vld [vmem:[%s14255_s14 + $0x1d0] sm:$0xff] }
 0x6fa   : >> { %v15697_v27 = vadd.f32 %v9392_v4, %v9304_v26 }
 0x6fb   : >> { %11374 = vmatmul.msk.f32.gmra.mxu0 %vm7758_vm0, %v15064_v51  ;;  %v11437_v51 = vld [vmem:[%s14255_s14 + $0x270] sm:$0xff] }
 0x6fc   : >> { %11338 = vmatmul.msk.f32.gmra.mxu2 %vm7758_vm0, %v11662_v36  ;;  %11398 = vmatmul.msk.f32.gmra.mxu1 %vm7758_vm0, %v15085_v10  ;;  %v11663_v36 = vld [vmem:[%s14255_s14 + $0x1b0] sm:$0xff] }
 0x6fe   : >> { %11362 = vmatmul.msk.f32.gmra.mxu3 %vm7758_vm0, %v16815_v24 }
 0x6ff   : >> { %v9306_v22 = vpop.f32.mrf.mxu2 }
 0x700   : >> { %v9307_v35 = vadd.f32 %v9306_v22, %v15517_v6  ;;  %v15707_v7 = vpop.f32.mrf.mxu0 }
 0x701   : >> { %16816 = vst [vmem:[#allocation9_spill] sm:$0xff] %v15707_v7  ;;  %v9395_v49 = vpop.f32.mrf.mxu3  ;;  %v15709_v25 = vpop.f32.mrf.mxu1  ;;  %v11666_v7 = vld [vmem:[%s14255_s14 + $0x1c8] sm:$0xff] }
 0x702   : >> { %v15711_v26 = vadd.f32 %v9395_v49, %v9307_v35  ;;  %v15731_v49 = vld [vmem:[%s14255_s14 + $0x278] sm:$0xff] }
 0x703   : >> { %11375 = vmatmul.msk.f32.gmra.mxu0 %vm7758_vm0, %v15085_v10 }
 0x704   : >> { %11411 = vmatmul.msk.f32.vlgmr.msra.gmra.mxu2 %vm7758_vm0, %v11663_v36  ;;  %11399 = vmatmul.msk.f32.gmra.mxu1 %vm7758_vm0, %v15103_v17  ;;  %v11664_v36 = vld [vmem:[%s14255_s14 + $0x1b8] sm:$0xff] }
 0x706   : >> { %11463 = vmatmul.msk.f32.vlgmr.msra.gmra.mxu3 %vm7758_vm0, %v11437_v51 }
 0x707   : >> { %v9309_v6 = vpop.f32.mrf.mxu2 }
 0x708   : >> { %v9310_v4 = vadd.f32 %v9309_v6, %v15533_v20  ;;  %v15722_v24 = vpop.f32.mrf.mxu0 }
 0x709   : >> { %16817 = vst [vmem:[#allocation34_spill] sm:$0xff] %v15722_v24  ;;  %v9398_v22 = vpop.f32.mrf.mxu3  ;;  %v15724_v35 = vpop.f32.mrf.mxu1  ;;  %v11665_v24 = vld [vmem:[%s14255_s14 + $0x1c0] sm:$0xff] }
 0x70a   : >> { %v15726_v10 = vadd.f32 %v9398_v22, %v9310_v4 }
 0x70b   : >> { %11376 = vmatmul.msk.f32.gmra.mxu0 %vm7758_vm0, %v15103_v17 }
 0x70c   : >> { %11412 = vmatmul.msk.f32.gmra.mxu2 %vm7758_vm0, %v11664_v36  ;;  %11400 = vmatmul.msk.f32.gmra.mxu1 %vm7758_vm0, %v15127_v13  ;;  %v15749_v36 = vld [vmem:[%s14255_s14 + $0x280] sm:$0xff] }
 0x70e   : >> { %11464 = vmatmul.msk.f32.gmra.mxu3 %vm7758_vm0, %v15731_v49 }
 0x70f   : >> { %v9312_v20 = vpop.f32.mrf.mxu2 }
 0x710   : >> { %v9313_v51 = vadd.f32 %v9312_v20, %v15549_v32  ;;  %v15740_v6 = vpop.f32.mrf.mxu0 }
 0x711   : >> { %16818 = vst [vmem:[#allocation35_spill] sm:$0xff] %v15740_v6  ;;  %v9401_v4 = vpop.f32.mrf.mxu3  ;;  %v15742_v22 = vpop.f32.mrf.mxu1 }
 0x712   : >> { %v15744_v17 = vadd.f32 %v9401_v4, %v9313_v51 }
 0x713   : >> { %11377 = vmatmul.msk.f32.gmra.mxu0 %vm7758_vm0, %v15127_v13 }
 0x714   : >> { %16819 = vst [vmem:[#allocation36_spill] sm:$0xff] %v15744_v17  ;;  %11413 = vmatmul.msk.f32.gmra.mxu2 %vm7758_vm0, %v11665_v24  ;;  %11401 = vmatmul.msk.f32.gmra.mxu1 %vm7758_vm0, %v15147_v5  ;;  %v15767_v24 = vld [vmem:[%s14255_s14 + $0x288] sm:$0xff] }
 0x716   : >> { %11465 = vmatmul.msk.f32.gmra.mxu3 %vm7758_vm0, %v15749_v36 }
 0x717   : >> { %v9315_v32 = vpop.f32.mrf.mxu2 }
 0x718   : >> { %v9316_v20 = vadd.f32 %v9315_v32, %v15565_v43  ;;  %v15758_v6 = vpop.f32.mrf.mxu0 }
 0x719   : >> { %16820 = vst [vmem:[#allocation38_spill] sm:$0xff] %v15758_v6  ;;  %v9404_v51 = vpop.f32.mrf.mxu3  ;;  %v15760_v4 = vpop.f32.mrf.mxu1 }
 0x71a   : >> { %v15762_v13 = vadd.f32 %v9404_v51, %v9316_v20 }
 0x71b   : >> { %11378 = vmatmul.msk.f32.gmra.mxu0 %vm7758_vm0, %v15147_v5 }
 0x71c   : >> { %16821 = vst [vmem:[#allocation40_spill] sm:$0xff] %v15762_v13  ;;  %11414 = vmatmul.msk.f32.gmra.mxu2 %vm7758_vm0, %v11666_v7  ;;  %11402 = vmatmul.msk.f32.gmra.mxu1 %vm7758_vm0, %v15165_v40  ;;  %v15785_v7 = vld [vmem:[%s14255_s14 + $0x290] sm:$0xff] }
 0x71e   : >> { %11466 = vmatmul.msk.f32.gmra.mxu3 %vm7758_vm0, %v15767_v24 }
 0x71f   : >> { %v9318_v43 = vpop.f32.mrf.mxu2 }
 0x720   : >> { %v9319_v32 = vadd.f32 %v9318_v43, %v15581_v39  ;;  %v15776_v6 = vpop.f32.mrf.mxu0 }
 0x721   : >> { %v9407_v20 = vpop.f32.mrf.mxu3  ;;  %v15778_v51 = vpop.f32.mrf.mxu1 }
 0x722   : >> { %v15780_v5 = vadd.f32 %v9407_v20, %v9319_v32 }
 0x723   : >> { %11379 = vmatmul.msk.f32.gmra.mxu0 %vm7758_vm0, %v15165_v40 }
 0x724   : >> { %16822 = vst [vmem:[#allocation45_spill] sm:$0xff] %v15780_v5  ;;  %11415 = vmatmul.msk.f32.gmra.mxu2 %vm7758_vm0, %v11667_v14  ;;  %11403 = vmatmul.msk.f32.gmra.mxu1 %vm7758_vm0, %v15185_v9  ;;  %v15803_v14 = vld [vmem:[%s14255_s14 + $0x298] sm:$0xff] }
 0x726   : >> { %11467 = vmatmul.msk.f32.gmra.mxu3 %vm7758_vm0, %v15785_v7 }
 0x727   : >> { %v9321_v39 = vpop.f32.mrf.mxu2 }
 0x728   : >> { %v9322_v43 = vadd.f32 %v9321_v39, %v15597_v54  ;;  %v15794_v37 = vpop.f32.mrf.mxu0 }
 0x729   : >> { %v9410_v32 = vpop.f32.mrf.mxu3  ;;  %v15796_v20 = vpop.f32.mrf.mxu1 }
 0x72a   : >> { %v15798_v40 = vadd.f32 %v9410_v32, %v9322_v43 }
 0x72b   : >> { %11380 = vmatmul.msk.f32.gmra.mxu0 %vm7758_vm0, %v15185_v9 }
 0x72c   : >> { %16823 = vst [vmem:[#allocation48_spill] sm:$0xff] %v15798_v40  ;;  %11416 = vmatmul.msk.f32.gmra.mxu2 %vm7758_vm0, %v11668_v18  ;;  %11404 = vmatmul.msk.f32.gmra.mxu1 %vm7758_vm0, %v15205_v28  ;;  %v15821_v18 = vld [vmem:[%s14255_s14 + $0x2a0] sm:$0xff] }
 0x72d   : >> { %v11669_v40 = vld [vmem:[%s14255_s14 + $0x1e0] sm:$0xff] }
 0x72e   : >> { %11468 = vmatmul.msk.f32.gmra.mxu3 %vm7758_vm0, %v15803_v14 }
 0x72f   : >> { %v9324_v54 = vpop.f32.mrf.mxu2 }
 0x730   : >> { %v9325_v39 = vadd.f32 %v9324_v54, %v15611_v53  ;;  %v15812_v29 = vpop.f32.mrf.mxu0 }
 0x731   : >> { %v9413_v43 = vpop.f32.mrf.mxu3  ;;  %v15814_v32 = vpop.f32.mrf.mxu1 }
 0x732   : >> { %v15816_v9 = vadd.f32 %v9413_v43, %v9325_v39 }
 0x733   : >> { %11381 = vmatmul.msk.f32.gmra.mxu0 %vm7758_vm0, %v15205_v28 }
 0x734   : >> { %16824 = vst [vmem:[#allocation49_spill] sm:$0xff] %v15816_v9  ;;  %11417 = vmatmul.msk.f32.gmra.mxu2 %vm7758_vm0, %v11669_v40  ;;  %11405 = vmatmul.msk.f32.gmra.mxu1 %vm7758_vm0, %v15225_v45  ;;  %v15839_v40 = vld [vmem:[%s14255_s14 + $0x2a8] sm:$0xff] }
 0x735   : >> { %v11670_v9 = vld [vmem:[%s14255_s14 + $0x1e8] sm:$0xff] }
 0x736   : >> { %11469 = vmatmul.msk.f32.gmra.mxu3 %vm7758_vm0, %v15821_v18 }
 0x737   : >> { %v9327_v53 = vpop.f32.mrf.mxu2 }
 0x738   : >> { %v9328_v54 = vadd.f32 %v9327_v53, %v15625_v62  ;;  %v15830_v5 = vpop.f32.mrf.mxu0 }
 0x739   : >> { %v9416_v39 = vpop.f32.mrf.mxu3  ;;  %v15832_v43 = vpop.f32.mrf.mxu1 }
 0x73a   : >> { %v15834_v28 = vadd.f32 %v9416_v39, %v9328_v54 }
 0x73b   : >> { %11382 = vmatmul.msk.f32.gmra.mxu0 %vm7758_vm0, %v15225_v45 }
 0x73c   : >> { %16825 = vst [vmem:[#allocation50_spill] sm:$0xff] %v15834_v28  ;;  %11418 = vmatmul.msk.f32.gmra.mxu2 %vm7758_vm0, %v11670_v9  ;;  %11406 = vmatmul.msk.f32.gmra.mxu1 %vm7758_vm0, %v15245_v57  ;;  %v15857_v9 = vld [vmem:[%s14255_s14 + $0x2b0] sm:$0xff] }
 0x73d   : >> { %v11671_v28 = vld [vmem:[%s14255_s14 + $0x1f0] sm:$0xff] }
 0x73e   : >> { %11470 = vmatmul.msk.f32.gmra.mxu3 %vm7758_vm0, %v15839_v40 }
 0x73f   : >> { %v9330_v62 = vpop.f32.mrf.mxu2 }
 0x740   : >> { %v9331_v53 = vadd.f32 %v9330_v62, %v15639_v63  ;;  %v15848_v56 = vpop.f32.mrf.mxu0 }
 0x741   : >> { %v9419_v54 = vpop.f32.mrf.mxu3  ;;  %v15850_v39 = vpop.f32.mrf.mxu1 }
 0x742   : >> { %v15852_v45 = vadd.f32 %v9419_v54, %v9331_v53 }
 0x743   : >> { %11383 = vmatmul.msk.f32.gmra.mxu0 %vm7758_vm0, %v15245_v57 }
 0x744   : >> { %16826 = vst [vmem:[#allocation51_spill] sm:$0xff] %v15852_v45  ;;  %11419 = vmatmul.msk.f32.gmra.mxu2 %vm7758_vm0, %v11671_v28  ;;  %11407 = vmatmul.msk.f32.gmra.mxu1 %vm7758_vm0, %v15265_v8  ;;  %v15875_v28 = vld [vmem:[%s14255_s14 + $0x2b8] sm:$0xff] }
 0x745   : >> { %v11672_v45 = vld [vmem:[%s14255_s14 + $0x1f8] sm:$0xff] }
 0x746   : >> { %11471 = vmatmul.msk.f32.gmra.mxu3 %vm7758_vm0, %v15857_v9 }
 0x747   : >> { %v9333_v63 = vpop.f32.mrf.mxu2 }
 0x748   : >> { %v9334_v62 = vadd.f32 %v9333_v63, %v15653_v61  ;;  %v15866_v2 = vpop.f32.mrf.mxu0 }
 0x749   : >> { %v9422_v53 = vpop.f32.mrf.mxu3  ;;  %v15868_v54 = vpop.f32.mrf.mxu1 }
 0x74a   : >> { %v15870_v57 = vadd.f32 %v9422_v53, %v9334_v62 }
 0x74b   : >> { %11384 = vmatmul.msk.f32.gmra.mxu0 %vm7758_vm0, %v15265_v8 }
 0x74c   : >> { %16827 = vst [vmem:[#allocation52_spill] sm:$0xff] %v15870_v57  ;;  %11420 = vmatmul.msk.f32.gmra.mxu2 %vm7758_vm0, %v11672_v45  ;;  %11408 = vmatmul.msk.f32.gmra.mxu1 %vm7758_vm0, %v15285_v60  ;;  %v15893_v45 = vld [vmem:[%s14255_s14 + $0x2c0] sm:$0xff] }
 0x74d   : >> { %v11673_v57 = vld [vmem:[%s14255_s14 + $0x200] sm:$0xff] }
 0x74e   : >> { %11472 = vmatmul.msk.f32.gmra.mxu3 %vm7758_vm0, %v15875_v28 }
 0x74f   : >> { %v9336_v61 = vpop.f32.mrf.mxu2 }
 0x750   : >> { %v9337_v63 = vadd.f32 %v9336_v61, %v15667_v3  ;;  %v15884_v13 = vpop.f32.mrf.mxu0 }
 0x751   : >> { %v9425_v62 = vpop.f32.mrf.mxu3  ;;  %v15886_v53 = vpop.f32.mrf.mxu1 }
 0x752   : >> { %v15888_v8 = vadd.f32 %v9425_v62, %v9337_v63 }
 0x753   : >> { %11385 = vmatmul.msk.f32.gmra.mxu0 %vm7758_vm0, %v15285_v60 }
 0x754   : >> { %16828 = vst [vmem:[#allocation53_spill] sm:$0xff] %v15888_v8  ;;  %11421 = vmatmul.msk.f32.gmra.mxu2 %vm7758_vm0, %v11673_v57  ;;  %11409 = vmatmul.msk.f32.gmra.mxu1 %vm7758_vm0, %v15305_v55  ;;  %v15911_v57 = vld [vmem:[%s14255_s14 + $0x2c8] sm:$0xff] }
 0x755   : >> { %v11674_v8 = vld [vmem:[%s14255_s14 + $0x208] sm:$0xff] }
 0x756   : >> { %11473 = vmatmul.msk.f32.gmra.mxu3 %vm7758_vm0, %v15893_v45 }
 0x757   : >> { %v9339_v3 = vpop.f32.mrf.mxu2 }
 0x758   : >> { %v9340_v61 = vadd.f32 %v9339_v3, %v15681_v16  ;;  %v15902_v23 = vpop.f32.mrf.mxu0 }
 0x759   : >> { %v9428_v63 = vpop.f32.mrf.mxu3  ;;  %v15904_v62 = vpop.f32.mrf.mxu1 }
 0x75a   : >> { %v15906_v60 = vadd.f32 %v9428_v63, %v9340_v61 }
 0x75b   : >> { %11386 = vmatmul.msk.f32.gmra.mxu0 %vm7758_vm0, %v15305_v55 }
 0x75c   : >> { %16829 = vst [vmem:[#allocation54_spill] sm:$0xff] %v15906_v60  ;;  %11422 = vmatmul.msk.f32.gmra.mxu2 %vm7758_vm0, %v11674_v8  ;;  %11410 = vmatmul.msk.f32.gmra.mxu1 %vm7758_vm0, %v15325_v38  ;;  %v15929_v8 = vld [vmem:[%s14255_s14 + $0x2d0] sm:$0xff] }
 0x75d   : >> { %v11675_v38 = vld [vmem:[%s14255_s14 + $0x210] sm:$0xff] }
 0x75e   : >> { %11474 = vmatmul.msk.f32.gmra.mxu3 %vm7758_vm0, %v15911_v57 }
 0x75f   : >> { %v9342_v16 = vpop.f32.mrf.mxu2 }
 0x760   : >> { %v9343_v3 = vadd.f32 %v9342_v16, %v15695_v15  ;;  %v15920_v11 = vpop.f32.mrf.mxu0 }
 0x761   : >> { %v9431_v61 = vpop.f32.mrf.mxu3  ;;  %v15922_v63 = vpop.f32.mrf.mxu1 }
 0x762   : >> { %16830 = vst [vmem:[#allocation55_spill] sm:$0xff] %v15922_v63  ;;  %v15924_v55 = vadd.f32 %v9431_v61, %v9343_v3 }
 0x763   : >> { %11487 = vmatmul.msk.f32.vlgmr.msra.gmra.mxu0 %vm7758_vm0, %v15731_v49 }
 0x764   : >> { %16831 = vst [vmem:[#allocation56_spill] sm:$0xff] %v15924_v55  ;;  %11423 = vmatmul.msk.f32.gmra.mxu2 %vm7758_vm0, %v11675_v38  ;;  %11511 = vmatmul.msk.f32.vlgmr.msra.gmra.mxu1 %vm7758_vm0, %v15749_v36  ;;  %v15947_v38 = vld [vmem:[%s14255_s14 + $0x2d8] sm:$0xff] }
 0x765   : >> { %v11676_v55 = vld [vmem:[%s14255_s14 + $0x218] sm:$0xff] }
 0x766   : >> { %11475 = vmatmul.msk.f32.gmra.mxu3 %vm7758_vm0, %v15929_v8 }
 0x767   : >> { %v9345_v15 = vpop.f32.mrf.mxu2 }
 0x768   : >> { %v9346_v16 = vadd.f32 %v9345_v15, %v15709_v25  ;;  %v15938_v60 = vpop.f32.mrf.mxu0 }
 0x769   : >> { %16832 = vst [vmem:[#allocation57_spill] sm:$0xff] %v15938_v60  ;;  %v9434_v3 = vpop.f32.mrf.mxu3  ;;  %v15940_v61 = vpop.f32.mrf.mxu1  ;;  %v10343_v60 = vld [vmem:[%s16047_s26 + $0x10] sm:$0xff] }
 0x76a   : >> { %16833 = vst [vmem:[#allocation58_spill] sm:$0xff] %v15940_v61  ;;  %v15942_v49 = vadd.f32 %v9434_v3, %v9346_v16 }
 0x76b   : >> { %11488 = vmatmul.msk.f32.gmra.mxu0 %vm7758_vm0, %v15749_v36 }
 0x76c   : >> { %16834 = vst [vmem:[#allocation59_spill] sm:$0xff] %v15942_v49  ;;  %11424 = vmatmul.msk.f32.gmra.mxu2 %vm7758_vm0, %v11676_v55  ;;  %11512 = vmatmul.msk.f32.gmra.mxu1 %vm7758_vm0, %v15767_v24  ;;  %v15965_v55 = vld [vmem:[%s14255_s14 + $0x2e0] sm:$0xff] }
 0x76d   : >> { %v11677_v49 = vld [vmem:[%s14255_s14 + $0x220] sm:$0xff] }
 0x76e   : >> { %11476 = vmatmul.msk.f32.gmra.mxu3 %vm7758_vm0, %v15947_v38 }
 0x76f   : >> { %v9348_v25 = vpop.f32.mrf.mxu2 }
 0x770   : >> { %v9349_v15 = vadd.f32 %v9348_v25, %v15724_v35  ;;  %v15956_v61 = vpop.f32.mrf.mxu0 }
 0x771   : >> { %16835 = vst [vmem:[#allocation60_spill] sm:$0xff] %v15956_v61  ;;  %v9437_v16 = vpop.f32.mrf.mxu3  ;;  %v15958_v3 = vpop.f32.mrf.mxu1  ;;  %v10346_v61 = vld [vmem:[%s16047_s26 + $0x28] sm:$0xff] }
 0x772   : >> { %16836 = vst [vmem:[#allocation61_spill] sm:$0xff] %v15958_v3  ;;  %v15960_v36 = vadd.f32 %v9437_v16, %v9349_v15 }
 0x773   : >> { %11489 = vmatmul.msk.f32.gmra.mxu0 %vm7758_vm0, %v15767_v24 }
 0x774   : >> { %16837 = vst [vmem:[#allocation62_spill] sm:$0xff] %v15960_v36  ;;  %11425 = vmatmul.msk.f32.gmra.mxu2 %vm7758_vm0, %v11677_v49  ;;  %11513 = vmatmul.msk.f32.gmra.mxu1 %vm7758_vm0, %v15785_v7  ;;  %v15983_v49 = vld [vmem:[%s14255_s14 + $0x2e8] sm:$0xff] }
 0x775   : >> { %v11678_v36 = vld [vmem:[%s14255_s14 + $0x228] sm:$0xff] }
 0x776   : >> { %11477 = vmatmul.msk.f32.gmra.mxu3 %vm7758_vm0, %v15965_v55 }
 0x777   : >> { %v9351_v35 = vpop.f32.mrf.mxu2 }
 0x778   : >> { %v9352_v25 = vadd.f32 %v9351_v35, %v15742_v22  ;;  %v15974_v3 = vpop.f32.mrf.mxu0 }
 0x779   : >> { %16838 = vst [vmem:[#allocation63_spill] sm:$0xff] %v15974_v3  ;;  %v9440_v15 = vpop.f32.mrf.mxu3  ;;  %v15976_v16 = vpop.f32.mrf.mxu1 }
 0x77a   : >> { %16839 = vst [vmem:[#allocation64_spill] sm:$0xff] %v15976_v16  ;;  %v15978_v24 = vadd.f32 %v9440_v15, %v9352_v25  ;;  %v11679_v16 = vld [vmem:[%s14255_s14 + $0x230] sm:$0xff] }
 0x77b   : >> { %11490 = vmatmul.msk.f32.gmra.mxu0 %vm7758_vm0, %v15785_v7 }
 0x77c   : >> { %16840 = vst [vmem:[#allocation65_spill] sm:$0xff] %v15978_v24  ;;  %11426 = vmatmul.msk.f32.gmra.mxu2 %vm7758_vm0, %v11678_v36  ;;  %11514 = vmatmul.msk.f32.gmra.mxu1 %vm7758_vm0, %v15803_v14  ;;  %v16001_v36 = vld [vmem:[%s14255_s14 + $0x2f0] sm:$0xff] }
 0x77e   : >> { %11478 = vmatmul.msk.f32.gmra.mxu3 %vm7758_vm0, %v15983_v49 }
 0x77f   : >> { %v9354_v22 = vpop.f32.mrf.mxu2 }
 0x780   : >> { %v9355_v35 = vadd.f32 %v9354_v22, %v15760_v4  ;;  %v15992_v25 = vpop.f32.mrf.mxu0 }
 0x781   : >> { %16841 = vst [vmem:[#allocation66_spill] sm:$0xff] %v15992_v25  ;;  %v9443_v15 = vpop.f32.mrf.mxu3  ;;  %v15994_v7 = vpop.f32.mrf.mxu1  ;;  %v10355_v25 = vld [vmem:[%s16047_s26 + $0x70] sm:$0xff] }
 0x782   : >> { %16842 = vst [vmem:[#allocation67_spill] sm:$0xff] %v15994_v7  ;;  %v15996_v24 = vadd.f32 %v9443_v15, %v9355_v35  ;;  %v11680_v35 = vld [vmem:[%s14255_s14 + $0x238] sm:$0xff]  ;;  %v11685_v7 = vld [vmem:[%s14255_s14 + $0x260] sm:$0xff] }
 0x783   : >> { %11491 = vmatmul.msk.f32.gmra.mxu0 %vm7758_vm0, %v15803_v14  ;;  %v16016_v14 = vld [vmem:[%s14255_s14 + $0x2f8] sm:$0xff] }
 0x784   : >> { %16843 = vst [vmem:[#allocation68_spill] sm:$0xff] %v15996_v24  ;;  %11427 = vmatmul.msk.f32.gmra.mxu2 %vm7758_vm0, %v11679_v16  ;;  %11515 = vmatmul.msk.f32.gmra.mxu1 %vm7758_vm0, %v15821_v18  ;;  %v11681_v24 = vld [vmem:[%s14255_s14 + $0x240] sm:$0xff] }
 0x786   : >> { %11479 = vmatmul.msk.f32.gmra.mxu3 %vm7758_vm0, %v16001_v36 }
 0x788   : >> { %v16009_v4 = vpop.f32.mrf.mxu0 }
 0x789   : >> { %16844 = vst [vmem:[#allocation69_spill] sm:$0xff] %v16009_v4  ;;  %v16011_v22 = vpop.f32.mrf.mxu1  ;;  %v10347_v4 = vld [vmem:[%s16047_s26 + $0x30] sm:$0xff] }
 0x78a   : >> { %16845 = vst [vmem:[#allocation70_spill] sm:$0xff] %v16011_v22  ;;  %v11683_v22 = vld [vmem:[%s14255_s14 + $0x250] sm:$0xff] }
 0x78b   : >> { %11492 = vmatmul.msk.f32.gmra.mxu0 %vm7758_vm0, %v15821_v18  ;;  %v16031_v18 = vld [vmem:[%s14255_s14 + $0x300] sm:$0xff] }
 0x78c   : >> { %11428 = vmatmul.msk.f32.gmra.mxu2 %vm7758_vm0, %v11680_v35  ;;  %11516 = vmatmul.msk.f32.gmra.mxu1 %vm7758_vm0, %v15839_v40 }
 0x78e   : >> { %11480 = vmatmul.msk.f32.gmra.mxu3 %vm7758_vm0, %v16016_v14 }
 0x790   : >> { %v16024_v16 = vpop.f32.mrf.mxu0 }
 0x791   : >> { %16846 = vst [vmem:[#allocation71_spill] sm:$0xff] %v16024_v16  ;;  %v16026_v15 = vpop.f32.mrf.mxu1 }
 0x792   : >> { %16847 = vst [vmem:[#allocation72_spill] sm:$0xff] %v16026_v15 }
 0x793   : >> { %11493 = vmatmul.msk.f32.gmra.mxu0 %vm7758_vm0, %v15839_v40  ;;  %v16052_v40 = vld [vmem:[%s14255_s14 + $0x308] sm:$0xff] }
 0x794   : >> { %11429 = vmatmul.msk.f32.gmra.mxu2 %vm7758_vm0, %v11681_v24  ;;  %11517 = vmatmul.msk.f32.gmra.mxu1 %vm7758_vm0, %v15857_v9  ;;  %v11682_v24 = vld [vmem:[%s14255_s14 + $0x248] sm:$0xff] }
 0x796   : >> { %11481 = vmatmul.msk.f32.gmra.mxu3 %vm7758_vm0, %v16031_v18 }
 0x798   : >> { %v16040_v35 = vpop.f32.mrf.mxu0 }
 0x799   : >> { %16848 = vst [vmem:[#allocation73_spill] sm:$0xff] %v16040_v35  ;;  %v16042_v16 = vpop.f32.mrf.mxu1  ;;  %v10356_v35 = vld [vmem:[%s16047_s26 + $0x78] sm:$0xff] }
 0x79a   : >> { %16849 = vst [vmem:[#allocation74_spill] sm:$0xff] %v16042_v16  ;;  %v10348_v16 = vld [vmem:[%s16047_s26 + $0x38] sm:$0xff]  ;;  %10472 = vmatpush.msrb.mxu3 %v10356_v35 }
 0x79b   : >> { %11494 = vmatmul.msk.f32.gmra.mxu0 %vm7758_vm0, %v15857_v9  ;;  %10449 = vmatpush.msrb.mxu2 %v10348_v16 }
 0x79c   : >> { %11430 = vmatmul.msk.f32.gmra.mxu2 %vm7758_vm0, %v11682_v24  ;;  %11518 = vmatmul.msk.f32.gmra.mxu1 %vm7758_vm0, %v15875_v28  ;;  %v16069_v24 = vld [vmem:[%s14255_s14 + $0x310] sm:$0xff] }
 0x79d   : >> { %10450 = vmatpush.msrb.mxu2 %v10347_v4  ;;  %10473 = vmatpush.msrb.mxu3 %v10355_v25 }
 0x79e   : >> { %11482 = vmatmul.msk.f32.gmra.mxu3 %vm7758_vm0, %v16052_v40 }
 0x79f   : >> { %10451 = vmatpush.msrb.mxu2 %v10346_v61  ;;  %v10354_v61 = vld [vmem:[%s16047_s26 + $0x68] sm:$0xff] }
 0x7a0   : >> { %v16062_v15 = vpop.f32.mrf.mxu0  ;;  %10474 = vmatpush.msrb.mxu3 %v10354_v61 }
 0x7a1   : >> { %16850 = vst [vmem:[#allocation75_spill] sm:$0xff] %v16062_v15  ;;  %v16064_v9 = vpop.f32.mrf.mxu1  ;;  %v16092_v15 = vpop.f32.mrf.mxu3 }
 0x7a2   : >> { %16851 = vst [vmem:[#allocation76_spill] sm:$0xff] %v16064_v9  ;;  %v16081_v9 = vpop.f32.mrf.mxu2 }
 0x7a3   : >> { %11495 = vmatmul.msk.f32.gmra.mxu0 %vm7758_vm0, %v15875_v28  ;;  %v16086_v28 = vld [vmem:[%s14255_s14 + $0x318] sm:$0xff] }
 0x7a4   : >> { %11431 = vmatmul.msk.f32.gmra.mxu2 %vm7758_vm0, %v11683_v22  ;;  %11519 = vmatmul.msk.f32.gmra.mxu1 %vm7758_vm0, %v15893_v45  ;;  %v11684_v22 = vld [vmem:[%s14255_s14 + $0x258] sm:$0xff] }
 0x7a6   : >> { %11483 = vmatmul.msk.f32.gmra.mxu3 %vm7758_vm0, %v16069_v24 }
 0x7a8   : >> { %v16077_v16 = vpop.f32.mrf.mxu0 }
 0x7a9   : >> { %16852 = vst [vmem:[#allocation77_spill] sm:$0xff] %v16077_v16  ;;  %v16079_v35 = vpop.f32.mrf.mxu1 }
 0x7aa   : >> { %16853 = vst [vmem:[#allocation78_spill] sm:$0xff] %v16079_v35 }
 0x7ab   : >> { %11496 = vmatmul.msk.f32.gmra.mxu0 %vm7758_vm0, %v15893_v45  ;;  %v16103_v45 = vld [vmem:[%s14255_s14 + $0x320] sm:$0xff] }
 0x7ac   : >> { %11432 = vmatmul.msk.f32.gmra.mxu2 %vm7758_vm0, %v11684_v22  ;;  %11520 = vmatmul.msk.f32.gmra.mxu1 %vm7758_vm0, %v15911_v57  ;;  %v16106_v22 = vpop.f32.mrf.mxu2 }
 0x7ae   : >> { %11484 = vmatmul.msk.f32.gmra.mxu3 %vm7758_vm0, %v16086_v28 }
 0x7b0   : >> { %v16096_v35 = vpop.f32.mrf.mxu0 }
 0x7b1   : >> { %16854 = vst [vmem:[#allocation79_spill] sm:$0xff] %v16096_v35  ;;  %v16098_v16 = vpop.f32.mrf.mxu1 }
 0x7b2   : >> { %16855 = vst [vmem:[#allocation80_spill] sm:$0xff] %v16098_v16  ;;  %v16115_v16 = vpop.f32.mrf.mxu3 }
 0x7b3   : >> { %11497 = vmatmul.msk.f32.gmra.mxu0 %vm7758_vm0, %v15911_v57 }
 0x7b4   : >> { %11433 = vmatmul.msk.f32.gmra.mxu2 %vm7758_vm0, %v11685_v7  ;;  %11521 = vmatmul.msk.f32.gmra.mxu1 %vm7758_vm0, %v15929_v8  ;;  %v16124_v7 = vld [vmem:[%s14255_s14 + $0x328] sm:$0xff]  ;;  %v16130_v25 = vpop.f32.mrf.mxu2 }
 0x7b6   : >> { %11485 = vmatmul.msk.f32.gmra.mxu3 %vm7758_vm0, %v16103_v45 }
 0x7b8   : >> { %v16117_v57 = vpop.f32.mrf.mxu0 }
 0x7b9   : >> { %16856 = vst [vmem:[#allocation81_spill] sm:$0xff] %v16117_v57  ;;  %v16119_v35 = vpop.f32.mrf.mxu1 }
 0x7ba   : >> { %16857 = vst [vmem:[#allocation82_spill] sm:$0xff] %v16119_v35 }
 0x7bb   : >> { %11498 = vmatmul.msk.f32.gmra.mxu0 %vm7758_vm0, %v15929_v8  ;;  %v16138_v8 = vpop.f32.mrf.mxu3 }
 0x7bc   : >> { %11434 = vmatmul.msk.f32.gmra.mxu2 %vm7758_vm0, %v15515_v46  ;;  %11522 = vmatmul.msk.f32.gmra.mxu1 %vm7758_vm0, %v15947_v38  ;;  %v16144_v46 = vpop.f32.mrf.mxu2 }
 0x7be   : >> { %11486 = vmatmul.msk.f32.gmra.mxu3 %vm7758_vm0, %v16124_v7 }
 0x7c0   : >> { %v16134_v4 = vpop.f32.mrf.mxu0 }
 0x7c1   : >> { %16858 = vst [vmem:[#allocation83_spill] sm:$0xff] %v16134_v4  ;;  %v16136_v35 = vpop.f32.mrf.mxu1  ;;  %v10344_v4 = vld [vmem:[%s16047_s26 + $0x18] sm:$0xff] }
 0x7c2   : >> { %16859 = vst [vmem:[#allocation84_spill] sm:$0xff] %v16136_v35 }
 0x7c3   : >> { %11499 = vmatmul.msk.f32.gmra.mxu0 %vm7758_vm0, %v15947_v38  ;;  %v16153_v35 = vpop.f32.mrf.mxu3  ;;  %v10345_v38 = vld [vmem:[%s16047_s26 + $0x20] sm:$0xff] }
 0x7c4   : >> { %11523 = vmatmul.msk.f32.gmra.mxu1 %vm7758_vm0, %v15965_v55  ;;  %10452 = vmatpush.msrb.mxu2 %v10345_v38  ;;  %v16164_v17 = vpop.f32.mrf.mxu2  ;;  %v9559_v38 = vadd.f32 %v15776_v6, %v15613_v59  ;;  %v10353_v59 = vld [vmem:[%s16047_s26 + $0x60] sm:$0xff]  ;;  %v9560_v6 = vadd.f32 %v15794_v37, %v15627_v31 }
 0x7c5   : >> { %10475 = vmatpush.msrb.mxu3 %v10353_v59 }
 0x7c6   : >> { %10453 = vmatpush.msrb.mxu2 %v10344_v4  ;;  %v10341_v4 = vld [vmem:[%s16047_s26] sm:$0xff]  ;;  %v9673_v31 = vadd.f32 %v15796_v20, %v9560_v6  ;;  %v9561_v20 = vadd.f32 %v15812_v29, %v15641_v19  ;;  %v16867_v6 = vld [vmem:[#allocation10_spill] sm:$0xff] }
 0x7c8   : >> { %v16146_v57 = vpop.f32.mrf.mxu0  ;;  %10454 = vmatpush.msrb.mxu2 %v10343_v60  ;;  %v9786_v63 = vadd.f32 %v16106_v22, %v9673_v31  ;;  %v10364_v22 = vld [vmem:[%s16047_s26 + $0xb8] sm:$0xff]  ;;  %v10363_v31 = vld [vmem:[%s16047_s26 + $0xb0] sm:$0xff]  ;;  %v9674_v29 = vadd.f32 %v15814_v32, %v9561_v20  ;;  %v10361_v32 = vld [vmem:[%s16047_s26 + $0xa0] sm:$0xff] }
 0x7c9   : >> { %16860 = vst [vmem:[#allocation85_spill] sm:$0xff] %v16146_v57  ;;  %v16148_v3 = vpop.f32.mrf.mxu1  ;;  %v16868_v20 = vld [vmem:[#allocation19_spill] sm:$0xff] }
 0x7ca   : >> { %16861 = vst [vmem:[#allocation86_spill] sm:$0xff] %v16148_v3 }
 0x7cb   : >> { %11500 = vmatmul.msk.f32.gmra.mxu0 %vm7758_vm0, %v15965_v55  ;;  %v10342_v55 = vld [vmem:[%s16047_s26 + $0x8] sm:$0xff]  ;;  %v16175_v60 = vpop.f32.mrf.mxu3 }
 0x7cc   : >> { %11524 = vmatmul.msk.f32.gmra.mxu1 %vm7758_vm0, %v15983_v49  ;;  %10455 = vmatpush.msrb.mxu2 %v10342_v55  ;;  %v16185_v61 = vpop.f32.mrf.mxu2 }
 0x7ce   : >> { %10456 = vmatpush.msrb.mxu2 %v10341_v4  ;;  %v16866_v4 = vld [vmem:[#allocation18_spill] sm:$0xff] }
 0x7d0   : >> { %v16159_v57 = vpop.f32.mrf.mxu0  ;;  %10495 = vmatpush.msra.mxu2 %v10364_v22 }
 0x7d1   : >> { %16862 = vst [vmem:[#allocation87_spill] sm:$0xff] %v16159_v57  ;;  %v16162_v3 = vpop.f32.mrf.mxu1  ;;  %v9672_v57 = vadd.f32 %v15778_v51, %v9559_v38  ;;  %v10352_v51 = vld [vmem:[%s16047_s26 + $0x58] sm:$0xff]  ;;  %v9103_v38 = vadd.f32 %v15400_v34, %v16866_v4  ;;  %v10350_v34 = vld [vmem:[%s16047_s26 + $0x48] sm:$0xff] }
 0x7d2   : >> { %16863 = vst [vmem:[#allocation88_spill] sm:$0xff] %v16162_v3  ;;  %10476 = vmatpush.msrb.mxu3 %v10352_v51  ;;  %v9104_v51 = vadd.f32 %v15416_v48, %v16867_v6  ;;  %10496 = vmatpush.msra.mxu2 %v10363_v31  ;;  %v9787_v48 = vadd.f32 %v16130_v25, %v9674_v29  ;;  %v10360_v25 = vld [vmem:[%s16047_s26 + $0x98] sm:$0xff]  ;;  %v10358_v31 = vld [vmem:[%s16047_s26 + $0x88] sm:$0xff] }
 0x7d3   : >> { %11501 = vmatmul.msk.f32.gmra.mxu0 %vm7758_vm0, %v15983_v49  ;;  %v9785_v55 = vadd.f32 %v16081_v9, %v9672_v57  ;;  %v16198_v9 = vld [vmem:[%s16652_s4] ss:$0 sm:$0xff]  ;;  %v16201_v57 = vpop.f32.mrf.mxu3 }
 0x7d4   : >> { %11525 = vmatmul.msk.f32.gmra.mxu1 %vm7758_vm0, %v16001_v36  ;;  %v9131_v4 = vadd.f32 %v16198_v9, %v9103_v38 }
 0x7d8   : >> { %v16177_v3 = vpop.f32.mrf.mxu0 }
 0x7d9   : >> { %16864 = vst [vmem:[#allocation89_spill] sm:$0xff] %v16177_v3  ;;  %v16180_v49 = vpop.f32.mrf.mxu1  ;;  %v10351_v3 = vld [vmem:[%s16047_s26 + $0x50] sm:$0xff] }
 0x7da   : >> { %16865 = vst [vmem:[#allocation90_spill] sm:$0xff] %v16180_v49  ;;  %10477 = vmatpush.msrb.mxu3 %v10351_v3 }
 0x7db   : >> { %11502 = vmatmul.msk.f32.gmra.mxu0 %vm7758_vm0, %v16001_v36  ;;  %v9999_v36 = vadd.f32 %v16092_v15, %v9785_v55  ;;  %v10349_v15 = vld [vmem:[%s16047_s26 + $0x40] sm:$0xff]  ;;  %v9155_v55 = vmax.f32 %v9131_v4, 0.0  ;;  %v9132_v4 = vadd.f32 %v16198_v9, %v9104_v51 }
 0x7dc   : >> { %11526 = vmatmul.msk.f32.gmra.mxu1 %vm7758_vm0, %v16016_v14  ;;  %10478 = vmatpush.msrb.mxu3 %v10350_v34  ;;  %v10362_v34 = vld [vmem:[%s16047_s26 + $0xa8] sm:$0xff] }
 0x7dd   : >> { %10497 = vmatpush.msra.mxu2 %v10362_v34  ;;  %v9156_v22 = vmax.f32 %v9132_v4, 0.0  ;;  %v9563_v34 = vadd.f32 %v15848_v56, %v15669_v33 }
 0x7de   : >> { %10479 = vmatpush.msrb.mxu3 %v10349_v15 }
 0x7df   : >> { %10498 = vmatpush.msra.mxu2 %v10361_v32  ;;  %v9676_v56 = vadd.f32 %v15850_v39, %v9563_v34  ;;  %v10369_v39 = vld [vmem:[%s16047_s26 + $0xe0] sm:$0xff]  ;;  %v9565_v34 = vadd.f32 %v15884_v13, %v15697_v27  ;;  %v10379_v27 = vld [vmem:[%s16047_s26 + $0x130] sm:$0xff] }
 0x7e0   : >> { %v10043_v49 = vpop.f32.mrf.mxu0 }
 0x7e1   : >> { %v10115_v37 = vadd.f32 %v10043_v49, %v9999_v36  ;;  %v10159_v59 = vpop.f32.mrf.mxu1  ;;  %v16216_v49 = vpop.f32.mrf.mxu2  ;;  %10499 = vmatpush.msra.mxu2 %v10360_v25  ;;  %v9678_v13 = vadd.f32 %v15886_v53, %v9565_v34  ;;  %v10377_v53 = vld [vmem:[%s16047_s26 + $0x120] sm:$0xff]  ;;  %v10386_v34 = vld [vmem:[%s16047_s26 + $0x168] sm:$0xff] }
 0x7e3   : >> { %v10231_v58 = vadd.f32 %v10159_v59, %v10115_v37  ;;  %11503 = vmatmul.msk.f32.gmra.mxu0 %vm7758_vm0, %v16016_v14  ;;  %v10000_v14 = vadd.f32 %v16115_v16, %v9786_v63  ;;  %v16224_v59 = vpop.f32.mrf.mxu3  ;;  %v9562_v16 = vadd.f32 %v15830_v5, %v15655_v41 }
 0x7e4   : >> { %11527 = vmatmul.msk.f32.gmra.mxu1 %vm7758_vm0, %v16031_v18 }
 0x7e5   : >> { %v10255_v3 = vadd.f32 %v16198_v9, %v10231_v58  ;;  %v9675_v41 = vadd.f32 %v15832_v43, %v9562_v16  ;;  %v10357_v43 = vld [vmem:[%s16047_s26 + $0x80] sm:$0xff] }
 0x7e7   : >> { %v10279_v38 = vmax.f32 %v10255_v3, 0.0  ;;  %v9105_v3 = vadd.f32 %v15432_v1, %v16868_v20 }
 0x7e8   : >> { %v10046_v36 = vpop.f32.mrf.mxu0 }
 0x7e9   : >> { %v10303_v19 = vmax.f32 %v9155_v55, %v10279_v38  ;;  %v10116_v58 = vadd.f32 %v10046_v36, %v10000_v14  ;;  %v10162_v37 = vpop.f32.mrf.mxu1  ;;  %v10001_v55 = vadd.f32 %v16138_v8, %v9787_v48  ;;  %v16241_v6 = vpop.f32.mrf.mxu2  ;;  %v10359_v14 = vld [vmem:[%s16047_s26 + $0x90] sm:$0xff]  ;;  %v9133_v1 = vadd.f32 %v16198_v9, %v9105_v3 }
 0x7ea   : >> { %10500 = vmatpush.msra.mxu2 %v10359_v14  ;;  %v9788_v8 = vadd.f32 %v16144_v46, %v9675_v41  ;;  %v10372_v46 = vld [vmem:[%s16047_s26 + $0xf8] sm:$0xff] }
 0x7eb   : >> { %v10232_v63 = vadd.f32 %v10162_v37, %v10116_v58  ;;  %11504 = vmatmul.msk.f32.gmra.mxu0 %vm7758_vm0, %v16031_v18  ;;  %v16250_v37 = vpop.f32.mrf.mxu3  ;;  %10518 = vmatpush.msra.mxu3 %v10372_v46  ;;  %v10368_v41 = vld [vmem:[%s16047_s26 + $0xd8] sm:$0xff] }
 0x7ec   : >> { %11528 = vmatmul.msk.f32.gmra.mxu1 %vm7758_vm0, %v16052_v40  ;;  %10501 = vmatpush.msra.mxu2 %v10358_v31 }
 0x7ed   : >> { %v10256_v15 = vadd.f32 %v16198_v9, %v10232_v63  ;;  %v10002_v63 = vadd.f32 %v16153_v35, %v9788_v8 }
 0x7ee   : >> { %10502 = vmatpush.msra.mxu2 %v10357_v43 }
 0x7ef   : >> { %v10280_v18 = vmax.f32 %v10256_v15, 0.0  ;;  %v10371_v15 = vld [vmem:[%s16047_s26 + $0xf0] sm:$0xff] }
 0x7f0   : >> { %v10049_v51 = vpop.f32.mrf.mxu0  ;;  %10519 = vmatpush.msra.mxu3 %v10371_v15 }
 0x7f1   : >> { %v10304_v5 = vmax.f32 %v9156_v22, %v10280_v18  ;;  %v10117_v38 = vadd.f32 %v10049_v51, %v10001_v55  ;;  %v10165_v36 = vpop.f32.mrf.mxu1  ;;  %v16265_v25 = vpop.f32.mrf.mxu2  ;;  %v10370_v22 = vld [vmem:[%s16047_s26 + $0xe8] sm:$0xff]  ;;  %v9564_v18 = vadd.f32 %v15866_v2, %v15683_v44 }
 0x7f2   : >> { %10520 = vmatpush.msra.mxu3 %v10370_v22  ;;  %v10376_v22 = vld [vmem:[%s16047_s26 + $0x118] sm:$0xff] }
 0x7f3   : >> { %v10327_v29 = vmax.f32 %v10303_v19, %v10304_v5  ;;  %v10233_v58 = vadd.f32 %v10165_v36, %v10117_v38  ;;  %11505 = vmatmul.msk.f32.gmra.mxu0 %vm7758_vm0, %v16052_v40  ;;  %v9157_v19 = vmax.f32 %v9133_v1, 0.0  ;;  %v16869_v40 = vld [vmem:[#allocation20_spill] sm:$0xff]  ;;  %v16280_v14 = vpop.f32.mrf.mxu3  ;;  %v10367_v1 = vld [vmem:[%s16047_s26 + $0xd0] sm:$0xff]  ;;  %v9677_v2 = vadd.f32 %v15868_v54, %v9564_v18  ;;  %v10365_v54 = vld [vmem:[%s16047_s26 + $0xc0] sm:$0xff] }
 0x7f4   : >> { %11529 = vmatmul.msk.f32.gmra.mxu1 %vm7758_vm0, %v16069_v24  ;;  %v9106_v48 = vadd.f32 %v15448_v52, %v16869_v40  ;;  %v9789_v52 = vadd.f32 %v16164_v17, %v9676_v56  ;;  %10521 = vmatpush.msra.mxu3 %v10369_v39  ;;  %v9107_v17 = vadd.f32 %v15464_v50, %v15280_v0  ;;  %v10366_v50 = vld [vmem:[%s16047_s26 + $0xc8] sm:$0xff]  ;;  %v10375_v39 = vld [vmem:[%s16047_s26 + $0x110] sm:$0xff] }
 0x7f5   : >> { %v10257_v4 = vadd.f32 %v16198_v9, %v10233_v58  ;;  %11535 = vmatmul.msk.f32.vlgmr.msrb.gmra.mxu2 %vm10437_vm1, %v10327_v29  ;;  %v9790_v29 = vadd.f32 %v16185_v61, %v9677_v2  ;;  %v10380_v61 = vld [vmem:[%s16047_s26 + $0x138] sm:$0xff]  ;;  %v10378_v56 = vld [vmem:[%s16047_s26 + $0x128] sm:$0xff]  ;;  %v16870_v2 = vld [vmem:[#allocation39_spill] sm:$0xff] }
 0x7f6   : >> { %v9134_v55 = vadd.f32 %v16198_v9, %v9106_v48  ;;  %10522 = vmatpush.msra.mxu3 %v10368_v41  ;;  %v9135_v0 = vadd.f32 %v16198_v9, %v9107_v17  ;;  %10541 = vmatpush.msrb.mxu2 %v10380_v61  ;;  %v11461_v17 = vld [vmem:[%s14255_s14 + $0x330] sm:$0xff]  ;;  %v10374_v41 = vld [vmem:[%s16047_s26 + $0x108] sm:$0xff] }
 0x7f7   : >> { %v10281_v32 = vmax.f32 %v10257_v4, 0.0 }
 0x7f8   : >> { %v10052_v16 = vpop.f32.mrf.mxu0  ;;  %v9158_v5 = vmax.f32 %v9134_v55, 0.0  ;;  %10523 = vmatpush.msra.mxu3 %v10367_v1  ;;  %v9159_v46 = vmax.f32 %v9135_v0, 0.0  ;;  %10542 = vmatpush.msrb.mxu2 %v10379_v27  ;;  %v10384_v27 = vld [vmem:[%s16047_s26 + $0x158] sm:$0xff] }
 0x7f9   : >> { %v10305_v33 = vmax.f32 %v9157_v19, %v10281_v32  ;;  %v10118_v20 = vadd.f32 %v10052_v16, %v10002_v63  ;;  %v10168_v3 = vpop.f32.mrf.mxu1  ;;  %v10004_v19 = vadd.f32 %v16201_v57, %v9790_v29  ;;  %v9566_v57 = vadd.f32 %v15902_v23, %v15711_v26 }
 0x7fa   : >> { %10524 = vmatpush.msra.mxu3 %v10366_v50  ;;  %10543 = vmatpush.msrb.mxu2 %v10378_v56 }
 0x7fb   : >> { %v10234_v35 = vadd.f32 %v10168_v3, %v10118_v20  ;;  %11506 = vmatmul.msk.f32.gmra.mxu0 %vm7758_vm0, %v16069_v24  ;;  %v10003_v24 = vadd.f32 %v16175_v60, %v9789_v52  ;;  %v16291_v60 = vpop.f32.mrf.mxu2  ;;  %v16304_v48 = vpop.f32.mrf.mxu3  ;;  %v9679_v23 = vadd.f32 %v15904_v62, %v9566_v57  ;;  %v10373_v62 = vld [vmem:[%s16047_s26 + $0x100] sm:$0xff] }
 0x7fc   : >> { %11530 = vmatmul.msk.f32.gmra.mxu1 %vm7758_vm0, %v16086_v28  ;;  %10525 = vmatpush.msra.mxu3 %v10365_v54  ;;  %v11462_v54 = vld [vmem:[%s14255_s14 + $0x338] sm:$0xff] }
 0x7fd   : >> { %v10258_v51 = vadd.f32 %v16198_v9, %v10234_v35  ;;  %10544 = vmatpush.msrb.mxu2 %v10377_v53 }
 0x7ff   : >> { %v10282_v38 = vmax.f32 %v10258_v51, 0.0  ;;  %10545 = vmatpush.msrb.mxu2 %v10376_v22 }
 0x800   : >> { %v10055_v36 = vpop.f32.mrf.mxu0 }
 0x801   : >> { %v10306_v44 = vmax.f32 %v9158_v5, %v10282_v38  ;;  %v10119_v31 = vadd.f32 %v10055_v36, %v10003_v24  ;;  %v10171_v8 = vpop.f32.mrf.mxu1  ;;  %10546 = vmatpush.msrb.mxu2 %v10375_v39  ;;  %v9567_v38 = vadd.f32 %v15920_v11, %v15726_v10  ;;  %v10387_v11 = vld [vmem:[%s16047_s26 + $0x170] sm:$0xff]  ;;  %v10381_v39 = vld [vmem:[%s16047_s26 + $0x140] sm:$0xff] }
 0x802   : >> { %v16871_v10 = vld [vmem:[#allocation55_spill] sm:$0xff] }
 0x803   : >> { %v10328_v58 = vmax.f32 %v10305_v33, %v10306_v44  ;;  %v10235_v43 = vadd.f32 %v10171_v8, %v10119_v31  ;;  %11507 = vmatmul.msk.f32.gmra.mxu0 %vm7758_vm0, %v16086_v28  ;;  %v9108_v28 = vadd.f32 %v15480_v21, %v15300_v42  ;;  %v9791_v42 = vadd.f32 %v16216_v49, %v9678_v13  ;;  %v16321_v3 = vpop.f32.mrf.mxu2 }
 0x804   : >> { %11531 = vmatmul.msk.f32.gmra.mxu1 %vm7758_vm0, %v16103_v45  ;;  %v9109_v49 = vadd.f32 %v15496_v30, %v15320_v47  ;;  %v16329_v30 = vpop.f32.mrf.mxu3  ;;  %10547 = vmatpush.msrb.mxu2 %v10374_v41  ;;  %v9680_v50 = vadd.f32 %v16871_v10, %v9567_v38 }
 0x805   : >> { %v10259_v4 = vadd.f32 %v16198_v9, %v10235_v43  ;;  %11536 = vmatmul.msk.f32.vlgmr.msrb.gmra.mxu3 %vm10437_vm1, %v10328_v58  ;;  %v9136_v33 = vadd.f32 %v16198_v9, %v9108_v28  ;;  %v10005_v55 = vadd.f32 %v16224_v59, %v9791_v42  ;;  %v9792_v59 = vadd.f32 %v16241_v6, %v9679_v23  ;;  %v10388_v6 = vld [vmem:[%s16047_s26 + $0x178] sm:$0xff]  ;;  %v10383_v42 = vld [vmem:[%s16047_s26 + $0x150] sm:$0xff] }
 0x806   : >> { %v9137_v47 = vadd.f32 %v16198_v9, %v9109_v49  ;;  %10548 = vmatpush.msrb.mxu2 %v10373_v62  ;;  %10564 = vmatpush.msrb.mxu3 %v10388_v6  ;;  %v16872_v28 = vld [vmem:[#allocation36_spill] sm:$0xff]  ;;  %v16881_v6 = vld [vmem:[#allocation61_spill] sm:$0xff] }
 0x807   : >> { %v10283_v40 = vmax.f32 %v10259_v4, 0.0  ;;  %v10006_v44 = vadd.f32 %v16250_v37, %v9792_v59  ;;  %v9793_v37 = vadd.f32 %v16265_v25, %v9680_v50  ;;  %v16874_v25 = vld [vmem:[#allocation11_spill] sm:$0xff]  ;;  %v16877_v23 = vld [vmem:[#allocation40_spill] sm:$0xff]  ;;  %v16879_v59 = vld [vmem:[#allocation21_spill] sm:$0xff] }
 0x808   : >> { %v10058_v63 = vpop.f32.mrf.mxu0  ;;  %v9161_v1 = vmax.f32 %v9137_v47, 0.0  ;;  %10565 = vmatpush.msrb.mxu3 %v10387_v11  ;;  %v10396_v47 = vld [vmem:[%s16047_s26 + $0x1b8] sm:$0xff]  ;;  %v10393_v50 = vld [vmem:[%s16047_s26 + $0x1a0] sm:$0xff] }
 0x809   : >> { %v10307_v32 = vmax.f32 %v9159_v46, %v10283_v40  ;;  %v10120_v16 = vadd.f32 %v10058_v63, %v10004_v19  ;;  %v10174_v15 = vpop.f32.mrf.mxu1  ;;  %v10385_v46 = vld [vmem:[%s16047_s26 + $0x160] sm:$0xff] }
 0x80a   : >> { %10566 = vmatpush.msrb.mxu3 %v10386_v34  ;;  %v16873_v19 = vld [vmem:[#allocation57_spill] sm:$0xff]  ;;  %v10392_v34 = vld [vmem:[%s16047_s26 + $0x198] sm:$0xff] }
 0x80b   : >> { %v10236_v21 = vadd.f32 %v10174_v15, %v10120_v16  ;;  %11508 = vmatmul.msk.f32.gmra.mxu0 %vm7758_vm0, %v16103_v45  ;;  %v9160_v45 = vmax.f32 %v9136_v33, 0.0  ;;  %v16345_v8 = vpop.f32.mrf.mxu2  ;;  %v9568_v40 = vadd.f32 %v16873_v19, %v16872_v28  ;;  %v10007_v15 = vadd.f32 %v16280_v14, %v9793_v37  ;;  %v16884_v37 = vld [vmem:[#allocation12_spill] sm:$0xff] }
 0x80c   : >> { %11532 = vmatmul.msk.f32.gmra.mxu1 %vm7758_vm0, %v16124_v7  ;;  %v16354_v61 = vpop.f32.mrf.mxu3  ;;  %10567 = vmatpush.msrb.mxu3 %v10385_v46 }
 0x80d   : >> { %v10260_v20 = vadd.f32 %v16198_v9, %v10236_v21  ;;  %v16876_v21 = vld [vmem:[#allocation58_spill] sm:$0xff] }
 0x80e   : >> { %10568 = vmatpush.msrb.mxu3 %v10384_v27  ;;  %v9681_v53 = vadd.f32 %v16876_v21, %v9568_v40  ;;  %v16886_v27 = vld [vmem:[#allocation64_spill] sm:$0xff]  ;;  %v10389_v21 = vld [vmem:[%s16047_s26 + $0x180] sm:$0xff] }
 0x80f   : >> { %v10284_v52 = vmax.f32 %v10260_v20, 0.0 }
 0x810   : >> { %v10061_v35 = vpop.f32.mrf.mxu0  ;;  %10569 = vmatpush.msrb.mxu3 %v10383_v42 }
 0x811   : >> { %v10308_v26 = vmax.f32 %v9160_v45, %v10284_v52  ;;  %v10121_v18 = vadd.f32 %v10061_v35, %v10005_v55  ;;  %v10177_v51 = vpop.f32.mrf.mxu1  ;;  %v10382_v45 = vld [vmem:[%s16047_s26 + $0x148] sm:$0xff]  ;;  %v9794_v52 = vadd.f32 %v16291_v60, %v9681_v53  ;;  %v16887_v53 = vld [vmem:[#allocation48_spill] sm:$0xff] }
 0x812   : >> { %10570 = vmatpush.msrb.mxu3 %v10382_v45  ;;  %v16880_v60 = vld [vmem:[#allocation42_spill] sm:$0xff] }
 0x813   : >> { %v10329_v5 = vmax.f32 %v10307_v32, %v10308_v26  ;;  %v10237_v24 = vadd.f32 %v10177_v51, %v10121_v18  ;;  %11509 = vmatmul.msk.f32.gmra.mxu0 %vm7758_vm0, %v16124_v7  ;;  %v9110_v7 = vadd.f32 %v16870_v2, %v15340_v12  ;;  %v16875_v32 = vld [vmem:[#allocation41_spill] sm:$0xff]  ;;  %v16367_v22 = vpop.f32.mrf.mxu2  ;;  %v16878_v26 = vld [vmem:[#allocation60_spill] sm:$0xff] }
 0x814   : >> { %11533 = vmatmul.msk.f32.gmra.mxu1 %vm7758_vm0, %v11461_v17  ;;  %v9111_v16 = vadd.f32 %v16875_v32, %v16874_v25  ;;  %v9569_v18 = vadd.f32 %v16878_v26, %v16877_v23  ;;  %10571 = vmatpush.msrb.mxu3 %v10381_v39 }
 0x815   : >> { %v10261_v36 = vadd.f32 %v16198_v9, %v10237_v24  ;;  %11537 = vmatmul.msk.f32.vlgmr.msra.gmra.mxu2 %vm10437_vm1, %v10329_v5  ;;  %v9138_v12 = vadd.f32 %v16198_v9, %v9110_v7  ;;  %v9112_v5 = vadd.f32 %v16880_v60, %v16879_v59  ;;  %v10008_v24 = vadd.f32 %v16304_v48, %v9794_v52 }
 0x816   : >> { %v9139_v55 = vadd.f32 %v16198_v9, %v9111_v16  ;;  %10587 = vmatpush.msra.mxu2 %v10396_v47 }
 0x817   : >> { %v10285_v31 = vmax.f32 %v10261_v36, 0.0  ;;  %v9162_v13 = vmax.f32 %v9138_v12, 0.0  ;;  %v10395_v36 = vld [vmem:[%s16047_s26 + $0x1b0] sm:$0xff] }
 0x818   : >> { %v10064_v0 = vpop.f32.mrf.mxu0  ;;  %v9163_v41 = vmax.f32 %v9139_v55, 0.0  ;;  %10588 = vmatpush.msra.mxu2 %v10395_v36  ;;  %v10404_v55 = vld [vmem:[%s16047_s26 + $0x1f8] sm:$0xff]  ;;  %v10401_v36 = vld [vmem:[%s16047_s26 + $0x1e0] sm:$0xff] }
 0x819   : >> { %v10309_v29 = vmax.f32 %v9161_v1, %v10285_v31  ;;  %v10122_v58 = vadd.f32 %v10064_v0, %v10006_v44  ;;  %v10180_v43 = vpop.f32.mrf.mxu1  ;;  %v9682_v1 = vadd.f32 %v16881_v6, %v9569_v18  ;;  %v10394_v31 = vld [vmem:[%s16047_s26 + $0x1a8] sm:$0xff]  ;;  %v9140_v0 = vadd.f32 %v16198_v9, %v9112_v5  ;;  %v10403_v18 = vld [vmem:[%s16047_s26 + $0x1f0] sm:$0xff]  ;;  %v16892_v6 = vld [vmem:[#allocation49_spill] sm:$0xff] }
 0x81a   : >> { %10589 = vmatpush.msra.mxu2 %v10394_v31 }
 0x81b   : >> { %v10238_v4 = vadd.f32 %v10180_v43, %v10122_v58  ;;  %11510 = vmatmul.msk.f32.gmra.mxu0 %vm7758_vm0, %v11461_v17  ;;  %v16377_v17 = vpop.f32.mrf.mxu3  ;;  %v9795_v11 = vadd.f32 %v16321_v3, %v9682_v1  ;;  %v16388_v48 = vpop.f32.mrf.mxu2  ;;  %v16883_v58 = vld [vmem:[#allocation63_spill] sm:$0xff]  ;;  %v9164_v12 = vmax.f32 %v9140_v0, 0.0  ;;  %v16893_v1 = vld [vmem:[#allocation69_spill] sm:$0xff] }
 0x81c   : >> { %11534 = vmatmul.msk.f32.gmra.mxu1 %vm7758_vm0, %v11462_v54  ;;  %10590 = vmatpush.msra.mxu2 %v10393_v50  ;;  %v16894_v0 = vld [vmem:[#allocation13_spill] sm:$0xff] }
 0x81d   : >> { %v10262_v63 = vadd.f32 %v16198_v9, %v10238_v4  ;;  %v16885_v4 = vld [vmem:[#allocation44_spill] sm:$0xff]  ;;  %v10009_v3 = vadd.f32 %v16329_v30, %v9795_v11  ;;  %v16895_v11 = vld [vmem:[#allocation47_spill] sm:$0xff] }
 0x81e   : >> { %v9113_v46 = vadd.f32 %v16885_v4, %v16884_v37  ;;  %10591 = vmatpush.msra.mxu2 %v10392_v34 }
 0x81f   : >> { %v10286_v56 = vmax.f32 %v10262_v63, 0.0  ;;  %v10391_v63 = vld [vmem:[%s16047_s26 + $0x190] sm:$0xff] }
 0x820   : >> { %v10067_v33 = vpop.f32.mrf.mxu0  ;;  %10592 = vmatpush.msra.mxu2 %v10391_v63 }
 0x821   : >> { %v10310_v57 = vmax.f32 %v9162_v13, %v10286_v56  ;;  %v10123_v20 = vadd.f32 %v10067_v33, %v10007_v15  ;;  %v10183_v49 = vpop.f32.mrf.mxu1  ;;  %v10390_v15 = vld [vmem:[%s16047_s26 + $0x188] sm:$0xff]  ;;  %v9141_v56 = vadd.f32 %v16198_v9, %v9113_v46 }
 0x822   : >> { %10593 = vmatpush.msra.mxu2 %v10390_v15  ;;  %v10398_v46 = vld [vmem:[%s16047_s26 + $0x1c8] sm:$0xff]  ;;  %v10412_v15 = vld [vmem:[%s16047_s26 + $0x238] sm:$0xff] }
 0x823   : >> { %v10330_v14 = vmax.f32 %v10309_v29, %v10310_v57  ;;  %v10239_v35 = vadd.f32 %v10183_v49, %v10123_v20  ;;  %v16882_v29 = vld [vmem:[#allocation45_spill] sm:$0xff]  ;;  %v16398_v19 = vpop.f32.mrf.mxu3  ;;  %v16888_v57 = vld [vmem:[#allocation66_spill] sm:$0xff]  ;;  %v16410_v45 = vpop.f32.mrf.mxu2  ;;  %v9165_v52 = vmax.f32 %v9141_v56, 0.0 }
 0x824   : >> { %v9570_v43 = vadd.f32 %v16883_v58, %v16882_v29  ;;  %v9571_v20 = vadd.f32 %v16888_v57, %v16887_v53  ;;  %10594 = vmatpush.msra.mxu2 %v10389_v21  ;;  %v10411_v57 = vld [vmem:[%s16047_s26 + $0x230] sm:$0xff] }
 0x825   : >> { %v10263_v51 = vadd.f32 %v16198_v9, %v10239_v35  ;;  %11538 = vmatmul.msk.f32.vlgmr.msra.gmra.mxu3 %vm10437_vm1, %v10330_v14  ;;  %v16889_v14 = vld [vmem:[#allocation23_spill] sm:$0xff] }
 0x826   : >> { %v9683_v13 = vadd.f32 %v16886_v27, %v9570_v43  ;;  %10610 = vmatpush.msra.mxu3 %v10404_v55  ;;  %v10399_v43 = vld [vmem:[%s16047_s26 + $0x1d0] sm:$0xff]  ;;  %v10397_v27 = vld [vmem:[%s16047_s26 + $0x1c0] sm:$0xff] }
 0x827   : >> { %v10287_v62 = vmax.f32 %v10263_v51, 0.0  ;;  %v16891_v51 = vld [vmem:[#allocation67_spill] sm:$0xff] }
 0x828   : >> { %v10070_v38 = vpop.f32.mrf.mxu0  ;;  %v9796_v33 = vadd.f32 %v16345_v8, %v9683_v13  ;;  %v16890_v8 = vld [vmem:[#allocation46_spill] sm:$0xff]  ;;  %v9684_v47 = vadd.f32 %v16891_v51, %v9571_v20  ;;  %10611 = vmatpush.msra.mxu3 %v10403_v18  ;;  %v16901_v20 = vld [vmem:[#allocation72_spill] sm:$0xff]  ;;  %v16902_v18 = vld [vmem:[#allocation51_spill] sm:$0xff] }
 0x829   : >> { %v10311_v2 = vmax.f32 %v9163_v41, %v10287_v62  ;;  %v10124_v7 = vadd.f32 %v10070_v38, %v10008_v24  ;;  %v10186_v44 = vpop.f32.mrf.mxu1  ;;  %v9114_v35 = vadd.f32 %v16890_v8, %v16889_v14  ;;  %v10402_v24 = vld [vmem:[%s16047_s26 + $0x1e8] sm:$0xff]  ;;  %v16903_v51 = vld [vmem:[#allocation73_spill] sm:$0xff] }
 0x82a   : >> { %v10010_v39 = vadd.f32 %v16354_v61, %v9796_v33  ;;  %v9797_v61 = vadd.f32 %v16367_v22, %v9684_v47  ;;  %10612 = vmatpush.msra.mxu3 %v10402_v24  ;;  %v16897_v13 = vld [vmem:[#allocation50_spill] sm:$0xff]  ;;  %v16899_v33 = vld [vmem:[#allocation25_spill] sm:$0xff]  ;;  %v9574_v47 = vadd.f32 %v16903_v51, %v16902_v18  ;;  %v10415_v18 = vld [vmem:[%s16047_s26 + $0x250] sm:$0xff] }
 0x82b   : >> { %v10240_v10 = vadd.f32 %v10186_v44, %v10124_v7  ;;  %v16418_v5 = vpop.f32.mrf.mxu3  ;;  %v9142_v62 = vadd.f32 %v16198_v9, %v9114_v35  ;;  %v10400_v44 = vld [vmem:[%s16047_s26 + $0x1d8] sm:$0xff]  ;;  %v9758_v22 = vpop.f32.mrf.mxu2  ;;  %v10410_v35 = vld [vmem:[%s16047_s26 + $0x228] sm:$0xff] }
 0x82c   : >> { %10613 = vmatpush.msra.mxu3 %v10401_v36  ;;  %v10011_v50 = vadd.f32 %v16377_v17, %v9797_v61  ;;  %v16905_v61 = vld [vmem:[#allocation30_spill] sm:$0xff] }
 0x82d   : >> { %v10264_v54 = vadd.f32 %v16198_v9, %v10240_v10  ;;  %v9166_v31 = vmax.f32 %v9142_v62, 0.0  ;;  %v9115_v10 = vadd.f32 %v16895_v11, %v16894_v0  ;;  %v16904_v62 = vld [vmem:[#allocation14_spill] sm:$0xff] }
 0x82e   : >> { %10614 = vmatpush.msra.mxu3 %v10400_v44  ;;  %v10406_v11 = vld [vmem:[%s16047_s26 + $0x208] sm:$0xff] }
 0x82f   : >> { %v10288_v28 = vmax.f32 %v10264_v54, 0.0  ;;  %v16896_v54 = vld [vmem:[#allocation70_spill] sm:$0xff] }
 0x830   : >> { %v10073_v40 = vpop.f32.mrf.mxu0  ;;  %10615 = vmatpush.msra.mxu3 %v10399_v43  ;;  %v10405_v43 = vld [vmem:[%s16047_s26 + $0x200] sm:$0xff]  ;;  %v16916_v51 = vld [vmem:[#allocation78_spill] sm:$0xff] }
 0x831   : >> { %v10312_v25 = vmax.f32 %v9164_v12, %v10288_v28  ;;  %v10125_v32 = vadd.f32 %v10073_v40, %v10009_v3  ;;  %v10189_v16 = vpop.f32.mrf.mxu1  ;;  %v9143_v3 = vadd.f32 %v16198_v9, %v9115_v10 }
 0x832   : >> { %10616 = vmatpush.msra.mxu3 %v10398_v46 }
 0x833   : >> { %v10331_v30 = vmax.f32 %v10311_v2, %v10312_v25  ;;  %v10241_v42 = vadd.f32 %v10189_v16, %v10125_v32  ;;  %v9572_v2 = vadd.f32 %v16893_v1, %v16892_v6  ;;  %v9972_v63 = vpop.f32.mrf.mxu3  ;;  %v16898_v25 = vld [vmem:[#allocation71_spill] sm:$0xff]  ;;  %v9167_v56 = vmax.f32 %v9143_v3, 0.0  ;;  %v9761_v8 = vpop.f32.mrf.mxu2 }
 0x834   : >> { %v9573_v32 = vadd.f32 %v16898_v25, %v16897_v13  ;;  %10617 = vmatpush.msra.mxu3 %v10397_v27  ;;  %v10407_v1 = vld [vmem:[%s16047_s26 + $0x210] sm:$0xff] }
 0x835   : >> { %v10265_v49 = vadd.f32 %v16198_v9, %v10241_v42  ;;  %11539 = vmatmul.msk.f32.vlgmr.msrb.gmra.mxu2 %vm10437_vm1, %v10331_v30  ;;  %v9685_v34 = vadd.f32 %v16896_v54, %v9572_v2  ;;  %v16900_v30 = vld [vmem:[#allocation16_spill] sm:$0xff]  ;;  %v16906_v2 = vld [vmem:[#allocation74_spill] sm:$0xff]  ;;  %v16909_v3 = vld [vmem:[#allocation15_spill] sm:$0xff] }
 0x836   : >> { %10633 = vmatpush.msrb.mxu2 %v10412_v15  ;;  %v16907_v54 = vld [vmem:[#allocation52_spill] sm:$0xff]  ;;  %v10419_v25 = vld [vmem:[%s16047_s26 + $0x270] sm:$0xff] }
 0x837   : >> { %v10289_v23 = vmax.f32 %v10265_v49, 0.0  ;;  %v9798_v28 = vadd.f32 %v16388_v48, %v9685_v34  ;;  %v9116_v48 = vadd.f32 %v16900_v30, %v16899_v33  ;;  %v9686_v49 = vadd.f32 %v16901_v20, %v9573_v32  ;;  %v16908_v34 = vld [vmem:[#allocation75_spill] sm:$0xff]  ;;  %v16911_v32 = vld [vmem:[#allocation76_spill] sm:$0xff]  ;;  %v10418_v30 = vld [vmem:[%s16047_s26 + $0x268] sm:$0xff] }
 0x838   : >> { %v10076_v26 = vpop.f32.mrf.mxu0  ;;  %10634 = vmatpush.msrb.mxu2 %v10411_v57  ;;  %v16913_v57 = vld [vmem:[#allocation77_spill] sm:$0xff] }
 0x839   : >> { %v10313_v41 = vmax.f32 %v9165_v52, %v10289_v23  ;;  %v10126_v59 = vadd.f32 %v10076_v26, %v10010_v39  ;;  %v10192_v60 = vpop.f32.mrf.mxu1  ;;  %v10012_v42 = vadd.f32 %v16398_v19, %v9798_v28  ;;  %v9144_v39 = vadd.f32 %v16198_v9, %v9116_v48  ;;  %v10409_v26 = vld [vmem:[%s16047_s26 + $0x220] sm:$0xff]  ;;  %v16910_v28 = vld [vmem:[#allocation31_spill] sm:$0xff] }
 0x83a   : >> { %v9799_v23 = vadd.f32 %v16410_v45, %v9686_v49  ;;  %10635 = vmatpush.msrb.mxu2 %v10410_v35  ;;  %v16914_v35 = vld [vmem:[#allocation37_spill] sm:$0xff] }
 0x83b   : >> { %v10242_v38 = vadd.f32 %v10192_v60, %v10126_v59  ;;  %v9975_v59 = vpop.f32.mrf.mxu3  ;;  %v10408_v60 = vld [vmem:[%s16047_s26 + $0x218] sm:$0xff]  ;;  %v9168_v24 = vmax.f32 %v9144_v39, 0.0 }
 0x83c   : >> { %10636 = vmatpush.msrb.mxu2 %v10409_v26  ;;  %v10013_v36 = vadd.f32 %v16418_v5, %v9799_v23  ;;  %v9764_v5 = vpop.f32.mrf.mxu2  ;;  %v16915_v39 = vld [vmem:[#allocation8_spill] sm:$0xff] }
 0x83d   : >> { %v10266_v7 = vadd.f32 %v16198_v9, %v10242_v38  ;;  %v9117_v38 = vadd.f32 %v16905_v61, %v16904_v62  ;;  %v9119_v23 = vadd.f32 %v16915_v39, %v16914_v35  ;;  %v10414_v61 = vld [vmem:[%s16047_s26 + $0x248] sm:$0xff] }
 0x83e   : >> { %10637 = vmatpush.msrb.mxu2 %v10408_v60  ;;  %v10422_v35 = vld [vmem:[%s16047_s26 + $0x288] sm:$0xff] }
 0x83f   : >> { %v10290_v29 = vmax.f32 %v10266_v7, 0.0  ;;  %v9687_v7 = vadd.f32 %v16906_v2, %v9574_v47  ;;  %v9145_v10 = vadd.f32 %v16198_v9, %v9117_v38  ;;  %v9147_v38 = vadd.f32 %v16198_v9, %v9119_v23  ;;  %v16918_v2 = vld [vmem:[#allocation79_spill] sm:$0xff] }
 0x840   : >> { %v10079_v58 = vpop.f32.mrf.mxu0  ;;  %10638 = vmatpush.msrb.mxu2 %v10407_v1  ;;  %v16917_v1 = vld [vmem:[#allocation54_spill] sm:$0xff] }
 0x841   : >> { %v10314_v12 = vmax.f32 %v9166_v31, %v10290_v29  ;;  %v10127_v37 = vadd.f32 %v10079_v58, %v10011_v50  ;;  %v10195_v4 = vpop.f32.mrf.mxu1  ;;  %v9800_v50 = vadd.f32 %v9758_v22, %v9687_v7  ;;  %v9169_v46 = vmax.f32 %v9145_v10, 0.0  ;;  %v16920_v10 = vld [vmem:[#allocation32_spill] sm:$0xff] }
 0x842   : >> { %10639 = vmatpush.msrb.mxu2 %v10406_v11  ;;  %v9118_v22 = vadd.f32 %v16910_v28, %v16909_v3  ;;  %v9577_v7 = vadd.f32 %v16918_v2, %v16917_v1  ;;  %v16919_v11 = vld [vmem:[#allocation22_spill] sm:$0xff]  ;;  %v10435_v1 = vld [vmem:[%s16047_s26 + $0x2f0] sm:$0xff]  ;;  %v16931_v2 = vld [vmem:[#allocation84_spill] sm:$0xff] }
 0x843   : >> { %v10332_v40 = vmax.f32 %v10313_v41, %v10314_v12  ;;  %v10243_v17 = vadd.f32 %v10195_v4, %v10127_v37  ;;  %v9575_v12 = vadd.f32 %v16908_v34, %v16907_v54  ;;  %v10420_v4 = vld [vmem:[%s16047_s26 + $0x278] sm:$0xff]  ;;  %v9978_v27 = vpop.f32.mrf.mxu3  ;;  %v10427_v54 = vld [vmem:[%s16047_s26 + $0x2b0] sm:$0xff]  ;;  %v10426_v3 = vld [vmem:[%s16047_s26 + $0x2a8] sm:$0xff] }
 0x844   : >> { %10640 = vmatpush.msrb.mxu2 %v10405_v43  ;;  %v9146_v48 = vadd.f32 %v16198_v9, %v9118_v22  ;;  %v16921_v34 = vld [vmem:[#allocation80_spill] sm:$0xff] }
 0x845   : >> { %v10267_v16 = vadd.f32 %v16198_v9, %v10243_v17  ;;  %11540 = vmatmul.msk.f32.vlgmr.msrb.gmra.mxu3 %vm10437_vm1, %v10332_v40  ;;  %v10014_v40 = vadd.f32 %v9972_v63, %v9800_v50  ;;  %v10417_v63 = vld [vmem:[%s16047_s26 + $0x260] sm:$0xff]  ;;  %v9120_v50 = vadd.f32 %v16920_v10, %v16919_v11  ;;  %v10434_v11 = vld [vmem:[%s16047_s26 + $0x2e8] sm:$0xff] }
 0x846   : >> { %10656 = vmatpush.msrb.mxu3 %v10420_v4 }
 0x847   : >> { %v10291_v21 = vmax.f32 %v10267_v16, 0.0  ;;  %v9688_v16 = vadd.f32 %v16911_v32, %v9575_v12  ;;  %v9690_v12 = vadd.f32 %v16921_v34, %v9577_v7  ;;  %v9148_v28 = vadd.f32 %v16198_v9, %v9120_v50 }
 0x848   : >> { %v10082_v53 = vpop.f32.mrf.mxu0  ;;  %10657 = vmatpush.msrb.mxu3 %v10419_v25  ;;  %v16923_v25 = vld [vmem:[#allocation81_spill] sm:$0xff] }
 0x849   : >> { %v10315_v55 = vmax.f32 %v9167_v56, %v10291_v21  ;;  %v10128_v52 = vadd.f32 %v10082_v53, %v10012_v42  ;;  %v10198_v14 = vpop.f32.mrf.mxu1  ;;  %v9801_v42 = vadd.f32 %v9761_v8, %v9688_v16  ;;  %v16912_v53 = vld [vmem:[#allocation53_spill] sm:$0xff] }
 0x84a   : >> { %10658 = vmatpush.msrb.mxu3 %v10418_v30  ;;  %v9576_v20 = vadd.f32 %v16913_v57, %v16912_v53  ;;  %v16925_v30 = vld [vmem:[#allocation17_spill] sm:$0xff]  ;;  %v10423_v53 = vld [vmem:[%s16047_s26 + $0x290] sm:$0xff]  ;;  %v16926_v57 = vld [vmem:[#allocation82_spill] sm:$0xff] }
 0x84b   : >> { %v10244_v19 = vadd.f32 %v10198_v14, %v10128_v52  ;;  %v10416_v52 = vld [vmem:[%s16047_s26 + $0x258] sm:$0xff]  ;;  %v9170_v14 = vmax.f32 %v9146_v48, 0.0  ;;  %v9981_v62 = vpop.f32.mrf.mxu3 }
 0x84c   : >> { %10659 = vmatpush.msrb.mxu3 %v10417_v63  ;;  %v9689_v47 = vadd.f32 %v16916_v51, %v9576_v20  ;;  %v16928_v51 = vld [vmem:[#allocation83_spill] sm:$0xff] }
 0x84d   : >> { %v10268_v41 = vadd.f32 %v16198_v9, %v10244_v19  ;;  %v10015_v19 = vadd.f32 %v9975_v59, %v9801_v42 }
 0x84e   : >> { %10660 = vmatpush.msrb.mxu3 %v10416_v52 }
 0x84f   : >> { %v10292_v6 = vmax.f32 %v10268_v41, 0.0 }
 0x850   : >> { %v10085_v45 = vpop.f32.mrf.mxu0  ;;  %10661 = vmatpush.msrb.mxu3 %v10415_v18  ;;  %v16927_v18 = vld [vmem:[#allocation59_spill] sm:$0xff] }
 0x851   : >> { %v10316_v44 = vmax.f32 %v9168_v24, %v10292_v6  ;;  %v10129_v31 = vadd.f32 %v10085_v45, %v10013_v36  ;;  %v10201_v0 = vpop.f32.mrf.mxu1  ;;  %v9802_v36 = vadd.f32 %v9764_v5, %v9689_v47  ;;  %v10413_v45 = vld [vmem:[%s16047_s26 + $0x240] sm:$0xff]  ;;  %v9579_v47 = vadd.f32 %v16928_v51, %v16927_v18 }
 0x852   : >> { %10662 = vmatpush.msrb.mxu3 %v10414_v61  ;;  %v16929_v61 = vld [vmem:[#allocation26_spill] sm:$0xff] }
 0x853   : >> { %v10333_v29 = vmax.f32 %v10315_v55, %v10316_v44  ;;  %v10245_v58 = vadd.f32 %v10201_v0, %v10129_v31  ;;  %v9767_v55 = vpop.f32.mrf.mxu2  ;;  %v10428_v31 = vld [vmem:[%s16047_s26 + $0x2b8] sm:$0xff]  ;;  %v9171_v0 = vmax.f32 %v9147_v38, 0.0  ;;  %v16930_v38 = vld [vmem:[#allocation33_spill] sm:$0xff]  ;;  %v9692_v7 = vadd.f32 %v16931_v2, %v9579_v47  ;;  %v16945_v2 = vld [vmem:[#allocation35_spill] sm:$0xff] }
 0x854   : >> { %10663 = vmatpush.msrb.mxu3 %v10413_v45  ;;  %v9803_v22 = vadd.f32 %v9767_v55, %v9690_v12 }
 0x855   : >> { %v10269_v37 = vadd.f32 %v16198_v9, %v10245_v58  ;;  %11541 = vmatmul.msk.f32.vlgmr.msra.gmra.mxu2 %vm10437_vm1, %v10333_v29  ;;  %v10016_v29 = vadd.f32 %v9978_v27, %v9802_v36  ;;  %v10425_v27 = vld [vmem:[%s16047_s26 + $0x2a0] sm:$0xff]  ;;  %v9122_v36 = vadd.f32 %v16930_v38, %v16929_v61  ;;  %v16942_v38 = vld [vmem:[#allocation68_spill] sm:$0xff] }
 0x856   : >> { %10679 = vmatpush.msra.mxu2 %v10428_v31  ;;  %v10017_v42 = vadd.f32 %v9981_v62, %v9803_v22 }
 0x857   : >> { %v10293_v17 = vmax.f32 %v10269_v37, 0.0  ;;  %v9150_v10 = vadd.f32 %v16198_v9, %v9122_v36  ;;  %v16943_v36 = vld [vmem:[#allocation89_spill] sm:$0xff] }
 0x858   : >> { %v10088_v13 = vpop.f32.mrf.mxu0  ;;  %10680 = vmatpush.msra.mxu2 %v10427_v54  ;;  %v16933_v54 = vld [vmem:[#allocation85_spill] sm:$0xff] }
 0x859   : >> { %v10317_v15 = vmax.f32 %v9169_v46, %v10293_v17  ;;  %v10130_v56 = vadd.f32 %v10088_v13, %v10014_v40  ;;  %v10204_v33 = vpop.f32.mrf.mxu1  ;;  %v9984_v17 = vpop.f32.mrf.mxu3  ;;  %v16922_v13 = vld [vmem:[#allocation56_spill] sm:$0xff] }
 0x85a   : >> { %10681 = vmatpush.msra.mxu2 %v10426_v3  ;;  %v9578_v32 = vadd.f32 %v16923_v25, %v16922_v13  ;;  %v16935_v3 = vld [vmem:[#allocation9_spill] sm:$0xff]  ;;  %v10431_v13 = vld [vmem:[%s16047_s26 + $0x2d0] sm:$0xff]  ;;  %v16936_v25 = vld [vmem:[#allocation86_spill] sm:$0xff] }
 0x85b   : >> { %v10246_v21 = vadd.f32 %v10204_v33, %v10130_v56  ;;  %v9770_v5 = vpop.f32.mrf.mxu2  ;;  %v9172_v56 = vmax.f32 %v9148_v28, 0.0  ;;  %v16924_v33 = vld [vmem:[#allocation24_spill] sm:$0xff] }
 0x85c   : >> { %10682 = vmatpush.msra.mxu2 %v10425_v27  ;;  %v9121_v48 = vadd.f32 %v16925_v30, %v16924_v33  ;;  %v9691_v20 = vadd.f32 %v16926_v57, %v9578_v32  ;;  %v11686_v33 = vld [vmem:[%s16652_s4] ss:$0 sm:$0xff]  ;;  %v16938_v57 = vld [vmem:[#allocation87_spill] sm:$0xff] }
 0x85d   : >> { %v10270_v49 = vadd.f32 %v16198_v9, %v10246_v21 }
 0x85e   : >> { %v9149_v39 = vadd.f32 %v16198_v9, %v9121_v48  ;;  %v9804_v23 = vadd.f32 %v9770_v5, %v9691_v20  ;;  %v10433_v5 = vld [vmem:[%s16047_s26 + $0x2e0] sm:$0xff] }
 0x85f   : >> { %v10294_v26 = vmax.f32 %v10270_v49, 0.0 }
 0x860   : >> { %v10091_v8 = vpop.f32.mrf.mxu0  ;;  %v9173_v62 = vmax.f32 %v9149_v39, 0.0 }
 0x861   : >> { %v10318_v41 = vmax.f32 %v9170_v14, %v10294_v26  ;;  %v10131_v60 = vadd.f32 %v10091_v8, %v10015_v19  ;;  %v10207_v24 = vpop.f32.mrf.mxu1  ;;  %v10421_v8 = vld [vmem:[%s16047_s26 + $0x280] sm:$0xff] }
 0x863   : >> { %v10334_v6 = vmax.f32 %v10317_v15, %v10318_v41  ;;  %v10247_v59 = vadd.f32 %v10207_v24, %v10131_v60  ;;  %v10424_v15 = vld [vmem:[%s16047_s26 + $0x298] sm:$0xff]  ;;  %v9773_v14 = vpop.f32.mrf.mxu2  ;;  %v9987_v60 = vpop.f32.mrf.mxu3 }
 0x864   : >> { %10683 = vmatpush.msra.mxu2 %v10424_v15  ;;  %v10436_v24 = vld [vmem:[%s16047_s26 + $0x2f8] sm:$0xff]  ;;  %v9805_v50 = vadd.f32 %v9773_v14, %v9692_v7 }
 0x865   : >> { %v10271_v44 = vadd.f32 %v16198_v9, %v10247_v59  ;;  %11542 = vmatmul.msk.f32.vlgmr.msra.gmra.mxu3 %vm10437_vm1, %v10334_v6  ;;  %v10018_v6 = vadd.f32 %v9984_v17, %v9804_v23  ;;  %v16939_v14 = vld [vmem:[#allocation28_spill] sm:$0xff] }
 0x866   : >> { %10684 = vmatpush.msra.mxu2 %v10423_v53  ;;  %10702 = vmatpush.msra.mxu3 %v10436_v24  ;;  %v10019_v22 = vadd.f32 %v9987_v60, %v9805_v50  ;;  %v16937_v53 = vld [vmem:[#allocation65_spill] sm:$0xff] }
 0x867   : >> { %v10295_v58 = vmax.f32 %v10271_v44, 0.0  ;;  %v9581_v20 = vadd.f32 %v16938_v57, %v16937_v53 }
 0x868   : >> { %v10094_v43 = vpop.f32.mrf.mxu0  ;;  %10685 = vmatpush.msra.mxu2 %v10422_v35  ;;  %10703 = vmatpush.msra.mxu3 %v10435_v1  ;;  %v16940_v35 = vld [vmem:[#allocation34_spill] sm:$0xff]  ;;  %v16944_v1 = vld [vmem:[#allocation29_spill] sm:$0xff] }
 0x869   : >> { %v10319_v37 = vmax.f32 %v9171_v0, %v10295_v58  ;;  %v10132_v4 = vadd.f32 %v10094_v43, %v10016_v29  ;;  %v10210_v46 = vpop.f32.mrf.mxu1  ;;  %v16932_v43 = vld [vmem:[#allocation62_spill] sm:$0xff]  ;;  %v9124_v39 = vadd.f32 %v16940_v35, %v16939_v14  ;;  %v9125_v7 = vadd.f32 %v16945_v2, %v16944_v1  ;;  %v10743_v1 = vld [vmem:[%s16655_s7 + $0x58] sm:$0xff] (%p7787_p0)  ;;  %v10742_v2 = vld [vmem:[%s16655_s7 + $0x50] sm:$0xff] (%p7787_p0) }
 0x86a   : >> { %10686 = vmatpush.msra.mxu2 %v10421_v8  ;;  %10704 = vmatpush.msra.mxu3 %v10434_v11  ;;  %v9580_v34 = vadd.f32 %v16933_v54, %v16932_v43  ;;  %v16941_v8 = vld [vmem:[#allocation88_spill] sm:$0xff] }
 0x86b   : >> { %v10248_v40 = vadd.f32 %v10210_v46, %v10132_v4  ;;  %v9776_v58 = vpop.f32.mrf.mxu2  ;;  %v9174_v4 = vmax.f32 %v9150_v10, 0.0  ;;  %v16934_v46 = vld [vmem:[#allocation27_spill] sm:$0xff]  ;;  %v9990_v17 = vpop.f32.mrf.mxu3  ;;  %v9694_v18 = vadd.f32 %v16941_v8, %v9581_v20  ;;  %v9152_v24 = vadd.f32 %v11686_v33, %v9124_v39  ;;  %v16946_v10 = vld [vmem:[#allocation90_spill] sm:$0xff] }
 0x86c   : >> { %10705 = vmatpush.msra.mxu3 %v10433_v5  ;;  %v9123_v28 = vadd.f32 %v16935_v3, %v16934_v46  ;;  %v9693_v32 = vadd.f32 %v16936_v25, %v9580_v34  ;;  %v9153_v43 = vadd.f32 %v11686_v33, %v9125_v7  ;;  %v16947_v3 = vld [vmem:[#allocation43_spill] sm:$0xff]  ;;  %v10741_v7 = vld [vmem:[%s16655_s7 + $0x48] sm:$0xff] (%p7787_p0) }
 0x86d   : >> { %v10272_v16 = vadd.f32 %v16198_v9, %v10248_v40 }
 0x86e   : >> { %v9151_v30 = vadd.f32 %v11686_v33, %v9123_v28  ;;  %v9806_v48 = vadd.f32 %v9776_v58, %v9693_v32  ;;  %v9177_v46 = vmax.f32 %v9153_v43, 0.0  ;;  %v16948_v28 = vld [vmem:[#allocation38_spill] sm:$0xff] }
 0x86f   : >> { %v10296_v21 = vmax.f32 %v10272_v16, 0.0  ;;  %v10733_v43 = vld [vmem:[%s16655_s7 + $0x8] sm:$0xff] (%p7787_p0) }
 0x870   : >> { %v10097_v63 = vpop.f32.mrf.mxu0  ;;  %v10020_v23 = vadd.f32 %v9990_v17, %v9806_v48 }
 0x871   : >> { %v10320_v49 = vmax.f32 %v9172_v56, %v10296_v21  ;;  %v10133_v55 = vadd.f32 %v10097_v63, %v10017_v42  ;;  %v10213_v52 = vpop.f32.mrf.mxu1  ;;  %v10429_v63 = vld [vmem:[%s16047_s26 + $0x2c0] sm:$0xff] }
 0x873   : >> { %v10335_v19 = vmax.f32 %v10319_v37, %v10320_v49  ;;  %v10249_v26 = vadd.f32 %v10213_v52, %v10133_v55  ;;  %v10432_v37 = vld [vmem:[%s16047_s26 + $0x2d8] sm:$0xff]  ;;  %v9779_v55 = vpop.f32.mrf.mxu2  ;;  %v9175_v52 = vmax.f32 %v9151_v30, 0.0  ;;  %v9993_v60 = vpop.f32.mrf.mxu3 }
 0x874   : >> { %10706 = vmatpush.msra.mxu3 %v10432_v37 }
 0x875   : >> { %v10273_v41 = vadd.f32 %v16198_v9, %v10249_v26  ;;  %11543 = vmatmul.msk.f32.vlgmr.msrb.gmra.mxu2 %vm10437_vm1, %v10335_v19 }
 0x876   : >> { %10707 = vmatpush.msra.mxu3 %v10431_v13 }
 0x877   : >> { %v10297_v59 = vmax.f32 %v10273_v41, 0.0 }
 0x878   : >> { %v10100_v45 = vpop.f32.mrf.mxu0 }
 0x879   : >> { %v10321_v44 = vmax.f32 %v9173_v62, %v10297_v59  ;;  %v10134_v31 = vadd.f32 %v10100_v45, %v10018_v6  ;;  %v10216_v0 = vpop.f32.mrf.mxu1  ;;  %v9807_v62 = vadd.f32 %v9779_v55, %v9694_v18  ;;  %v9582_v6 = vadd.f32 %v16943_v36, %v16942_v38  ;;  %v10747_v36 = vld [vmem:[%s16655_s7 + $0x78] sm:$0xff] (%p7787_p0) }
 0x87a   : >> { %v9176_v45 = vmax.f32 %v9152_v24, 0.0  ;;  %10752 = vmatpush.msra.mxu0 (%p7787_p0), %v10747_v36 }
 0x87b   : >> { %v10250_v29 = vadd.f32 %v10216_v0, %v10134_v31  ;;  %v9782_v0 = vpop.f32.mrf.mxu2  ;;  %v9695_v50 = vadd.f32 %v16946_v10, %v9582_v6  ;;  %v9996_v37 = vpop.f32.mrf.mxu3  ;;  %v10736_v10 = vld [vmem:[%s16655_s7 + $0x20] sm:$0xff] (%p7787_p0) }
 0x87d   : >> { %v10274_v12 = vadd.f32 %v16198_v9, %v10250_v29  ;;  %v10430_v9 = vld [vmem:[%s16047_s26 + $0x2c8] sm:$0xff]  ;;  %v9808_v54 = vadd.f32 %v9782_v0, %v9695_v50  ;;  %v10738_v0 = vld [vmem:[%s16655_s7 + $0x30] sm:$0xff] (%p7787_p0)  ;;  %v11687_v50 = vld [vmem:[%s16654_s6] ss:$0 sm:$0xff] (%p7787_p0)  ;;  %s11709_s26 = scalar_lea.hbm (%p7787_p0), %s11708_s21, 8 }
 0x87e   : >> { %10708 = vmatpush.msra.mxu3 %v10430_v9  ;;  %p11710_p1 = scmp.ne.s32.totalorder (%p7787_p0), %s11708_s21, %s11709_s26  ;;  %p11715_p5 = scmp.lt.s32.totalorder (%p7787_p0), %s11713_s27, %s11709_s26 }
 0x87f   : >> { %v10298_v40 = vmax.f32 %v10274_v12, 0.0 }
 0x880   : >> { %v10103_v27 = vpop.f32.mrf.mxu0  ;;  %10709 = vmatpush.msra.mxu3 %v10429_v63  ;;  %p11711_p2 = pnand (%p7787_p0), %p11710_p1, %p11870_p6  ;;  %p11716_p7 = por (%p7787_p0), %p11715_p5, %p11714_p4 }
 0x881   : >> { %v10322_v16 = vmax.f32 %v9174_v4, %v10298_v40  ;;  %v10135_v15 = vadd.f32 %v10103_v27, %v10019_v22  ;;  %v10219_v56 = vpop.f32.mrf.mxu1  ;;  %v9126_v22 = vadd.f32 %v16948_v28, %v16947_v3  ;;  %v10022_v40 = vadd.f32 %v9996_v37, %v9808_v54  ;;  %v10732_v54 = vld [vmem:[%s16655_s7] sm:$0xff] (%p7787_p0) }
 0x882   : > { %p11712_p3 = pneg (%p7787_p0), %p11711_p2 }
 0x883   : >> { %v10336_v42 = vmax.f32 %v10321_v44, %v10322_v16  ;;  %v10251_v21 = vadd.f32 %v10219_v56, %v10135_v15  ;;  %v10021_v44 = vadd.f32 %v9993_v60, %v9807_v62  ;;  %v9154_v16 = vadd.f32 %v11686_v33, %v9126_v22 }
 0x884   : > { %p11717_p10 = pnand (%p7787_p0), %p11716_p7, %p11712_p3 }
 0x885   : >> { %v10275_v49 = vadd.f32 %v11686_v33, %v10251_v21  ;;  %11544 = vmatmul.msk.f32.vlgmr.msrb.gmra.mxu3 %vm10437_vm1, %v10336_v42  ;;  %v9178_v9 = vmax.f32 %v9154_v16, 0.0  ;;  %v10458_v21 = vpop.f32.mrf.mxu2 }
 0x887   : >> { %v10299_v19 = vmax.f32 %v10275_v49, 0.0 }
 0x888   : >> { %v10106_v26 = vpop.f32.mrf.mxu0  ;;  %v10481_v63 = vpop.f32.mrf.mxu3 }
 0x889   : >> { %v10323_v51 = vmax.f32 %v9175_v52, %v10299_v19  ;;  %v10136_v47 = vadd.f32 %v10106_v26, %v10020_v23  ;;  %v10222_v41 = vpop.f32.mrf.mxu1  ;;  %v10714_v52 = vadd.f32 %v10481_v63, %v10458_v21 }
 0x88b   : >> { %v10252_v61 = vadd.f32 %v10222_v41, %v10136_v47 }
 0x88d   : >> { %v10276_v59 = vadd.f32 %v11686_v33, %v10252_v61  ;;  %v16949_v61 = vld [vmem:[#allocation7_spill] sm:$0xff] }
 0x88f   : >> { %v10300_v31 = vmax.f32 %v10276_v59, 0.0  ;;  %v10745_v59 = vld [vmem:[%s16655_s7 + $0x68] sm:$0xff] (%p7787_p0) }
 0x890   : >> { %v10109_v11 = vpop.f32.mrf.mxu0 }
 0x891   : >> { %v10324_v29 = vmax.f32 %v9176_v45, %v10300_v31  ;;  %v10137_v58 = vadd.f32 %v10109_v11, %v10021_v44  ;;  %v10225_v5 = vpop.f32.mrf.mxu1  ;;  %v10744_v45 = vld [vmem:[%s16655_s7 + $0x60] sm:$0xff] (%p7787_p0)  ;;  %v10739_v31 = vld [vmem:[%s16655_s7 + $0x38] sm:$0xff] (%p7787_p0)  ;;  %v10737_v11 = vld [vmem:[%s16655_s7 + $0x28] sm:$0xff] (%p7787_p0) }
 0x892   : > { %v10740_v44 = vld [vmem:[%s16655_s7 + $0x40] sm:$0xff] (%p7787_p0) }
 0x893   : >> { %v10337_v34 = vmax.f32 %v10323_v51, %v10324_v29  ;;  %v10253_v12 = vadd.f32 %v10225_v5, %v10137_v58  ;;  %v10735_v29 = vld [vmem:[%s16655_s7 + $0x18] sm:$0xff] (%p7787_p0)  ;;  %v10734_v58 = vld [vmem:[%s16655_s7 + $0x10] sm:$0xff] (%p7787_p0) }
 0x895   : >> { %v10277_v4 = vadd.f32 %v11686_v33, %v10253_v12  ;;  %11545 = vmatmul.msk.f32.vlgmr.msra.gmra.mxu2 %vm10437_vm1, %v10337_v34  ;;  %v11688_v12 = vld [vmem:[%s16656_s8] ss:$0 sm:$0xff] (%p7787_p0) }
 0x897   : >> { %v10301_v17 = vmax.f32 %v10277_v4, 0.0 }
 0x898   : >> { %v10112_v27 = vpop.f32.mrf.mxu0  ;;  %v10504_v53 = vpop.f32.mrf.mxu2 }
 0x899   : >> { %v10325_v13 = vmax.f32 %v9177_v46, %v10301_v17  ;;  %v10138_v25 = vadd.f32 %v10112_v27, %v10022_v40  ;;  %v10228_v32 = vpop.f32.mrf.mxu1  ;;  %v10715_v14 = vadd.f32 %v10714_v52, %v10504_v53 }
 0x89b   : >> { %v10254_v15 = vadd.f32 %v10228_v32, %v10138_v25 }
 0x89d   : >> { %v10278_v56 = vadd.f32 %v11686_v33, %v10254_v15 }
 0x89f   : >> { %v10302_v30 = vmax.f32 %v10278_v56, 0.0 }
 0x8a1   : >> { %v10326_v48 = vmax.f32 %v9178_v9, %v10302_v30 }
 0x8a3   : >> { %v10338_v42 = vmax.f32 %v10325_v13, %v10326_v48 }
 0x8a5   : >> { %11546 = vmatmul.msk.f32.vlgmr.msra.gmra.mxu3 %vm10437_vm1, %v10338_v42 }
 0x8a8   : >> { %v10527_v57 = vpop.f32.mrf.mxu3 }
 0x8a9   : >> { %v10716_v39 = vadd.f32 %v10715_v14, %v10527_v57 }
 0x8b8   : >> { %v10550_v20 = vpop.f32.mrf.mxu2 }
 0x8b9   : >> { %v10717_v23 = vadd.f32 %v10716_v39, %v10550_v20 }
 0x8c8   : >> { %v10573_v49 = vpop.f32.mrf.mxu3 }
 0x8c9   : >> { %v10718_v33 = vadd.f32 %v10717_v23, %v10573_v49 }
 0x8d8   : >> { %v10596_v55 = vpop.f32.mrf.mxu2 }
 0x8d9   : >> { %v10719_v26 = vadd.f32 %v10718_v33, %v10596_v55 }
 0x8e8   : >> { %v10619_v35 = vpop.f32.mrf.mxu3 }
 0x8e9   : >> { %v10720_v18 = vadd.f32 %v10719_v26, %v10619_v35 }
 0x8f8   : >> { %v10642_v19 = vpop.f32.mrf.mxu2 }
 0x8f9   : >> { %v10721_v51 = vadd.f32 %v10720_v18, %v10642_v19 }
 0x908   : >> { %v10665_v8 = vpop.f32.mrf.mxu3 }
 0x909   : >> { %v10722_v41 = vadd.f32 %v10721_v51, %v10665_v8 }
 0x918   : >> { %v10688_v47 = vpop.f32.mrf.mxu2 }
 0x919   : >> { %v10723_v60 = vadd.f32 %v10722_v41, %v10688_v47 }
 0x928   : >> { %v10711_v24 = vpop.f32.mrf.mxu3 }
 0x929   : >> { %v10724_v62 = vadd.f32 %v10723_v60, %v10711_v24  ;;  %7789 = sbr.rel (!%p7787_p0) target bundleno = 1163 (0x48b), region = 204 }
 0x92b   : >> { %v10725_v38 = vadd.f32 %v16949_v61, %v10724_v62  }
 0x92d   : >> { %v16950_v6 = vmov %v10725_v38  ;;  %v10730_v5 = vadd.f32 (%p7787_p0), %v11687_v50, %v10725_v38 }
 0x92e   : > { %v10746_v6 = vld [vmem:[%s16655_s7 + $0x70] sm:$0xff] }
 0x92f   : > { %10753 = vmatpush.msra.mxu0 %v10746_v6  ;;  %v10731_v34 = vmax.f32 %v10730_v5, 0.0 }
 0x931   : > { %10754 = vmatpush.msra.mxu0 %v10745_v59 }
 0x933   : > { %10755 = vmatpush.msra.mxu0 %v10744_v45 }
 0x935   : > { %10756 = vmatpush.msra.mxu0 %v10743_v1 }
 0x937   : > { %10757 = vmatpush.msra.mxu0 %v10742_v2 }
 0x939   : > { %10758 = vmatpush.msra.mxu0 %v10741_v7 }
 0x93b   : > { %10759 = vmatpush.msra.mxu0 %v10740_v44 }
 0x93d   : > { %10760 = vmatpush.msra.mxu0 %v10739_v31 }
 0x93f   : > { %10761 = vmatpush.msra.mxu0 %v10738_v0 }
 0x941   : > { %10762 = vmatpush.msra.mxu0 %v10737_v11 }
 0x943   : > { %10763 = vmatpush.msra.mxu0 %v10736_v10 }
 0x945   : > { %10764 = vmatpush.msra.mxu0 %v10735_v29 }
 0x947   : > { %10765 = vmatpush.msra.mxu0 %v10734_v58 }
 0x949   : > { %10766 = vmatpush.msra.mxu0 %v10733_v43 }
 0x94b   : > { %10767 = vmatpush.msra.mxu0 %v10732_v54 }
 0x94c   : > { %10768 = vmatmul.f32.vlgmr.msra.gmra.mxu0 %v10731_v34 }
 0x9c9   : > { %v10769_v37 = vpop.f32.mrf.mxu0 }
 0x9ca   : > { %v10770_v4 = vadd.f32 %v11688_v12, %v10769_v37 }
 0x9cc   : > { %v10773_v46 = vsel %vm10772_vm2, %v10770_v4, -inf }
 0x9cd   : > { %10774 = vmax.xlane.f32.xlu0 %v10773_v46 }
 0xa40   : > { %v10775_v3 = vpop.xlane.xlu0 %10774 }
 0xa41   : > { %v10776_v28 = vsub.f32 %v10770_v4, %v10775_v3 }
 0xa43   : > { %v10777_v22 = vmul.f32 1.442695, %v10776_v28 }
 0xa45   : > { %11689 = vpow2.f32 %v10777_v22 }
 0xa4b   : > { %v11690_v40 = vpop.eup %11689 }
 0xa4c   : > { %v10779_v17 = vsel %vm10772_vm2, %v11690_v40, 0.0 }
 0xa4d   : > { %10780 = vadd.xlane.f32.xlu0 %v10779_v17 }
 0xac0   : > { %v10781_v27 = vpop.xlane.xlu0 %10780 }
 0xac1   : > { %11691 = vlog2.f32 %v10781_v27 }
 0xac7   : > { %v11692_v13 = vpop.eup %11691 }
 0xac8   : > { %v10783_v25 = vmul.f32 0.6931472, %v11692_v13 }
 0xaca   : > { %v10784_v32 = vsub.f32 %v10776_v28, %v10783_v25 }
 0xacc   : > { %10785 = vst.msk [vmem:[%s13467_s17] sm:$0xff] %vm10772_vm2, %v10784_v32 }
 0xacd   : > { %11720 = shalt.err (!%p11717_p10)
}
 0xace   : > { %11561 = dma.vmem_to_hbm [thread:$0]  (%p11870_p6), %s10800_s23, 128, %s10802_s24, %s10787_s25  }
 0xacf PF: > { %s10813_s28 = sand.u32 1, %s11755_s30   ;;  %p11564_p11 = pnand %p10917_p9, %p11874_p8 }
 0xad0   : > { %s10814_s17 = scalar_lea.sflag [#allocation5], %s10813_s28 }
 0xad1   : > { %p11565_p12 = pneg %p11564_p11 }
 0xad3   : > { %11750 = dma.done.wait (%p11565_p12), %s10814_s17, 128  }
 0xad4   : > { %11752 = vsyncadd (%p11565_p12), %s10814_s17, 4294967168  ;;  %p19_p13 = scmp.ge.s32.totalorder %s11855_s15, 4   ;;  %s16951_s30 = smov %s11759_s10 }
 0xad5   : > { %s16952_s10 = smov %s11763_s11  ;;  %s16953_s11 = smov %s11868_s18 }
 0xad6   : > { %s16954_s12 = smov %s11855_s15  ;;  %21 = sbr.rel (!%p19_p13) target bundleno = 3 (0x3), region = 215 }
 0xadb   :  { %10820 = vsyncpa [#allocation5], 1 }
 0xadc   :  { %10822 = vsyncpa [#allocation5 + $0x1], 1 }

</bundles_post_ra>
